<compile_context>
chip_gen: v7x
topology: tpu7x:2x2x1
jax: 0.10.0
libtpu: 0.0.40
codegen_flags: <defaults>
</compile_context>

<pallas_src>
import math

import jax
import jax.numpy as jnp
from jax.experimental import pallas as pl
from jax.experimental.pallas import tpu as pltpu

# ----------------------------- config ---------------------------------------
D = 32            # hidden_size
H = 4             # num_attention_heads
HD = D // H       # attention head size
I = 64            # intermediate_size
NUM_LAYERS = 2    # num_hidden_layers
LN_EPS = 1e-12
SCALE = 1.0 / math.sqrt(HD)

# Kernel-facing (pre-packed) parameter layout.
PARAM_KEYS = ("wqkv", "bqkv", "wo", "bo", "ln1g", "ln1b",
              "wi", "bi", "wo2", "bo2", "ln2g", "ln2b")


# ----------------------------- kernel helpers --------------------------------
def _layernorm(x, gamma, beta):
    mu = jnp.mean(x, axis=-1, keepdims=True)
    var = jnp.mean((x - mu) * (x - mu), axis=-1, keepdims=True)
    return (x - mu) * jax.lax.rsqrt(var + LN_EPS) * gamma + beta


def _per_head_mask(m2):
    """(S, T) additive key mask -> (H*S, 1, T), batch ordered (head, sequence)."""
    S, T = m2.shape
    mb = jnp.broadcast_to(m2[None], (H, S, T)).reshape(H * S, T)
    return mb[:, None, :]


def _bert_layer(x3, key_mask_b, p):
    """One BertLayer (eval mode) over S independent sequences of T tokens.

    x3:         (S, T, D)
    key_mask_b: (H*S, 1, T) additive key mask, batch ordered (head, sequence)
    p:          dict of packed weights (y = x @ W + b convention)
    """
    S, T, _ = x3.shape
    R = S * T
    x2 = x3.reshape(R, D)

    # Fused QKV projection: one MXU pass over all rows of this layer.
    qkv = jnp.dot(x2, p["wqkv"], preferred_element_type=jnp.float32) + p["bqkv"]
    qkv3 = qkv.reshape(S, T, 3 * D)

    def split_heads(base):
        # -> (H*S, T, HD), batch index = h * S + s
        heads = [qkv3[:, :, base + h * HD: base + (h + 1) * HD] for h in range(H)]
        return jnp.stack(heads, axis=0).reshape(H * S, T, HD)

    qh = split_heads(0)
    kh = split_heads(D)
    vh = split_heads(2 * D)

    # Attention batched over all (head, sequence) pairs at once.
    s = jnp.einsum("bqd,bkd->bqk", qh, kh,
                   preferred_element_type=jnp.float32) * SCALE
    s = s + key_mask_b
    s = s - jnp.max(s, axis=-1, keepdims=True)
    e = jnp.exp(s)
    probs = e / jnp.sum(e, axis=-1, keepdims=True)          # exact softmax
    ctx = jnp.einsum("bqk,bkd->bqd", probs, vh,
                     preferred_element_type=jnp.float32)    # (H*S, T, HD)

    # Output projection with the head-merge folded in: wo is (H, HD, D), so the
    # per-head contexts never need a lane concat.
    ctx_h = ctx.reshape(H, R, HD)
    attn_hro = jnp.einsum("hrd,hdo->hro", ctx_h, p["wo"],
                          preferred_element_type=jnp.float32)  # (H, R, D)
    attn = attn_hro[0]
    for hh in range(1, H):
        attn = attn + attn_hro[hh]
    attn = attn + p["bo"]                                       # (R, D)

    h1 = _layernorm(attn + x2, p["ln1g"], p["ln1b"])

    f = jnp.dot(h1, p["wi"], preferred_element_type=jnp.float32) + p["bi"]
    f = jax.nn.gelu(f, approximate=True)                        # hidden_act = "gelu_new"
    f = jnp.dot(f, p["wo2"], preferred_element_type=jnp.float32) + p["bo2"]
    out = _layernorm(f + h1, p["ln2g"], p["ln2b"])
    return out.reshape(S, T, D)


# ----------------------------- fused encoder kernel --------------------------
def encoder_kernel(x_ref, am0_ref, am_ref, nm_ref, red_ref, *rest):
    n = len(PARAM_KEYS)
    param_refs = rest[:n]
    red_out_ref, hid_out_ref = rest[n], rest[n + 1]

    # Param arrays are stacked along a leading dim:
    #   [text_0 .. text_{n-1}, info_0 .. info_{n-1}]
    num_layers = param_refs[0].shape[0] // 2

    def layer_p(idx):
        return {k: r[idx] for k, r in zip(PARAM_KEYS, param_refs)}

    BB, N, L, _ = x_ref.shape
    Np1 = nm_ref.shape[-1]
    S = BB * N

    # Masks broadcast over heads once (hoisted out of the layer loop).
    mask0_b = _per_head_mask(am0_ref[...].reshape(S, L))     # layer-0 text mask
    mask_b = _per_head_mask(am_ref[...].reshape(S, L))       # layers>0 text mask
    node_b = _per_head_mask(nm_ref[...].reshape(BB, Np1))    # station mask

    # Every batch element starts from the same shared reduce state.
    reduce_h = jnp.broadcast_to(red_ref[...], (BB, 1, D))    # (BB, 1, D)

    hidden = x_ref[...].reshape(S, L, D)
    for i in range(num_layers):
        # ---- text-encoding BertLayer over all BB*N blocks ----
        hidden = _bert_layer(hidden, mask0_b if i == 0 else mask_b, layer_p(i))
        hid_out_ref[...] = hidden.reshape(BB, N, L, D)

        # ---- information-exchanging BertLayer over [reduce ; CLS_0..CLS_{N-1}] ----
        cls = hidden[:, 1, :].reshape(BB, N, D)                       # (BB, N, D)
        reduce_cls = jnp.concatenate([reduce_h, cls], axis=1)         # (BB, N+1, D)
        station = _bert_layer(reduce_cls, node_b, layer_p(num_layers + i))
        reduce_h = station[:, 0:1, :]                                 # (BB, 1, D)

        # hidden[:, :, 0, :] = station[:, 1:, :]  (targeted token-0 row store)
        hid_out_ref[:, :, 0:1, :] = station[:, 1:, :][:, :, None, :]

        if i + 1 < num_layers:
            hidden = hid_out_ref[...].reshape(S, L, D)

    red_out_ref[...] = reduce_h


# ----------------------------- wrapper ---------------------------------------
def _grid_steps(batch):
    """1 fat step on single-TC chips (v5e/v6e); 2 'parallel' steps on v7x."""
    try:
        kind = jax.devices()[0].device_kind.lower()
    except Exception:
        kind = ""
    if "v7" in kind and batch % 2 == 0 and batch >= 2:
        return 2
    return 1


def _pack_layer(p):
    """Repack one BertLayer's params into the kernel-friendly layout."""
    return dict(
        wqkv=jnp.concatenate([p["wq"], p["wk"], p["wv"]], axis=1),   # (D, 3D)
        bqkv=jnp.concatenate([p["bq"], p["bk"], p["bv"]], axis=1),   # (1, 3D)
        wo=p["wo"].reshape(H, HD, D),                                # (H, HD, D)
        bo=p["bo"], ln1g=p["ln1g"], ln1b=p["ln1b"],
        wi=p["wi"], bi=p["bi"], wo2=p["wo2"], bo2=p["bo2"],
        ln2g=p["ln2g"], ln2b=p["ln2b"],
    )


def encoder_forward(hidden_states, attention_mask, reduce_hidden_states,
                    node_mask, text_params, info_params):
    """Mirrors BlockLevelContextawareEncoder.forward (eval mode)."""
    BN, L_, D_ = hidden_states.shape
    B = node_mask.shape[0]
    Np1 = node_mask.shape[-1]
    N = Np1 - 1

    x = hidden_states.reshape(B, N, L_, D_).astype(jnp.float32)
    am = attention_mask.reshape(B, N, L_).astype(jnp.float32)
    am0 = am.at[:, :, 0].set(jnp.float32(-10000.0))     # layer-0 station-slot mask
    nm = node_mask.reshape(B, 1, Np1).astype(jnp.float32)
    red = reduce_hidden_states.astype(jnp.float32)       # (1, D)

    # Pack + stack per-layer params: [text_0..text_{n-1}, info_0..info_{n-1}]
    packed = [_pack_layer(p) for p in list(text_params) + list(info_params)]
    param_list = [jnp.stack([p[k] for p in packed], axis=0) for k in PARAM_KEYS]

    steps = _grid_steps(B)
    BB = B // steps

    in_specs = [
        pl.BlockSpec((BB, N, L_, D_), lambda b: (b, 0, 0, 0)),   # hidden
        pl.BlockSpec((BB, N, L_), lambda b: (b, 0, 0)),          # layer-0 mask
        pl.BlockSpec((BB, N, L_), lambda b: (b, 0, 0)),          # mask (layers > 0)
        pl.BlockSpec((BB, 1, Np1), lambda b: (b, 0, 0)),         # node mask
        pl.BlockSpec((1, D_), lambda b: (0, 0)),                 # reduce init (shared)
    ] + [pl.BlockSpec(p.shape, lambda b, nd=p.ndim: (0,) * nd)   # resident weights
         for p in param_list]

    out_shapes = (
        jax.ShapeDtypeStruct((B, 1, D_), jnp.float32),           # reduce out
        jax.ShapeDtypeStruct((B, N, L_, D_), jnp.float32),       # hidden out
    )
    out_specs = (
        pl.BlockSpec((BB, 1, D_), lambda b: (b, 0, 0)),
        pl.BlockSpec((BB, N, L_, D_), lambda b: (b, 0, 0, 0)),
    )

    red_out, hid_out = pl.pallas_call(
        encoder_kernel,
        grid=(steps,),
        in_specs=in_specs,
        out_specs=out_specs,
        out_shape=out_shapes,
        input_output_aliases={0: 1},                             # x -> hidden out
        compiler_params=pltpu.CompilerParams(
            dimension_semantics=("parallel",)),                  # v7x: 2 TCs split batch
    )(x, am0, am, nm, red, *param_list)

    return red_out, hid_out.reshape(B * N, L_, D_)


# ----------------------------- params ----------------------------------------
def init_bert_layer_params(key):
    ks = jax.random.split(key, 6)

    def w(k, shape):
        return 0.02 * jax.random.normal(k, shape, jnp.float32)

    z = lambda shape: jnp.zeros(shape, jnp.float32)
    return dict(
        wq=w(ks[0], (D, D)), bq=z((1, D)),
        wk=w(ks[1], (D, D)), bk=z((1, D)),
        wv=w(ks[2], (D, D)), bv=z((1, D)),
        wo=w(ks[3], (D, D)), bo=z((1, D)),
        ln1g=jnp.ones((1, D), jnp.float32), ln1b=z((1, D)),
        wi=w(ks[4], (D, I)), bi=z((1, I)),
        wo2=w(ks[5], (I, D)), bo2=z((1, D)),
        ln2g=jnp.ones((1, D), jnp.float32), ln2b=z((1, D)),
    )


def init_params(key):
    keys = jax.random.split(key, 2 * NUM_LAYERS)
    text_params = [init_bert_layer_params(keys[i]) for i in range(NUM_LAYERS)]
    info_params = [init_bert_layer_params(keys[NUM_LAYERS + i])
                   for i in range(NUM_LAYERS)]
    return text_params, info_params


# ----------------------------- main -------------------------------------------
if __name__ == "__main__":
    B, N, L = 2, 3, 8
    BN = B * N

    key = jax.random.PRNGKey(0)
    k_h, k_r, k_p = jax.random.split(key, 3)

    hidden_states = jax.random.normal(k_h, (BN, L, D), jnp.float32)
    attention_mask = jnp.zeros((BN, 1, 1, L), jnp.float32)      # additive mask
    reduce_hidden_states = jax.random.normal(k_r, (1, D), jnp.float32)
    node_mask = jnp.zeros((B, 1, 1, N + 1), jnp.float32)        # additive mask

    text_params, info_params = init_params(k_p)

    reduce_out, hidden_out = encoder_forward(
        hidden_states, attention_mask, reduce_hidden_states, node_mask,
        text_params, info_params)
    jax.block_until_ready((reduce_out, hidden_out))

    assert reduce_out.shape == (B, 1, D)
    assert hidden_out.shape == (BN, L, D)
    print("KERNEL_OK")
</pallas_src>

<mosaic_0001>
module attributes {stable_mosaic.version = 11 : i64} {
  func.func @encoder_kernel(%arg0: i32, %arg1: memref<2x3x8x32xf32, #tpu.memory_space<vmem>>, %arg2: memref<2x3x8xf32, #tpu.memory_space<vmem>>, %arg3: memref<2x3x8xf32, #tpu.memory_space<vmem>>, %arg4: memref<2x1x4xf32, #tpu.memory_space<vmem>>, %arg5: memref<1x32xf32, #tpu.memory_space<vmem>>, %arg6: memref<4x32x96xf32, #tpu.memory_space<vmem>>, %arg7: memref<4x1x96xf32, #tpu.memory_space<vmem>>, %arg8: memref<4x4x8x32xf32, #tpu.memory_space<vmem>>, %arg9: memref<4x1x32xf32, #tpu.memory_space<vmem>>, %arg10: memref<4x1x32xf32, #tpu.memory_space<vmem>>, %arg11: memref<4x1x32xf32, #tpu.memory_space<vmem>>, %arg12: memref<4x32x64xf32, #tpu.memory_space<vmem>>, %arg13: memref<4x1x64xf32, #tpu.memory_space<vmem>>, %arg14: memref<4x64x32xf32, #tpu.memory_space<vmem>>, %arg15: memref<4x1x32xf32, #tpu.memory_space<vmem>>, %arg16: memref<4x1x32xf32, #tpu.memory_space<vmem>>, %arg17: memref<4x1x32xf32, #tpu.memory_space<vmem>>, %arg18: memref<2x1x32xf32, #tpu.memory_space<vmem>>, %arg19: memref<2x3x8x32xf32, #tpu.memory_space<vmem>>) attributes {dimension_semantics = [#tpu.dimension_semantics<parallel>], iteration_bounds = array<i64: 1>, scalar_prefetch = 0 : i64, scratch_operands = 0 : i64, tpu.core_type = #tpu.core_type<tc>, window_params = [{transform_indices = @transform_0, window_bounds = array<i64: 2, 3, 8, 32>}, {transform_indices = @transform_1, window_bounds = array<i64: 2, 3, 8>}, {transform_indices = @transform_2, window_bounds = array<i64: 2, 3, 8>}, {transform_indices = @transform_3, window_bounds = array<i64: 2, 1, 4>}, {pipeline_mode = #tpu.pipeline_mode<synchronous>, transform_indices = @transform_4, window_bounds = array<i64: 1, 32>}, {pipeline_mode = #tpu.pipeline_mode<synchronous>, transform_indices = @transform_5, window_bounds = array<i64: 4, 32, 96>}, {pipeline_mode = #tpu.pipeline_mode<synchronous>, transform_indices = @transform_6, window_bounds = array<i64: 4, 1, 96>}, {pipeline_mode = #tpu.pipeline_mode<synchronous>, transform_indices = @transform_7, window_bounds = array<i64: 4, 4, 8, 32>}, {pipeline_mode = #tpu.pipeline_mode<synchronous>, transform_indices = @transform_8, window_bounds = array<i64: 4, 1, 32>}, {pipeline_mode = #tpu.pipeline_mode<synchronous>, transform_indices = @transform_9, window_bounds = array<i64: 4, 1, 32>}, {pipeline_mode = #tpu.pipeline_mode<synchronous>, transform_indices = @transform_10, window_bounds = array<i64: 4, 1, 32>}, {pipeline_mode = #tpu.pipeline_mode<synchronous>, transform_indices = @transform_11, window_bounds = array<i64: 4, 32, 64>}, {pipeline_mode = #tpu.pipeline_mode<synchronous>, transform_indices = @transform_12, window_bounds = array<i64: 4, 1, 64>}, {pipeline_mode = #tpu.pipeline_mode<synchronous>, transform_indices = @transform_13, window_bounds = array<i64: 4, 64, 32>}, {pipeline_mode = #tpu.pipeline_mode<synchronous>, transform_indices = @transform_14, window_bounds = array<i64: 4, 1, 32>}, {pipeline_mode = #tpu.pipeline_mode<synchronous>, transform_indices = @transform_15, window_bounds = array<i64: 4, 1, 32>}, {pipeline_mode = #tpu.pipeline_mode<synchronous>, transform_indices = @transform_16, window_bounds = array<i64: 4, 1, 32>}, {transform_indices = @transform_17, window_bounds = array<i64: 2, 1, 32>}, {transform_indices = @transform_18, window_bounds = array<i64: 2, 3, 8, 32>}]} {
    %c0 = arith.constant 0 : index
    %c0_0 = arith.constant 0 : index
    %c0_1 = arith.constant 0 : index
    %0 = vector.load %arg2[%c0, %c0_0, %c0_1] : memref<2x3x8xf32, #tpu.memory_space<vmem>>, vector<2x3x8xf32>
    %1 = vector.shape_cast %0 : vector<2x3x8xf32> to vector<6x8xf32>
    %2 = vector.shape_cast %1 : vector<6x8xf32> to vector<1x6x8xf32>
    %3 = vector.shape_cast %2 : vector<1x6x8xf32> to vector<1x6x8xf32>
    %4 = vector.broadcast %3 : vector<1x6x8xf32> to vector<4x6x8xf32>
    %5 = vector.shape_cast %4 : vector<4x6x8xf32> to vector<24x8xf32>
    %6 = vector.shape_cast %5 : vector<24x8xf32> to vector<24x1x8xf32>
    %c0_2 = arith.constant 0 : index
    %c0_3 = arith.constant 0 : index
    %c0_4 = arith.constant 0 : index
    %7 = vector.load %arg3[%c0_2, %c0_3, %c0_4] : memref<2x3x8xf32, #tpu.memory_space<vmem>>, vector<2x3x8xf32>
    %8 = vector.shape_cast %7 : vector<2x3x8xf32> to vector<6x8xf32>
    %9 = vector.shape_cast %8 : vector<6x8xf32> to vector<1x6x8xf32>
    %10 = vector.shape_cast %9 : vector<1x6x8xf32> to vector<1x6x8xf32>
    %11 = vector.broadcast %10 : vector<1x6x8xf32> to vector<4x6x8xf32>
    %12 = vector.shape_cast %11 : vector<4x6x8xf32> to vector<24x8xf32>
    %13 = vector.shape_cast %12 : vector<24x8xf32> to vector<24x1x8xf32>
    %c0_5 = arith.constant 0 : index
    %c0_6 = arith.constant 0 : index
    %c0_7 = arith.constant 0 : index
    %14 = vector.load %arg4[%c0_5, %c0_6, %c0_7] : memref<2x1x4xf32, #tpu.memory_space<vmem>>, vector<2x1x4xf32>
    %15 = vector.shape_cast %14 : vector<2x1x4xf32> to vector<2x4xf32>
    %16 = vector.shape_cast %15 : vector<2x4xf32> to vector<1x2x4xf32>
    %17 = vector.shape_cast %16 : vector<1x2x4xf32> to vector<1x2x4xf32>
    %18 = vector.broadcast %17 : vector<1x2x4xf32> to vector<4x2x4xf32>
    %19 = vector.shape_cast %18 : vector<4x2x4xf32> to vector<8x4xf32>
    %20 = vector.shape_cast %19 : vector<8x4xf32> to vector<8x1x4xf32>
    %c0_8 = arith.constant 0 : index
    %c0_9 = arith.constant 0 : index
    %21 = vector.load %arg5[%c0_8, %c0_9] : memref<1x32xf32, #tpu.memory_space<vmem>>, vector<1x32xf32>
    %22 = vector.shape_cast %21 : vector<1x32xf32> to vector<1x1x32xf32>
    %23 = vector.broadcast %22 : vector<1x1x32xf32> to vector<2x1x32xf32>
    %c0_10 = arith.constant 0 : index
    %c0_11 = arith.constant 0 : index
    %c0_12 = arith.constant 0 : index
    %c0_13 = arith.constant 0 : index
    %24 = vector.load %arg1[%c0_10, %c0_11, %c0_12, %c0_13] : memref<2x3x8x32xf32, #tpu.memory_space<vmem>>, vector<2x3x8x32xf32>
    %25 = vector.shape_cast %24 : vector<2x3x8x32xf32> to vector<6x8x32xf32>
    %c0_14 = arith.constant 0 : index
    %c0_15 = arith.constant 0 : index
    %c0_16 = arith.constant 0 : index
    %26 = vector.load %arg6[%c0_14, %c0_15, %c0_16] : memref<4x32x96xf32, #tpu.memory_space<vmem>>, vector<1x32x96xf32>
    %27 = vector.shape_cast %26 : vector<1x32x96xf32> to vector<32x96xf32>
    %c0_17 = arith.constant 0 : index
    %c0_18 = arith.constant 0 : index
    %c0_19 = arith.constant 0 : index
    %28 = vector.load %arg7[%c0_17, %c0_18, %c0_19] : memref<4x1x96xf32, #tpu.memory_space<vmem>>, vector<1x1x96xf32>
    %29 = vector.shape_cast %28 : vector<1x1x96xf32> to vector<1x96xf32>
    %c0_20 = arith.constant 0 : index
    %c0_21 = arith.constant 0 : index
    %c0_22 = arith.constant 0 : index
    %c0_23 = arith.constant 0 : index
    %30 = vector.load %arg8[%c0_20, %c0_21, %c0_22, %c0_23] : memref<4x4x8x32xf32, #tpu.memory_space<vmem>>, vector<1x4x8x32xf32>
    %31 = vector.shape_cast %30 : vector<1x4x8x32xf32> to vector<4x8x32xf32>
    %c0_24 = arith.constant 0 : index
    %c0_25 = arith.constant 0 : index
    %c0_26 = arith.constant 0 : index
    %32 = vector.load %arg9[%c0_24, %c0_25, %c0_26] : memref<4x1x32xf32, #tpu.memory_space<vmem>>, vector<1x1x32xf32>
    %33 = vector.shape_cast %32 : vector<1x1x32xf32> to vector<1x32xf32>
    %c0_27 = arith.constant 0 : index
    %c0_28 = arith.constant 0 : index
    %c0_29 = arith.constant 0 : index
    %34 = vector.load %arg10[%c0_27, %c0_28, %c0_29] : memref<4x1x32xf32, #tpu.memory_space<vmem>>, vector<1x1x32xf32>
    %35 = vector.shape_cast %34 : vector<1x1x32xf32> to vector<1x32xf32>
    %c0_30 = arith.constant 0 : index
    %c0_31 = arith.constant 0 : index
    %c0_32 = arith.constant 0 : index
    %36 = vector.load %arg11[%c0_30, %c0_31, %c0_32] : memref<4x1x32xf32, #tpu.memory_space<vmem>>, vector<1x1x32xf32>
    %37 = vector.shape_cast %36 : vector<1x1x32xf32> to vector<1x32xf32>
    %c0_33 = arith.constant 0 : index
    %c0_34 = arith.constant 0 : index
    %c0_35 = arith.constant 0 : index
    %38 = vector.load %arg12[%c0_33, %c0_34, %c0_35] : memref<4x32x64xf32, #tpu.memory_space<vmem>>, vector<1x32x64xf32>
    %39 = vector.shape_cast %38 : vector<1x32x64xf32> to vector<32x64xf32>
    %c0_36 = arith.constant 0 : index
    %c0_37 = arith.constant 0 : index
    %c0_38 = arith.constant 0 : index
    %40 = vector.load %arg13[%c0_36, %c0_37, %c0_38] : memref<4x1x64xf32, #tpu.memory_space<vmem>>, vector<1x1x64xf32>
    %41 = vector.shape_cast %40 : vector<1x1x64xf32> to vector<1x64xf32>
    %c0_39 = arith.constant 0 : index
    %c0_40 = arith.constant 0 : index
    %c0_41 = arith.constant 0 : index
    %42 = vector.load %arg14[%c0_39, %c0_40, %c0_41] : memref<4x64x32xf32, #tpu.memory_space<vmem>>, vector<1x64x32xf32>
    %43 = vector.shape_cast %42 : vector<1x64x32xf32> to vector<64x32xf32>
    %c0_42 = arith.constant 0 : index
    %c0_43 = arith.constant 0 : index
    %c0_44 = arith.constant 0 : index
    %44 = vector.load %arg15[%c0_42, %c0_43, %c0_44] : memref<4x1x32xf32, #tpu.memory_space<vmem>>, vector<1x1x32xf32>
    %45 = vector.shape_cast %44 : vector<1x1x32xf32> to vector<1x32xf32>
    %c0_45 = arith.constant 0 : index
    %c0_46 = arith.constant 0 : index
    %c0_47 = arith.constant 0 : index
    %46 = vector.load %arg16[%c0_45, %c0_46, %c0_47] : memref<4x1x32xf32, #tpu.memory_space<vmem>>, vector<1x1x32xf32>
    %47 = vector.shape_cast %46 : vector<1x1x32xf32> to vector<1x32xf32>
    %c0_48 = arith.constant 0 : index
    %c0_49 = arith.constant 0 : index
    %c0_50 = arith.constant 0 : index
    %48 = vector.load %arg17[%c0_48, %c0_49, %c0_50] : memref<4x1x32xf32, #tpu.memory_space<vmem>>, vector<1x1x32xf32>
    %49 = vector.shape_cast %48 : vector<1x1x32xf32> to vector<1x32xf32>
    %50 = vector.shape_cast %25 : vector<6x8x32xf32> to vector<48x32xf32>
    %cst = arith.constant dense<0.000000e+00> : vector<48x96xf32>
    %51 = tpu.matmul %50, %27, %cst {dimension_numbers = #tpu.dot_dimension_numbers<[1], [0], [0], [1], [0, 0, 1, 1], [], []>} : vector<48x32xf32>, vector<32x96xf32>, vector<48x96xf32> -> vector<48x96xf32>
    %52 = vector.broadcast %29 : vector<1x96xf32> to vector<48x96xf32>
    %53 = arith.addf %51, %52 : vector<48x96xf32>
    %54 = vector.shape_cast %53 : vector<48x96xf32> to vector<6x8x96xf32>
    %55 = vector.extract_strided_slice %54 {offsets = [0, 0, 0], sizes = [6, 8, 8], strides = [1, 1, 1]} : vector<6x8x96xf32> to vector<6x8x8xf32>
    %56 = vector.extract_strided_slice %54 {offsets = [0, 0, 8], sizes = [6, 8, 8], strides = [1, 1, 1]} : vector<6x8x96xf32> to vector<6x8x8xf32>
    %57 = vector.extract_strided_slice %54 {offsets = [0, 0, 16], sizes = [6, 8, 8], strides = [1, 1, 1]} : vector<6x8x96xf32> to vector<6x8x8xf32>
    %58 = vector.extract_strided_slice %54 {offsets = [0, 0, 24], sizes = [6, 8, 8], strides = [1, 1, 1]} : vector<6x8x96xf32> to vector<6x8x8xf32>
    %59 = vector.shape_cast %55 : vector<6x8x8xf32> to vector<1x6x8x8xf32>
    %60 = vector.shape_cast %56 : vector<6x8x8xf32> to vector<1x6x8x8xf32>
    %61 = vector.shape_cast %57 : vector<6x8x8xf32> to vector<1x6x8x8xf32>
    %62 = vector.shape_cast %58 : vector<6x8x8xf32> to vector<1x6x8x8xf32>
    %63 = tpu.concatenate %59, %60, %61, %62 in 0 : vector<1x6x8x8xf32>, vector<1x6x8x8xf32>, vector<1x6x8x8xf32>, vector<1x6x8x8xf32> -> vector<4x6x8x8xf32>
    %64 = vector.shape_cast %63 : vector<4x6x8x8xf32> to vector<24x8x8xf32>
    %65 = vector.extract_strided_slice %54 {offsets = [0, 0, 32], sizes = [6, 8, 8], strides = [1, 1, 1]} : vector<6x8x96xf32> to vector<6x8x8xf32>
    %66 = vector.extract_strided_slice %54 {offsets = [0, 0, 40], sizes = [6, 8, 8], strides = [1, 1, 1]} : vector<6x8x96xf32> to vector<6x8x8xf32>
    %67 = vector.extract_strided_slice %54 {offsets = [0, 0, 48], sizes = [6, 8, 8], strides = [1, 1, 1]} : vector<6x8x96xf32> to vector<6x8x8xf32>
    %68 = vector.extract_strided_slice %54 {offsets = [0, 0, 56], sizes = [6, 8, 8], strides = [1, 1, 1]} : vector<6x8x96xf32> to vector<6x8x8xf32>
    %69 = vector.shape_cast %65 : vector<6x8x8xf32> to vector<1x6x8x8xf32>
    %70 = vector.shape_cast %66 : vector<6x8x8xf32> to vector<1x6x8x8xf32>
    %71 = vector.shape_cast %67 : vector<6x8x8xf32> to vector<1x6x8x8xf32>
    %72 = vector.shape_cast %68 : vector<6x8x8xf32> to vector<1x6x8x8xf32>
    %73 = tpu.concatenate %69, %70, %71, %72 in 0 : vector<1x6x8x8xf32>, vector<1x6x8x8xf32>, vector<1x6x8x8xf32>, vector<1x6x8x8xf32> -> vector<4x6x8x8xf32>
    %74 = vector.shape_cast %73 : vector<4x6x8x8xf32> to vector<24x8x8xf32>
    %75 = vector.extract_strided_slice %54 {offsets = [0, 0, 64], sizes = [6, 8, 8], strides = [1, 1, 1]} : vector<6x8x96xf32> to vector<6x8x8xf32>
    %76 = vector.extract_strided_slice %54 {offsets = [0, 0, 72], sizes = [6, 8, 8], strides = [1, 1, 1]} : vector<6x8x96xf32> to vector<6x8x8xf32>
    %77 = vector.extract_strided_slice %54 {offsets = [0, 0, 80], sizes = [6, 8, 8], strides = [1, 1, 1]} : vector<6x8x96xf32> to vector<6x8x8xf32>
    %78 = vector.extract_strided_slice %54 {offsets = [0, 0, 88], sizes = [6, 8, 8], strides = [1, 1, 1]} : vector<6x8x96xf32> to vector<6x8x8xf32>
    %79 = vector.shape_cast %75 : vector<6x8x8xf32> to vector<1x6x8x8xf32>
    %80 = vector.shape_cast %76 : vector<6x8x8xf32> to vector<1x6x8x8xf32>
    %81 = vector.shape_cast %77 : vector<6x8x8xf32> to vector<1x6x8x8xf32>
    %82 = vector.shape_cast %78 : vector<6x8x8xf32> to vector<1x6x8x8xf32>
    %83 = tpu.concatenate %79, %80, %81, %82 in 0 : vector<1x6x8x8xf32>, vector<1x6x8x8xf32>, vector<1x6x8x8xf32>, vector<1x6x8x8xf32> -> vector<4x6x8x8xf32>
    %84 = vector.shape_cast %83 : vector<4x6x8x8xf32> to vector<24x8x8xf32>
    "tpu.trace_start"() <{level = 10 : i32, message = "bqd,bkd->bqk"}> : () -> ()
    %cst_51 = arith.constant dense<0.000000e+00> : vector<24x8x8xf32>
    %85 = tpu.matmul %64, %74, %cst_51 {dimension_numbers = #tpu.dot_dimension_numbers<[2], [2], [1], [1], [0, 0, 0, 1, 1, 1], [0], [0]>} : vector<24x8x8xf32>, vector<24x8x8xf32>, vector<24x8x8xf32> -> vector<24x8x8xf32>
    "tpu.trace_stop"() : () -> ()
    %cst_52 = arith.constant 0.353553385 : f32
    %86 = vector.broadcast %cst_52 : f32 to vector<24x8x8xf32>
    %87 = arith.mulf %85, %86 : vector<24x8x8xf32>
    %88 = vector.broadcast %6 : vector<24x1x8xf32> to vector<24x8x8xf32>
    %89 = arith.addf %87, %88 : vector<24x8x8xf32>
    %cst_53 = arith.constant dense<0xFF800000> : vector<24x8xf32>
    %90 = vector.multi_reduction <maximumf>, %89, %cst_53 [2] : vector<24x8x8xf32> to vector<24x8xf32>
    %91 = vector.shape_cast %90 : vector<24x8xf32> to vector<24x8x1xf32>
    %92 = vector.broadcast %91 : vector<24x8x1xf32> to vector<24x8x8xf32>
    %93 = arith.subf %89, %92 : vector<24x8x8xf32>
    %94 = math.exp %93 : vector<24x8x8xf32>
    %cst_54 = arith.constant dense<0.000000e+00> : vector<24x8xf32>
    %95 = vector.multi_reduction <add>, %94, %cst_54 [2] : vector<24x8x8xf32> to vector<24x8xf32>
    %96 = vector.shape_cast %95 : vector<24x8xf32> to vector<24x8x1xf32>
    %97 = vector.broadcast %96 : vector<24x8x1xf32> to vector<24x8x8xf32>
    %98 = arith.divf %94, %97 : vector<24x8x8xf32>
    "tpu.trace_start"() <{level = 10 : i32, message = "bqk,bkd->bqd"}> : () -> ()
    %cst_55 = arith.constant dense<0.000000e+00> : vector<24x8x8xf32>
    %99 = tpu.matmul %98, %84, %cst_55 {dimension_numbers = #tpu.dot_dimension_numbers<[2], [1], [1], [2], [0, 0, 0, 1, 1, 2], [0], [0]>} : vector<24x8x8xf32>, vector<24x8x8xf32>, vector<24x8x8xf32> -> vector<24x8x8xf32>
    "tpu.trace_stop"() : () -> ()
    %100 = vector.shape_cast %99 : vector<24x8x8xf32> to vector<4x48x8xf32>
    "tpu.trace_start"() <{level = 10 : i32, message = "hrd,hdo->hro"}> : () -> ()
    %cst_56 = arith.constant dense<0.000000e+00> : vector<4x48x32xf32>
    %101 = tpu.matmul %100, %31, %cst_56 {dimension_numbers = #tpu.dot_dimension_numbers<[2], [1], [1], [2], [0, 0, 0, 1, 1, 2], [0], [0]>} : vector<4x48x8xf32>, vector<4x8x32xf32>, vector<4x48x32xf32> -> vector<4x48x32xf32>
    "tpu.trace_stop"() : () -> ()
    %102 = vector.extract_strided_slice %101 {offsets = [0, 0, 0], sizes = [1, 48, 32], strides = [1, 1, 1]} : vector<4x48x32xf32> to vector<1x48x32xf32>
    %103 = vector.shape_cast %102 : vector<1x48x32xf32> to vector<48x32xf32>
    %104 = vector.extract_strided_slice %101 {offsets = [1, 0, 0], sizes = [1, 48, 32], strides = [1, 1, 1]} : vector<4x48x32xf32> to vector<1x48x32xf32>
    %105 = vector.shape_cast %104 : vector<1x48x32xf32> to vector<48x32xf32>
    %106 = arith.addf %103, %105 : vector<48x32xf32>
    %107 = vector.extract_strided_slice %101 {offsets = [2, 0, 0], sizes = [1, 48, 32], strides = [1, 1, 1]} : vector<4x48x32xf32> to vector<1x48x32xf32>
    %108 = vector.shape_cast %107 : vector<1x48x32xf32> to vector<48x32xf32>
    %109 = arith.addf %106, %108 : vector<48x32xf32>
    %110 = vector.extract_strided_slice %101 {offsets = [3, 0, 0], sizes = [1, 48, 32], strides = [1, 1, 1]} : vector<4x48x32xf32> to vector<1x48x32xf32>
    %111 = vector.shape_cast %110 : vector<1x48x32xf32> to vector<48x32xf32>
    %112 = arith.addf %109, %111 : vector<48x32xf32>
    %113 = vector.broadcast %33 : vector<1x32xf32> to vector<48x32xf32>
    %114 = arith.addf %112, %113 : vector<48x32xf32>
    %115 = arith.addf %114, %50 : vector<48x32xf32>
    %cst_57 = arith.constant dense<0.000000e+00> : vector<48xf32>
    %116 = vector.multi_reduction <add>, %115, %cst_57 [1] : vector<48x32xf32> to vector<48xf32>
    %117 = vector.shape_cast %116 : vector<48xf32> to vector<48x1xf32>
    %cst_58 = arith.constant 3.200000e+01 : f32
    %118 = vector.broadcast %cst_58 : f32 to vector<48x1xf32>
    %119 = arith.divf %117, %118 : vector<48x1xf32>
    %120 = vector.broadcast %119 : vector<48x1xf32> to vector<48x32xf32>
    %121 = arith.subf %115, %120 : vector<48x32xf32>
    %122 = vector.broadcast %119 : vector<48x1xf32> to vector<48x32xf32>
    %123 = arith.subf %115, %122 : vector<48x32xf32>
    %124 = arith.mulf %121, %123 : vector<48x32xf32>
    %cst_59 = arith.constant dense<0.000000e+00> : vector<48xf32>
    %125 = vector.multi_reduction <add>, %124, %cst_59 [1] : vector<48x32xf32> to vector<48xf32>
    %126 = vector.shape_cast %125 : vector<48xf32> to vector<48x1xf32>
    %cst_60 = arith.constant 3.200000e+01 : f32
    %127 = vector.broadcast %cst_60 : f32 to vector<48x1xf32>
    %128 = arith.divf %126, %127 : vector<48x1xf32>
    %129 = vector.broadcast %119 : vector<48x1xf32> to vector<48x32xf32>
    %130 = arith.subf %115, %129 : vector<48x32xf32>
    %cst_61 = arith.constant 9.99999996E-13 : f32
    %131 = vector.broadcast %cst_61 : f32 to vector<48x1xf32>
    %132 = arith.addf %128, %131 : vector<48x1xf32>
    %133 = math.rsqrt %132 : vector<48x1xf32>
    %134 = vector.broadcast %133 : vector<48x1xf32> to vector<48x32xf32>
    %135 = arith.mulf %130, %134 : vector<48x32xf32>
    %136 = vector.broadcast %35 : vector<1x32xf32> to vector<48x32xf32>
    %137 = arith.mulf %135, %136 : vector<48x32xf32>
    %138 = vector.broadcast %37 : vector<1x32xf32> to vector<48x32xf32>
    %139 = arith.addf %137, %138 : vector<48x32xf32>
    %cst_62 = arith.constant dense<0.000000e+00> : vector<48x64xf32>
    %140 = tpu.matmul %139, %39, %cst_62 {dimension_numbers = #tpu.dot_dimension_numbers<[1], [0], [0], [1], [0, 0, 1, 1], [], []>} : vector<48x32xf32>, vector<32x64xf32>, vector<48x64xf32> -> vector<48x64xf32>
    %141 = vector.broadcast %41 : vector<1x64xf32> to vector<48x64xf32>
    %142 = arith.addf %140, %141 : vector<48x64xf32>
    %143 = arith.mulf %142, %142 : vector<48x64xf32>
    %144 = arith.mulf %142, %143 : vector<48x64xf32>
    %cst_63 = arith.constant 4.471500e-02 : f32
    %145 = vector.broadcast %cst_63 : f32 to vector<48x64xf32>
    %146 = arith.mulf %145, %144 : vector<48x64xf32>
    %147 = arith.addf %142, %146 : vector<48x64xf32>
    %cst_64 = arith.constant 0.797884583 : f32
    %148 = vector.broadcast %cst_64 : f32 to vector<48x64xf32>
    %149 = arith.mulf %148, %147 : vector<48x64xf32>
    %150 = math.tanh %149 : vector<48x64xf32>
    %cst_65 = arith.constant 1.000000e+00 : f32
    %151 = vector.broadcast %cst_65 : f32 to vector<48x64xf32>
    %152 = arith.addf %151, %150 : vector<48x64xf32>
    %cst_66 = arith.constant 5.000000e-01 : f32
    %153 = vector.broadcast %cst_66 : f32 to vector<48x64xf32>
    %154 = arith.mulf %153, %152 : vector<48x64xf32>
    %155 = arith.mulf %142, %154 : vector<48x64xf32>
    %cst_67 = arith.constant dense<0.000000e+00> : vector<48x32xf32>
    %156 = tpu.matmul %155, %43, %cst_67 {dimension_numbers = #tpu.dot_dimension_numbers<[1], [0], [0], [1], [0, 0, 1, 1], [], []>} : vector<48x64xf32>, vector<64x32xf32>, vector<48x32xf32> -> vector<48x32xf32>
    %157 = vector.broadcast %45 : vector<1x32xf32> to vector<48x32xf32>
    %158 = arith.addf %156, %157 : vector<48x32xf32>
    %159 = arith.addf %158, %139 : vector<48x32xf32>
    %cst_68 = arith.constant dense<0.000000e+00> : vector<48xf32>
    %160 = vector.multi_reduction <add>, %159, %cst_68 [1] : vector<48x32xf32> to vector<48xf32>
    %161 = vector.shape_cast %160 : vector<48xf32> to vector<48x1xf32>
    %cst_69 = arith.constant 3.200000e+01 : f32
    %162 = vector.broadcast %cst_69 : f32 to vector<48x1xf32>
    %163 = arith.divf %161, %162 : vector<48x1xf32>
    %164 = vector.broadcast %163 : vector<48x1xf32> to vector<48x32xf32>
    %165 = arith.subf %159, %164 : vector<48x32xf32>
    %166 = vector.broadcast %163 : vector<48x1xf32> to vector<48x32xf32>
    %167 = arith.subf %159, %166 : vector<48x32xf32>
    %168 = arith.mulf %165, %167 : vector<48x32xf32>
    %cst_70 = arith.constant dense<0.000000e+00> : vector<48xf32>
    %169 = vector.multi_reduction <add>, %168, %cst_70 [1] : vector<48x32xf32> to vector<48xf32>
    %170 = vector.shape_cast %169 : vector<48xf32> to vector<48x1xf32>
    %cst_71 = arith.constant 3.200000e+01 : f32
    %171 = vector.broadcast %cst_71 : f32 to vector<48x1xf32>
    %172 = arith.divf %170, %171 : vector<48x1xf32>
    %173 = vector.broadcast %163 : vector<48x1xf32> to vector<48x32xf32>
    %174 = arith.subf %159, %173 : vector<48x32xf32>
    %cst_72 = arith.constant 9.99999996E-13 : f32
    %175 = vector.broadcast %cst_72 : f32 to vector<48x1xf32>
    %176 = arith.addf %172, %175 : vector<48x1xf32>
    %177 = math.rsqrt %176 : vector<48x1xf32>
    %178 = vector.broadcast %177 : vector<48x1xf32> to vector<48x32xf32>
    %179 = arith.mulf %174, %178 : vector<48x32xf32>
    %180 = vector.broadcast %47 : vector<1x32xf32> to vector<48x32xf32>
    %181 = arith.mulf %179, %180 : vector<48x32xf32>
    %182 = vector.broadcast %49 : vector<1x32xf32> to vector<48x32xf32>
    %183 = arith.addf %181, %182 : vector<48x32xf32>
    %184 = vector.shape_cast %183 : vector<48x32xf32> to vector<6x8x32xf32>
    %185 = vector.shape_cast %184 : vector<6x8x32xf32> to vector<2x3x8x32xf32>
    %c0_73 = arith.constant 0 : index
    %c0_74 = arith.constant 0 : index
    %c0_75 = arith.constant 0 : index
    %c0_76 = arith.constant 0 : index
    %186 = vector.load %arg19[%c0_73, %c0_74, %c0_75, %c0_76] : memref<2x3x8x32xf32, #tpu.memory_space<vmem>>, vector<2x3x8x32xf32>
    tpu.vector_store %arg19[%c0_73, %c0_74, %c0_75, %c0_76], %185 {strides = array<i32>} : memref<2x3x8x32xf32, #tpu.memory_space<vmem>>, vector<2x3x8x32xf32>,
    %187 = vector.extract_strided_slice %184 {offsets = [0, 1, 0], sizes = [6, 1, 32], strides = [1, 1, 1]} : vector<6x8x32xf32> to vector<6x1x32xf32>
    %188 = vector.shape_cast %187 : vector<6x1x32xf32> to vector<6x32xf32>
    %189 = vector.shape_cast %188 : vector<6x32xf32> to vector<2x3x32xf32>
    %190 = tpu.concatenate %23, %189 in 1 : vector<2x1x32xf32>, vector<2x3x32xf32> -> vector<2x4x32xf32>
    %c2 = arith.constant 2 : index
    %c0_77 = arith.constant 0 : index
    %c0_78 = arith.constant 0 : index
    %191 = vector.load %arg6[%c2, %c0_77, %c0_78] : memref<4x32x96xf32, #tpu.memory_space<vmem>>, vector<1x32x96xf32>
    %192 = vector.shape_cast %191 : vector<1x32x96xf32> to vector<32x96xf32>
    %c2_79 = arith.constant 2 : index
    %c0_80 = arith.constant 0 : index
    %c0_81 = arith.constant 0 : index
    %193 = vector.load %arg7[%c2_79, %c0_80, %c0_81] : memref<4x1x96xf32, #tpu.memory_space<vmem>>, vector<1x1x96xf32>
    %194 = vector.shape_cast %193 : vector<1x1x96xf32> to vector<1x96xf32>
    %c2_82 = arith.constant 2 : index
    %c0_83 = arith.constant 0 : index
    %c0_84 = arith.constant 0 : index
    %c0_85 = arith.constant 0 : index
    %195 = vector.load %arg8[%c2_82, %c0_83, %c0_84, %c0_85] : memref<4x4x8x32xf32, #tpu.memory_space<vmem>>, vector<1x4x8x32xf32>
    %196 = vector.shape_cast %195 : vector<1x4x8x32xf32> to vector<4x8x32xf32>
    %c2_86 = arith.constant 2 : index
    %c0_87 = arith.constant 0 : index
    %c0_88 = arith.constant 0 : index
    %197 = vector.load %arg9[%c2_86, %c0_87, %c0_88] : memref<4x1x32xf32, #tpu.memory_space<vmem>>, vector<1x1x32xf32>
    %198 = vector.shape_cast %197 : vector<1x1x32xf32> to vector<1x32xf32>
    %c2_89 = arith.constant 2 : index
    %c0_90 = arith.constant 0 : index
    %c0_91 = arith.constant 0 : index
    %199 = vector.load %arg10[%c2_89, %c0_90, %c0_91] : memref<4x1x32xf32, #tpu.memory_space<vmem>>, vector<1x1x32xf32>
    %200 = vector.shape_cast %199 : vector<1x1x32xf32> to vector<1x32xf32>
    %c2_92 = arith.constant 2 : index
    %c0_93 = arith.constant 0 : index
    %c0_94 = arith.constant 0 : index
    %201 = vector.load %arg11[%c2_92, %c0_93, %c0_94] : memref<4x1x32xf32, #tpu.memory_space<vmem>>, vector<1x1x32xf32>
    %202 = vector.shape_cast %201 : vector<1x1x32xf32> to vector<1x32xf32>
    %c2_95 = arith.constant 2 : index
    %c0_96 = arith.constant 0 : index
    %c0_97 = arith.constant 0 : index
    %203 = vector.load %arg12[%c2_95, %c0_96, %c0_97] : memref<4x32x64xf32, #tpu.memory_space<vmem>>, vector<1x32x64xf32>
    %204 = vector.shape_cast %203 : vector<1x32x64xf32> to vector<32x64xf32>
    %c2_98 = arith.constant 2 : index
    %c0_99 = arith.constant 0 : index
    %c0_100 = arith.constant 0 : index
    %205 = vector.load %arg13[%c2_98, %c0_99, %c0_100] : memref<4x1x64xf32, #tpu.memory_space<vmem>>, vector<1x1x64xf32>
    %206 = vector.shape_cast %205 : vector<1x1x64xf32> to vector<1x64xf32>
    %c2_101 = arith.constant 2 : index
    %c0_102 = arith.constant 0 : index
    %c0_103 = arith.constant 0 : index
    %207 = vector.load %arg14[%c2_101, %c0_102, %c0_103] : memref<4x64x32xf32, #tpu.memory_space<vmem>>, vector<1x64x32xf32>
    %208 = vector.shape_cast %207 : vector<1x64x32xf32> to vector<64x32xf32>
    %c2_104 = arith.constant 2 : index
    %c0_105 = arith.constant 0 : index
    %c0_106 = arith.constant 0 : index
    %209 = vector.load %arg15[%c2_104, %c0_105, %c0_106] : memref<4x1x32xf32, #tpu.memory_space<vmem>>, vector<1x1x32xf32>
    %210 = vector.shape_cast %209 : vector<1x1x32xf32> to vector<1x32xf32>
    %c2_107 = arith.constant 2 : index
    %c0_108 = arith.constant 0 : index
    %c0_109 = arith.constant 0 : index
    %211 = vector.load %arg16[%c2_107, %c0_108, %c0_109] : memref<4x1x32xf32, #tpu.memory_space<vmem>>, vector<1x1x32xf32>
    %212 = vector.shape_cast %211 : vector<1x1x32xf32> to vector<1x32xf32>
    %c2_110 = arith.constant 2 : index
    %c0_111 = arith.constant 0 : index
    %c0_112 = arith.constant 0 : index
    %213 = vector.load %arg17[%c2_110, %c0_111, %c0_112] : memref<4x1x32xf32, #tpu.memory_space<vmem>>, vector<1x1x32xf32>
    %214 = vector.shape_cast %213 : vector<1x1x32xf32> to vector<1x32xf32>
    %215 = vector.shape_cast %190 : vector<2x4x32xf32> to vector<8x32xf32>
    %cst_113 = arith.constant dense<0.000000e+00> : vector<8x96xf32>
    %216 = tpu.matmul %215, %192, %cst_113 {dimension_numbers = #tpu.dot_dimension_numbers<[1], [0], [0], [1], [0, 0, 1, 1], [], []>} : vector<8x32xf32>, vector<32x96xf32>, vector<8x96xf32> -> vector<8x96xf32>
    %217 = vector.broadcast %194 : vector<1x96xf32> to vector<8x96xf32>
    %218 = arith.addf %216, %217 : vector<8x96xf32>
    %219 = vector.shape_cast %218 : vector<8x96xf32> to vector<2x4x96xf32>
    %220 = vector.extract_strided_slice %219 {offsets = [0, 0, 0], sizes = [2, 4, 8], strides = [1, 1, 1]} : vector<2x4x96xf32> to vector<2x4x8xf32>
    %221 = vector.extract_strided_slice %219 {offsets = [0, 0, 8], sizes = [2, 4, 8], strides = [1, 1, 1]} : vector<2x4x96xf32> to vector<2x4x8xf32>
    %222 = vector.extract_strided_slice %219 {offsets = [0, 0, 16], sizes = [2, 4, 8], strides = [1, 1, 1]} : vector<2x4x96xf32> to vector<2x4x8xf32>
    %223 = vector.extract_strided_slice %219 {offsets = [0, 0, 24], sizes = [2, 4, 8], strides = [1, 1, 1]} : vector<2x4x96xf32> to vector<2x4x8xf32>
    %224 = vector.shape_cast %220 : vector<2x4x8xf32> to vector<1x2x4x8xf32>
    %225 = vector.shape_cast %221 : vector<2x4x8xf32> to vector<1x2x4x8xf32>
    %226 = vector.shape_cast %222 : vector<2x4x8xf32> to vector<1x2x4x8xf32>
    %227 = vector.shape_cast %223 : vector<2x4x8xf32> to vector<1x2x4x8xf32>
    %228 = tpu.concatenate %224, %225, %226, %227 in 0 : vector<1x2x4x8xf32>, vector<1x2x4x8xf32>, vector<1x2x4x8xf32>, vector<1x2x4x8xf32> -> vector<4x2x4x8xf32>
    %229 = vector.shape_cast %228 : vector<4x2x4x8xf32> to vector<8x4x8xf32>
    %230 = vector.extract_strided_slice %219 {offsets = [0, 0, 32], sizes = [2, 4, 8], strides = [1, 1, 1]} : vector<2x4x96xf32> to vector<2x4x8xf32>
    %231 = vector.extract_strided_slice %219 {offsets = [0, 0, 40], sizes = [2, 4, 8], strides = [1, 1, 1]} : vector<2x4x96xf32> to vector<2x4x8xf32>
    %232 = vector.extract_strided_slice %219 {offsets = [0, 0, 48], sizes = [2, 4, 8], strides = [1, 1, 1]} : vector<2x4x96xf32> to vector<2x4x8xf32>
    %233 = vector.extract_strided_slice %219 {offsets = [0, 0, 56], sizes = [2, 4, 8], strides = [1, 1, 1]} : vector<2x4x96xf32> to vector<2x4x8xf32>
    %234 = vector.shape_cast %230 : vector<2x4x8xf32> to vector<1x2x4x8xf32>
    %235 = vector.shape_cast %231 : vector<2x4x8xf32> to vector<1x2x4x8xf32>
    %236 = vector.shape_cast %232 : vector<2x4x8xf32> to vector<1x2x4x8xf32>
    %237 = vector.shape_cast %233 : vector<2x4x8xf32> to vector<1x2x4x8xf32>
    %238 = tpu.concatenate %234, %235, %236, %237 in 0 : vector<1x2x4x8xf32>, vector<1x2x4x8xf32>, vector<1x2x4x8xf32>, vector<1x2x4x8xf32> -> vector<4x2x4x8xf32>
    %239 = vector.shape_cast %238 : vector<4x2x4x8xf32> to vector<8x4x8xf32>
    %240 = vector.extract_strided_slice %219 {offsets = [0, 0, 64], sizes = [2, 4, 8], strides = [1, 1, 1]} : vector<2x4x96xf32> to vector<2x4x8xf32>
    %241 = vector.extract_strided_slice %219 {offsets = [0, 0, 72], sizes = [2, 4, 8], strides = [1, 1, 1]} : vector<2x4x96xf32> to vector<2x4x8xf32>
    %242 = vector.extract_strided_slice %219 {offsets = [0, 0, 80], sizes = [2, 4, 8], strides = [1, 1, 1]} : vector<2x4x96xf32> to vector<2x4x8xf32>
    %243 = vector.extract_strided_slice %219 {offsets = [0, 0, 88], sizes = [2, 4, 8], strides = [1, 1, 1]} : vector<2x4x96xf32> to vector<2x4x8xf32>
    %244 = vector.shape_cast %240 : vector<2x4x8xf32> to vector<1x2x4x8xf32>
    %245 = vector.shape_cast %241 : vector<2x4x8xf32> to vector<1x2x4x8xf32>
    %246 = vector.shape_cast %242 : vector<2x4x8xf32> to vector<1x2x4x8xf32>
    %247 = vector.shape_cast %243 : vector<2x4x8xf32> to vector<1x2x4x8xf32>
    %248 = tpu.concatenate %244, %245, %246, %247 in 0 : vector<1x2x4x8xf32>, vector<1x2x4x8xf32>, vector<1x2x4x8xf32>, vector<1x2x4x8xf32> -> vector<4x2x4x8xf32>
    %249 = vector.shape_cast %248 : vector<4x2x4x8xf32> to vector<8x4x8xf32>
    "tpu.trace_start"() <{level = 10 : i32, message = "bqd,bkd->bqk"}> : () -> ()
    %cst_114 = arith.constant dense<0.000000e+00> : vector<8x4x4xf32>
    %250 = tpu.matmul %229, %239, %cst_114 {dimension_numbers = #tpu.dot_dimension_numbers<[2], [2], [1], [1], [0, 0, 0, 1, 1, 1], [0], [0]>} : vector<8x4x8xf32>, vector<8x4x8xf32>, vector<8x4x4xf32> -> vector<8x4x4xf32>
    "tpu.trace_stop"() : () -> ()
    %cst_115 = arith.constant 0.353553385 : f32
    %251 = vector.broadcast %cst_115 : f32 to vector<8x4x4xf32>
    %252 = arith.mulf %250, %251 : vector<8x4x4xf32>
    %253 = vector.broadcast %20 : vector<8x1x4xf32> to vector<8x4x4xf32>
    %254 = arith.addf %252, %253 : vector<8x4x4xf32>
    %cst_116 = arith.constant dense<0xFF800000> : vector<8x4xf32>
    %255 = vector.multi_reduction <maximumf>, %254, %cst_116 [2] : vector<8x4x4xf32> to vector<8x4xf32>
    %256 = vector.shape_cast %255 : vector<8x4xf32> to vector<8x4x1xf32>
    %257 = vector.broadcast %256 : vector<8x4x1xf32> to vector<8x4x4xf32>
    %258 = arith.subf %254, %257 : vector<8x4x4xf32>
    %259 = math.exp %258 : vector<8x4x4xf32>
    %cst_117 = arith.constant dense<0.000000e+00> : vector<8x4xf32>
    %260 = vector.multi_reduction <add>, %259, %cst_117 [2] : vector<8x4x4xf32> to vector<8x4xf32>
    %261 = vector.shape_cast %260 : vector<8x4xf32> to vector<8x4x1xf32>
    %262 = vector.broadcast %261 : vector<8x4x1xf32> to vector<8x4x4xf32>
    %263 = arith.divf %259, %262 : vector<8x4x4xf32>
    "tpu.trace_start"() <{level = 10 : i32, message = "bqk,bkd->bqd"}> : () -> ()
    %cst_118 = arith.constant dense<0.000000e+00> : vector<8x4x8xf32>
    %264 = tpu.matmul %263, %249, %cst_118 {dimension_numbers = #tpu.dot_dimension_numbers<[2], [1], [1], [2], [0, 0, 0, 1, 1, 2], [0], [0]>} : vector<8x4x4xf32>, vector<8x4x8xf32>, vector<8x4x8xf32> -> vector<8x4x8xf32>
    "tpu.trace_stop"() : () -> ()
    %265 = vector.shape_cast %264 : vector<8x4x8xf32> to vector<4x8x8xf32>
    "tpu.trace_start"() <{level = 10 : i32, message = "hrd,hdo->hro"}> : () -> ()
    %cst_119 = arith.constant dense<0.000000e+00> : vector<4x8x32xf32>
    %266 = tpu.matmul %265, %196, %cst_119 {dimension_numbers = #tpu.dot_dimension_numbers<[2], [1], [1], [2], [0, 0, 0, 1, 1, 2], [0], [0]>} : vector<4x8x8xf32>, vector<4x8x32xf32>, vector<4x8x32xf32> -> vector<4x8x32xf32>
    "tpu.trace_stop"() : () -> ()
    %267 = vector.extract_strided_slice %266 {offsets = [0, 0, 0], sizes = [1, 8, 32], strides = [1, 1, 1]} : vector<4x8x32xf32> to vector<1x8x32xf32>
    %268 = vector.shape_cast %267 : vector<1x8x32xf32> to vector<8x32xf32>
    %269 = vector.extract_strided_slice %266 {offsets = [1, 0, 0], sizes = [1, 8, 32], strides = [1, 1, 1]} : vector<4x8x32xf32> to vector<1x8x32xf32>
    %270 = vector.shape_cast %269 : vector<1x8x32xf32> to vector<8x32xf32>
    %271 = arith.addf %268, %270 : vector<8x32xf32>
    %272 = vector.extract_strided_slice %266 {offsets = [2, 0, 0], sizes = [1, 8, 32], strides = [1, 1, 1]} : vector<4x8x32xf32> to vector<1x8x32xf32>
    %273 = vector.shape_cast %272 : vector<1x8x32xf32> to vector<8x32xf32>
    %274 = arith.addf %271, %273 : vector<8x32xf32>
    %275 = vector.extract_strided_slice %266 {offsets = [3, 0, 0], sizes = [1, 8, 32], strides = [1, 1, 1]} : vector<4x8x32xf32> to vector<1x8x32xf32>
    %276 = vector.shape_cast %275 : vector<1x8x32xf32> to vector<8x32xf32>
    %277 = arith.addf %274, %276 : vector<8x32xf32>
    %278 = vector.broadcast %198 : vector<1x32xf32> to vector<8x32xf32>
    %279 = arith.addf %277, %278 : vector<8x32xf32>
    %280 = arith.addf %279, %215 : vector<8x32xf32>
    %cst_120 = arith.constant dense<0.000000e+00> : vector<8xf32>
    %281 = vector.multi_reduction <add>, %280, %cst_120 [1] : vector<8x32xf32> to vector<8xf32>
    %282 = vector.shape_cast %281 : vector<8xf32> to vector<8x1xf32>
    %cst_121 = arith.constant 3.200000e+01 : f32
    %283 = vector.broadcast %cst_121 : f32 to vector<8x1xf32>
    %284 = arith.divf %282, %283 : vector<8x1xf32>
    %285 = vector.broadcast %284 : vector<8x1xf32> to vector<8x32xf32>
    %286 = arith.subf %280, %285 : vector<8x32xf32>
    %287 = vector.broadcast %284 : vector<8x1xf32> to vector<8x32xf32>
    %288 = arith.subf %280, %287 : vector<8x32xf32>
    %289 = arith.mulf %286, %288 : vector<8x32xf32>
    %cst_122 = arith.constant dense<0.000000e+00> : vector<8xf32>
    %290 = vector.multi_reduction <add>, %289, %cst_122 [1] : vector<8x32xf32> to vector<8xf32>
    %291 = vector.shape_cast %290 : vector<8xf32> to vector<8x1xf32>
    %cst_123 = arith.constant 3.200000e+01 : f32
    %292 = vector.broadcast %cst_123 : f32 to vector<8x1xf32>
    %293 = arith.divf %291, %292 : vector<8x1xf32>
    %294 = vector.broadcast %284 : vector<8x1xf32> to vector<8x32xf32>
    %295 = arith.subf %280, %294 : vector<8x32xf32>
    %cst_124 = arith.constant 9.99999996E-13 : f32
    %296 = vector.broadcast %cst_124 : f32 to vector<8x1xf32>
    %297 = arith.addf %293, %296 : vector<8x1xf32>
    %298 = math.rsqrt %297 : vector<8x1xf32>
    %299 = vector.broadcast %298 : vector<8x1xf32> to vector<8x32xf32>
    %300 = arith.mulf %295, %299 : vector<8x32xf32>
    %301 = vector.broadcast %200 : vector<1x32xf32> to vector<8x32xf32>
    %302 = arith.mulf %300, %301 : vector<8x32xf32>
    %303 = vector.broadcast %202 : vector<1x32xf32> to vector<8x32xf32>
    %304 = arith.addf %302, %303 : vector<8x32xf32>
    %cst_125 = arith.constant dense<0.000000e+00> : vector<8x64xf32>
    %305 = tpu.matmul %304, %204, %cst_125 {dimension_numbers = #tpu.dot_dimension_numbers<[1], [0], [0], [1], [0, 0, 1, 1], [], []>} : vector<8x32xf32>, vector<32x64xf32>, vector<8x64xf32> -> vector<8x64xf32>
    %306 = vector.broadcast %206 : vector<1x64xf32> to vector<8x64xf32>
    %307 = arith.addf %305, %306 : vector<8x64xf32>
    %308 = arith.mulf %307, %307 : vector<8x64xf32>
    %309 = arith.mulf %307, %308 : vector<8x64xf32>
    %cst_126 = arith.constant 4.471500e-02 : f32
    %310 = vector.broadcast %cst_126 : f32 to vector<8x64xf32>
    %311 = arith.mulf %310, %309 : vector<8x64xf32>
    %312 = arith.addf %307, %311 : vector<8x64xf32>
    %cst_127 = arith.constant 0.797884583 : f32
    %313 = vector.broadcast %cst_127 : f32 to vector<8x64xf32>
    %314 = arith.mulf %313, %312 : vector<8x64xf32>
    %315 = math.tanh %314 : vector<8x64xf32>
    %cst_128 = arith.constant 1.000000e+00 : f32
    %316 = vector.broadcast %cst_128 : f32 to vector<8x64xf32>
    %317 = arith.addf %316, %315 : vector<8x64xf32>
    %cst_129 = arith.constant 5.000000e-01 : f32
    %318 = vector.broadcast %cst_129 : f32 to vector<8x64xf32>
    %319 = arith.mulf %318, %317 : vector<8x64xf32>
    %320 = arith.mulf %307, %319 : vector<8x64xf32>
    %cst_130 = arith.constant dense<0.000000e+00> : vector<8x32xf32>
    %321 = tpu.matmul %320, %208, %cst_130 {dimension_numbers = #tpu.dot_dimension_numbers<[1], [0], [0], [1], [0, 0, 1, 1], [], []>} : vector<8x64xf32>, vector<64x32xf32>, vector<8x32xf32> -> vector<8x32xf32>
    %322 = vector.broadcast %210 : vector<1x32xf32> to vector<8x32xf32>
    %323 = arith.addf %321, %322 : vector<8x32xf32>
    %324 = arith.addf %323, %304 : vector<8x32xf32>
    %cst_131 = arith.constant dense<0.000000e+00> : vector<8xf32>
    %325 = vector.multi_reduction <add>, %324, %cst_131 [1] : vector<8x32xf32> to vector<8xf32>
    %326 = vector.shape_cast %325 : vector<8xf32> to vector<8x1xf32>
    %cst_132 = arith.constant 3.200000e+01 : f32
    %327 = vector.broadcast %cst_132 : f32 to vector<8x1xf32>
    %328 = arith.divf %326, %327 : vector<8x1xf32>
    %329 = vector.broadcast %328 : vector<8x1xf32> to vector<8x32xf32>
    %330 = arith.subf %324, %329 : vector<8x32xf32>
    %331 = vector.broadcast %328 : vector<8x1xf32> to vector<8x32xf32>
    %332 = arith.subf %324, %331 : vector<8x32xf32>
    %333 = arith.mulf %330, %332 : vector<8x32xf32>
    %cst_133 = arith.constant dense<0.000000e+00> : vector<8xf32>
    %334 = vector.multi_reduction <add>, %333, %cst_133 [1] : vector<8x32xf32> to vector<8xf32>
    %335 = vector.shape_cast %334 : vector<8xf32> to vector<8x1xf32>
    %cst_134 = arith.constant 3.200000e+01 : f32
    %336 = vector.broadcast %cst_134 : f32 to vector<8x1xf32>
    %337 = arith.divf %335, %336 : vector<8x1xf32>
    %338 = vector.broadcast %328 : vector<8x1xf32> to vector<8x32xf32>
    %339 = arith.subf %324, %338 : vector<8x32xf32>
    %cst_135 = arith.constant 9.99999996E-13 : f32
    %340 = vector.broadcast %cst_135 : f32 to vector<8x1xf32>
    %341 = arith.addf %337, %340 : vector<8x1xf32>
    %342 = math.rsqrt %341 : vector<8x1xf32>
    %343 = vector.broadcast %342 : vector<8x1xf32> to vector<8x32xf32>
    %344 = arith.mulf %339, %343 : vector<8x32xf32>
    %345 = vector.broadcast %212 : vector<1x32xf32> to vector<8x32xf32>
    %346 = arith.mulf %344, %345 : vector<8x32xf32>
    %347 = vector.broadcast %214 : vector<1x32xf32> to vector<8x32xf32>
    %348 = arith.addf %346, %347 : vector<8x32xf32>
    %349 = vector.shape_cast %348 : vector<8x32xf32> to vector<2x4x32xf32>
    %350 = vector.extract_strided_slice %349 {offsets = [0, 0, 0], sizes = [2, 1, 32], strides = [1, 1, 1]} : vector<2x4x32xf32> to vector<2x1x32xf32>
    %351 = vector.extract_strided_slice %349 {offsets = [0, 1, 0], sizes = [2, 3, 32], strides = [1, 1, 1]} : vector<2x4x32xf32> to vector<2x3x32xf32>
    %352 = vector.shape_cast %351 : vector<2x3x32xf32> to vector<2x3x1x32xf32>
    %c0_136 = arith.constant 0 : index
    %c0_137 = arith.constant 0 : index
    %c0_138 = arith.constant 0 : index
    %c0_139 = arith.constant 0 : index
    %353 = vector.load %arg19[%c0_136, %c0_137, %c0_138, %c0_139] : memref<2x3x8x32xf32, #tpu.memory_space<vmem>>, vector<2x3x1x32xf32>
    tpu.vector_store %arg19[%c0_136, %c0_137, %c0_138, %c0_139], %352 {strides = array<i32>} : memref<2x3x8x32xf32, #tpu.memory_space<vmem>>, vector<2x3x1x32xf32>,
    %c0_140 = arith.constant 0 : index
    %c0_141 = arith.constant 0 : index
    %c0_142 = arith.constant 0 : index
    %c0_143 = arith.constant 0 : index
    %354 = vector.load %arg19[%c0_140, %c0_141, %c0_142, %c0_143] : memref<2x3x8x32xf32, #tpu.memory_space<vmem>>, vector<2x3x8x32xf32>
    %355 = vector.shape_cast %354 : vector<2x3x8x32xf32> to vector<6x8x32xf32>
    %c1 = arith.constant 1 : index
    %c0_144 = arith.constant 0 : index
    %c0_145 = arith.constant 0 : index
    %356 = vector.load %arg6[%c1, %c0_144, %c0_145] : memref<4x32x96xf32, #tpu.memory_space<vmem>>, vector<1x32x96xf32>
    %357 = vector.shape_cast %356 : vector<1x32x96xf32> to vector<32x96xf32>
    %c1_146 = arith.constant 1 : index
    %c0_147 = arith.constant 0 : index
    %c0_148 = arith.constant 0 : index
    %358 = vector.load %arg7[%c1_146, %c0_147, %c0_148] : memref<4x1x96xf32, #tpu.memory_space<vmem>>, vector<1x1x96xf32>
    %359 = vector.shape_cast %358 : vector<1x1x96xf32> to vector<1x96xf32>
    %c1_149 = arith.constant 1 : index
    %c0_150 = arith.constant 0 : index
    %c0_151 = arith.constant 0 : index
    %c0_152 = arith.constant 0 : index
    %360 = vector.load %arg8[%c1_149, %c0_150, %c0_151, %c0_152] : memref<4x4x8x32xf32, #tpu.memory_space<vmem>>, vector<1x4x8x32xf32>
    %361 = vector.shape_cast %360 : vector<1x4x8x32xf32> to vector<4x8x32xf32>
    %c1_153 = arith.constant 1 : index
    %c0_154 = arith.constant 0 : index
    %c0_155 = arith.constant 0 : index
    %362 = vector.load %arg9[%c1_153, %c0_154, %c0_155] : memref<4x1x32xf32, #tpu.memory_space<vmem>>, vector<1x1x32xf32>
    %363 = vector.shape_cast %362 : vector<1x1x32xf32> to vector<1x32xf32>
    %c1_156 = arith.constant 1 : index
    %c0_157 = arith.constant 0 : index
    %c0_158 = arith.constant 0 : index
    %364 = vector.load %arg10[%c1_156, %c0_157, %c0_158] : memref<4x1x32xf32, #tpu.memory_space<vmem>>, vector<1x1x32xf32>
    %365 = vector.shape_cast %364 : vector<1x1x32xf32> to vector<1x32xf32>
    %c1_159 = arith.constant 1 : index
    %c0_160 = arith.constant 0 : index
    %c0_161 = arith.constant 0 : index
    %366 = vector.load %arg11[%c1_159, %c0_160, %c0_161] : memref<4x1x32xf32, #tpu.memory_space<vmem>>, vector<1x1x32xf32>
    %367 = vector.shape_cast %366 : vector<1x1x32xf32> to vector<1x32xf32>
    %c1_162 = arith.constant 1 : index
    %c0_163 = arith.constant 0 : index
    %c0_164 = arith.constant 0 : index
    %368 = vector.load %arg12[%c1_162, %c0_163, %c0_164] : memref<4x32x64xf32, #tpu.memory_space<vmem>>, vector<1x32x64xf32>
    %369 = vector.shape_cast %368 : vector<1x32x64xf32> to vector<32x64xf32>
    %c1_165 = arith.constant 1 : index
    %c0_166 = arith.constant 0 : index
    %c0_167 = arith.constant 0 : index
    %370 = vector.load %arg13[%c1_165, %c0_166, %c0_167] : memref<4x1x64xf32, #tpu.memory_space<vmem>>, vector<1x1x64xf32>
    %371 = vector.shape_cast %370 : vector<1x1x64xf32> to vector<1x64xf32>
    %c1_168 = arith.constant 1 : index
    %c0_169 = arith.constant 0 : index
    %c0_170 = arith.constant 0 : index
    %372 = vector.load %arg14[%c1_168, %c0_169, %c0_170] : memref<4x64x32xf32, #tpu.memory_space<vmem>>, vector<1x64x32xf32>
    %373 = vector.shape_cast %372 : vector<1x64x32xf32> to vector<64x32xf32>
    %c1_171 = arith.constant 1 : index
    %c0_172 = arith.constant 0 : index
    %c0_173 = arith.constant 0 : index
    %374 = vector.load %arg15[%c1_171, %c0_172, %c0_173] : memref<4x1x32xf32, #tpu.memory_space<vmem>>, vector<1x1x32xf32>
    %375 = vector.shape_cast %374 : vector<1x1x32xf32> to vector<1x32xf32>
    %c1_174 = arith.constant 1 : index
    %c0_175 = arith.constant 0 : index
    %c0_176 = arith.constant 0 : index
    %376 = vector.load %arg16[%c1_174, %c0_175, %c0_176] : memref<4x1x32xf32, #tpu.memory_space<vmem>>, vector<1x1x32xf32>
    %377 = vector.shape_cast %376 : vector<1x1x32xf32> to vector<1x32xf32>
    %c1_177 = arith.constant 1 : index
    %c0_178 = arith.constant 0 : index
    %c0_179 = arith.constant 0 : index
    %378 = vector.load %arg17[%c1_177, %c0_178, %c0_179] : memref<4x1x32xf32, #tpu.memory_space<vmem>>, vector<1x1x32xf32>
    %379 = vector.shape_cast %378 : vector<1x1x32xf32> to vector<1x32xf32>
    %380 = vector.shape_cast %355 : vector<6x8x32xf32> to vector<48x32xf32>
    %cst_180 = arith.constant dense<0.000000e+00> : vector<48x96xf32>
    %381 = tpu.matmul %380, %357, %cst_180 {dimension_numbers = #tpu.dot_dimension_numbers<[1], [0], [0], [1], [0, 0, 1, 1], [], []>} : vector<48x32xf32>, vector<32x96xf32>, vector<48x96xf32> -> vector<48x96xf32>
    %382 = vector.broadcast %359 : vector<1x96xf32> to vector<48x96xf32>
    %383 = arith.addf %381, %382 : vector<48x96xf32>
    %384 = vector.shape_cast %383 : vector<48x96xf32> to vector<6x8x96xf32>
    %385 = vector.extract_strided_slice %384 {offsets = [0, 0, 0], sizes = [6, 8, 8], strides = [1, 1, 1]} : vector<6x8x96xf32> to vector<6x8x8xf32>
    %386 = vector.extract_strided_slice %384 {offsets = [0, 0, 8], sizes = [6, 8, 8], strides = [1, 1, 1]} : vector<6x8x96xf32> to vector<6x8x8xf32>
    %387 = vector.extract_strided_slice %384 {offsets = [0, 0, 16], sizes = [6, 8, 8], strides = [1, 1, 1]} : vector<6x8x96xf32> to vector<6x8x8xf32>
    %388 = vector.extract_strided_slice %384 {offsets = [0, 0, 24], sizes = [6, 8, 8], strides = [1, 1, 1]} : vector<6x8x96xf32> to vector<6x8x8xf32>
    %389 = vector.shape_cast %385 : vector<6x8x8xf32> to vector<1x6x8x8xf32>
    %390 = vector.shape_cast %386 : vector<6x8x8xf32> to vector<1x6x8x8xf32>
    %391 = vector.shape_cast %387 : vector<6x8x8xf32> to vector<1x6x8x8xf32>
    %392 = vector.shape_cast %388 : vector<6x8x8xf32> to vector<1x6x8x8xf32>
    %393 = tpu.concatenate %389, %390, %391, %392 in 0 : vector<1x6x8x8xf32>, vector<1x6x8x8xf32>, vector<1x6x8x8xf32>, vector<1x6x8x8xf32> -> vector<4x6x8x8xf32>
    %394 = vector.shape_cast %393 : vector<4x6x8x8xf32> to vector<24x8x8xf32>
    %395 = vector.extract_strided_slice %384 {offsets = [0, 0, 32], sizes = [6, 8, 8], strides = [1, 1, 1]} : vector<6x8x96xf32> to vector<6x8x8xf32>
    %396 = vector.extract_strided_slice %384 {offsets = [0, 0, 40], sizes = [6, 8, 8], strides = [1, 1, 1]} : vector<6x8x96xf32> to vector<6x8x8xf32>
    %397 = vector.extract_strided_slice %384 {offsets = [0, 0, 48], sizes = [6, 8, 8], strides = [1, 1, 1]} : vector<6x8x96xf32> to vector<6x8x8xf32>
    %398 = vector.extract_strided_slice %384 {offsets = [0, 0, 56], sizes = [6, 8, 8], strides = [1, 1, 1]} : vector<6x8x96xf32> to vector<6x8x8xf32>
    %399 = vector.shape_cast %395 : vector<6x8x8xf32> to vector<1x6x8x8xf32>
    %400 = vector.shape_cast %396 : vector<6x8x8xf32> to vector<1x6x8x8xf32>
    %401 = vector.shape_cast %397 : vector<6x8x8xf32> to vector<1x6x8x8xf32>
    %402 = vector.shape_cast %398 : vector<6x8x8xf32> to vector<1x6x8x8xf32>
    %403 = tpu.concatenate %399, %400, %401, %402 in 0 : vector<1x6x8x8xf32>, vector<1x6x8x8xf32>, vector<1x6x8x8xf32>, vector<1x6x8x8xf32> -> vector<4x6x8x8xf32>
    %404 = vector.shape_cast %403 : vector<4x6x8x8xf32> to vector<24x8x8xf32>
    %405 = vector.extract_strided_slice %384 {offsets = [0, 0, 64], sizes = [6, 8, 8], strides = [1, 1, 1]} : vector<6x8x96xf32> to vector<6x8x8xf32>
    %406 = vector.extract_strided_slice %384 {offsets = [0, 0, 72], sizes = [6, 8, 8], strides = [1, 1, 1]} : vector<6x8x96xf32> to vector<6x8x8xf32>
    %407 = vector.extract_strided_slice %384 {offsets = [0, 0, 80], sizes = [6, 8, 8], strides = [1, 1, 1]} : vector<6x8x96xf32> to vector<6x8x8xf32>
    %408 = vector.extract_strided_slice %384 {offsets = [0, 0, 88], sizes = [6, 8, 8], strides = [1, 1, 1]} : vector<6x8x96xf32> to vector<6x8x8xf32>
    %409 = vector.shape_cast %405 : vector<6x8x8xf32> to vector<1x6x8x8xf32>
    %410 = vector.shape_cast %406 : vector<6x8x8xf32> to vector<1x6x8x8xf32>
    %411 = vector.shape_cast %407 : vector<6x8x8xf32> to vector<1x6x8x8xf32>
    %412 = vector.shape_cast %408 : vector<6x8x8xf32> to vector<1x6x8x8xf32>
    %413 = tpu.concatenate %409, %410, %411, %412 in 0 : vector<1x6x8x8xf32>, vector<1x6x8x8xf32>, vector<1x6x8x8xf32>, vector<1x6x8x8xf32> -> vector<4x6x8x8xf32>
    %414 = vector.shape_cast %413 : vector<4x6x8x8xf32> to vector<24x8x8xf32>
    "tpu.trace_start"() <{level = 10 : i32, message = "bqd,bkd->bqk"}> : () -> ()
    %cst_181 = arith.constant dense<0.000000e+00> : vector<24x8x8xf32>
    %415 = tpu.matmul %394, %404, %cst_181 {dimension_numbers = #tpu.dot_dimension_numbers<[2], [2], [1], [1], [0, 0, 0, 1, 1, 1], [0], [0]>} : vector<24x8x8xf32>, vector<24x8x8xf32>, vector<24x8x8xf32> -> vector<24x8x8xf32>
    "tpu.trace_stop"() : () -> ()
    %cst_182 = arith.constant 0.353553385 : f32
    %416 = vector.broadcast %cst_182 : f32 to vector<24x8x8xf32>
    %417 = arith.mulf %415, %416 : vector<24x8x8xf32>
    %418 = vector.broadcast %13 : vector<24x1x8xf32> to vector<24x8x8xf32>
    %419 = arith.addf %417, %418 : vector<24x8x8xf32>
    %cst_183 = arith.constant dense<0xFF800000> : vector<24x8xf32>
    %420 = vector.multi_reduction <maximumf>, %419, %cst_183 [2] : vector<24x8x8xf32> to vector<24x8xf32>
    %421 = vector.shape_cast %420 : vector<24x8xf32> to vector<24x8x1xf32>
    %422 = vector.broadcast %421 : vector<24x8x1xf32> to vector<24x8x8xf32>
    %423 = arith.subf %419, %422 : vector<24x8x8xf32>
    %424 = math.exp %423 : vector<24x8x8xf32>
    %cst_184 = arith.constant dense<0.000000e+00> : vector<24x8xf32>
    %425 = vector.multi_reduction <add>, %424, %cst_184 [2] : vector<24x8x8xf32> to vector<24x8xf32>
    %426 = vector.shape_cast %425 : vector<24x8xf32> to vector<24x8x1xf32>
    %427 = vector.broadcast %426 : vector<24x8x1xf32> to vector<24x8x8xf32>
    %428 = arith.divf %424, %427 : vector<24x8x8xf32>
    "tpu.trace_start"() <{level = 10 : i32, message = "bqk,bkd->bqd"}> : () -> ()
    %cst_185 = arith.constant dense<0.000000e+00> : vector<24x8x8xf32>
    %429 = tpu.matmul %428, %414, %cst_185 {dimension_numbers = #tpu.dot_dimension_numbers<[2], [1], [1], [2], [0, 0, 0, 1, 1, 2], [0], [0]>} : vector<24x8x8xf32>, vector<24x8x8xf32>, vector<24x8x8xf32> -> vector<24x8x8xf32>
    "tpu.trace_stop"() : () -> ()
    %430 = vector.shape_cast %429 : vector<24x8x8xf32> to vector<4x48x8xf32>
    "tpu.trace_start"() <{level = 10 : i32, message = "hrd,hdo->hro"}> : () -> ()
    %cst_186 = arith.constant dense<0.000000e+00> : vector<4x48x32xf32>
    %431 = tpu.matmul %430, %361, %cst_186 {dimension_numbers = #tpu.dot_dimension_numbers<[2], [1], [1], [2], [0, 0, 0, 1, 1, 2], [0], [0]>} : vector<4x48x8xf32>, vector<4x8x32xf32>, vector<4x48x32xf32> -> vector<4x48x32xf32>
    "tpu.trace_stop"() : () -> ()
    %432 = vector.extract_strided_slice %431 {offsets = [0, 0, 0], sizes = [1, 48, 32], strides = [1, 1, 1]} : vector<4x48x32xf32> to vector<1x48x32xf32>
    %433 = vector.shape_cast %432 : vector<1x48x32xf32> to vector<48x32xf32>
    %434 = vector.extract_strided_slice %431 {offsets = [1, 0, 0], sizes = [1, 48, 32], strides = [1, 1, 1]} : vector<4x48x32xf32> to vector<1x48x32xf32>
    %435 = vector.shape_cast %434 : vector<1x48x32xf32> to vector<48x32xf32>
    %436 = arith.addf %433, %435 : vector<48x32xf32>
    %437 = vector.extract_strided_slice %431 {offsets = [2, 0, 0], sizes = [1, 48, 32], strides = [1, 1, 1]} : vector<4x48x32xf32> to vector<1x48x32xf32>
    %438 = vector.shape_cast %437 : vector<1x48x32xf32> to vector<48x32xf32>
    %439 = arith.addf %436, %438 : vector<48x32xf32>
    %440 = vector.extract_strided_slice %431 {offsets = [3, 0, 0], sizes = [1, 48, 32], strides = [1, 1, 1]} : vector<4x48x32xf32> to vector<1x48x32xf32>
    %441 = vector.shape_cast %440 : vector<1x48x32xf32> to vector<48x32xf32>
    %442 = arith.addf %439, %441 : vector<48x32xf32>
    %443 = vector.broadcast %363 : vector<1x32xf32> to vector<48x32xf32>
    %444 = arith.addf %442, %443 : vector<48x32xf32>
    %445 = arith.addf %444, %380 : vector<48x32xf32>
    %cst_187 = arith.constant dense<0.000000e+00> : vector<48xf32>
    %446 = vector.multi_reduction <add>, %445, %cst_187 [1] : vector<48x32xf32> to vector<48xf32>
    %447 = vector.shape_cast %446 : vector<48xf32> to vector<48x1xf32>
    %cst_188 = arith.constant 3.200000e+01 : f32
    %448 = vector.broadcast %cst_188 : f32 to vector<48x1xf32>
    %449 = arith.divf %447, %448 : vector<48x1xf32>
    %450 = vector.broadcast %449 : vector<48x1xf32> to vector<48x32xf32>
    %451 = arith.subf %445, %450 : vector<48x32xf32>
    %452 = vector.broadcast %449 : vector<48x1xf32> to vector<48x32xf32>
    %453 = arith.subf %445, %452 : vector<48x32xf32>
    %454 = arith.mulf %451, %453 : vector<48x32xf32>
    %cst_189 = arith.constant dense<0.000000e+00> : vector<48xf32>
    %455 = vector.multi_reduction <add>, %454, %cst_189 [1] : vector<48x32xf32> to vector<48xf32>
    %456 = vector.shape_cast %455 : vector<48xf32> to vector<48x1xf32>
    %cst_190 = arith.constant 3.200000e+01 : f32
    %457 = vector.broadcast %cst_190 : f32 to vector<48x1xf32>
    %458 = arith.divf %456, %457 : vector<48x1xf32>
    %459 = vector.broadcast %449 : vector<48x1xf32> to vector<48x32xf32>
    %460 = arith.subf %445, %459 : vector<48x32xf32>
    %cst_191 = arith.constant 9.99999996E-13 : f32
    %461 = vector.broadcast %cst_191 : f32 to vector<48x1xf32>
    %462 = arith.addf %458, %461 : vector<48x1xf32>
    %463 = math.rsqrt %462 : vector<48x1xf32>
    %464 = vector.broadcast %463 : vector<48x1xf32> to vector<48x32xf32>
    %465 = arith.mulf %460, %464 : vector<48x32xf32>
    %466 = vector.broadcast %365 : vector<1x32xf32> to vector<48x32xf32>
    %467 = arith.mulf %465, %466 : vector<48x32xf32>
    %468 = vector.broadcast %367 : vector<1x32xf32> to vector<48x32xf32>
    %469 = arith.addf %467, %468 : vector<48x32xf32>
    %cst_192 = arith.constant dense<0.000000e+00> : vector<48x64xf32>
    %470 = tpu.matmul %469, %369, %cst_192 {dimension_numbers = #tpu.dot_dimension_numbers<[1], [0], [0], [1], [0, 0, 1, 1], [], []>} : vector<48x32xf32>, vector<32x64xf32>, vector<48x64xf32> -> vector<48x64xf32>
    %471 = vector.broadcast %371 : vector<1x64xf32> to vector<48x64xf32>
    %472 = arith.addf %470, %471 : vector<48x64xf32>
    %473 = arith.mulf %472, %472 : vector<48x64xf32>
    %474 = arith.mulf %472, %473 : vector<48x64xf32>
    %cst_193 = arith.constant 4.471500e-02 : f32
    %475 = vector.broadcast %cst_193 : f32 to vector<48x64xf32>
    %476 = arith.mulf %475, %474 : vector<48x64xf32>
    %477 = arith.addf %472, %476 : vector<48x64xf32>
    %cst_194 = arith.constant 0.797884583 : f32
    %478 = vector.broadcast %cst_194 : f32 to vector<48x64xf32>
    %479 = arith.mulf %478, %477 : vector<48x64xf32>
    %480 = math.tanh %479 : vector<48x64xf32>
    %cst_195 = arith.constant 1.000000e+00 : f32
    %481 = vector.broadcast %cst_195 : f32 to vector<48x64xf32>
    %482 = arith.addf %481, %480 : vector<48x64xf32>
    %cst_196 = arith.constant 5.000000e-01 : f32
    %483 = vector.broadcast %cst_196 : f32 to vector<48x64xf32>
    %484 = arith.mulf %483, %482 : vector<48x64xf32>
    %485 = arith.mulf %472, %484 : vector<48x64xf32>
    %cst_197 = arith.constant dense<0.000000e+00> : vector<48x32xf32>
    %486 = tpu.matmul %485, %373, %cst_197 {dimension_numbers = #tpu.dot_dimension_numbers<[1], [0], [0], [1], [0, 0, 1, 1], [], []>} : vector<48x64xf32>, vector<64x32xf32>, vector<48x32xf32> -> vector<48x32xf32>
    %487 = vector.broadcast %375 : vector<1x32xf32> to vector<48x32xf32>
    %488 = arith.addf %486, %487 : vector<48x32xf32>
    %489 = arith.addf %488, %469 : vector<48x32xf32>
    %cst_198 = arith.constant dense<0.000000e+00> : vector<48xf32>
    %490 = vector.multi_reduction <add>, %489, %cst_198 [1] : vector<48x32xf32> to vector<48xf32>
    %491 = vector.shape_cast %490 : vector<48xf32> to vector<48x1xf32>
    %cst_199 = arith.constant 3.200000e+01 : f32
    %492 = vector.broadcast %cst_199 : f32 to vector<48x1xf32>
    %493 = arith.divf %491, %492 : vector<48x1xf32>
    %494 = vector.broadcast %493 : vector<48x1xf32> to vector<48x32xf32>
    %495 = arith.subf %489, %494 : vector<48x32xf32>
    %496 = vector.broadcast %493 : vector<48x1xf32> to vector<48x32xf32>
    %497 = arith.subf %489, %496 : vector<48x32xf32>
    %498 = arith.mulf %495, %497 : vector<48x32xf32>
    %cst_200 = arith.constant dense<0.000000e+00> : vector<48xf32>
    %499 = vector.multi_reduction <add>, %498, %cst_200 [1] : vector<48x32xf32> to vector<48xf32>
    %500 = vector.shape_cast %499 : vector<48xf32> to vector<48x1xf32>
    %cst_201 = arith.constant 3.200000e+01 : f32
    %501 = vector.broadcast %cst_201 : f32 to vector<48x1xf32>
    %502 = arith.divf %500, %501 : vector<48x1xf32>
    %503 = vector.broadcast %493 : vector<48x1xf32> to vector<48x32xf32>
    %504 = arith.subf %489, %503 : vector<48x32xf32>
    %cst_202 = arith.constant 9.99999996E-13 : f32
    %505 = vector.broadcast %cst_202 : f32 to vector<48x1xf32>
    %506 = arith.addf %502, %505 : vector<48x1xf32>
    %507 = math.rsqrt %506 : vector<48x1xf32>
    %508 = vector.broadcast %507 : vector<48x1xf32> to vector<48x32xf32>
    %509 = arith.mulf %504, %508 : vector<48x32xf32>
    %510 = vector.broadcast %377 : vector<1x32xf32> to vector<48x32xf32>
    %511 = arith.mulf %509, %510 : vector<48x32xf32>
    %512 = vector.broadcast %379 : vector<1x32xf32> to vector<48x32xf32>
    %513 = arith.addf %511, %512 : vector<48x32xf32>
    %514 = vector.shape_cast %513 : vector<48x32xf32> to vector<6x8x32xf32>
    %515 = vector.shape_cast %514 : vector<6x8x32xf32> to vector<2x3x8x32xf32>
    %c0_203 = arith.constant 0 : index
    %c0_204 = arith.constant 0 : index
    %c0_205 = arith.constant 0 : index
    %c0_206 = arith.constant 0 : index
    %516 = vector.load %arg19[%c0_203, %c0_204, %c0_205, %c0_206] : memref<2x3x8x32xf32, #tpu.memory_space<vmem>>, vector<2x3x8x32xf32>
    tpu.vector_store %arg19[%c0_203, %c0_204, %c0_205, %c0_206], %515 {strides = array<i32>} : memref<2x3x8x32xf32, #tpu.memory_space<vmem>>, vector<2x3x8x32xf32>,
    %517 = vector.extract_strided_slice %514 {offsets = [0, 1, 0], sizes = [6, 1, 32], strides = [1, 1, 1]} : vector<6x8x32xf32> to vector<6x1x32xf32>
    %518 = vector.shape_cast %517 : vector<6x1x32xf32> to vector<6x32xf32>
    %519 = vector.shape_cast %518 : vector<6x32xf32> to vector<2x3x32xf32>
    %520 = tpu.concatenate %350, %519 in 1 : vector<2x1x32xf32>, vector<2x3x32xf32> -> vector<2x4x32xf32>
    %c3 = arith.constant 3 : index
    %c0_207 = arith.constant 0 : index
    %c0_208 = arith.constant 0 : index
    %521 = vector.load %arg6[%c3, %c0_207, %c0_208] : memref<4x32x96xf32, #tpu.memory_space<vmem>>, vector<1x32x96xf32>
    %522 = vector.shape_cast %521 : vector<1x32x96xf32> to vector<32x96xf32>
    %c3_209 = arith.constant 3 : index
    %c0_210 = arith.constant 0 : index
    %c0_211 = arith.constant 0 : index
    %523 = vector.load %arg7[%c3_209, %c0_210, %c0_211] : memref<4x1x96xf32, #tpu.memory_space<vmem>>, vector<1x1x96xf32>
    %524 = vector.shape_cast %523 : vector<1x1x96xf32> to vector<1x96xf32>
    %c3_212 = arith.constant 3 : index
    %c0_213 = arith.constant 0 : index
    %c0_214 = arith.constant 0 : index
    %c0_215 = arith.constant 0 : index
    %525 = vector.load %arg8[%c3_212, %c0_213, %c0_214, %c0_215] : memref<4x4x8x32xf32, #tpu.memory_space<vmem>>, vector<1x4x8x32xf32>
    %526 = vector.shape_cast %525 : vector<1x4x8x32xf32> to vector<4x8x32xf32>
    %c3_216 = arith.constant 3 : index
    %c0_217 = arith.constant 0 : index
    %c0_218 = arith.constant 0 : index
    %527 = vector.load %arg9[%c3_216, %c0_217, %c0_218] : memref<4x1x32xf32, #tpu.memory_space<vmem>>, vector<1x1x32xf32>
    %528 = vector.shape_cast %527 : vector<1x1x32xf32> to vector<1x32xf32>
    %c3_219 = arith.constant 3 : index
    %c0_220 = arith.constant 0 : index
    %c0_221 = arith.constant 0 : index
    %529 = vector.load %arg10[%c3_219, %c0_220, %c0_221] : memref<4x1x32xf32, #tpu.memory_space<vmem>>, vector<1x1x32xf32>
    %530 = vector.shape_cast %529 : vector<1x1x32xf32> to vector<1x32xf32>
    %c3_222 = arith.constant 3 : index
    %c0_223 = arith.constant 0 : index
    %c0_224 = arith.constant 0 : index
    %531 = vector.load %arg11[%c3_222, %c0_223, %c0_224] : memref<4x1x32xf32, #tpu.memory_space<vmem>>, vector<1x1x32xf32>
    %532 = vector.shape_cast %531 : vector<1x1x32xf32> to vector<1x32xf32>
    %c3_225 = arith.constant 3 : index
    %c0_226 = arith.constant 0 : index
    %c0_227 = arith.constant 0 : index
    %533 = vector.load %arg12[%c3_225, %c0_226, %c0_227] : memref<4x32x64xf32, #tpu.memory_space<vmem>>, vector<1x32x64xf32>
    %534 = vector.shape_cast %533 : vector<1x32x64xf32> to vector<32x64xf32>
    %c3_228 = arith.constant 3 : index
    %c0_229 = arith.constant 0 : index
    %c0_230 = arith.constant 0 : index
    %535 = vector.load %arg13[%c3_228, %c0_229, %c0_230] : memref<4x1x64xf32, #tpu.memory_space<vmem>>, vector<1x1x64xf32>
    %536 = vector.shape_cast %535 : vector<1x1x64xf32> to vector<1x64xf32>
    %c3_231 = arith.constant 3 : index
    %c0_232 = arith.constant 0 : index
    %c0_233 = arith.constant 0 : index
    %537 = vector.load %arg14[%c3_231, %c0_232, %c0_233] : memref<4x64x32xf32, #tpu.memory_space<vmem>>, vector<1x64x32xf32>
    %538 = vector.shape_cast %537 : vector<1x64x32xf32> to vector<64x32xf32>
    %c3_234 = arith.constant 3 : index
    %c0_235 = arith.constant 0 : index
    %c0_236 = arith.constant 0 : index
    %539 = vector.load %arg15[%c3_234, %c0_235, %c0_236] : memref<4x1x32xf32, #tpu.memory_space<vmem>>, vector<1x1x32xf32>
    %540 = vector.shape_cast %539 : vector<1x1x32xf32> to vector<1x32xf32>
    %c3_237 = arith.constant 3 : index
    %c0_238 = arith.constant 0 : index
    %c0_239 = arith.constant 0 : index
    %541 = vector.load %arg16[%c3_237, %c0_238, %c0_239] : memref<4x1x32xf32, #tpu.memory_space<vmem>>, vector<1x1x32xf32>
    %542 = vector.shape_cast %541 : vector<1x1x32xf32> to vector<1x32xf32>
    %c3_240 = arith.constant 3 : index
    %c0_241 = arith.constant 0 : index
    %c0_242 = arith.constant 0 : index
    %543 = vector.load %arg17[%c3_240, %c0_241, %c0_242] : memref<4x1x32xf32, #tpu.memory_space<vmem>>, vector<1x1x32xf32>
    %544 = vector.shape_cast %543 : vector<1x1x32xf32> to vector<1x32xf32>
    %545 = vector.shape_cast %520 : vector<2x4x32xf32> to vector<8x32xf32>
    %cst_243 = arith.constant dense<0.000000e+00> : vector<8x96xf32>
    %546 = tpu.matmul %545, %522, %cst_243 {dimension_numbers = #tpu.dot_dimension_numbers<[1], [0], [0], [1], [0, 0, 1, 1], [], []>} : vector<8x32xf32>, vector<32x96xf32>, vector<8x96xf32> -> vector<8x96xf32>
    %547 = vector.broadcast %524 : vector<1x96xf32> to vector<8x96xf32>
    %548 = arith.addf %546, %547 : vector<8x96xf32>
    %549 = vector.shape_cast %548 : vector<8x96xf32> to vector<2x4x96xf32>
    %550 = vector.extract_strided_slice %549 {offsets = [0, 0, 0], sizes = [2, 4, 8], strides = [1, 1, 1]} : vector<2x4x96xf32> to vector<2x4x8xf32>
    %551 = vector.extract_strided_slice %549 {offsets = [0, 0, 8], sizes = [2, 4, 8], strides = [1, 1, 1]} : vector<2x4x96xf32> to vector<2x4x8xf32>
    %552 = vector.extract_strided_slice %549 {offsets = [0, 0, 16], sizes = [2, 4, 8], strides = [1, 1, 1]} : vector<2x4x96xf32> to vector<2x4x8xf32>
    %553 = vector.extract_strided_slice %549 {offsets = [0, 0, 24], sizes = [2, 4, 8], strides = [1, 1, 1]} : vector<2x4x96xf32> to vector<2x4x8xf32>
    %554 = vector.shape_cast %550 : vector<2x4x8xf32> to vector<1x2x4x8xf32>
    %555 = vector.shape_cast %551 : vector<2x4x8xf32> to vector<1x2x4x8xf32>
    %556 = vector.shape_cast %552 : vector<2x4x8xf32> to vector<1x2x4x8xf32>
    %557 = vector.shape_cast %553 : vector<2x4x8xf32> to vector<1x2x4x8xf32>
    %558 = tpu.concatenate %554, %555, %556, %557 in 0 : vector<1x2x4x8xf32>, vector<1x2x4x8xf32>, vector<1x2x4x8xf32>, vector<1x2x4x8xf32> -> vector<4x2x4x8xf32>
    %559 = vector.shape_cast %558 : vector<4x2x4x8xf32> to vector<8x4x8xf32>
    %560 = vector.extract_strided_slice %549 {offsets = [0, 0, 32], sizes = [2, 4, 8], strides = [1, 1, 1]} : vector<2x4x96xf32> to vector<2x4x8xf32>
    %561 = vector.extract_strided_slice %549 {offsets = [0, 0, 40], sizes = [2, 4, 8], strides = [1, 1, 1]} : vector<2x4x96xf32> to vector<2x4x8xf32>
    %562 = vector.extract_strided_slice %549 {offsets = [0, 0, 48], sizes = [2, 4, 8], strides = [1, 1, 1]} : vector<2x4x96xf32> to vector<2x4x8xf32>
    %563 = vector.extract_strided_slice %549 {offsets = [0, 0, 56], sizes = [2, 4, 8], strides = [1, 1, 1]} : vector<2x4x96xf32> to vector<2x4x8xf32>
    %564 = vector.shape_cast %560 : vector<2x4x8xf32> to vector<1x2x4x8xf32>
    %565 = vector.shape_cast %561 : vector<2x4x8xf32> to vector<1x2x4x8xf32>
    %566 = vector.shape_cast %562 : vector<2x4x8xf32> to vector<1x2x4x8xf32>
    %567 = vector.shape_cast %563 : vector<2x4x8xf32> to vector<1x2x4x8xf32>
    %568 = tpu.concatenate %564, %565, %566, %567 in 0 : vector<1x2x4x8xf32>, vector<1x2x4x8xf32>, vector<1x2x4x8xf32>, vector<1x2x4x8xf32> -> vector<4x2x4x8xf32>
    %569 = vector.shape_cast %568 : vector<4x2x4x8xf32> to vector<8x4x8xf32>
    %570 = vector.extract_strided_slice %549 {offsets = [0, 0, 64], sizes = [2, 4, 8], strides = [1, 1, 1]} : vector<2x4x96xf32> to vector<2x4x8xf32>
    %571 = vector.extract_strided_slice %549 {offsets = [0, 0, 72], sizes = [2, 4, 8], strides = [1, 1, 1]} : vector<2x4x96xf32> to vector<2x4x8xf32>
    %572 = vector.extract_strided_slice %549 {offsets = [0, 0, 80], sizes = [2, 4, 8], strides = [1, 1, 1]} : vector<2x4x96xf32> to vector<2x4x8xf32>
    %573 = vector.extract_strided_slice %549 {offsets = [0, 0, 88], sizes = [2, 4, 8], strides = [1, 1, 1]} : vector<2x4x96xf32> to vector<2x4x8xf32>
    %574 = vector.shape_cast %570 : vector<2x4x8xf32> to vector<1x2x4x8xf32>
    %575 = vector.shape_cast %571 : vector<2x4x8xf32> to vector<1x2x4x8xf32>
    %576 = vector.shape_cast %572 : vector<2x4x8xf32> to vector<1x2x4x8xf32>
    %577 = vector.shape_cast %573 : vector<2x4x8xf32> to vector<1x2x4x8xf32>
    %578 = tpu.concatenate %574, %575, %576, %577 in 0 : vector<1x2x4x8xf32>, vector<1x2x4x8xf32>, vector<1x2x4x8xf32>, vector<1x2x4x8xf32> -> vector<4x2x4x8xf32>
    %579 = vector.shape_cast %578 : vector<4x2x4x8xf32> to vector<8x4x8xf32>
    "tpu.trace_start"() <{level = 10 : i32, message = "bqd,bkd->bqk"}> : () -> ()
    %cst_244 = arith.constant dense<0.000000e+00> : vector<8x4x4xf32>
    %580 = tpu.matmul %559, %569, %cst_244 {dimension_numbers = #tpu.dot_dimension_numbers<[2], [2], [1], [1], [0, 0, 0, 1, 1, 1], [0], [0]>} : vector<8x4x8xf32>, vector<8x4x8xf32>, vector<8x4x4xf32> -> vector<8x4x4xf32>
    "tpu.trace_stop"() : () -> ()
    %cst_245 = arith.constant 0.353553385 : f32
    %581 = vector.broadcast %cst_245 : f32 to vector<8x4x4xf32>
    %582 = arith.mulf %580, %581 : vector<8x4x4xf32>
    %583 = vector.broadcast %20 : vector<8x1x4xf32> to vector<8x4x4xf32>
    %584 = arith.addf %582, %583 : vector<8x4x4xf32>
    %cst_246 = arith.constant dense<0xFF800000> : vector<8x4xf32>
    %585 = vector.multi_reduction <maximumf>, %584, %cst_246 [2] : vector<8x4x4xf32> to vector<8x4xf32>
    %586 = vector.shape_cast %585 : vector<8x4xf32> to vector<8x4x1xf32>
    %587 = vector.broadcast %586 : vector<8x4x1xf32> to vector<8x4x4xf32>
    %588 = arith.subf %584, %587 : vector<8x4x4xf32>
    %589 = math.exp %588 : vector<8x4x4xf32>
    %cst_247 = arith.constant dense<0.000000e+00> : vector<8x4xf32>
    %590 = vector.multi_reduction <add>, %589, %cst_247 [2] : vector<8x4x4xf32> to vector<8x4xf32>
    %591 = vector.shape_cast %590 : vector<8x4xf32> to vector<8x4x1xf32>
    %592 = vector.broadcast %591 : vector<8x4x1xf32> to vector<8x4x4xf32>
    %593 = arith.divf %589, %592 : vector<8x4x4xf32>
    "tpu.trace_start"() <{level = 10 : i32, message = "bqk,bkd->bqd"}> : () -> ()
    %cst_248 = arith.constant dense<0.000000e+00> : vector<8x4x8xf32>
    %594 = tpu.matmul %593, %579, %cst_248 {dimension_numbers = #tpu.dot_dimension_numbers<[2], [1], [1], [2], [0, 0, 0, 1, 1, 2], [0], [0]>} : vector<8x4x4xf32>, vector<8x4x8xf32>, vector<8x4x8xf32> -> vector<8x4x8xf32>
    "tpu.trace_stop"() : () -> ()
    %595 = vector.shape_cast %594 : vector<8x4x8xf32> to vector<4x8x8xf32>
    "tpu.trace_start"() <{level = 10 : i32, message = "hrd,hdo->hro"}> : () -> ()
    %cst_249 = arith.constant dense<0.000000e+00> : vector<4x8x32xf32>
    %596 = tpu.matmul %595, %526, %cst_249 {dimension_numbers = #tpu.dot_dimension_numbers<[2], [1], [1], [2], [0, 0, 0, 1, 1, 2], [0], [0]>} : vector<4x8x8xf32>, vector<4x8x32xf32>, vector<4x8x32xf32> -> vector<4x8x32xf32>
    "tpu.trace_stop"() : () -> ()
    %597 = vector.extract_strided_slice %596 {offsets = [0, 0, 0], sizes = [1, 8, 32], strides = [1, 1, 1]} : vector<4x8x32xf32> to vector<1x8x32xf32>
    %598 = vector.shape_cast %597 : vector<1x8x32xf32> to vector<8x32xf32>
    %599 = vector.extract_strided_slice %596 {offsets = [1, 0, 0], sizes = [1, 8, 32], strides = [1, 1, 1]} : vector<4x8x32xf32> to vector<1x8x32xf32>
    %600 = vector.shape_cast %599 : vector<1x8x32xf32> to vector<8x32xf32>
    %601 = arith.addf %598, %600 : vector<8x32xf32>
    %602 = vector.extract_strided_slice %596 {offsets = [2, 0, 0], sizes = [1, 8, 32], strides = [1, 1, 1]} : vector<4x8x32xf32> to vector<1x8x32xf32>
    %603 = vector.shape_cast %602 : vector<1x8x32xf32> to vector<8x32xf32>
    %604 = arith.addf %601, %603 : vector<8x32xf32>
    %605 = vector.extract_strided_slice %596 {offsets = [3, 0, 0], sizes = [1, 8, 32], strides = [1, 1, 1]} : vector<4x8x32xf32> to vector<1x8x32xf32>
    %606 = vector.shape_cast %605 : vector<1x8x32xf32> to vector<8x32xf32>
    %607 = arith.addf %604, %606 : vector<8x32xf32>
    %608 = vector.broadcast %528 : vector<1x32xf32> to vector<8x32xf32>
    %609 = arith.addf %607, %608 : vector<8x32xf32>
    %610 = arith.addf %609, %545 : vector<8x32xf32>
    %cst_250 = arith.constant dense<0.000000e+00> : vector<8xf32>
    %611 = vector.multi_reduction <add>, %610, %cst_250 [1] : vector<8x32xf32> to vector<8xf32>
    %612 = vector.shape_cast %611 : vector<8xf32> to vector<8x1xf32>
    %cst_251 = arith.constant 3.200000e+01 : f32
    %613 = vector.broadcast %cst_251 : f32 to vector<8x1xf32>
    %614 = arith.divf %612, %613 : vector<8x1xf32>
    %615 = vector.broadcast %614 : vector<8x1xf32> to vector<8x32xf32>
    %616 = arith.subf %610, %615 : vector<8x32xf32>
    %617 = vector.broadcast %614 : vector<8x1xf32> to vector<8x32xf32>
    %618 = arith.subf %610, %617 : vector<8x32xf32>
    %619 = arith.mulf %616, %618 : vector<8x32xf32>
    %cst_252 = arith.constant dense<0.000000e+00> : vector<8xf32>
    %620 = vector.multi_reduction <add>, %619, %cst_252 [1] : vector<8x32xf32> to vector<8xf32>
    %621 = vector.shape_cast %620 : vector<8xf32> to vector<8x1xf32>
    %cst_253 = arith.constant 3.200000e+01 : f32
    %622 = vector.broadcast %cst_253 : f32 to vector<8x1xf32>
    %623 = arith.divf %621, %622 : vector<8x1xf32>
    %624 = vector.broadcast %614 : vector<8x1xf32> to vector<8x32xf32>
    %625 = arith.subf %610, %624 : vector<8x32xf32>
    %cst_254 = arith.constant 9.99999996E-13 : f32
    %626 = vector.broadcast %cst_254 : f32 to vector<8x1xf32>
    %627 = arith.addf %623, %626 : vector<8x1xf32>
    %628 = math.rsqrt %627 : vector<8x1xf32>
    %629 = vector.broadcast %628 : vector<8x1xf32> to vector<8x32xf32>
    %630 = arith.mulf %625, %629 : vector<8x32xf32>
    %631 = vector.broadcast %530 : vector<1x32xf32> to vector<8x32xf32>
    %632 = arith.mulf %630, %631 : vector<8x32xf32>
    %633 = vector.broadcast %532 : vector<1x32xf32> to vector<8x32xf32>
    %634 = arith.addf %632, %633 : vector<8x32xf32>
    %cst_255 = arith.constant dense<0.000000e+00> : vector<8x64xf32>
    %635 = tpu.matmul %634, %534, %cst_255 {dimension_numbers = #tpu.dot_dimension_numbers<[1], [0], [0], [1], [0, 0, 1, 1], [], []>} : vector<8x32xf32>, vector<32x64xf32>, vector<8x64xf32> -> vector<8x64xf32>
    %636 = vector.broadcast %536 : vector<1x64xf32> to vector<8x64xf32>
    %637 = arith.addf %635, %636 : vector<8x64xf32>
    %638 = arith.mulf %637, %637 : vector<8x64xf32>
    %639 = arith.mulf %637, %638 : vector<8x64xf32>
    %cst_256 = arith.constant 4.471500e-02 : f32
    %640 = vector.broadcast %cst_256 : f32 to vector<8x64xf32>
    %641 = arith.mulf %640, %639 : vector<8x64xf32>
    %642 = arith.addf %637, %641 : vector<8x64xf32>
    %cst_257 = arith.constant 0.797884583 : f32
    %643 = vector.broadcast %cst_257 : f32 to vector<8x64xf32>
    %644 = arith.mulf %643, %642 : vector<8x64xf32>
    %645 = math.tanh %644 : vector<8x64xf32>
    %cst_258 = arith.constant 1.000000e+00 : f32
    %646 = vector.broadcast %cst_258 : f32 to vector<8x64xf32>
    %647 = arith.addf %646, %645 : vector<8x64xf32>
    %cst_259 = arith.constant 5.000000e-01 : f32
    %648 = vector.broadcast %cst_259 : f32 to vector<8x64xf32>
    %649 = arith.mulf %648, %647 : vector<8x64xf32>
    %650 = arith.mulf %637, %649 : vector<8x64xf32>
    %cst_260 = arith.constant dense<0.000000e+00> : vector<8x32xf32>
    %651 = tpu.matmul %650, %538, %cst_260 {dimension_numbers = #tpu.dot_dimension_numbers<[1], [0], [0], [1], [0, 0, 1, 1], [], []>} : vector<8x64xf32>, vector<64x32xf32>, vector<8x32xf32> -> vector<8x32xf32>
    %652 = vector.broadcast %540 : vector<1x32xf32> to vector<8x32xf32>
    %653 = arith.addf %651, %652 : vector<8x32xf32>
    %654 = arith.addf %653, %634 : vector<8x32xf32>
    %cst_261 = arith.constant dense<0.000000e+00> : vector<8xf32>
    %655 = vector.multi_reduction <add>, %654, %cst_261 [1] : vector<8x32xf32> to vector<8xf32>
    %656 = vector.shape_cast %655 : vector<8xf32> to vector<8x1xf32>
    %cst_262 = arith.constant 3.200000e+01 : f32
    %657 = vector.broadcast %cst_262 : f32 to vector<8x1xf32>
    %658 = arith.divf %656, %657 : vector<8x1xf32>
    %659 = vector.broadcast %658 : vector<8x1xf32> to vector<8x32xf32>
    %660 = arith.subf %654, %659 : vector<8x32xf32>
    %661 = vector.broadcast %658 : vector<8x1xf32> to vector<8x32xf32>
    %662 = arith.subf %654, %661 : vector<8x32xf32>
    %663 = arith.mulf %660, %662 : vector<8x32xf32>
    %cst_263 = arith.constant dense<0.000000e+00> : vector<8xf32>
    %664 = vector.multi_reduction <add>, %663, %cst_263 [1] : vector<8x32xf32> to vector<8xf32>
    %665 = vector.shape_cast %664 : vector<8xf32> to vector<8x1xf32>
    %cst_264 = arith.constant 3.200000e+01 : f32
    %666 = vector.broadcast %cst_264 : f32 to vector<8x1xf32>
    %667 = arith.divf %665, %666 : vector<8x1xf32>
    %668 = vector.broadcast %658 : vector<8x1xf32> to vector<8x32xf32>
    %669 = arith.subf %654, %668 : vector<8x32xf32>
    %cst_265 = arith.constant 9.99999996E-13 : f32
    %670 = vector.broadcast %cst_265 : f32 to vector<8x1xf32>
    %671 = arith.addf %667, %670 : vector<8x1xf32>
    %672 = math.rsqrt %671 : vector<8x1xf32>
    %673 = vector.broadcast %672 : vector<8x1xf32> to vector<8x32xf32>
    %674 = arith.mulf %669, %673 : vector<8x32xf32>
    %675 = vector.broadcast %542 : vector<1x32xf32> to vector<8x32xf32>
    %676 = arith.mulf %674, %675 : vector<8x32xf32>
    %677 = vector.broadcast %544 : vector<1x32xf32> to vector<8x32xf32>
    %678 = arith.addf %676, %677 : vector<8x32xf32>
    %679 = vector.shape_cast %678 : vector<8x32xf32> to vector<2x4x32xf32>
    %680 = vector.extract_strided_slice %679 {offsets = [0, 0, 0], sizes = [2, 1, 32], strides = [1, 1, 1]} : vector<2x4x32xf32> to vector<2x1x32xf32>
    %681 = vector.extract_strided_slice %679 {offsets = [0, 1, 0], sizes = [2, 3, 32], strides = [1, 1, 1]} : vector<2x4x32xf32> to vector<2x3x32xf32>
    %682 = vector.shape_cast %681 : vector<2x3x32xf32> to vector<2x3x1x32xf32>
    %c0_266 = arith.constant 0 : index
    %c0_267 = arith.constant 0 : index
    %c0_268 = arith.constant 0 : index
    %c0_269 = arith.constant 0 : index
    %683 = vector.load %arg19[%c0_266, %c0_267, %c0_268, %c0_269] : memref<2x3x8x32xf32, #tpu.memory_space<vmem>>, vector<2x3x1x32xf32>
    tpu.vector_store %arg19[%c0_266, %c0_267, %c0_268, %c0_269], %682 {strides = array<i32>} : memref<2x3x8x32xf32, #tpu.memory_space<vmem>>, vector<2x3x1x32xf32>,
    %c0_270 = arith.constant 0 : index
    %c0_271 = arith.constant 0 : index
    %c0_272 = arith.constant 0 : index
    %684 = vector.load %arg18[%c0_270, %c0_271, %c0_272] : memref<2x1x32xf32, #tpu.memory_space<vmem>>, vector<2x1x32xf32>
    tpu.vector_store %arg18[%c0_270, %c0_271, %c0_272], %680 {strides = array<i32>} : memref<2x1x32xf32, #tpu.memory_space<vmem>>, vector<2x1x32xf32>,
    return
  }
  func.func @transform_0(%arg0: i32) -> (i32, i32, i32, i32) {
    %c0_i32 = arith.constant 0 : i32
    %c0_i32_0 = arith.constant 0 : i32
    %c0_i32_1 = arith.constant 0 : i32
    %c0_i32_2 = arith.constant 0 : i32
    return %arg0, %c0_i32, %c0_i32_0, %c0_i32_1 : i32, i32, i32, i32
  }
  func.func @transform_1(%arg0: i32) -> (i32, i32, i32) {
    %c0_i32 = arith.constant 0 : i32
    %c0_i32_0 = arith.constant 0 : i32
    %c0_i32_1 = arith.constant 0 : i32
    return %arg0, %c0_i32, %c0_i32_0 : i32, i32, i32
  }
  func.func @transform_2(%arg0: i32) -> (i32, i32, i32) {
    %c0_i32 = arith.constant 0 : i32
    %c0_i32_0 = arith.constant 0 : i32
    %c0_i32_1 = arith.constant 0 : i32
    return %arg0, %c0_i32, %c0_i32_0 : i32, i32, i32
  }
  func.func @transform_3(%arg0: i32) -> (i32, i32, i32) {
    %c0_i32 = arith.constant 0 : i32
    %c0_i32_0 = arith.constant 0 : i32
    %c0_i32_1 = arith.constant 0 : i32
    return %arg0, %c0_i32, %c0_i32_0 : i32, i32, i32
  }
  func.func @transform_4(%arg0: i32) -> (i32, i32) {
    %c0_i32 = arith.constant 0 : i32
    %c0_i32_0 = arith.constant 0 : i32
    %c0_i32_1 = arith.constant 0 : i32
    return %c0_i32, %c0_i32_0 : i32, i32
  }
  func.func @transform_5(%arg0: i32) -> (i32, i32, i32) {
    %c0_i32 = arith.constant 0 : i32
    %c0_i32_0 = arith.constant 0 : i32
    %c0_i32_1 = arith.constant 0 : i32
    %c0_i32_2 = arith.constant 0 : i32
    return %c0_i32, %c0_i32_0, %c0_i32_1 : i32, i32, i32
  }
  func.func @transform_6(%arg0: i32) -> (i32, i32, i32) {
    %c0_i32 = arith.constant 0 : i32
    %c0_i32_0 = arith.constant 0 : i32
    %c0_i32_1 = arith.constant 0 : i32
    %c0_i32_2 = arith.constant 0 : i32
    return %c0_i32, %c0_i32_0, %c0_i32_1 : i32, i32, i32
  }
  func.func @transform_7(%arg0: i32) -> (i32, i32, i32, i32) {
    %c0_i32 = arith.constant 0 : i32
    %c0_i32_0 = arith.constant 0 : i32
    %c0_i32_1 = arith.constant 0 : i32
    %c0_i32_2 = arith.constant 0 : i32
    %c0_i32_3 = arith.constant 0 : i32
    return %c0_i32, %c0_i32_0, %c0_i32_1, %c0_i32_2 : i32, i32, i32, i32
  }
  func.func @transform_8(%arg0: i32) -> (i32, i32, i32) {
    %c0_i32 = arith.constant 0 : i32
    %c0_i32_0 = arith.constant 0 : i32
    %c0_i32_1 = arith.constant 0 : i32
    %c0_i32_2 = arith.constant 0 : i32
    return %c0_i32, %c0_i32_0, %c0_i32_1 : i32, i32, i32
  }
  func.func @transform_9(%arg0: i32) -> (i32, i32, i32) {
    %c0_i32 = arith.constant 0 : i32
    %c0_i32_0 = arith.constant 0 : i32
    %c0_i32_1 = arith.constant 0 : i32
    %c0_i32_2 = arith.constant 0 : i32
    return %c0_i32, %c0_i32_0, %c0_i32_1 : i32, i32, i32
  }
  func.func @transform_10(%arg0: i32) -> (i32, i32, i32) {
    %c0_i32 = arith.constant 0 : i32
    %c0_i32_0 = arith.constant 0 : i32
    %c0_i32_1 = arith.constant 0 : i32
    %c0_i32_2 = arith.constant 0 : i32
    return %c0_i32, %c0_i32_0, %c0_i32_1 : i32, i32, i32
  }
  func.func @transform_11(%arg0: i32) -> (i32, i32, i32) {
    %c0_i32 = arith.constant 0 : i32
    %c0_i32_0 = arith.constant 0 : i32
    %c0_i32_1 = arith.constant 0 : i32
    %c0_i32_2 = arith.constant 0 : i32
    return %c0_i32, %c0_i32_0, %c0_i32_1 : i32, i32, i32
  }
  func.func @transform_12(%arg0: i32) -> (i32, i32, i32) {
    %c0_i32 = arith.constant 0 : i32
    %c0_i32_0 = arith.constant 0 : i32
    %c0_i32_1 = arith.constant 0 : i32
    %c0_i32_2 = arith.constant 0 : i32
    return %c0_i32, %c0_i32_0, %c0_i32_1 : i32, i32, i32
  }
  func.func @transform_13(%arg0: i32) -> (i32, i32, i32) {
    %c0_i32 = arith.constant 0 : i32
    %c0_i32_0 = arith.constant 0 : i32
    %c0_i32_1 = arith.constant 0 : i32
    %c0_i32_2 = arith.constant 0 : i32
    return %c0_i32, %c0_i32_0, %c0_i32_1 : i32, i32, i32
  }
  func.func @transform_14(%arg0: i32) -> (i32, i32, i32) {
    %c0_i32 = arith.constant 0 : i32
    %c0_i32_0 = arith.constant 0 : i32
    %c0_i32_1 = arith.constant 0 : i32
    %c0_i32_2 = arith.constant 0 : i32
    return %c0_i32, %c0_i32_0, %c0_i32_1 : i32, i32, i32
  }
  func.func @transform_15(%arg0: i32) -> (i32, i32, i32) {
    %c0_i32 = arith.constant 0 : i32
    %c0_i32_0 = arith.constant 0 : i32
    %c0_i32_1 = arith.constant 0 : i32
    %c0_i32_2 = arith.constant 0 : i32
    return %c0_i32, %c0_i32_0, %c0_i32_1 : i32, i32, i32
  }
  func.func @transform_16(%arg0: i32) -> (i32, i32, i32) {
    %c0_i32 = arith.constant 0 : i32
    %c0_i32_0 = arith.constant 0 : i32
    %c0_i32_1 = arith.constant 0 : i32
    %c0_i32_2 = arith.constant 0 : i32
    return %c0_i32, %c0_i32_0, %c0_i32_1 : i32, i32, i32
  }
  func.func @transform_17(%arg0: i32) -> (i32, i32, i32) {
    %c0_i32 = arith.constant 0 : i32
    %c0_i32_0 = arith.constant 0 : i32
    %c0_i32_1 = arith.constant 0 : i32
    return %arg0, %c0_i32, %c0_i32_0 : i32, i32, i32
  }
  func.func @transform_18(%arg0: i32) -> (i32, i32, i32, i32) {
    %c0_i32 = arith.constant 0 : i32
    %c0_i32_0 = arith.constant 0 : i32
    %c0_i32_1 = arith.constant 0 : i32
    %c0_i32_2 = arith.constant 0 : i32
    return %arg0, %c0_i32, %c0_i32_0, %c0_i32_1 : i32, i32, i32, i32
  }
}

</mosaic_0001>

<bundles_post_ra>
// kernel: tpu_custom_call.1
= control target key start
LH: loop header
LB: loop body
LE: loop exit
PB: predicated region body
PF: predicated region fallthrough
CT: control target
= control target key end

     0   :  { %s20081_s0 = inlined_call_operand.hbm [shape: f32[2,3,8,32], index: 0, kind: input, shape index: {}, may-alias: {0,18}]   ;;  %s20082_s1 = inlined_call_operand.vmem [shape: f32[2,3,8], index: 1, kind: input, shape index: {}]   ;;  %s20083_s2 = inlined_call_operand.vmem [shape: f32[2,3,8], index: 2, kind: input, shape index: {}]   ;;  %s20084_s3 = inlined_call_operand.hbm [shape: f32[2,1,4], index: 3, kind: input, shape index: {}]   ;;  %s20085_s4 = inlined_call_operand.vmem [shape: f32[1,32], index: 4, kind: input, shape index: {}]   ;;  %s20086_s5 = inlined_call_operand.vmem [shape: f32[4,32,96], index: 5, kind: input, shape index: {}]   ;;  %s20087_s6 = inlined_call_operand.vmem [shape: f32[4,1,96], index: 6, kind: input, shape index: {}]   ;;  %s20088_s7 = inlined_call_operand.vmem [shape: f32[4,4,8,32], index: 7, kind: input, shape index: {}]   ;;  %s20089_s8 = inlined_call_operand.vmem [shape: f32[4,1,32], index: 8, kind: input, shape index: {}]   ;;  %s20090_s9 = inlined_call_operand.vmem [shape: f32[4,1,32], index: 9, kind: input, shape index: {}]   ;;  %s20091_s10 = inlined_call_operand.vmem [shape: f32[4,1,32], index: 10, kind: input, shape index: {}]   ;;  %s20092_s11 = inlined_call_operand.vmem [shape: f32[4,32,64], index: 11, kind: input, shape index: {}]   ;;  %s20093_s12 = inlined_call_operand.vmem [shape: f32[4,1,64], index: 12, kind: input, shape index: {}]   ;;  %s20094_s13 = inlined_call_operand.vmem [shape: f32[4,64,32], index: 13, kind: input, shape index: {}]   ;;  %s20095_s14 = inlined_call_operand.vmem [shape: f32[4,1,32], index: 14, kind: input, shape index: {}]   ;;  %s20096_s15 = inlined_call_operand.vmem [shape: f32[4,1,32], index: 15, kind: input, shape index: {}]   ;;  %s20097_s16 = inlined_call_operand.vmem [shape: f32[4,1,32], index: 16, kind: input, shape index: {}]   ;;  %s20098_s17 = inlined_call_operand.hbm [shape: f32[2,1,32], index: 17, kind: output, shape index: {0}]   ;;  %s20099_s18 = inlined_call_operand.hbm [shape: f32[2,3,8,32], index: 18, kind: output, shape index: {1}, may-alias: {0,18}]  }
   0x1   :  { %20104 = sst [smem:[#allocation14_spill]] %s20081_s0 }
   0x2   :  { %20105 = sst [smem:[#allocation15_spill]] %s20082_s1 }
   0x3   :  { %20106 = sst [smem:[#allocation16_spill]] %s20083_s2 }
   0x4   :  { %20107 = sst [smem:[#allocation17_spill]] %s20099_s18 }
   0x5   :  { %24 = vsyncpa [#allocation3], 0 }
   0x6   :  { %25 = vsyncpa [#allocation6], 0 }
   0x7   :  { %26 = vsyncpa [#allocation4], 0 }
   0x8   :  { %27 = vsyncpa [#allocation9], 0  ;;  %s17225_s27 = smov [#allocation2]   ;;  %s20108_s0 = sld [smem:[#allocation14_spill]] }
   0x9   :  { %s33_s28 = sshll.u32 %s17225_s27, 4  ;;  %s34_s28 = int_to_ptr.vmem [resolvable:$true] %s33_s28 }
   0xe   :  { %s17129_s19 = scalar_lea.hbm %s20108_s0, 768 }
   0xf   :  { %p17130_p0 = scmp.ne.s32.totalorder %s20108_s0, %s17129_s19  ;;  %p17133_p1 = scmp.lt.u32.totalorder %s17129_s19, %s20108_s0 }
  0x11   :  { %p17135_p2 = pnand %p17133_p1, %p17130_p0 }
  0x13   :  { %17138 = shalt.err (!%p17135_p2)
}
  0x14   :  { %s17139_s2 = scalar_lea.vmem %s34_s28, 768  ;;  %p17144_p4 = scmp.lt.s32.totalorder %s34_s28, %s34_s28 }
  0x15   :  { %p17140_p3 = scmp.ne.s32.totalorder %s34_s28, %s17139_s2  ;;  %p17145_p5 = scmp.lt.s32.totalorder %s17139_s2, %s17139_s2 }
  0x17   :  { %p17146_p6 = por %p17145_p5, %p17144_p4 }
  0x19   :  { %p17147_p7 = pnand %p17146_p6, %p17140_p3 }
  0x1b   :  { %17150 = shalt.err (!%p17147_p7)
}
  0x1c   :  { %s17226_s23 = smov 128   ;;  %s17227_s24 = smov 8  }
  0x1d   :  { %39 = dma.hbm_to_vmem [thread:$0]  %s20108_s0, 768, %s34_s28, [#allocation3], %s17226_s23, %s17226_s23, %s17227_s24  }
  0x1e   :  { %s17228_s27 = smov [#allocation5]   ;;  %s17151_s1 = scalar_lea.hbm %s20084_s3, 32 }
  0x1f   :  { %s49_s29 = sshll.u32 %s17228_s27, 4  ;;  %p17152_p8 = scmp.ne.s32.totalorder %s20084_s3, %s17151_s1  ;;  %s50_s29 = int_to_ptr.vmem [resolvable:$true] %s49_s29 }
  0x20   :  { %p17155_p9 = scmp.lt.u32.totalorder %s17151_s1, %s20084_s3 }
  0x22   :  { %p17157_p10 = pnand %p17155_p9, %p17152_p8 }
  0x24   :  { %17160 = shalt.err (!%p17157_p10)
}
  0x25   :  { %s17161_s18 = scalar_lea.vmem %s50_s29, 32  ;;  %p17166_p12 = scmp.lt.s32.totalorder %s50_s29, %s50_s29 }
  0x26   :  { %p17162_p11 = scmp.ne.s32.totalorder %s50_s29, %s17161_s18  ;;  %p17167_p13 = scmp.lt.s32.totalorder %s17161_s18, %s17161_s18 }
  0x28   :  { %p17168_p0 = por %p17167_p13, %p17166_p12 }
  0x2a   :  { %p17169_p1 = pnand %p17168_p0, %p17162_p11 }
  0x2c   :  { %17172 = shalt.err (!%p17169_p1)
}
  0x2d   :  { %s17229_s28 = smov 16   ;;  %s17230_s0 = smov 1  }
  0x2e   :  { %55 = dma.hbm_to_vmem [thread:$0]  %s20084_s3, 32, %s50_s29, [#allocation6], %s17229_s28, %s17229_s28, %s17230_s0  }
  0x2f   :  { %17217 = dma.done.wait [#allocation3], 768  }
  0x30   :  { %17218 = vsyncadd [#allocation3], 4294966528 }
  0x31   :  { %17219 = dma.done.wait [#allocation6], 32  }
  0x32   :  { %17220 = vsyncadd [#allocation6], 4294967264  ;;  %vm231_vm0 = vcmask 261120   ;;  %v197_v0 = vld [vmem:[%s20086_s5] sm:$0xff]  ;;  %v198_v1 = vld [vmem:[%s20086_s5 + $0x8] sm:$0xff]  ;;  %s17231_s2 = smov 120  }
  0x33   :  { %v199_v2 = vld [vmem:[%s20086_s5 + $0x10] sm:$0xff]  ;;  %v16610_v3 = vpack.c.bf16 %v198_v1, %v197_v0  ;;  %v200_v4 = vld [vmem:[%s20086_s5 + $0x18] sm:$0xff]  ;;  %v191_v5 = vld [vmem:[#allocation2] sm:$0xff]  ;;  %s17232_s25 = smov 112   ;;  %v17233_v25 = vmov 0.0   ;;  %s17234_s26 = smov 104  }
  0x34   :  { %v16614_v6 = vpack.c.bf16 %v200_v4, %v199_v2  ;;  %15650 = vmatprep.mubr.msk.f32.mxu0 %vm231_vm0, %v191_v5  ;;  %v192_v7 = vld [vmem:[#allocation2 + $0x8] sm:$0xff]  ;;  %v193_v8 = vld [vmem:[#allocation2 + $0x10] sm:$0xff]  ;;  %v194_v9 = vld [vmem:[#allocation2 + $0x18] sm:$0xff]  ;;  %15664 = vmatprep.subr.mxu1 %v17233_v25  ;;  %vm17235_vm1 = vmmov 0   ;;  %s17236_s27 = smov 96   ;;  %vm389_vm2 = vcmask 64512  }
  0x35   :  { %16611 = vmatprep.subr.bf16.mxu0 %v16610_v3  ;;  %v195_v10 = vld [vmem:[#allocation2 + $0x20] sm:$0xff]  ;;  %v196_v11 = vld [vmem:[#allocation2 + $0x28] sm:$0xff]  ;;  %15666 = vmatprep.mubr.msk.f32.mxu1 %vm17235_vm1, %v17233_v25  ;;  %s17237_s30 = smov 64   ;;  %s20109_s1 = sld [smem:[#allocation15_spill]]  ;;  %vm5148_vm3 = vcmask 523264   ;;  %vm5383_vm4 = vcmask 1042434  }
  0x36   :  { %16613 = vmatpush3.bf16.msra.mxu0 %v16610_v3  ;;  %v14784_v12 = vld [vmem:[%s20087_s6] ss:$0 sm:$0xff]  ;;  %vm5386_vm5 = vcmask 1043459   ;;  %vm5394_vm6 = vcmask 1040384   ;;  %vm6168_vm7 = vcmask 27648   ;;  %vm6263_vm8 = vcmask 1043456  }
  0x37   :  { %16615 = vmatprep.subr.bf16.mxu0 %v16614_v6  ;;  %vm6259_vm9 = vcmask 31744   ;;  %vm7466_vm10 = vcmask 253952  }
  0x3a   :  { %16617 = vmatpush3.bf16.msra.mxu0 %v16614_v6  ;;  %v17238_v6 = vmov 1966171168  }
  0x3b   :  { %15659 = vmatprep.subr.mxu0 %v17233_v25 }
  0x3d   :  { %15651 = vmatmul.mubr.msk.f32.vlgmr.msra.gmra.mrb[0].mxu0 %vm231_vm0, %v192_v7  ;;  %v101_v7 = vunpack.c.l.s4 %v17238_v6 }
  0x3e   :  { %15653 = vmatprep.mubr.msk.f32.mxu0 %vm231_vm0, %v193_v8  ;;  %v103_v8 = vlaneseq }
  0x41   :  { %15654 = vmatmul.mubr.msk.f32.gmra.mrb[2].mxu0 %vm231_vm0, %v194_v9  ;;  %v102_v9 = vunpack.c.0.s8 %v101_v7 }
  0x42   :  { %15656 = vmatprep.mubr.msk.f32.mxu0 %vm231_vm0, %v195_v10  ;;  %v104_v10 = vshrl.u32 %v103_v8, 7 }
  0x45   :  { %15657 = vmatmul.mubr.msk.f32.gmra.mrb[4].mxu0 %vm231_vm0, %v196_v11  ;;  %v14780_v11 = vld.sshfl [vmem:[%s20109_s1] sm:$0x13 pattern:$0x75316420] }
  0x46   :  { %15661 = vmatprep.mubr.msk.f32.mxu0 %vm17235_vm1, %v17233_v25 }
 0x110   :  { %v15652_v13 = vpop.f32.mrb[0].mxu0 }
 0x111   :  { %v316_v14 = vpop.f32.mrb[1].mxu0  ;;  %v17392_v18 = vadd.f32 %v15652_v13, %v14784_v12  ;;  %v17715_v13 = vsub.s32 %v102_v9, %v104_v10 }
 0x112   :  { %v17388_v15 = vadd.f32 %v14784_v12, %v316_v14 }
 0x114   :  { %v15655_v16 = vpop.f32.mrb[2].mxu0  ;;  %351 = vrot.lane.b32.xlu0 %v17388_v15, %s17231_s2 }
 0x115   :  { %v326_v17 = vpop.f32.mrb[3].mxu0  ;;  %v17400_v22 = vadd.f32 %v15655_v16, %v14784_v12  ;;  %v106_v16 = vrot.slane %v14780_v11, %v17715_v13 }
 0x116   :  { %v17394_v19 = vadd.f32 %v14784_v12, %v326_v17  ;;  %v14781_v17 = vld.sshfl [vmem:[%s20109_s1 + $0x4] sm:$0x13 pattern:$0x75316420]  ;;  %s20110_s1 = sld [smem:[#allocation16_spill]] }
 0x118   :  { %v15658_v20 = vpop.f32.mrb[4].mxu0  ;;  %355 = vrot.lane.b32.xlu1 %v17394_v19, %s17231_s2  ;;  %353 = vrot.lane.b32.xlu0 %v17392_v18, %s17231_s2 }
 0x119   :  { %v336_v21 = vpop.f32.mrb[5].mxu0  ;;  %v17408_v24 = vadd.f32 %v15658_v20, %v14784_v12 }
 0x11a   :  { %v17402_v23 = vadd.f32 %v14784_v12, %v336_v21  ;;  %v99_v12 = vcombine.high %v14780_v11, %v14780_v11  ;;  %v114_v21 = vcombine.high %v106_v16, %v106_v16 }
 0x11c   :  { %357 = vrot.lane.b32.xlu1 %v17400_v22, %s17231_s2  ;;  %359 = vrot.lane.b32.xlu0 %v17402_v23, %s17231_s2  ;;  %v113_v14 = vrot.slane %v99_v12, %v17715_v13 }
 0x120   :  { %361 = vrot.lane.b32.xlu1 %v17408_v24, %s17231_s2  ;;  %363 = vrot.lane.b32.xlu0 %v17388_v15, %s17232_s25 }
 0x124   :  { %365 = vrot.lane.b32.xlu1 %v17392_v18, %s17232_s25  ;;  %367 = vrot.lane.b32.xlu0 %v17394_v19, %s17232_s25 }
 0x128   :  { %369 = vrot.lane.b32.xlu1 %v17400_v22, %s17232_s25  ;;  %371 = vrot.lane.b32.xlu0 %v17402_v23, %s17232_s25 }
 0x12c   :  { %373 = vrot.lane.b32.xlu1 %v17408_v24, %s17232_s25  ;;  %375 = vrot.lane.b32.xlu0 %v17388_v15, %s17234_s26 }
 0x130   :  { %377 = vrot.lane.b32.xlu1 %v17392_v18, %s17234_s26  ;;  %379 = vrot.lane.b32.xlu0 %v17394_v19, %s17234_s26 }
 0x134   :  { %381 = vrot.lane.b32.xlu1 %v17400_v22, %s17234_s26  ;;  %383 = vrot.lane.b32.xlu0 %v17402_v23, %s17234_s26 }
 0x138   :  { %385 = vrot.lane.b32.xlu1 %v17408_v24, %s17234_s26  ;;  %464 = vrot.lane.b32.xlu0 %v17392_v18, %s17236_s27 }
 0x13c   :  { %387 = vrot.lane.b32.xlu1 %v17388_v15, %s17236_s27  ;;  %540 = vrot.lane.b32.xlu0 %v17394_v19, %s17236_s27 }
 0x140   :  { %616 = vrot.lane.b32.xlu1 %v17400_v22, %s17236_s27  ;;  %692 = vrot.lane.b32.xlu0 %v17402_v23, %s17236_s27 }
 0x144   :  { %768 = vrot.lane.b32.xlu1 %v17408_v24, %s17236_s27 }
 0x186   :  { %v17454_v26 = vpop.permute.xlu0 %351 }
 0x187   :  { %844 = vrot.lane.b32.xlu0 %v17454_v26, %s17236_s27 }
 0x18a   :  { %v17458_v27 = vpop.permute.xlu1 %355  ;;  %v17460_v28 = vpop.permute.xlu0 %353 }
 0x18b   :  { %996 = vrot.lane.b32.xlu0 %v17458_v27, %s17236_s27  ;;  %920 = vrot.lane.b32.xlu1 %v17460_v28, %s17236_s27 }
 0x18e   :  { %v17466_v29 = vpop.permute.xlu1 %357  ;;  %v17468_v30 = vpop.permute.xlu0 %359 }
 0x18f   :  { %1072 = vrot.lane.b32.xlu1 %v17466_v29, %s17236_s27  ;;  %1148 = vrot.lane.b32.xlu0 %v17468_v30, %s17236_s27 }
 0x192   :  { %v17474_v31 = vpop.permute.xlu1 %361  ;;  %v17476_v32 = vpop.permute.xlu0 %363 }
 0x193   :  { %1224 = vrot.lane.b32.xlu1 %v17474_v31, %s17236_s27  ;;  %1300 = vrot.lane.b32.xlu0 %v17476_v32, %s17236_s27 }
 0x196   :  { %v17482_v33 = vpop.permute.xlu1 %365  ;;  %v17484_v34 = vpop.permute.xlu0 %367 }
 0x197   :  { %1376 = vrot.lane.b32.xlu1 %v17482_v33, %s17236_s27  ;;  %1452 = vrot.lane.b32.xlu0 %v17484_v34, %s17236_s27 }
 0x19a   :  { %v17490_v35 = vpop.permute.xlu1 %369  ;;  %v17492_v36 = vpop.permute.xlu0 %371 }
 0x19b   :  { %1528 = vrot.lane.b32.xlu1 %v17490_v35, %s17236_s27  ;;  %1604 = vrot.lane.b32.xlu0 %v17492_v36, %s17236_s27 }
 0x19e   :  { %v17498_v37 = vpop.permute.xlu1 %373  ;;  %v17500_v38 = vpop.permute.xlu0 %375 }
 0x19f   :  { %1680 = vrot.lane.b32.xlu1 %v17498_v37, %s17236_s27  ;;  %1756 = vrot.lane.b32.xlu0 %v17500_v38, %s17236_s27 }
 0x1a2   :  { %v17506_v39 = vpop.permute.xlu1 %377  ;;  %v17508_v40 = vpop.permute.xlu0 %379 }
 0x1a3   :  { %1832 = vrot.lane.b32.xlu1 %v17506_v39, %s17236_s27  ;;  %1908 = vrot.lane.b32.xlu0 %v17508_v40, %s17236_s27 }
 0x1a6   :  { %v17514_v41 = vpop.permute.xlu1 %381  ;;  %v17516_v42 = vpop.permute.xlu0 %383 }
 0x1a7   :  { %1984 = vrot.lane.b32.xlu1 %v17514_v41, %s17236_s27  ;;  %2060 = vrot.lane.b32.xlu0 %v17516_v42, %s17236_s27 }
 0x1aa   :  { %v17522_v43 = vpop.permute.xlu1 %385  ;;  %v465_v44 = vpop.permute.xlu0 %464 }
 0x1ab   :  { %2136 = vrot.lane.b32.xlu1 %v17522_v43, %s17236_s27  ;;  %2630 = vrot.lane.b32.xlu0 %v17392_v18, %s17237_s30 }
 0x1ac   :  { %15665 = vmatpush3.xpose.msk.msra.mxu1 %vm389_vm2, %v465_v44 }
 0x1ad   :  { %15669 = vmatprep.subr.mxu1 %v17233_v25 }
 0x1ae   :  { %v388_v45 = vpop.permute.xlu1 %387  ;;  %v541_v46 = vpop.permute.xlu0 %540 }
 0x1af   :  { %15667 = vmatmul.mubr.msk.f32.vlgmr.msra.gmra.mrb[0].mxu1 %vm389_vm2, %v17392_v18  ;;  %15660 = vmatpush3.xpose.msk.msra.mxu0 %vm389_vm2, %v388_v45 }
 0x1b0   :  { %2554 = vrot.lane.b32.xlu1 %v17388_v15, %s17237_s30  ;;  %2782 = vrot.lane.b32.xlu0 %v17400_v22, %s17237_s30 }
 0x1b1   :  { %15670 = vmatpush3.xpose.msk.msra.mxu1 %vm389_vm2, %v541_v46  ;;  %15671 = vmatprep.mubr.msk.f32.mxu1 %vm17235_vm1, %v17233_v25 }
 0x1b2   :  { %15662 = vmatmul.mubr.msk.f32.vlgmr.msra.gmra.mrb[6].mxu0 %vm389_vm2, %v17388_v15  ;;  %15679 = vmatprep.subr.mxu0 %v17233_v25  ;;  %v617_v47 = vpop.permute.xlu1 %616  ;;  %v693_v48 = vpop.permute.xlu0 %692  ;;  %v17718_v15 = vsub.s32 0, %v104_v10 }
 0x1b3   :  { %15674 = vmatprep.subr.mxu1 %v17233_v25  ;;  %15680 = vmatpush3.xpose.msk.msra.mxu0 %vm389_vm2, %v693_v48 }
 0x1b4   :  { %15672 = vmatmul.mubr.msk.f32.vlgmr.msra.gmra.mrb[2].mxu1 %vm389_vm2, %v17394_v19  ;;  %2706 = vrot.lane.b32.xlu1 %v17394_v19, %s17237_s30  ;;  %v17725_v18 = vrot.slane %v113_v14, %v17718_v15  ;;  %v122_v19 = vcombine.high %v14781_v17, %v14781_v17 }
 0x1b5   :  { %2934 = vrot.lane.b32.xlu0 %v17408_v24, %s17237_s30  ;;  %15675 = vmatpush3.xpose.msk.msra.mxu1 %vm389_vm2, %v617_v47 }
 0x1b6   :  { %15676 = vmatprep.mubr.msk.f32.mxu1 %vm17235_vm1, %v17233_v25  ;;  %15681 = vmatprep.mubr.msk.f32.mxu0 %vm17235_vm1, %v17233_v25  ;;  %v769_v49 = vpop.permute.xlu1 %768 }
 0x1b7   :  { %15682 = vmatmul.mubr.msk.f32.vlgmr.msra.gmra.mrb[8].mxu0 %vm389_vm2, %v17402_v23  ;;  %15684 = vmatprep.subr.mxu1 %v17233_v25 }
 0x1b8   :  { %15677 = vmatmul.mubr.msk.f32.vlgmr.msra.gmra.mrb[4].mxu1 %vm389_vm2, %v17400_v22  ;;  %2858 = vrot.lane.b32.xlu1 %v17402_v23, %s17237_s30 }
 0x1b9   :  { %3086 = vrot.lane.b32.xlu0 %v17460_v28, %s17237_s30  ;;  %15685 = vmatpush3.xpose.msk.msra.mxu1 %vm389_vm2, %v769_v49 }
 0x1ba   :  { %15686 = vmatprep.mubr.msk.f32.mxu1 %vm17235_vm1, %v17233_v25  ;;  %15689 = vmatprep.subr.mxu0 %v17233_v25 }
 0x1bb   :  { %15691 = vmatprep.mubr.msk.f32.mxu0 %vm17235_vm1, %v17233_v25  ;;  %15694 = vmatprep.subr.mxu1 %v17233_v25 }
 0x1bc   :  { %15687 = vmatmul.mubr.msk.f32.vlgmr.msra.gmra.mrb[6].mxu1 %vm389_vm2, %v17408_v24  ;;  %3010 = vrot.lane.b32.xlu1 %v17454_v26, %s17237_s30  ;;  %v17728_v24 = vrot.slane %v106_v16, %v17718_v15 }
 0x1bd   :  { %3238 = vrot.lane.b32.xlu0 %v17466_v29, %s17237_s30  ;;  %15696 = vmatprep.mubr.msk.f32.mxu1 %vm17235_vm1, %v17233_v25 }
 0x1c0   :  { %3162 = vrot.lane.b32.xlu1 %v17458_v27, %s17237_s30 }
 0x1c1   :  { %3390 = vrot.lane.b32.xlu0 %v17474_v31, %s17237_s30 }
 0x1c4   :  { %3466 = vrot.lane.b32.xlu1 %v17476_v32, %s17237_s30 }
 0x1c5   :  { %3618 = vrot.lane.b32.xlu0 %v17484_v34, %s17237_s30 }
 0x1c8   :  { %3542 = vrot.lane.b32.xlu1 %v17482_v33, %s17237_s30 }
 0x1c9   :  { %3922 = vrot.lane.b32.xlu0 %v17500_v38, %s17237_s30 }
 0x1cc   :  { %3694 = vrot.lane.b32.xlu1 %v17490_v35, %s17237_s30 }
 0x1cd   :  { %3770 = vrot.lane.b32.xlu0 %v17492_v36, %s17237_s30 }
 0x1d0   :  { %3846 = vrot.lane.b32.xlu1 %v17498_v37, %s17237_s30 }
 0x1d4   :  { %3998 = vrot.lane.b32.xlu1 %v17506_v39, %s17237_s30 }
 0x1d8   :  { %3314 = vrot.lane.b32.xlu1 %v17468_v30, %s17237_s30 }
 0x1f9   :  { %v845_v50 = vpop.permute.xlu0 %844 }
 0x1fa   :  { %15690 = vmatpush3.xpose.msk.msra.mxu0 %vm389_vm2, %v845_v50 }
 0x1fb   :  { %15699 = vmatprep.subr.mxu0 %v17233_v25 }
 0x1fd   :  { %v921_v51 = vpop.permute.xlu1 %920  ;;  %15692 = vmatmul.mubr.msk.f32.vlgmr.msra.gmra.mrb[10].mxu0 %vm389_vm2, %v17454_v26  ;;  %v997_v52 = vpop.permute.xlu0 %996 }
 0x1fe   :  { %15695 = vmatpush3.xpose.msk.msra.mxu1 %vm389_vm2, %v921_v51  ;;  %15700 = vmatpush3.xpose.msk.msra.mxu0 %vm389_vm2, %v997_v52 }
 0x1ff   :  { %15701 = vmatprep.mubr.msk.f32.mxu0 %vm17235_vm1, %v17233_v25  ;;  %15704 = vmatprep.subr.mxu1 %v17233_v25 }
 0x200   :  { %15709 = vmatprep.subr.mxu0 %v17233_v25 }
 0x201   :  { %v1073_v53 = vpop.permute.xlu1 %1072  ;;  %15697 = vmatmul.mubr.msk.f32.vlgmr.msra.gmra.mrb[8].mxu1 %vm389_vm2, %v17460_v28  ;;  %15702 = vmatmul.mubr.msk.f32.vlgmr.msra.gmra.mrb[12].mxu0 %vm389_vm2, %v17458_v27  ;;  %v1149_v54 = vpop.permute.xlu0 %1148  ;;  %v136_v28 = vrot.slane %v122_v19, %v17715_v13 }
 0x202   :  { %15705 = vmatpush3.xpose.msk.msra.mxu1 %vm389_vm2, %v1073_v53  ;;  %15710 = vmatpush3.xpose.msk.msra.mxu0 %vm389_vm2, %v1149_v54 }
 0x203   :  { %15706 = vmatprep.mubr.msk.f32.mxu1 %vm17235_vm1, %v17233_v25  ;;  %15711 = vmatprep.mubr.msk.f32.mxu0 %vm17235_vm1, %v17233_v25 }
 0x204   :  { %15714 = vmatprep.subr.mxu1 %v17233_v25  ;;  %15719 = vmatprep.subr.mxu0 %v17233_v25 }
 0x205   :  { %v1225_v55 = vpop.permute.xlu1 %1224  ;;  %15707 = vmatmul.mubr.msk.f32.vlgmr.msra.gmra.mrb[10].mxu1 %vm389_vm2, %v17466_v29  ;;  %15712 = vmatmul.mubr.msk.f32.vlgmr.msra.gmra.mrb[14].mxu0 %vm389_vm2, %v17468_v30  ;;  %v1301_v56 = vpop.permute.xlu0 %1300 }
 0x206   :  { %15715 = vmatpush3.xpose.msk.msra.mxu1 %vm389_vm2, %v1225_v55  ;;  %15720 = vmatpush3.xpose.msk.msra.mxu0 %vm389_vm2, %v1301_v56 }
 0x207   :  { %15716 = vmatprep.mubr.msk.f32.mxu1 %vm17235_vm1, %v17233_v25  ;;  %15721 = vmatprep.mubr.msk.f32.mxu0 %vm17235_vm1, %v17233_v25 }
 0x208   :  { %15724 = vmatprep.subr.mxu1 %v17233_v25  ;;  %15729 = vmatprep.subr.mxu0 %v17233_v25 }
 0x209   :  { %v1377_v57 = vpop.permute.xlu1 %1376  ;;  %15717 = vmatmul.mubr.msk.f32.vlgmr.msra.gmra.mrb[12].mxu1 %vm389_vm2, %v17474_v31  ;;  %15722 = vmatmul.mubr.msk.f32.vlgmr.msra.gmra.mrb[16].mxu0 %vm389_vm2, %v17476_v32  ;;  %v1453_v58 = vpop.permute.xlu0 %1452  ;;  %v17735_v31 = vrot.slane %v114_v21, %v17718_v15  ;;  %v129_v32 = vrot.slane %v14781_v17, %v17715_v13 }
 0x20a   :  { %15725 = vmatpush3.xpose.msk.msra.mxu1 %vm389_vm2, %v1377_v57  ;;  %15730 = vmatpush3.xpose.msk.msra.mxu0 %vm389_vm2, %v1453_v58 }
 0x20b   :  { %15726 = vmatprep.mubr.msk.f32.mxu1 %vm17235_vm1, %v17233_v25  ;;  %15731 = vmatprep.mubr.msk.f32.mxu0 %vm17235_vm1, %v17233_v25  ;;  %v17752_v46 = vrot.slane %v129_v32, %v17718_v15  ;;  %v137_v47 = vcombine.high %v129_v32, %v129_v32 }
 0x20c   :  { %15734 = vmatprep.subr.mxu1 %v17233_v25  ;;  %15739 = vmatprep.subr.mxu0 %v17233_v25 }
 0x20d   :  { %v1529_v59 = vpop.permute.xlu1 %1528  ;;  %15727 = vmatmul.mubr.msk.f32.vlgmr.msra.gmra.mrb[14].mxu1 %vm389_vm2, %v17482_v33  ;;  %15732 = vmatmul.mubr.msk.f32.vlgmr.msra.gmra.mrb[18].mxu0 %vm389_vm2, %v17484_v34  ;;  %v1605_v60 = vpop.permute.xlu0 %1604  ;;  %v17763_v56 = vrot.slane %v137_v47, %v17718_v15 }
 0x20e   :  { %15735 = vmatpush3.xpose.msk.msra.mxu1 %vm389_vm2, %v1529_v59  ;;  %15740 = vmatpush3.xpose.msk.msra.mxu0 %vm389_vm2, %v1605_v60 }
 0x20f   :  { %15736 = vmatprep.mubr.msk.f32.mxu1 %vm17235_vm1, %v17233_v25  ;;  %15741 = vmatprep.mubr.msk.f32.mxu0 %vm17235_vm1, %v17233_v25 }
 0x210   :  { %15744 = vmatprep.subr.mxu1 %v17233_v25  ;;  %15749 = vmatprep.subr.mxu0 %v17233_v25 }
 0x211   :  { %v1681_v61 = vpop.permute.xlu1 %1680  ;;  %15737 = vmatmul.mubr.msk.f32.vlgmr.msra.gmra.mrb[16].mxu1 %vm389_vm2, %v17490_v35  ;;  %15742 = vmatmul.mubr.msk.f32.vlgmr.msra.gmra.mrb[20].mxu0 %vm389_vm2, %v17492_v36  ;;  %v1757_v62 = vpop.permute.xlu0 %1756 }
 0x212   :  { %15745 = vmatpush3.xpose.msk.msra.mxu1 %vm389_vm2, %v1681_v61  ;;  %15750 = vmatpush3.xpose.msk.msra.mxu0 %vm389_vm2, %v1757_v62 }
 0x213   :  { %15746 = vmatprep.mubr.msk.f32.mxu1 %vm17235_vm1, %v17233_v25  ;;  %15751 = vmatprep.mubr.msk.f32.mxu0 %vm17235_vm1, %v17233_v25 }
 0x214   :  { %15754 = vmatprep.subr.mxu1 %v17233_v25  ;;  %15759 = vmatprep.subr.mxu0 %v17233_v25 }
 0x215   :  { %v1833_v63 = vpop.permute.xlu1 %1832  ;;  %15747 = vmatmul.mubr.msk.f32.vlgmr.msra.gmra.mrb[18].mxu1 %vm389_vm2, %v17498_v37  ;;  %15752 = vmatmul.mubr.msk.f32.vlgmr.msra.gmra.mrb[22].mxu0 %vm389_vm2, %v17500_v38  ;;  %v1909_v0 = vpop.permute.xlu0 %1908  ;;  %v17744_v38 = vrot.slane %v136_v28, %v17718_v15 }
 0x216   :  { %15755 = vmatpush3.xpose.msk.msra.mxu1 %vm389_vm2, %v1833_v63  ;;  %15760 = vmatpush3.xpose.msk.msra.mxu0 %vm389_vm2, %v1909_v0 }
 0x217   :  { %15756 = vmatprep.mubr.msk.f32.mxu1 %vm17235_vm1, %v17233_v25  ;;  %15761 = vmatprep.mubr.msk.f32.mxu0 %vm17235_vm1, %v17233_v25 }
 0x218   :  { %15764 = vmatprep.subr.mxu1 %v17233_v25  ;;  %15769 = vmatprep.subr.mxu0 %v17233_v25 }
 0x219   :  { %v1985_v1 = vpop.permute.xlu1 %1984  ;;  %15757 = vmatmul.mubr.msk.f32.vlgmr.msra.gmra.mrb[20].mxu1 %vm389_vm2, %v17506_v39  ;;  %15762 = vmatmul.mubr.msk.f32.vlgmr.msra.gmra.mrb[24].mxu0 %vm389_vm2, %v17508_v40  ;;  %v2061_v2 = vpop.permute.xlu0 %2060 }
 0x21a   :  { %15765 = vmatpush3.xpose.msk.msra.mxu1 %vm389_vm2, %v1985_v1  ;;  %15770 = vmatpush3.xpose.msk.msra.mxu0 %vm389_vm2, %v2061_v2 }
 0x21b   :  { %15766 = vmatprep.mubr.msk.f32.mxu1 %vm17235_vm1, %v17233_v25  ;;  %15771 = vmatprep.mubr.msk.f32.mxu0 %vm17235_vm1, %v17233_v25 }
 0x21c   :  { %15774 = vmatprep.subr.mxu1 %v17233_v25  ;;  %15779 = vmatprep.subr.mxu0 %v17233_v25 }
 0x21d   :  { %v2137_v3 = vpop.permute.xlu1 %2136  ;;  %15767 = vmatmul.mubr.msk.f32.vlgmr.msra.gmra.mrb[22].mxu1 %vm389_vm2, %v17514_v41  ;;  %15772 = vmatmul.mubr.msk.f32.vlgmr.msra.gmra.mrb[26].mxu0 %vm389_vm2, %v17516_v42  ;;  %v2631_v4 = vpop.permute.xlu0 %2630 }
 0x21e   :  { %15775 = vmatpush3.xpose.msk.msra.mxu1 %vm389_vm2, %v2137_v3  ;;  %15776 = vmatprep.mubr.msk.f32.mxu1 %vm17235_vm1, %v17233_v25 }
 0x21f   :  { %15784 = vmatprep.subr.mxu1 %v17233_v25  ;;  %15781 = vmatprep.mubr.msk.f32.mxu0 %vm17235_vm1, %v17233_v25 }
 0x221   :  { %15777 = vmatmul.mubr.msk.f32.vlgmr.msra.gmra.mrb[24].mxu1 %vm389_vm2, %v17522_v43 }
 0x222   :  { %v2555_v5 = vpop.permute.xlu1 %2554  ;;  %15785 = vmatpush3.msra.mxu1 %v2631_v4  ;;  %15786 = vmatprep.mubr.msk.f32.mxu1 %vm17235_vm1, %v17233_v25 }
 0x223   :  { %15780 = vmatpush3.msra.mxu0 %v2555_v5  ;;  %15794 = vmatprep.subr.mxu1 %v17233_v25 }
 0x224   :  { %15789 = vmatprep.subr.mxu0 %v17233_v25 }
 0x226   :  { %v17779_v11 = vpop.permute.xlu1 %2706 }
 0x22a   :  { %v17801_v47 = vpop.permute.xlu1 %2858 }
 0x282   :  { %v536_v20 = vpop.f32.mrb[0].mxu1 }
 0x283   :  { %v2213_v22 = vmul.f32 0.35355338, %v536_v20  ;;  %v15668_v23 = vpop.f32.mrb[1].mxu1 }
 0x285   :  { %v460_v26 = vpop.f32.mrb[6].mxu0  ;;  %v17731_v27 = vadd.f32 %v17725_v18, %v2213_v22 }
 0x286   :  { %v2212_v29 = vmul.f32 0.35355338, %v460_v26  ;;  %v15663_v30 = vpop.f32.mrb[7].mxu0 }
 0x287   :  { %v612_v33 = vpop.f32.mrb[2].mxu1  ;;  %v2293_v34 = vsel %vm389_vm2, %v17731_v27, -inf }
 0x288   :  { %v2214_v35 = vmul.f32 0.35355338, %v612_v33  ;;  %v15673_v36 = vpop.f32.mrb[3].mxu1  ;;  %2294 = vmax.xlane.f32.xlu1 %v2293_v34  ;;  %v17741_v37 = vadd.f32 %v17728_v24, %v2212_v29 }
 0x28a   :  { %v764_v39 = vpop.f32.mrb[8].mxu0  ;;  %v2290_v44 = vsel %vm389_vm2, %v17741_v37, -inf  ;;  %v17749_v45 = vadd.f32 %v17735_v31, %v2214_v35 }
 0x28b   :  { %v688_v48 = vpop.f32.mrb[4].mxu1  ;;  %v2216_v49 = vmul.f32 0.35355338, %v764_v39  ;;  %v15683_v50 = vpop.f32.mrb[9].mxu0  ;;  %2291 = vmax.xlane.f32.xlu0 %v2290_v44 }
 0x28c   :  { %v2215_v51 = vmul.f32 0.35355338, %v688_v48  ;;  %v15678_v52 = vpop.f32.mrb[5].mxu1  ;;  %v2296_v54 = vsel %vm389_vm2, %v17749_v45, -inf }
 0x28d   :  { %v17755_v53 = vadd.f32 %v17744_v38, %v2216_v49 }
 0x28e   :  { %v17760_v55 = vadd.f32 %v17752_v46, %v2215_v51 }
 0x28f   :  { %v840_v57 = vpop.f32.mrb[6].mxu1  ;;  %2297 = vmax.xlane.f32.xlu0 %v2296_v54  ;;  %v2302_v58 = vsel %vm389_vm2, %v17755_v53, -inf }
 0x290   :  { %v2217_v59 = vmul.f32 0.35355338, %v840_v57  ;;  %v15688_v60 = vpop.f32.mrb[7].mxu1  ;;  %2303 = vmax.xlane.f32.xlu1 %v2302_v58  ;;  %v2299_v61 = vsel %vm389_vm2, %v17760_v55, -inf }
 0x292   :  { %v17770_v62 = vadd.f32 %v17763_v56, %v2217_v59 }
 0x293   :  { %2300 = vmax.xlane.f32.xlu0 %v2299_v61 }
 0x294   :  { %v2305_v63 = vsel %vm389_vm2, %v17770_v62, -inf }
 0x297   :  { %2306 = vmax.xlane.f32.xlu0 %v2305_v63 }
 0x2d0   :  { %v916_v0 = vpop.f32.mrb[10].mxu0 }
 0x2d1   :  { %v2218_v1 = vmul.f32 0.35355338, %v916_v0  ;;  %v15693_v2 = vpop.f32.mrb[11].mxu0 }
 0x2d3   :  { %v17775_v3 = vadd.f32 %v17728_v24, %v2218_v1 }
 0x2d4   :  { %v992_v4 = vpop.f32.mrb[8].mxu1  ;;  %v1068_v5 = vpop.f32.mrb[12].mxu0 }
 0x2d5   :  { %v2219_v6 = vmul.f32 0.35355338, %v992_v4  ;;  %v2220_v7 = vmul.f32 0.35355338, %v1068_v5  ;;  %v15698_v8 = vpop.f32.mrb[9].mxu1  ;;  %v15703_v9 = vpop.f32.mrb[13].mxu0 }
 0x2d6   :  { %v2308_v10 = vsel %vm389_vm2, %v17775_v3, -inf  ;;  %v17823_v9 = vpop.permute.xlu0 %2782 }
 0x2d7   :  { %2309 = vmax.xlane.f32.xlu1 %v2308_v10  ;;  %v17782_v12 = vadd.f32 %v17725_v18, %v2219_v6  ;;  %v17785_v14 = vadd.f32 %v17735_v31, %v2220_v7  ;;  %v17825_v10 = vpop.permute.xlu1 %3010 }
 0x2d8   :  { %v1144_v16 = vpop.f32.mrb[10].mxu1  ;;  %v1220_v17 = vpop.f32.mrb[14].mxu0 }
 0x2d9   :  { %v2221_v19 = vmul.f32 0.35355338, %v1144_v16  ;;  %v2222_v20 = vmul.f32 0.35355338, %v1220_v17  ;;  %v15708_v21 = vpop.f32.mrb[11].mxu1  ;;  %v15713_v22 = vpop.f32.mrb[15].mxu0 }
 0x2da   :  { %v2311_v23 = vsel %vm389_vm2, %v17782_v12, -inf  ;;  %v2314_v26 = vsel %vm389_vm2, %v17785_v14, -inf }
 0x2db   :  { %2312 = vmax.xlane.f32.xlu0 %v2311_v23  ;;  %2315 = vmax.xlane.f32.xlu1 %v2314_v26  ;;  %v17792_v28 = vadd.f32 %v17752_v46, %v2221_v19  ;;  %v17795_v29 = vadd.f32 %v17744_v38, %v2222_v20 }
 0x2dc   :  { %v1296_v30 = vpop.f32.mrb[12].mxu1  ;;  %v1372_v32 = vpop.f32.mrb[16].mxu0 }
 0x2dd   :  { %v2223_v33 = vmul.f32 0.35355338, %v1296_v30  ;;  %v2224_v34 = vmul.f32 0.35355338, %v1372_v32  ;;  %v15718_v35 = vpop.f32.mrb[13].mxu1  ;;  %v15723_v36 = vpop.f32.mrb[17].mxu0 }
 0x2de   :  { %v2317_v39 = vsel %vm389_vm2, %v17792_v28, -inf  ;;  %v2320_v44 = vsel %vm389_vm2, %v17795_v29, -inf }
 0x2df   :  { %2318 = vmax.xlane.f32.xlu0 %v2317_v39  ;;  %2321 = vmax.xlane.f32.xlu1 %v2320_v44  ;;  %v17804_v48 = vadd.f32 %v17763_v56, %v2223_v33  ;;  %v17807_v49 = vadd.f32 %v17728_v24, %v2224_v34 }
 0x2e0   :  { %v1448_v50 = vpop.f32.mrb[14].mxu1  ;;  %v1524_v51 = vpop.f32.mrb[18].mxu0 }
 0x2e1   :  { %v2225_v52 = vmul.f32 0.35355338, %v1448_v50  ;;  %v2226_v54 = vmul.f32 0.35355338, %v1524_v51  ;;  %v15728_v57 = vpop.f32.mrb[15].mxu1  ;;  %v15733_v58 = vpop.f32.mrb[19].mxu0 }
 0x2e2   :  { %v2323_v59 = vsel %vm389_vm2, %v17804_v48, -inf  ;;  %v2326_v60 = vsel %vm389_vm2, %v17807_v49, -inf  ;;  %v17849_v58 = vpop.permute.xlu0 %2934 }
 0x2e3   :  { %2324 = vmax.xlane.f32.xlu0 %v2323_v59  ;;  %2327 = vmax.xlane.f32.xlu1 %v2326_v60  ;;  %v17814_v61 = vadd.f32 %v17725_v18, %v2225_v52  ;;  %v17817_v63 = vadd.f32 %v17735_v31, %v2226_v54  ;;  %v17843_v52 = vpop.permute.xlu1 %3162 }
 0x2e4   :  { %v1600_v0 = vpop.f32.mrb[16].mxu1  ;;  %v1676_v1 = vpop.f32.mrb[20].mxu0 }
 0x2e5   :  { %v2227_v2 = vmul.f32 0.35355338, %v1600_v0  ;;  %v2228_v4 = vmul.f32 0.35355338, %v1676_v1  ;;  %v15738_v5 = vpop.f32.mrb[17].mxu1  ;;  %v15743_v6 = vpop.f32.mrb[21].mxu0 }
 0x2e6   :  { %v2329_v7 = vsel %vm389_vm2, %v17814_v61, -inf  ;;  %v2332_v8 = vsel %vm389_vm2, %v17817_v63, -inf }
 0x2e7   :  { %2330 = vmax.xlane.f32.xlu0 %v2329_v7  ;;  %2333 = vmax.xlane.f32.xlu1 %v2332_v8  ;;  %v17828_v16 = vadd.f32 %v17752_v46, %v2227_v2  ;;  %v17831_v17 = vadd.f32 %v17744_v38, %v2228_v4  ;;  %v17867_v8 = vpop.permute.xlu1 %3466 }
 0x2e8   :  { %v1752_v19 = vpop.f32.mrb[18].mxu1  ;;  %v1828_v20 = vpop.f32.mrb[22].mxu0 }
 0x2e9   :  { %v2229_v21 = vmul.f32 0.35355338, %v1752_v19  ;;  %v2230_v22 = vmul.f32 0.35355338, %v1828_v20  ;;  %v15748_v23 = vpop.f32.mrb[19].mxu1  ;;  %v15753_v26 = vpop.f32.mrb[23].mxu0 }
 0x2ea   :  { %v2335_v30 = vsel %vm389_vm2, %v17828_v16, -inf  ;;  %v2338_v32 = vsel %vm389_vm2, %v17831_v17, -inf  ;;  %v17873_v26 = vpop.permute.xlu0 %3086 }
 0x2eb   :  { %2336 = vmax.xlane.f32.xlu0 %v2335_v30  ;;  %2339 = vmax.xlane.f32.xlu1 %v2338_v32  ;;  %v17838_v33 = vadd.f32 %v17763_v56, %v2229_v21  ;;  %v17841_v34 = vadd.f32 %v17728_v24, %v2230_v22  ;;  %v17880_v30 = vpop.permute.xlu1 %3542 }
 0x2ec   :  { %v1904_v35 = vpop.f32.mrb[20].mxu1  ;;  %v1980_v36 = vpop.f32.mrb[24].mxu0 }
 0x2ed   :  { %v2231_v39 = vmul.f32 0.35355338, %v1904_v35  ;;  %v2232_v44 = vmul.f32 0.35355338, %v1980_v36  ;;  %v15758_v50 = vpop.f32.mrb[21].mxu1  ;;  %v15763_v51 = vpop.f32.mrb[25].mxu0 }
 0x2ee   :  { %v2341_v54 = vsel %vm389_vm2, %v17838_v33, -inf  ;;  %v2344_v57 = vsel %vm389_vm2, %v17841_v34, -inf  ;;  %v17882_v32 = vpop.permute.xlu0 %3238 }
 0x2ef   :  { %2342 = vmax.xlane.f32.xlu0 %v2341_v54  ;;  %2345 = vmax.xlane.f32.xlu1 %v2344_v57  ;;  %v17852_v24 = vadd.f32 %v17725_v18, %v2231_v39  ;;  %v17855_v59 = vadd.f32 %v17735_v31, %v2232_v44  ;;  %v17884_v35 = vpop.permute.xlu1 %3694 }
 0x2f0   :  { %v2056_v60 = vpop.f32.mrb[22].mxu1  ;;  %v2132_v0 = vpop.f32.mrb[26].mxu0 }
 0x2f1   :  { %v2233_v1 = vmul.f32 0.35355338, %v2056_v60  ;;  %v2234_v2 = vmul.f32 0.35355338, %v2132_v0  ;;  %v15768_v4 = vpop.f32.mrb[23].mxu1  ;;  %v15773_v5 = vpop.f32.mrb[27].mxu0 }
 0x2f2   :  { %v2347_v6 = vsel %vm389_vm2, %v17852_v24, -inf  ;;  %v2350_v7 = vsel %vm389_vm2, %v17855_v59, -inf  ;;  %v17886_v36 = vpop.permute.xlu0 %3390 }
 0x2f3   :  { %2348 = vmax.xlane.f32.xlu0 %v2347_v6  ;;  %2351 = vmax.xlane.f32.xlu1 %v2350_v7  ;;  %v17862_v18 = vadd.f32 %v17752_v46, %v2233_v1  ;;  %v17865_v31 = vadd.f32 %v17744_v38, %v2234_v2  ;;  %v17888_v39 = vpop.permute.xlu1 %3846 }
 0x2f4   :  { %v2208_v19 = vpop.f32.mrb[24].mxu1 }
 0x2f5   :  { %v2235_v20 = vmul.f32 0.35355338, %v2208_v19  ;;  %v15778_v21 = vpop.f32.mrb[25].mxu1  ;;  %v2353_v22 = vsel %vm389_vm2, %v17862_v18, -inf  ;;  %v2356_v23 = vsel %vm389_vm2, %v17865_v31, -inf }
 0x2f6   :  { %v17890_v44 = vpop.permute.xlu0 %3618 }
 0x2f7   :  { %2354 = vmax.xlane.f32.xlu0 %v2353_v22  ;;  %2357 = vmax.xlane.f32.xlu1 %v2356_v23  ;;  %v17876_v46 = vadd.f32 %v17763_v56, %v2235_v20  ;;  %v17894_v56 = vpop.permute.xlu1 %3998 }
 0x2f9   :  { %v2359_v38 = vsel %vm389_vm2, %v17876_v46, -inf }
 0x2fa   :  { %v17896_v50 = vpop.permute.xlu0 %3922 }
 0x2fb   :  { %2360 = vmax.xlane.f32.xlu0 %v2359_v38  ;;  %v17900_v51 = vpop.permute.xlu1 %3314 }
 0x2fe   :  { %v17902_v54 = vpop.permute.xlu0 %3770 }
 0x308   :  { %4150 = vrot.lane.b32.xlu1 %v17514_v41, %s17237_s30 }
 0x311   :  { %4074 = vrot.lane.b32.xlu0 %v17508_v40, %s17237_s30 }
 0x315   :  { %v2295_v57 = vpop.xlane.xlu1 %2294 }
 0x316   :  { %v2363_v0 = vsub.f32 %v17731_v27, %v2295_v57 }
 0x318   :  { %v2292_v60 = vpop.xlane.xlu0 %2291  ;;  %v2388_v41 = vmul.f32 1.442695, %v2363_v0 }
 0x319   :  { %v2362_v1 = vsub.f32 %v17741_v37, %v2292_v60 }
 0x31b   :  { %v2386_v2 = vmul.f32 1.442695, %v2362_v1 }
 0x31c   :  { %v2298_v4 = vpop.xlane.xlu0 %2297 }
 0x31d   :  { %v2364_v5 = vsub.f32 %v17749_v45, %v2298_v4  ;;  %v2304_v6 = vpop.xlane.xlu1 %2303  ;;  %16775 = vpow2.f32 %v2386_v2 }
 0x31e   :  { %v2366_v7 = vsub.f32 %v17755_v53, %v2304_v6  ;;  %16777 = vpow2.f32 %v2388_v41 }
 0x31f   :  { %v2390_v40 = vmul.f32 1.442695, %v2364_v5 }
 0x320   :  { %v2301_v19 = vpop.xlane.xlu0 %2300  ;;  %v2394_v20 = vmul.f32 1.442695, %v2366_v7 }
 0x321   :  { %v2365_v21 = vsub.f32 %v17760_v55, %v2301_v19  ;;  %16779 = vpow2.f32 %v2390_v40 }
 0x322   :  { %16781 = vpow2.f32 %v2394_v20 }
 0x323   :  { %v2392_v22 = vmul.f32 1.442695, %v2365_v21 }
 0x324   :  { %v2307_v27 = vpop.xlane.xlu0 %2306 }
 0x325   :  { %v2367_v37 = vsub.f32 %v17770_v62, %v2307_v27  ;;  %16783 = vpow2.f32 %v2392_v22 }
 0x327   :  { %v2396_v23 = vmul.f32 1.442695, %v2367_v37  ;;  %v17910_v38 = vpop.eup %16775 }
 0x328   :  { %v17912_v45 = vpop.eup %16777  ;;  %v2434_v53 = vsel %vm389_vm2, %v17910_v38, 0.0 }
 0x329   :  { %16785 = vpow2.f32 %v2396_v23  ;;  %v2437_v62 = vsel %vm389_vm2, %v17912_v45, 0.0 }
 0x32b   :  { %v17916_v57 = vpop.eup %16779 }
 0x32c   :  { %2435 = vadd.xlane.f32.xlu1 %v2434_v53  ;;  %v17918_v55 = vpop.eup %16781  ;;  %v2440_v60 = vsel %vm389_vm2, %v17916_v57, 0.0 }
 0x32d   :  { %v2446_v2 = vsel %vm389_vm2, %v17918_v55, 0.0 }
 0x32f   :  { %v17924_v0 = vpop.eup %16783 }
 0x330   :  { %2441 = vadd.xlane.f32.xlu1 %v2440_v60  ;;  %2438 = vadd.xlane.f32.xlu0 %v2437_v62  ;;  %v2443_v1 = vsel %vm389_vm2, %v17924_v0, 0.0 }
 0x333   :  { %v17930_v4 = vpop.eup %16785 }
 0x334   :  { %2444 = vadd.xlane.f32.xlu0 %v2443_v1  ;;  %2447 = vadd.xlane.f32.xlu1 %v2446_v2  ;;  %v2449_v41 = vsel %vm389_vm2, %v17930_v4, 0.0 }
 0x338   :  { %2450 = vadd.xlane.f32.xlu0 %v2449_v41 }
 0x364   :  { %v2310_v5 = vpop.xlane.xlu1 %2309 }
 0x365   :  { %v2368_v6 = vsub.f32 %v17775_v3, %v2310_v5 }
 0x367   :  { %v2398_v7 = vmul.f32 1.442695, %v2368_v6 }
 0x368   :  { %v2313_v40 = vpop.xlane.xlu0 %2312  ;;  %v2316_v19 = vpop.xlane.xlu1 %2315 }
 0x369   :  { %16787 = vpow2.f32 %v2398_v7  ;;  %v2369_v20 = vsub.f32 %v17782_v12, %v2313_v40  ;;  %v2370_v21 = vsub.f32 %v17785_v14, %v2316_v19 }
 0x36b   :  { %v2400_v22 = vmul.f32 1.442695, %v2369_v20  ;;  %v2402_v27 = vmul.f32 1.442695, %v2370_v21 }
 0x36c   :  { %v2319_v37 = vpop.xlane.xlu0 %2318  ;;  %v2322_v23 = vpop.xlane.xlu1 %2321 }
 0x36d   :  { %16789 = vpow2.f32 %v2400_v22  ;;  %v2371_v53 = vsub.f32 %v17792_v28, %v2319_v37  ;;  %v2372_v60 = vsub.f32 %v17795_v29, %v2322_v23 }
 0x36e   :  { %16791 = vpow2.f32 %v2402_v27 }
 0x36f   :  { %v2404_v62 = vmul.f32 1.442695, %v2371_v53  ;;  %v2406_v3 = vmul.f32 1.442695, %v2372_v60 }
 0x370   :  { %v2325_v1 = vpop.xlane.xlu0 %2324  ;;  %v2328_v2 = vpop.xlane.xlu1 %2327 }
 0x371   :  { %16793 = vpow2.f32 %v2404_v62  ;;  %v2373_v41 = vsub.f32 %v17804_v48, %v2325_v1  ;;  %v2374_v12 = vsub.f32 %v17807_v49, %v2328_v2 }
 0x372   :  { %16795 = vpow2.f32 %v2406_v3 }
 0x373   :  { %v17941_v14 = vpop.eup %16787  ;;  %v2408_v5 = vmul.f32 1.442695, %v2373_v41  ;;  %v2410_v6 = vmul.f32 1.442695, %v2374_v12 }
 0x374   :  { %v2331_v7 = vpop.xlane.xlu0 %2330  ;;  %v2334_v40 = vpop.xlane.xlu1 %2333  ;;  %v2452_v28 = vsel %vm389_vm2, %v17941_v14, 0.0 }
 0x375   :  { %16797 = vpow2.f32 %v2408_v5  ;;  %v2375_v29 = vsub.f32 %v17814_v61, %v2331_v7  ;;  %v2376_v19 = vsub.f32 %v17817_v63, %v2334_v40  ;;  %2453 = vadd.xlane.f32.xlu1 %v2452_v28 }
 0x376   :  { %16799 = vpow2.f32 %v2410_v6 }
 0x377   :  { %v17947_v48 = vpop.eup %16789  ;;  %v2412_v49 = vmul.f32 1.442695, %v2375_v29  ;;  %v2414_v20 = vmul.f32 1.442695, %v2376_v19 }
 0x378   :  { %v17949_v21 = vpop.eup %16791  ;;  %v2337_v22 = vpop.xlane.xlu0 %2336  ;;  %v2455_v37 = vsel %vm389_vm2, %v17947_v48, 0.0 }
 0x379   :  { %v2340_v27 = vpop.xlane.xlu1 %2339  ;;  %16801 = vpow2.f32 %v2412_v49  ;;  %v2377_v23 = vsub.f32 %v17828_v16, %v2337_v22  ;;  %2456 = vadd.xlane.f32.xlu0 %v2455_v37  ;;  %v2458_v63 = vsel %vm389_vm2, %v17949_v21, 0.0 }
 0x37a   :  { %v2378_v61 = vsub.f32 %v17831_v17, %v2340_v27  ;;  %16803 = vpow2.f32 %v2414_v20  ;;  %2459 = vadd.xlane.f32.xlu1 %v2458_v63 }
 0x37b   :  { %v17957_v53 = vpop.eup %16793  ;;  %v2416_v60 = vmul.f32 1.442695, %v2377_v23 }
 0x37c   :  { %v2418_v62 = vmul.f32 1.442695, %v2378_v61  ;;  %v17959_v3 = vpop.eup %16795  ;;  %v2343_v1 = vpop.xlane.xlu0 %2342  ;;  %v2461_v41 = vsel %vm389_vm2, %v17957_v53, 0.0 }
 0x37d   :  { %v2346_v2 = vpop.xlane.xlu1 %2345  ;;  %16805 = vpow2.f32 %v2416_v60  ;;  %v2379_v16 = vsub.f32 %v17838_v33, %v2343_v1  ;;  %2462 = vadd.xlane.f32.xlu0 %v2461_v41  ;;  %v2464_v12 = vsel %vm389_vm2, %v17959_v3, 0.0 }
 0x37e   :  { %v2380_v17 = vsub.f32 %v17841_v34, %v2346_v2  ;;  %16807 = vpow2.f32 %v2418_v62  ;;  %2465 = vadd.xlane.f32.xlu1 %v2464_v12 }
 0x37f   :  { %v17967_v5 = vpop.eup %16797  ;;  %v2420_v6 = vmul.f32 1.442695, %v2379_v16 }
 0x380   :  { %v2422_v7 = vmul.f32 1.442695, %v2380_v17  ;;  %v17969_v40 = vpop.eup %16799  ;;  %v2349_v28 = vpop.xlane.xlu0 %2348  ;;  %v2467_v19 = vsel %vm389_vm2, %v17967_v5, 0.0 }
 0x381   :  { %v2352_v29 = vpop.xlane.xlu1 %2351  ;;  %16809 = vpow2.f32 %v2420_v6  ;;  %v2381_v33 = vsub.f32 %v17852_v24, %v2349_v28  ;;  %2468 = vadd.xlane.f32.xlu0 %v2467_v19  ;;  %v2470_v49 = vsel %vm389_vm2, %v17969_v40, 0.0 }
 0x382   :  { %v2382_v34 = vsub.f32 %v17855_v59, %v2352_v29  ;;  %16811 = vpow2.f32 %v2422_v7  ;;  %2471 = vadd.xlane.f32.xlu1 %v2470_v49 }
 0x383   :  { %v17977_v20 = vpop.eup %16801  ;;  %v2424_v22 = vmul.f32 1.442695, %v2381_v33 }
 0x384   :  { %v2426_v27 = vmul.f32 1.442695, %v2382_v34  ;;  %v17979_v37 = vpop.eup %16803  ;;  %v2355_v23 = vpop.xlane.xlu0 %2354  ;;  %v2473_v63 = vsel %vm389_vm2, %v17977_v20, 0.0 }
 0x385   :  { %v2358_v61 = vpop.xlane.xlu1 %2357  ;;  %16813 = vpow2.f32 %v2424_v22  ;;  %v2383_v24 = vsub.f32 %v17862_v18, %v2355_v23  ;;  %2474 = vadd.xlane.f32.xlu0 %v2473_v63  ;;  %v2476_v60 = vsel %vm389_vm2, %v17979_v37, 0.0 }
 0x386   :  { %v2384_v59 = vsub.f32 %v17865_v31, %v2358_v61  ;;  %16815 = vpow2.f32 %v2426_v27  ;;  %2477 = vadd.xlane.f32.xlu1 %v2476_v60 }
 0x387   :  { %v17987_v62 = vpop.eup %16805  ;;  %v2428_v1 = vmul.f32 1.442695, %v2383_v24 }
 0x388   :  { %v2430_v2 = vmul.f32 1.442695, %v2384_v59  ;;  %v17989_v41 = vpop.eup %16807  ;;  %v2361_v16 = vpop.xlane.xlu0 %2360  ;;  %v2479_v17 = vsel %vm389_vm2, %v17987_v62, 0.0 }
 0x389   :  { %16817 = vpow2.f32 %v2428_v1  ;;  %v2385_v18 = vsub.f32 %v17876_v46, %v2361_v16  ;;  %2480 = vadd.xlane.f32.xlu0 %v2479_v17  ;;  %v2482_v31 = vsel %vm389_vm2, %v17989_v41, 0.0  ;;  %v18028_v24 = vpop.permute.xlu1 %4150 }
 0x38a   :  { %16819 = vpow2.f32 %v2430_v2  ;;  %2483 = vadd.xlane.f32.xlu1 %v2482_v31 }
 0x38b   :  { %v17996_v12 = vpop.eup %16809  ;;  %v2432_v6 = vmul.f32 1.442695, %v2385_v18 }
 0x38c   :  { %v17998_v7 = vpop.eup %16811  ;;  %v2485_v28 = vsel %vm389_vm2, %v17996_v12, 0.0  ;;  %v18030_v59 = vpop.permute.xlu0 %4074 }
 0x38d   :  { %16821 = vpow2.f32 %v2432_v6  ;;  %2486 = vadd.xlane.f32.xlu0 %v2485_v28  ;;  %v2488_v29 = vsel %vm389_vm2, %v17998_v7, 0.0 }
 0x38e   :  { %2489 = vadd.xlane.f32.xlu1 %v2488_v29 }
 0x38f   :  { %v18004_v46 = vpop.eup %16813 }
 0x390   :  { %v18006_v19 = vpop.eup %16815  ;;  %v2491_v33 = vsel %vm389_vm2, %v18004_v46, 0.0 }
 0x391   :  { %2492 = vadd.xlane.f32.xlu0 %v2491_v33  ;;  %v2494_v34 = vsel %vm389_vm2, %v18006_v19, 0.0 }
 0x392   :  { %2495 = vadd.xlane.f32.xlu1 %v2494_v34 }
 0x393   :  { %v18012_v49 = vpop.eup %16817 }
 0x394   :  { %v18014_v22 = vpop.eup %16819  ;;  %v2497_v27 = vsel %vm389_vm2, %v18012_v49, 0.0 }
 0x395   :  { %2498 = vadd.xlane.f32.xlu0 %v2497_v27  ;;  %v2500_v23 = vsel %vm389_vm2, %v18014_v22, 0.0 }
 0x396   :  { %2501 = vadd.xlane.f32.xlu1 %v2500_v23 }
 0x397   :  { %v18020_v61 = vpop.eup %16821 }
 0x398   :  { %v2503_v63 = vsel %vm389_vm2, %v18020_v61, 0.0 }
 0x399   :  { %2504 = vadd.xlane.f32.xlu0 %v2503_v63 }
 0x3a7   :  { %4302 = vrot.lane.b32.xlu1 %v17522_v43, %s17237_s30 }
 0x3af   :  { %4226 = vrot.lane.b32.xlu0 %v17516_v42, %s17237_s30 }
 0x3b9   :  { %v2436_v60 = vpop.xlane.xlu1 %2435 }
 0x3ba   :  { %16823 = vrcp.f32 %v2436_v60 }
 0x3bd   :  { %v2439_v1 = vpop.xlane.xlu0 %2438  ;;  %v2442_v2 = vpop.xlane.xlu1 %2441 }
 0x3be   :  { %16825 = vrcp.f32 %v2439_v1 }
 0x3bf   :  { %16827 = vrcp.f32 %v2442_v2 }
 0x3c1   :  { %v2445_v16 = vpop.xlane.xlu0 %2444  ;;  %v2448_v17 = vpop.xlane.xlu1 %2447 }
 0x3c2   :  { %16829 = vrcp.f32 %v2445_v16 }
 0x3c3   :  { %16831 = vrcp.f32 %v2448_v17 }
 0x3c4   :  { %v16824_v18 = vpop.eup %16823 }
 0x3c5   :  { %v2451_v31 = vpop.xlane.xlu0 %2450  ;;  %v2507_v43 = vmul.f32 %v16824_v18, %v17910_v38 }
 0x3c6   :  { %16833 = vrcp.f32 %v2451_v31 }
 0x3c7   :  { %15782 = vmatmul.mubr.msk.f32.vlgmr.msra.gmra.mrb[28].mxu0 %vm389_vm2, %v2507_v43 }
 0x3c8   :  { %v16826_v42 = vpop.eup %16825  ;;  %15790 = vmatpush3.msra.mxu0 %v17779_v11  ;;  %15791 = vmatprep.mubr.msk.f32.mxu0 %vm17235_vm1, %v17233_v25 }
 0x3c9   :  { %v16828_v6 = vpop.eup %16827  ;;  %15799 = vmatprep.subr.mxu0 %v17233_v25  ;;  %v2509_v28 = vmul.f32 %v16826_v42, %v17912_v45 }
 0x3ca   :  { %v2511_v29 = vmul.f32 %v16828_v6, %v17916_v57 }
 0x3cb   :  { %15787 = vmatmul.mubr.msk.f32.vlgmr.msra.gmra.mrb[26].mxu1 %vm389_vm2, %v2509_v28 }
 0x3cc   :  { %v16830_v33 = vpop.eup %16829  ;;  %15792 = vmatmul.mubr.msk.f32.vlgmr.msra.gmra.mrb[30].mxu0 %vm389_vm2, %v2511_v29  ;;  %15795 = vmatpush3.msra.mxu1 %v17823_v9 }
 0x3cd   :  { %v16832_v38 = vpop.eup %16831  ;;  %15800 = vmatpush3.msra.mxu0 %v17801_v47  ;;  %15796 = vmatprep.mubr.msk.f32.mxu1 %vm17235_vm1, %v17233_v25  ;;  %v2513_v11 = vmul.f32 %v16830_v33, %v17924_v0 }
 0x3ce   :  { %15801 = vmatprep.mubr.msk.f32.mxu0 %vm17235_vm1, %v17233_v25  ;;  %15804 = vmatprep.subr.mxu1 %v17233_v25  ;;  %v2515_v45 = vmul.f32 %v16832_v38, %v17918_v55 }
 0x3cf   :  { %15809 = vmatprep.subr.mxu0 %v17233_v25  ;;  %15797 = vmatmul.mubr.msk.f32.vlgmr.msra.gmra.mrb[28].mxu1 %vm389_vm2, %v2513_v11 }
 0x3d0   :  { %v16834_v9 = vpop.eup %16833  ;;  %15802 = vmatmul.mubr.msk.f32.vlgmr.msra.gmra.mrb[32].mxu0 %vm389_vm2, %v2515_v45  ;;  %15805 = vmatpush3.msra.mxu1 %v17849_v58 }
 0x3d1   :  { %15810 = vmatpush3.msra.mxu0 %v17825_v10  ;;  %15806 = vmatprep.mubr.msk.f32.mxu1 %vm17235_vm1, %v17233_v25  ;;  %v2517_v47 = vmul.f32 %v16834_v9, %v17930_v4 }
 0x3d2   :  { %15814 = vmatprep.subr.mxu1 %v17233_v25  ;;  %15811 = vmatprep.mubr.msk.f32.mxu0 %vm17235_vm1, %v17233_v25 }
 0x3d3   :  { %15807 = vmatmul.mubr.msk.f32.vlgmr.msra.gmra.mrb[30].mxu1 %vm389_vm2, %v2517_v47  ;;  %15819 = vmatprep.subr.mxu0 %v17233_v25 }
 0x3d4   :  { %15815 = vmatpush3.msra.mxu1 %v17873_v26  ;;  %15816 = vmatprep.mubr.msk.f32.mxu1 %vm17235_vm1, %v17233_v25 }
 0x3d5   :  { %15824 = vmatprep.subr.mxu1 %v17233_v25 }
 0x402   :  { %v2454_v10 = vpop.xlane.xlu1 %2453 }
 0x403   :  { %16835 = vrcp.f32 %v2454_v10 }
 0x406   :  { %v2457_v58 = vpop.xlane.xlu0 %2456 }
 0x407   :  { %16837 = vrcp.f32 %v2457_v58  ;;  %v2460_v57 = vpop.xlane.xlu1 %2459  ;;  %v204_v58 = vld [vmem:[%s20088_s7 + $0x10] sm:$0xff] }
 0x408   :  { %16839 = vrcp.f32 %v2460_v57 }
 0x40a   :  { %v2463_v55 = vpop.xlane.xlu0 %2462 }
 0x40b   :  { %16841 = vrcp.f32 %v2463_v55  ;;  %v2466_v0 = vpop.xlane.xlu1 %2465 }
 0x40c   :  { %16843 = vrcp.f32 %v2466_v0 }
 0x40d   :  { %v16836_v4 = vpop.eup %16835 }
 0x40e   :  { %v2469_v34 = vpop.xlane.xlu0 %2468  ;;  %v2519_v27 = vmul.f32 %v16836_v4, %v17941_v14 }
 0x40f   :  { %16845 = vrcp.f32 %v2469_v34  ;;  %v2472_v26 = vpop.xlane.xlu1 %2471 }
 0x410   :  { %16847 = vrcp.f32 %v2472_v26  ;;  %15812 = vmatmul.mubr.msk.f32.vlgmr.msra.gmra.mrb[34].mxu0 %vm389_vm2, %v2519_v27 }
 0x411   :  { %v16838_v23 = vpop.eup %16837  ;;  %15820 = vmatpush3.msra.mxu0 %v17843_v52  ;;  %15821 = vmatprep.mubr.msk.f32.mxu0 %vm17235_vm1, %v17233_v25 }
 0x412   :  { %v16840_v63 = vpop.eup %16839  ;;  %v2475_v60 = vpop.xlane.xlu0 %2474  ;;  %15829 = vmatprep.subr.mxu0 %v17233_v25  ;;  %v2521_v1 = vmul.f32 %v16838_v23, %v17947_v48 }
 0x413   :  { %16849 = vrcp.f32 %v2475_v60  ;;  %v2478_v2 = vpop.xlane.xlu1 %2477  ;;  %v2523_v14 = vmul.f32 %v16840_v63, %v17949_v21 }
 0x414   :  { %16851 = vrcp.f32 %v2478_v2  ;;  %15817 = vmatmul.mubr.msk.f32.vlgmr.msra.gmra.mrb[32].mxu1 %vm389_vm2, %v2521_v1  ;;  %v205_v2 = vld [vmem:[%s20088_s7 + $0x18] sm:$0xff] }
 0x415   :  { %v16842_v16 = vpop.eup %16841  ;;  %15822 = vmatmul.mubr.msk.f32.vlgmr.msra.gmra.mrb[36].mxu0 %vm389_vm2, %v2523_v14  ;;  %15825 = vmatpush3.msra.mxu1 %v17882_v32 }
 0x416   :  { %v16844_v52 = vpop.eup %16843  ;;  %15830 = vmatpush3.msra.mxu0 %v17900_v51  ;;  %v2481_v17 = vpop.xlane.xlu0 %2480  ;;  %15826 = vmatprep.mubr.msk.f32.mxu1 %vm17235_vm1, %v17233_v25  ;;  %v2525_v48 = vmul.f32 %v16842_v16, %v17957_v53 }
 0x417   :  { %16853 = vrcp.f32 %v2481_v17  ;;  %v2484_v18 = vpop.xlane.xlu1 %2483  ;;  %15831 = vmatprep.mubr.msk.f32.mxu0 %vm17235_vm1, %v17233_v25  ;;  %15834 = vmatprep.subr.mxu1 %v17233_v25  ;;  %v2527_v21 = vmul.f32 %v16844_v52, %v17959_v3 }
 0x418   :  { %16855 = vrcp.f32 %v2484_v18  ;;  %15839 = vmatprep.subr.mxu0 %v17233_v25  ;;  %15827 = vmatmul.mubr.msk.f32.vlgmr.msra.gmra.mrb[34].mxu1 %vm389_vm2, %v2525_v48 }
 0x419   :  { %v16846_v32 = vpop.eup %16845  ;;  %15832 = vmatmul.mubr.msk.f32.vlgmr.msra.gmra.mrb[38].mxu0 %vm389_vm2, %v2527_v21  ;;  %15835 = vmatpush3.msra.mxu1 %v17886_v36 }
 0x41a   :  { %v16848_v51 = vpop.eup %16847  ;;  %15840 = vmatpush3.msra.mxu0 %v17867_v8  ;;  %v2487_v53 = vpop.xlane.xlu0 %2486  ;;  %15836 = vmatprep.mubr.msk.f32.mxu1 %vm17235_vm1, %v17233_v25  ;;  %v2529_v31 = vmul.f32 %v16846_v32, %v17967_v5 }
 0x41b   :  { %16857 = vrcp.f32 %v2487_v53  ;;  %v2490_v3 = vpop.xlane.xlu1 %2489  ;;  %15841 = vmatprep.mubr.msk.f32.mxu0 %vm17235_vm1, %v17233_v25  ;;  %15844 = vmatprep.subr.mxu1 %v17233_v25  ;;  %v2531_v43 = vmul.f32 %v16848_v51, %v17969_v40 }
 0x41c   :  { %16859 = vrcp.f32 %v2490_v3  ;;  %15849 = vmatprep.subr.mxu0 %v17233_v25  ;;  %15837 = vmatmul.mubr.msk.f32.vlgmr.msra.gmra.mrb[36].mxu1 %vm389_vm2, %v2529_v31 }
 0x41d   :  { %v16850_v8 = vpop.eup %16849  ;;  %15842 = vmatmul.mubr.msk.f32.vlgmr.msra.gmra.mrb[40].mxu0 %vm389_vm2, %v2531_v43  ;;  %15845 = vmatpush3.msra.mxu1 %v17880_v30 }
 0x41e   :  { %v16852_v36 = vpop.eup %16851  ;;  %15850 = vmatpush3.msra.mxu0 %v17890_v44  ;;  %v2493_v5 = vpop.xlane.xlu0 %2492  ;;  %15846 = vmatprep.mubr.msk.f32.mxu1 %vm17235_vm1, %v17233_v25  ;;  %v2533_v42 = vmul.f32 %v16850_v8, %v17977_v20 }
 0x41f   :  { %16861 = vrcp.f32 %v2493_v5  ;;  %v2496_v40 = vpop.xlane.xlu1 %2495  ;;  %15851 = vmatprep.mubr.msk.f32.mxu0 %vm17235_vm1, %v17233_v25  ;;  %15854 = vmatprep.subr.mxu1 %v17233_v25  ;;  %v2535_v6 = vmul.f32 %v16852_v36, %v17979_v37 }
 0x420   :  { %16863 = vrcp.f32 %v2496_v40  ;;  %15859 = vmatprep.subr.mxu0 %v17233_v25  ;;  %15847 = vmatmul.mubr.msk.f32.vlgmr.msra.gmra.mrb[38].mxu1 %vm389_vm2, %v2533_v42 }
 0x421   :  { %v16854_v30 = vpop.eup %16853  ;;  %15852 = vmatmul.mubr.msk.f32.vlgmr.msra.gmra.mrb[42].mxu0 %vm389_vm2, %v2535_v6  ;;  %15855 = vmatpush3.msra.mxu1 %v17884_v35 }
 0x422   :  { %v16856_v44 = vpop.eup %16855  ;;  %15860 = vmatpush3.msra.mxu0 %v17902_v54  ;;  %v2499_v20 = vpop.xlane.xlu0 %2498  ;;  %15856 = vmatprep.mubr.msk.f32.mxu1 %vm17235_vm1, %v17233_v25  ;;  %v2537_v28 = vmul.f32 %v16854_v30, %v17987_v62 }
 0x423   :  { %16865 = vrcp.f32 %v2499_v20  ;;  %v2502_v37 = vpop.xlane.xlu1 %2501  ;;  %15861 = vmatprep.mubr.msk.f32.mxu0 %vm17235_vm1, %v17233_v25  ;;  %15864 = vmatprep.subr.mxu1 %v17233_v25  ;;  %v2539_v29 = vmul.f32 %v16856_v44, %v17989_v41 }
 0x424   :  { %16867 = vrcp.f32 %v2502_v37  ;;  %15869 = vmatprep.subr.mxu0 %v17233_v25  ;;  %15857 = vmatmul.mubr.msk.f32.vlgmr.msra.gmra.mrb[40].mxu1 %vm389_vm2, %v2537_v28 }
 0x425   :  { %v16858_v35 = vpop.eup %16857  ;;  %15862 = vmatmul.mubr.msk.f32.vlgmr.msra.gmra.mrb[44].mxu0 %vm389_vm2, %v2539_v29  ;;  %15865 = vmatpush3.msra.mxu1 %v17888_v39 }
 0x426   :  { %v16860_v54 = vpop.eup %16859  ;;  %15870 = vmatpush3.msra.mxu0 %v17896_v50  ;;  %v2505_v62 = vpop.xlane.xlu0 %2504  ;;  %15866 = vmatprep.mubr.msk.f32.mxu1 %vm17235_vm1, %v17233_v25  ;;  %v2541_v33 = vmul.f32 %v16858_v35, %v17996_v12 }
 0x427   :  { %16869 = vrcp.f32 %v2505_v62  ;;  %15871 = vmatprep.mubr.msk.f32.mxu0 %vm17235_vm1, %v17233_v25  ;;  %15874 = vmatprep.subr.mxu1 %v17233_v25  ;;  %v2543_v41 = vmul.f32 %v16860_v54, %v17998_v7  ;;  %v4303_v45 = vpop.permute.xlu1 %4302 }
 0x428   :  { %15879 = vmatprep.subr.mxu0 %v17233_v25  ;;  %15867 = vmatmul.mubr.msk.f32.vlgmr.msra.gmra.mrb[42].mxu1 %vm389_vm2, %v2541_v33 }
 0x429   :  { %v16862_v39 = vpop.eup %16861  ;;  %15872 = vmatmul.mubr.msk.f32.vlgmr.msra.gmra.mrb[46].mxu0 %vm389_vm2, %v2543_v41  ;;  %15875 = vmatpush3.msra.mxu1 %v17894_v56 }
 0x42a   :  { %v16864_v50 = vpop.eup %16863  ;;  %15880 = vmatpush3.msra.mxu0 %v18030_v59  ;;  %15876 = vmatprep.mubr.msk.f32.mxu1 %vm17235_vm1, %v17233_v25  ;;  %v2545_v12 = vmul.f32 %v16862_v39, %v18004_v46  ;;  %v4227_v38 = vpop.permute.xlu0 %4226  ;;  %v202_v46 = vld [vmem:[%s20088_s7] sm:$0xff] }
 0x42b   :  { %15881 = vmatprep.mubr.msk.f32.mxu0 %vm17235_vm1, %v17233_v25  ;;  %15884 = vmatprep.subr.mxu1 %v17233_v25  ;;  %v2547_v7 = vmul.f32 %v16864_v50, %v18006_v19 }
 0x42c   :  { %15889 = vmatprep.subr.mxu0 %v17233_v25  ;;  %15877 = vmatmul.mubr.msk.f32.vlgmr.msra.gmra.mrb[44].mxu1 %vm389_vm2, %v2545_v12 }
 0x42d   :  { %v16866_v56 = vpop.eup %16865  ;;  %15882 = vmatmul.mubr.msk.f32.vlgmr.msra.gmra.mrb[48].mxu0 %vm389_vm2, %v2547_v7  ;;  %15885 = vmatpush3.msra.mxu1 %v18028_v24  ;;  %v203_v24 = vld [vmem:[%s20088_s7 + $0x8] sm:$0xff] }
 0x42e   :  { %v16868_v59 = vpop.eup %16867  ;;  %15890 = vmatpush3.msra.mxu0 %v4227_v38  ;;  %15886 = vmatprep.mubr.msk.f32.mxu1 %vm17235_vm1, %v17233_v25  ;;  %v2549_v19 = vmul.f32 %v16866_v56, %v18012_v49  ;;  %v14887_v38 = vld [vmem:[%s20089_s8] ss:$0 sm:$0xff] }
 0x42f   :  { %15891 = vmatprep.mubr.msk.f32.mxu0 %vm17235_vm1, %v17233_v25  ;;  %15894 = vmatprep.subr.mxu1 %v17233_v25  ;;  %v2551_v11 = vmul.f32 %v16868_v59, %v18014_v22 }
 0x430   :  { %15887 = vmatmul.mubr.msk.f32.vlgmr.msra.gmra.mrb[46].mxu1 %vm389_vm2, %v2549_v19  ;;  %15899 = vmatprep.subr.mxu0 %v202_v46  ;;  %v17115_v19 = vld [vmem:[#allocation2 + $0x8] sm:$0xff] }
 0x431   :  { %v16870_v9 = vpop.eup %16869  ;;  %15892 = vmatmul.mubr.msk.f32.vlgmr.msra.gmra.mrb[50].mxu0 %vm389_vm2, %v2551_v11  ;;  %15895 = vmatpush3.msra.mxu1 %v4303_v45  ;;  %v17116_v45 = vld [vmem:[#allocation2] sm:$0xff] }
 0x432   :  { %15896 = vmatprep.mubr.msk.f32.mxu1 %vm17235_vm1, %v17233_v25  ;;  %v2553_v49 = vmul.f32 %v16870_v9, %v18020_v61  ;;  %15900 = vmatpush3.msra.mxu0 %v202_v46 }
 0x433   :  { %15910 = vmatprep.subr.mxu0 %v203_v24 }
 0x434   :  { %15897 = vmatmul.mubr.msk.f32.vlgmr.msra.gmra.mrb[48].mxu1 %vm389_vm2, %v2553_v49 }
 0x49a   :  { %v2626_v22 = vpop.f32.mrb[28].mxu0 }
 0x49b   :  { %v15783_v47 = vpop.f32.mrb[29].mxu0  ;;  %15901 = vmatprep.mubr.msk.f32.mxu0 %vm389_vm2, %v2626_v22 }
 0x49e   :  { %v2702_v10 = vpop.f32.mrb[26].mxu1 }
 0x49f   :  { %v2778_v57 = vpop.f32.mrb[30].mxu0  ;;  %v15788_v55 = vpop.f32.mrb[27].mxu1  ;;  %15902 = vmatmul.mubr.msk.f32.vlgmr.msra.gmra.mrb[52].mxu0 %vm389_vm2, %v2702_v10 }
 0x4a0   :  { %v15793_v0 = vpop.f32.mrb[31].mxu0  ;;  %15904 = vmatprep.mubr.msk.f32.mxu0 %vm389_vm2, %v2778_v57  ;;  %15911 = vmatpush3.msra.mxu0 %v203_v24  ;;  %v17117_v57 = vld [vmem:[#allocation2 + $0x10] sm:$0xff] }
 0x4a1   :  { %15921 = vmatprep.subr.mxu0 %v204_v58 }
 0x4a2   :  { %v2854_v61 = vpop.f32.mrb[28].mxu1 }
 0x4a3   :  { %v2930_v4 = vpop.f32.mrb[32].mxu0  ;;  %v15798_v34 = vpop.f32.mrb[29].mxu1  ;;  %15905 = vmatmul.mubr.msk.f32.gmra.mrb[54].mxu0 %vm389_vm2, %v2854_v61 }
 0x4a4   :  { %v15803_v27 = vpop.f32.mrb[33].mxu0  ;;  %15907 = vmatprep.mubr.msk.f32.mxu0 %vm389_vm2, %v2930_v4  ;;  %v17118_v4 = vld [vmem:[#allocation2 + $0x18] sm:$0xff] }
 0x4a6   :  { %v3006_v26 = vpop.f32.mrb[30].mxu1 }
 0x4a7   :  { %v15808_v23 = vpop.f32.mrb[31].mxu1  ;;  %15908 = vmatmul.mubr.msk.f32.gmra.mrb[56].mxu0 %vm389_vm2, %v3006_v26 }
 0x4e3   :  { %v3082_v63 = vpop.f32.mrb[34].mxu0 }
 0x4e4   :  { %v15813_v60 = vpop.f32.mrb[35].mxu0  ;;  %15912 = vmatprep.mubr.msk.f32.mxu0 %vm389_vm2, %v3082_v63  ;;  %v17119_v63 = vld [vmem:[#allocation2 + $0x20] sm:$0xff] }
 0x4e7   :  { %v3158_v1 = vpop.f32.mrb[32].mxu1 }
 0x4e8   :  { %v3234_v14 = vpop.f32.mrb[36].mxu0  ;;  %v15818_v16 = vpop.f32.mrb[33].mxu1  ;;  %15913 = vmatmul.mubr.msk.f32.vlgmr.msra.gmra.mrb[52].mxu0 %vm389_vm2, %v3158_v1  ;;  %v17120_v1 = vld [vmem:[#allocation2 + $0x28] sm:$0xff] }
 0x4e9   :  { %v15823_v52 = vpop.f32.mrb[37].mxu0  ;;  %15915 = vmatprep.mubr.msk.f32.mxu0 %vm389_vm2, %v3234_v14  ;;  %15922 = vmatpush3.msra.mxu0 %v204_v58 }
 0x4ea   :  { %15932 = vmatprep.subr.mxu0 %v205_v2 }
 0x4eb   :  { %v3310_v17 = vpop.f32.mrb[34].mxu1 }
 0x4ec   :  { %v3386_v48 = vpop.f32.mrb[38].mxu0  ;;  %v15828_v18 = vpop.f32.mrb[35].mxu1  ;;  %15916 = vmatmul.mubr.msk.f32.gmra.mrb[54].mxu0 %vm389_vm2, %v3310_v17 }
 0x4ed   :  { %v15833_v21 = vpop.f32.mrb[39].mxu0  ;;  %15918 = vmatprep.mubr.msk.f32.mxu0 %vm389_vm2, %v3386_v48 }
 0x4ef   :  { %v3462_v32 = vpop.f32.mrb[36].mxu1 }
 0x4f0   :  { %v3538_v51 = vpop.f32.mrb[40].mxu0  ;;  %v15838_v53 = vpop.f32.mrb[37].mxu1  ;;  %15919 = vmatmul.mubr.msk.f32.gmra.mrb[56].mxu0 %vm389_vm2, %v3462_v32 }
 0x4f1   :  { %v15843_v31 = vpop.f32.mrb[41].mxu0  ;;  %15923 = vmatprep.mubr.msk.f32.mxu0 %vm389_vm2, %v3538_v51 }
 0x4f3   :  { %v3614_v3 = vpop.f32.mrb[38].mxu1 }
 0x4f4   :  { %v3690_v43 = vpop.f32.mrb[42].mxu0  ;;  %v15848_v8 = vpop.f32.mrb[39].mxu1  ;;  %15924 = vmatmul.mubr.msk.f32.vlgmr.msra.gmra.mrb[52].mxu0 %vm389_vm2, %v3614_v3 }
 0x4f5   :  { %v15853_v36 = vpop.f32.mrb[43].mxu0  ;;  %15926 = vmatprep.mubr.msk.f32.mxu0 %vm389_vm2, %v3690_v43  ;;  %15933 = vmatpush3.msra.mxu0 %v205_v2 }
 0x4f6   :  { %16011 = vmatprep.subr.mxu0 %v17233_v25 }
 0x4f7   :  { %v3766_v5 = vpop.f32.mrb[40].mxu1 }
 0x4f8   :  { %v3842_v42 = vpop.f32.mrb[44].mxu0  ;;  %v15858_v40 = vpop.f32.mrb[41].mxu1  ;;  %15927 = vmatmul.mubr.msk.f32.gmra.mrb[54].mxu0 %vm389_vm2, %v3766_v5 }
 0x4f9   :  { %v15863_v6 = vpop.f32.mrb[45].mxu0  ;;  %15929 = vmatprep.mubr.msk.f32.mxu0 %vm389_vm2, %v3842_v42 }
 0x4fb   :  { %v3918_v30 = vpop.f32.mrb[42].mxu1 }
 0x4fc   :  { %v3994_v44 = vpop.f32.mrb[46].mxu0  ;;  %v15868_v20 = vpop.f32.mrb[43].mxu1  ;;  %15930 = vmatmul.mubr.msk.f32.gmra.mrb[56].mxu0 %vm389_vm2, %v3918_v30 }
 0x4fd   :  { %v15873_v28 = vpop.f32.mrb[47].mxu0  ;;  %15934 = vmatprep.mubr.msk.f32.mxu0 %vm389_vm2, %v3994_v44 }
 0x4ff   :  { %v4070_v37 = vpop.f32.mrb[44].mxu1 }
 0x500   :  { %v4146_v29 = vpop.f32.mrb[48].mxu0  ;;  %v15878_v35 = vpop.f32.mrb[45].mxu1  ;;  %15935 = vmatmul.mubr.msk.f32.vlgmr.msra.gmra.mrb[52].mxu0 %vm389_vm2, %v4070_v37 }
 0x501   :  { %v15883_v54 = vpop.f32.mrb[49].mxu0  ;;  %15937 = vmatprep.mubr.msk.f32.mxu0 %vm389_vm2, %v4146_v29 }
 0x503   :  { %v4222_v62 = vpop.f32.mrb[46].mxu1 }
 0x504   :  { %v4298_v33 = vpop.f32.mrb[50].mxu0  ;;  %v15888_v41 = vpop.f32.mrb[47].mxu1  ;;  %15938 = vmatmul.mubr.msk.f32.gmra.mrb[54].mxu0 %vm389_vm2, %v4222_v62 }
 0x505   :  { %v15893_v39 = vpop.f32.mrb[51].mxu0  ;;  %15940 = vmatprep.mubr.msk.f32.mxu0 %vm389_vm2, %v4298_v33 }
 0x507   :  { %v4374_v50 = vpop.f32.mrb[48].mxu1 }
 0x508   :  { %v15898_v12 = vpop.f32.mrb[49].mxu1  ;;  %15941 = vmatmul.mubr.msk.f32.gmra.mrb[56].mxu0 %vm389_vm2, %v4374_v50 }
 0x509   :  { %16013 = vmatprep.mubr.msk.f32.mxu0 %vm17235_vm1, %v17233_v25 }
 0x5d3   :  { %v15936_v7 = vpop.f32.mrb[52].mxu0 }
 0x5d4   :  { %v4855_v56 = vadd.f32 %v15936_v7, %v14887_v38  ;;  %v4801_v46 = vpop.f32.mrb[53].mxu0  ;;  %v210_v7 = vld [vmem:[%s20092_s11 + $0x8] sm:$0xff] }
 0x5d5   :  { %v4854_v59 = vadd.f32 %v14887_v38, %v4801_v46  ;;  %v211_v46 = vld [vmem:[%s20092_s11 + $0x10] sm:$0xff] }
 0x5d6   :  { %v4861_v11 = vadd.f32 %v17115_v19, %v4855_v56 }
 0x5d7   :  { %v4860_v24 = vadd.f32 %v17116_v45, %v4854_v59  ;;  %v15939_v9 = vpop.f32.mrb[54].mxu0  ;;  %v212_v59 = vld [vmem:[%s20092_s11 + $0x18] sm:$0xff] }
 0x5d8   :  { %v4811_v49 = vpop.f32.mrb[55].mxu0  ;;  %v4869_v22 = vsel %vm231_vm0, %v4861_v11, 0.0  ;;  %v4857_v47 = vadd.f32 %v15939_v9, %v14887_v38  ;;  %v16622_v19 = vpack.c.bf16 %v212_v59, %v211_v46 }
 0x5d9   :  { %v4856_v10 = vadd.f32 %v14887_v38, %v4811_v49  ;;  %4870 = vadd.xlane.f32.xlu1 %v4869_v22  ;;  %v4866_v58 = vsel %vm231_vm0, %v4860_v24, 0.0 }
 0x5da   :  { %4867 = vadd.xlane.f32.xlu0 %v4866_v58  ;;  %v4863_v34 = vadd.f32 %v17118_v4, %v4857_v47 }
 0x5db   :  { %v4862_v55 = vadd.f32 %v17117_v57, %v4856_v10  ;;  %v15942_v0 = vpop.f32.mrb[56].mxu0 }
 0x5dc   :  { %v4821_v61 = vpop.f32.mrb[57].mxu0  ;;  %v4859_v27 = vadd.f32 %v15942_v0, %v14887_v38  ;;  %v4875_v14 = vsel %vm231_vm0, %v4863_v34, 0.0 }
 0x5dd   :  { %v4858_v26 = vadd.f32 %v14887_v38, %v4821_v61  ;;  %v4872_v23 = vsel %vm231_vm0, %v4862_v55, 0.0  ;;  %v209_v38 = vld [vmem:[%s20092_s11] sm:$0xff] }
 0x5de   :  { %4873 = vadd.xlane.f32.xlu0 %v4872_v23  ;;  %v4865_v2 = vadd.f32 %v17120_v1, %v4859_v27  ;;  %v16618_v56 = vpack.c.bf16 %v210_v7, %v209_v38  ;;  %v14890_v7 = vld [vmem:[%s20093_s12] ss:$0 sm:$0xff] }
 0x5df   :  { %v4864_v60 = vadd.f32 %v17119_v63, %v4858_v26  ;;  %v14888_v63 = vld [vmem:[%s20090_s9] ss:$0 sm:$0xff] }
 0x5e0   :  { %v4881_v52 = vsel %vm231_vm0, %v4865_v2, 0.0  ;;  %16619 = vmatprep.subr.bf16.mxu1 %v16618_v56 }
 0x5e1   :  { %v4878_v16 = vsel %vm231_vm0, %v4864_v60, 0.0  ;;  %16621 = vmatpush3.bf16.msra.mxu1 %v16618_v56 }
 0x5e2   :  { %4876 = vadd.xlane.f32.xlu0 %v4875_v14  ;;  %4879 = vadd.xlane.f32.xlu1 %v4878_v16  ;;  %v14889_v16 = vld [vmem:[%s20091_s10] ss:$0 sm:$0xff] }
 0x5e3   :  { %16623 = vmatprep.subr.bf16.mxu1 %v16622_v19 }
 0x5e5   :  { %16625 = vmatpush3.bf16.msra.mxu1 %v16622_v19 }
 0x5e6   :  { %4882 = vadd.xlane.f32.xlu0 %v4881_v52 }
 0x666   :  { %v4871_v17 = vpop.xlane.xlu1 %4870 }
 0x667   :  { %v4886_v48 = vmul.f32 0.03125, %v4871_v17  ;;  %v4868_v18 = vpop.xlane.xlu0 %4867 }
 0x668   :  { %v4885_v21 = vmul.f32 0.03125, %v4868_v18 }
 0x669   :  { %v18212_v32 = vsub.f32 %v4861_v11, %v4886_v48 }
 0x66a   :  { %v18214_v51 = vsub.f32 %v4860_v24, %v4885_v21 }
 0x66b   :  { %v4874_v53 = vpop.xlane.xlu0 %4873  ;;  %v4898_v31 = vmul.f32 %v18212_v32, %v18212_v32 }
 0x66c   :  { %v4887_v3 = vmul.f32 0.03125, %v4874_v53  ;;  %v4897_v43 = vmul.f32 %v18214_v51, %v18214_v51 }
 0x66d   :  { %v4906_v8 = vsel %vm231_vm0, %v4898_v31, 0.0 }
 0x66e   :  { %v18221_v36 = vsub.f32 %v4862_v55, %v4887_v3  ;;  %4907 = vadd.xlane.f32.xlu0 %v4906_v8  ;;  %v4903_v5 = vsel %vm231_vm0, %v4897_v43, 0.0 }
 0x66f   :  { %v4877_v42 = vpop.xlane.xlu0 %4876  ;;  %4904 = vadd.xlane.f32.xlu1 %v4903_v5  ;;  %v4880_v40 = vpop.xlane.xlu1 %4879 }
 0x670   :  { %v4888_v6 = vmul.f32 0.03125, %v4877_v42  ;;  %v4889_v30 = vmul.f32 0.03125, %v4880_v40  ;;  %v4899_v44 = vmul.f32 %v18221_v36, %v18221_v36 }
 0x672   :  { %v18226_v20 = vsub.f32 %v4863_v34, %v4888_v6  ;;  %v18228_v28 = vsub.f32 %v4864_v60, %v4889_v30  ;;  %v4909_v37 = vsel %vm231_vm0, %v4899_v44, 0.0 }
 0x673   :  { %v4883_v29 = vpop.xlane.xlu0 %4882  ;;  %4910 = vadd.xlane.f32.xlu1 %v4909_v37  ;;  %v215_v37 = vld [vmem:[%s20094_s13 + $0x8] sm:$0xff] }
 0x674   :  { %v4890_v35 = vmul.f32 0.03125, %v4883_v29  ;;  %v4900_v54 = vmul.f32 %v18226_v20, %v18226_v20  ;;  %v4901_v62 = vmul.f32 %v18228_v28, %v18228_v28 }
 0x676   :  { %v18235_v33 = vsub.f32 %v4865_v2, %v4890_v35  ;;  %v4912_v41 = vsel %vm231_vm0, %v4900_v54, 0.0  ;;  %v4915_v39 = vsel %vm231_vm0, %v4901_v62, 0.0  ;;  %v216_v35 = vld [vmem:[%s20094_s13 + $0x10] sm:$0xff]  ;;  %v217_v54 = vld [vmem:[%s20094_s13 + $0x18] sm:$0xff] }
 0x677   :  { %4913 = vadd.xlane.f32.xlu0 %v4912_v41  ;;  %4916 = vadd.xlane.f32.xlu1 %v4915_v39  ;;  %v16630_v62 = vpack.c.bf16 %v217_v54, %v216_v35  ;;  %v219_v41 = vld [vmem:[%s20094_s13 + $0x28] sm:$0xff] }
 0x678   :  { %v4902_v50 = vmul.f32 %v18235_v33, %v18235_v33 }
 0x67a   :  { %v4918_v12 = vsel %vm231_vm0, %v4902_v50, 0.0  ;;  %v220_v50 = vld [vmem:[%s20094_s13 + $0x30] sm:$0xff] }
 0x67b   :  { %4919 = vadd.xlane.f32.xlu0 %v4918_v12  ;;  %v221_v12 = vld [vmem:[%s20094_s13 + $0x38] sm:$0xff] }
 0x67c   :  { %v16638_v38 = vpack.c.bf16 %v221_v12, %v220_v50 }
 0x6fb   :  { %v4908_v11 = vpop.xlane.xlu0 %4907 }
 0x6fc   :  { %v4922_v45 = vmul.f32 0.03125, %v4908_v11  ;;  %v4905_v24 = vpop.xlane.xlu1 %4904 }
 0x6fd   :  { %v4921_v9 = vmul.f32 0.03125, %v4905_v24 }
 0x6fe   :  { %v4928_v49 = vadd.f32 1e-12, %v4922_v45 }
 0x6ff   :  { %v4927_v22 = vadd.f32 1e-12, %v4921_v9 }
 0x700   :  { %16871 = vrsqrt.f32 %v4928_v49  ;;  %v4911_v47 = vpop.xlane.xlu1 %4910 }
 0x701   :  { %16873 = vrsqrt.f32 %v4927_v22  ;;  %v4923_v10 = vmul.f32 0.03125, %v4911_v47 }
 0x703   :  { %v4929_v58 = vadd.f32 1e-12, %v4923_v10 }
 0x704   :  { %v4914_v57 = vpop.xlane.xlu0 %4913  ;;  %v4917_v55 = vpop.xlane.xlu1 %4916 }
 0x705   :  { %16875 = vrsqrt.f32 %v4929_v58  ;;  %v4924_v0 = vmul.f32 0.03125, %v4914_v57  ;;  %v4925_v61 = vmul.f32 0.03125, %v4917_v55 }
 0x707   :  { %v4930_v4 = vadd.f32 1e-12, %v4924_v0  ;;  %v4931_v34 = vadd.f32 1e-12, %v4925_v61 }
 0x708   :  { %v4920_v27 = vpop.xlane.xlu0 %4919 }
 0x709   :  { %16877 = vrsqrt.f32 %v4930_v4  ;;  %v4926_v26 = vmul.f32 0.03125, %v4920_v27 }
 0x70a   :  { %v16872_v23 = vpop.eup %16871  ;;  %16879 = vrsqrt.f32 %v4931_v34 }
 0x70b   :  { %v16874_v60 = vpop.eup %16873  ;;  %v4940_v1 = vmul.f32 %v16872_v23, %v18212_v32  ;;  %v4932_v2 = vadd.f32 1e-12, %v4926_v26 }
 0x70c   :  { %v4939_v14 = vmul.f32 %v16874_v60, %v18214_v51 }
 0x70d   :  { %16881 = vrsqrt.f32 %v4932_v2  ;;  %v4952_v52 = vmul.f32 %v14888_v63, %v4940_v1 }
 0x70e   :  { %v4951_v17 = vmul.f32 %v14888_v63, %v4939_v14 }
 0x70f   :  { %v16876_v48 = vpop.eup %16875  ;;  %v18265_v53 = vadd.f32 %v14889_v16, %v4952_v52 }
 0x710   :  { %v18262_v18 = vadd.f32 %v14889_v16, %v4951_v17  ;;  %v4941_v21 = vmul.f32 %v16876_v48, %v18221_v36 }
 0x712   :  { %15951 = vmatprep.mubr.msk.f32.mxu1 %vm231_vm0, %v18262_v18  ;;  %v4953_v32 = vmul.f32 %v14888_v63, %v4941_v21 }
 0x713   :  { %v16878_v31 = vpop.eup %16877  ;;  %15952 = vmatmul.mubr.msk.f32.vlgmr.msra.gmra.mrb[50].mxu1 %vm231_vm0, %v18265_v53 }
 0x714   :  { %v16880_v51 = vpop.eup %16879  ;;  %v18271_v3 = vadd.f32 %v14889_v16, %v4953_v32  ;;  %v4942_v43 = vmul.f32 %v16878_v31, %v18226_v20 }
 0x715   :  { %v4943_v8 = vmul.f32 %v16880_v51, %v18228_v28  ;;  %v214_v28 = vld [vmem:[%s20094_s13] sm:$0xff] }
 0x716   :  { %15954 = vmatprep.mubr.msk.f32.mxu1 %vm231_vm0, %v18271_v3  ;;  %v4954_v36 = vmul.f32 %v14888_v63, %v4942_v43  ;;  %v16626_v29 = vpack.c.bf16 %v215_v37, %v214_v28 }
 0x717   :  { %v16882_v5 = vpop.eup %16881  ;;  %v4955_v42 = vmul.f32 %v14888_v63, %v4943_v8 }
 0x718   :  { %v18277_v40 = vadd.f32 %v14889_v16, %v4954_v36  ;;  %v4944_v6 = vmul.f32 %v16882_v5, %v18235_v33  ;;  %16627 = vmatprep.subr.bf16.mxu1 %v16626_v29  ;;  %v218_v33 = vld [vmem:[%s20094_s13 + $0x20] sm:$0xff] }
 0x719   :  { %v18280_v30 = vadd.f32 %v14889_v16, %v4955_v42  ;;  %16629 = vmatpush3.bf16.msra.mxu1 %v16626_v29  ;;  %v16634_v39 = vpack.c.bf16 %v219_v41, %v218_v33 }
 0x71a   :  { %15955 = vmatmul.mubr.msk.f32.gmra.mrb[52].mxu1 %vm231_vm0, %v18277_v40  ;;  %v4956_v44 = vmul.f32 %v14888_v63, %v4944_v6  ;;  %16631 = vmatprep.subr.bf16.mxu1 %v16630_v62 }
 0x71b   :  { %15957 = vmatprep.mubr.msk.f32.mxu1 %vm231_vm0, %v18280_v30 }
 0x71c   :  { %v18286_v20 = vadd.f32 %v14889_v16, %v4956_v44 }
 0x71d   :  { %16633 = vmatpush3.bf16.msra.mxu1 %v16630_v62 }
 0x71e   :  { %15958 = vmatmul.mubr.msk.f32.gmra.mrb[54].mxu1 %vm231_vm0, %v18286_v20  ;;  %16635 = vmatprep.subr.bf16.mxu1 %v16634_v39 }
 0x721   :  { %16637 = vmatpush3.bf16.msra.mxu1 %v16634_v39 }
 0x722   :  { %16639 = vmatprep.subr.bf16.mxu1 %v16638_v38 }
 0x725   :  { %16641 = vmatpush3.bf16.msra.mxu1 %v16638_v38 }
 0x7e6   :  { %v15953_v56 = vpop.f32.mrb[50].mxu1 }
 0x7e7   :  { %v5065_v46 = vadd.f32 %v15953_v56, %v14890_v7  ;;  %v5059_v59 = vpop.f32.mrb[51].mxu1 }
 0x7e8   :  { %v5060_v19 = vadd.f32 %v14890_v7, %v5059_v59 }
 0x7e9   :  { %v5089_v11 = vmul.f32 %v5065_v46, %v5065_v46 }
 0x7ea   :  { %v5088_v45 = vmul.f32 %v5060_v19, %v5060_v19 }
 0x7eb   :  { %v5095_v24 = vmul.f32 %v5089_v11, %v5065_v46 }
 0x7ec   :  { %v5094_v9 = vmul.f32 %v5088_v45, %v5060_v19 }
 0x7ed   :  { %v5101_v49 = vmul.f32 0.044715, %v5095_v24  ;;  %v15956_v22 = vpop.f32.mrb[52].mxu1 }
 0x7ee   :  { %v5100_v47 = vmul.f32 0.044715, %v5094_v9  ;;  %v5075_v10 = vadd.f32 %v15956_v22, %v14890_v7  ;;  %v5069_v58 = vpop.f32.mrb[53].mxu1 }
 0x7ef   :  { %v5107_v57 = vadd.f32 %v5101_v49, %v5065_v46  ;;  %v5070_v55 = vadd.f32 %v14890_v7, %v5069_v58  ;;  %v14897_v58 = vld [vmem:[%s20095_s14] ss:$0 sm:$0xff] }
 0x7f0   :  { %v5106_v0 = vadd.f32 %v5100_v47, %v5060_v19  ;;  %v5091_v61 = vmul.f32 %v5075_v10, %v5075_v10 }
 0x7f1   :  { %v5113_v4 = vmul.f32 0.7978846, %v5107_v57  ;;  %v5090_v34 = vmul.f32 %v5070_v55, %v5070_v55  ;;  %v15959_v27 = vpop.f32.mrb[54].mxu1 }
 0x7f2   :  { %v5112_v26 = vmul.f32 0.7978846, %v5106_v0  ;;  %v5097_v23 = vmul.f32 %v5091_v61, %v5075_v10  ;;  %v5085_v63 = vadd.f32 %v15959_v27, %v14890_v7  ;;  %v5079_v60 = vpop.f32.mrb[55].mxu1 }
 0x7f3   :  { %16883 = vtanh.f32 %v5113_v4  ;;  %v5096_v1 = vmul.f32 %v5090_v34, %v5070_v55  ;;  %v5080_v2 = vadd.f32 %v14890_v7, %v5079_v60 }
 0x7f4   :  { %16885 = vtanh.f32 %v5112_v26  ;;  %v5103_v14 = vmul.f32 0.044715, %v5097_v23  ;;  %v5093_v16 = vmul.f32 %v5085_v63, %v5085_v63 }
 0x7f5   :  { %v5102_v52 = vmul.f32 0.044715, %v5096_v1  ;;  %v5092_v17 = vmul.f32 %v5080_v2, %v5080_v2 }
 0x7f6   :  { %v5109_v48 = vadd.f32 %v5103_v14, %v5075_v10  ;;  %v5099_v21 = vmul.f32 %v5093_v16, %v5085_v63 }
 0x7f7   :  { %v5108_v32 = vadd.f32 %v5102_v52, %v5070_v55  ;;  %v5098_v31 = vmul.f32 %v5092_v17, %v5080_v2 }
 0x7f8   :  { %v5115_v51 = vmul.f32 0.7978846, %v5109_v48  ;;  %v5105_v43 = vmul.f32 0.044715, %v5099_v21 }
 0x7f9   :  { %v5114_v8 = vmul.f32 0.7978846, %v5108_v32  ;;  %v5104_v36 = vmul.f32 0.044715, %v5098_v31 }
 0x7fa   :  { %16887 = vtanh.f32 %v5115_v51  ;;  %v5111_v5 = vadd.f32 %v5105_v43, %v5085_v63 }
 0x7fb   :  { %16889 = vtanh.f32 %v5114_v8  ;;  %v5110_v42 = vadd.f32 %v5104_v36, %v5080_v2 }
 0x7fc   :  { %v5117_v6 = vmul.f32 0.7978846, %v5111_v5 }
 0x7fd   :  { %v16884_v44 = vpop.eup %16883  ;;  %v5116_v28 = vmul.f32 0.7978846, %v5110_v42 }
 0x7fe   :  { %v16886_v37 = vpop.eup %16885  ;;  %v5125_v29 = vadd.f32 1.0, %v16884_v44  ;;  %16891 = vtanh.f32 %v5117_v6 }
 0x7ff   :  { %16893 = vtanh.f32 %v5116_v28  ;;  %v5124_v35 = vadd.f32 1.0, %v16886_v37 }
 0x800   :  { %v5131_v54 = vmul.f32 0.5, %v5125_v29 }
 0x801   :  { %v5130_v62 = vmul.f32 0.5, %v5124_v35 }
 0x802   :  { %v5137_v39 = vmul.f32 %v5131_v54, %v5065_v46 }
 0x803   :  { %v5136_v33 = vmul.f32 %v5130_v62, %v5060_v19 }
 0x804   :  { %v16888_v41 = vpop.eup %16887 }
 0x805   :  { %v16890_v50 = vpop.eup %16889  ;;  %15976 = vmatprep.mubr.msk.f32.mxu1 %vm5148_vm3, %v5136_v33  ;;  %v5127_v12 = vadd.f32 1.0, %v16888_v41 }
 0x806   :  { %15977 = vmatmul.mubr.msk.f32.vlgmr.msra.gmra.mrb[56].mxu1 %vm5148_vm3, %v5137_v39  ;;  %v5126_v38 = vadd.f32 1.0, %v16890_v50 }
 0x807   :  { %v5133_v7 = vmul.f32 0.5, %v5127_v12 }
 0x808   :  { %v16892_v56 = vpop.eup %16891  ;;  %v5132_v59 = vmul.f32 0.5, %v5126_v38 }
 0x809   :  { %v16894_v11 = vpop.eup %16893  ;;  %v5129_v45 = vadd.f32 1.0, %v16892_v56  ;;  %v5139_v49 = vmul.f32 %v5133_v7, %v5075_v10 }
 0x80a   :  { %v5138_v24 = vmul.f32 %v5132_v59, %v5070_v55  ;;  %v5128_v9 = vadd.f32 1.0, %v16894_v11 }
 0x80b   :  { %v5135_v22 = vmul.f32 0.5, %v5129_v45 }
 0x80c   :  { %15979 = vmatprep.mubr.msk.f32.mxu1 %vm5148_vm3, %v5138_v24  ;;  %v5134_v19 = vmul.f32 0.5, %v5128_v9  ;;  %v14906_v9 = vld [vmem:[%s20086_s5 + $0x40] sm:$0xff] }
 0x80d   :  { %15980 = vmatmul.mubr.msk.f32.gmra.mrb[58].mxu1 %vm5148_vm3, %v5139_v49  ;;  %v5141_v47 = vmul.f32 %v5135_v22, %v5085_v63  ;;  %v14907_v49 = vld [vmem:[%s20086_s5 + $0x48] sm:$0xff] }
 0x80e   :  { %v5140_v46 = vmul.f32 %v5134_v19, %v5080_v2  ;;  %v16643_v22 = vpack.c.bf16 %v14907_v49, %v14906_v9  ;;  %v17239_v19 = vmov 0.0|0.0  }
 0x80f   :  { %16642 = vmatprep.subr.bf16.mxu1 %v17239_v19 }
 0x810   :  { %15982 = vmatprep.mubr.msk.f32.mxu1 %vm5148_vm3, %v5140_v46  ;;  %16644 = vmatpush3.bf16.msra.mxu1 %v16643_v22  ;;  %v14908_v46 = vld [vmem:[%s20086_s5 + $0x50] sm:$0xff]  ;;  %v14934_v22 = vld [vmem:[%s20087_s6 + $0x2] ss:$0 sm:$0xff] }
 0x811   :  { %15983 = vmatmul.mubr.msk.f32.gmra.mrb[60].mxu1 %vm5148_vm3, %v5141_v47  ;;  %v14909_v47 = vld [vmem:[%s20086_s5 + $0x58] sm:$0xff]  ;;  %16645 = vmatprep.subr.bf16.mxu1 %v17239_v19 }
 0x812   :  { %15993 = vmatprep.mubr.msk.f32.mxu1 %vm17235_vm1, %v17233_v25 }
 0x8d9   :  { %v15978_v10 = vpop.f32.mrb[56].mxu1 }
 0x8da   :  { %v5239_v57 = vadd.f32 %v15978_v10, %v14897_v58  ;;  %v5233_v55 = vpop.f32.mrb[57].mxu1 }
 0x8db   :  { %v5234_v27 = vadd.f32 %v14897_v58, %v5233_v55 }
 0x8dc   :  { %v5263_v0 = vadd.f32 %v5239_v57, %v18265_v53 }
 0x8dd   :  { %v5262_v2 = vadd.f32 %v5234_v27, %v18262_v18 }
 0x8de   :  { %v5271_v61 = vsel %vm231_vm0, %v5263_v0, 0.0 }
 0x8df   :  { %5272 = vadd.xlane.f32.xlu1 %v5271_v61  ;;  %v5268_v21 = vsel %vm231_vm0, %v5262_v2, 0.0 }
 0x8e0   :  { %v15981_v4 = vpop.f32.mrb[58].mxu1 }
 0x8e1   :  { %v5243_v34 = vpop.f32.mrb[59].mxu1  ;;  %v5249_v53 = vadd.f32 %v15981_v4, %v14897_v58 }
 0x8e2   :  { %v5244_v26 = vadd.f32 %v14897_v58, %v5243_v34 }
 0x8e4   :  { %v5264_v23 = vadd.f32 %v5244_v26, %v18271_v3  ;;  %v15984_v63 = vpop.f32.mrb[60].mxu1  ;;  %v5265_v3 = vadd.f32 %v5249_v53, %v18277_v40  ;;  %v14905_v53 = vld [vmem:[%s20097_s16] ss:$0 sm:$0xff] }
 0x8e5   :  { %v5259_v60 = vadd.f32 %v15984_v63, %v14897_v58  ;;  %v5253_v1 = vpop.f32.mrb[61].mxu1 }
 0x8e6   :  { %v5254_v14 = vadd.f32 %v14897_v58, %v5253_v1  ;;  %v5274_v16 = vsel %vm231_vm0, %v5264_v23, 0.0  ;;  %v5277_v18 = vsel %vm231_vm0, %v5265_v3, 0.0  ;;  %v16646_v58 = vpack.c.bf16 %v14909_v47, %v14908_v46  ;;  %v14904_v1 = vld [vmem:[%s20096_s15] ss:$0 sm:$0xff] }
 0x8e7   :  { %v5267_v52 = vadd.f32 %v5259_v60, %v18286_v20  ;;  %5275 = vadd.xlane.f32.xlu1 %v5274_v16 }
 0x8e8   :  { %v5266_v17 = vadd.f32 %v5254_v14, %v18280_v30  ;;  %16647 = vmatpush3.bf16.msra.mxu1 %v16646_v58 }
 0x8e9   :  { %v5283_v48 = vsel %vm231_vm0, %v5267_v52, 0.0  ;;  %15996 = vmatprep.subr.mxu1 %v17233_v25 }
 0x8ea   :  { %5284 = vadd.xlane.f32.xlu0 %v5283_v48  ;;  %v5280_v32 = vsel %vm231_vm0, %v5266_v17, 0.0 }
 0x8eb   :  { %5269 = vadd.xlane.f32.xlu1 %v5268_v21 }
 0x8ee   :  { %5281 = vadd.xlane.f32.xlu0 %v5280_v32 }
 0x8f2   :  { %5278 = vadd.xlane.f32.xlu0 %v5277_v18 }
 0x96c   :  { %v5273_v31 = vpop.xlane.xlu1 %5272 }
 0x96d   :  { %v5287_v20 = vmul.f32 0.03125, %v5273_v31 }
 0x96f   :  { %v18340_v51 = vsub.f32 %v5263_v0, %v5287_v20 }
 0x971   :  { %v5299_v30 = vmul.f32 %v18340_v51, %v18340_v51 }
 0x973   :  { %v5307_v43 = vsel %vm231_vm0, %v5299_v30, 0.0 }
 0x974   :  { %v5276_v8 = vpop.xlane.xlu1 %5275  ;;  %5308 = vadd.xlane.f32.xlu1 %v5307_v43 }
 0x975   :  { %v5288_v36 = vmul.f32 0.03125, %v5276_v8 }
 0x977   :  { %v18345_v5 = vsub.f32 %v5264_v23, %v5288_v36  ;;  %v5285_v40 = vpop.xlane.xlu0 %5284 }
 0x978   :  { %v5291_v42 = vmul.f32 0.03125, %v5285_v40  ;;  %v5270_v6 = vpop.xlane.xlu1 %5269 }
 0x979   :  { %v5286_v44 = vmul.f32 0.03125, %v5270_v6  ;;  %v5300_v28 = vmul.f32 %v18345_v5, %v18345_v5 }
 0x97a   :  { %v18349_v37 = vsub.f32 %v5267_v52, %v5291_v42 }
 0x97b   :  { %v18351_v29 = vsub.f32 %v5262_v2, %v5286_v44  ;;  %v5282_v35 = vpop.xlane.xlu0 %5281  ;;  %v5310_v54 = vsel %vm231_vm0, %v5300_v28, 0.0 }
 0x97c   :  { %v5290_v62 = vmul.f32 0.03125, %v5282_v35  ;;  %5311 = vadd.xlane.f32.xlu1 %v5310_v54  ;;  %v5303_v33 = vmul.f32 %v18349_v37, %v18349_v37 }
 0x97d   :  { %v5298_v41 = vmul.f32 %v18351_v29, %v18351_v29 }
 0x97e   :  { %v18358_v39 = vsub.f32 %v5266_v17, %v5290_v62  ;;  %v5319_v50 = vsel %vm231_vm0, %v5303_v33, 0.0 }
 0x97f   :  { %5320 = vadd.xlane.f32.xlu0 %v5319_v50  ;;  %v5279_v12 = vpop.xlane.xlu0 %5278  ;;  %v5304_v38 = vsel %vm231_vm0, %v5298_v41, 0.0 }
 0x980   :  { %v5289_v7 = vmul.f32 0.03125, %v5279_v12  ;;  %5305 = vadd.xlane.f32.xlu1 %v5304_v38  ;;  %v5302_v56 = vmul.f32 %v18358_v39, %v18358_v39 }
 0x982   :  { %v18364_v59 = vsub.f32 %v5265_v3, %v5289_v7  ;;  %v5316_v11 = vsel %vm231_vm0, %v5302_v56, 0.0  ;;  %v190_v56 = vld [vmem:[%s20085_s4] sm:$0x1] }
 0x983   :  { %5317 = vadd.xlane.f32.xlu0 %v5316_v11 }
 0x984   :  { %v5301_v45 = vmul.f32 %v18364_v59, %v18364_v59 }
 0x986   :  { %v5313_v24 = vsel %vm231_vm0, %v5301_v45, 0.0 }
 0x987   :  { %5314 = vadd.xlane.f32.xlu0 %v5313_v24 }
 0xa01   :  { %v5309_v10 = vpop.xlane.xlu1 %5308 }
 0xa02   :  { %v5323_v57 = vmul.f32 0.03125, %v5309_v10 }
 0xa04   :  { %v5329_v55 = vadd.f32 1e-12, %v5323_v57 }
 0xa06   :  { %16895 = vrsqrt.f32 %v5329_v55 }
 0xa09   :  { %v5312_v0 = vpop.xlane.xlu1 %5311 }
 0xa0a   :  { %v5324_v61 = vmul.f32 0.03125, %v5312_v0 }
 0xa0c   :  { %v5330_v4 = vadd.f32 1e-12, %v5324_v61  ;;  %v5321_v34 = vpop.xlane.xlu0 %5320 }
 0xa0d   :  { %v5327_v27 = vmul.f32 0.03125, %v5321_v34  ;;  %v5306_v26 = vpop.xlane.xlu1 %5305 }
 0xa0e   :  { %16897 = vrsqrt.f32 %v5330_v4  ;;  %v5322_v23 = vmul.f32 0.03125, %v5306_v26 }
 0xa0f   :  { %v5333_v63 = vadd.f32 1e-12, %v5327_v27 }
 0xa10   :  { %v16896_v60 = vpop.eup %16895  ;;  %v5328_v2 = vadd.f32 1e-12, %v5322_v23  ;;  %v5318_v14 = vpop.xlane.xlu0 %5317 }
 0xa11   :  { %v5341_v16 = vmul.f32 %v16896_v60, %v18340_v51  ;;  %16899 = vrsqrt.f32 %v5333_v63  ;;  %v5326_v52 = vmul.f32 0.03125, %v5318_v14 }
 0xa12   :  { %16901 = vrsqrt.f32 %v5328_v2 }
 0xa13   :  { %v5353_v17 = vmul.f32 %v14904_v1, %v5341_v16  ;;  %v5332_v48 = vadd.f32 1e-12, %v5326_v52  ;;  %v14952_v16 = vld [vmem:[#allocation5] ss:$0 sm:$0xff] }
 0xa14   :  { %v5315_v21 = vpop.xlane.xlu0 %5314 }
 0xa15   :  { %v5365_v3 = vadd.f32 %v14905_v53, %v5353_v17  ;;  %16903 = vrsqrt.f32 %v5332_v48  ;;  %v5325_v32 = vmul.f32 0.03125, %v5315_v21 }
 0xa17   :  { %5371 = vst.msk [vmem:[#allocation8 + $0x8] sm:$0xff] %vm231_vm0, %v5365_v3  ;;  %v5331_v18 = vadd.f32 1e-12, %v5325_v32 }
 0xa18   :  { %v16898_v31 = vpop.eup %16897 }
 0xa19   :  { %v5342_v20 = vmul.f32 %v16898_v31, %v18345_v5  ;;  %16905 = vrsqrt.f32 %v5331_v18 }
 0xa1b   :  { %v16900_v51 = vpop.eup %16899  ;;  %v5354_v30 = vmul.f32 %v14904_v1, %v5342_v20 }
 0xa1c   :  { %v16902_v43 = vpop.eup %16901  ;;  %v5345_v8 = vmul.f32 %v16900_v51, %v18349_v37  ;;  %v5382_v37 = vrot.slane %v5365_v3, 7  ;;  %v14953_v3 = vld [vmem:[#allocation5 + $0x1] ss:$0 sm:$0xff] }
 0xa1d   :  { %v5366_v36 = vadd.f32 %v14905_v53, %v5354_v30  ;;  %v5340_v40 = vmul.f32 %v16902_v43, %v18351_v29 }
 0xa1e   :  { %v5357_v42 = vmul.f32 %v14904_v1, %v5345_v8 }
 0xa1f   :  { %v16904_v6 = vpop.eup %16903  ;;  %5372 = vst.msk [vmem:[#allocation8 + $0x10] sm:$0xff] %vm231_vm0, %v5366_v36  ;;  %v5352_v44 = vmul.f32 %v14904_v1, %v5340_v40  ;;  %v5385_v12 = vrot.slane %v5366_v36, 6 }
 0xa20   :  { %v5369_v28 = vadd.f32 %v14905_v53, %v5357_v42  ;;  %v5344_v35 = vmul.f32 %v16904_v6, %v18358_v39 }
 0xa21   :  { %v5364_v54 = vadd.f32 %v14905_v53, %v5352_v44 }
 0xa22   :  { %5375 = vst.msk [vmem:[#allocation8 + $0x28] sm:$0xff] %vm231_vm0, %v5369_v28  ;;  %v5356_v5 = vmul.f32 %v14904_v1, %v5344_v35  ;;  %v5390_v7 = vrot.slane %v5369_v28, 6 }
 0xa23   :  { %v16906_v62 = vpop.eup %16905  ;;  %5370 = vst.msk [vmem:[#allocation8] sm:$0xff] %vm231_vm0, %v5364_v54  ;;  %v5384_v41 = vsel %vm5383_vm4, %v5382_v37, %v5364_v54 }
 0xa24   :  { %v5368_v33 = vadd.f32 %v14905_v53, %v5356_v5  ;;  %v5343_v29 = vmul.f32 %v16906_v62, %v18364_v59  ;;  %v5387_v11 = vsel %vm5386_vm5, %v5385_v12, %v5384_v41 }
 0xa25   :  { %v5395_v24 = vsel %vm5394_vm6, %v190_v56, %v5387_v11 }
 0xa26   :  { %5374 = vst.msk [vmem:[#allocation8 + $0x20] sm:$0xff] %vm231_vm0, %v5368_v33  ;;  %v5355_v50 = vmul.f32 %v14904_v1, %v5343_v29  ;;  %v5388_v39 = vrot.slane %v5368_v33, 7 }
 0xa28   :  { %v5367_v38 = vadd.f32 %v14905_v53, %v5355_v50 }
 0xa2a   :  { %5373 = vst.msk [vmem:[#allocation8 + $0x18] sm:$0xff] %vm231_vm0, %v5367_v38  ;;  %v5389_v59 = vsel %vm5383_vm4, %v5388_v39, %v5367_v38 }
 0xa2b   :  { %v5391_v45 = vsel %vm5386_vm5, %v5390_v7, %v5389_v59 }
 0xa2c   :  { %v5396_v9 = vsel %vm5394_vm6, %v190_v56, %v5391_v45 }
 0xa2d   :  { %v18412_v49 = vcombine.low %v5395_v24, %v5396_v9 }
 0xa2f   :  { %15994 = vmatmul.mubr.msk.f32.vlgmr.msra.gmra.mrb[62].mxu1 %vm231_vm0, %v18412_v49 }
 0xa30   :  { %15998 = vmatprep.mubr.msk.f32.mxu1 %vm17235_vm1, %v17233_v25 }
 0xb02   :  { %v5514_v46 = vpop.f32.mrb[62].mxu1 }
 0xb03   :  { %v18421_v47 = vadd.f32 %v14934_v22, %v5514_v46  ;;  %v15995_v58 = vpop.f32.mrb[63].mxu1 }
 0xb05   :  { %5520 = vrot.lane.b32.xlu1 %v18421_v47, %s17231_s2  ;;  %v18427_v10 = vcombine.high %v18421_v47, %v18421_v47 }
 0xb07   :  { %5522 = vrot.lane.b32.xlu0 %v18427_v10, %s17231_s2 }
 0xb09   :  { %5524 = vrot.lane.b32.xlu1 %v18421_v47, %s17232_s25 }
 0xb0b   :  { %5528 = vrot.lane.b32.xlu0 %v18421_v47, %s17234_s26 }
 0xb0d   :  { %5526 = vrot.lane.b32.xlu1 %v18427_v10, %s17232_s25 }
 0xb0f   :  { %5532 = vrot.lane.b32.xlu0 %v18421_v47, %s17236_s27 }
 0xb11   :  { %5530 = vrot.lane.b32.xlu1 %v18427_v10, %s17234_s26 }
 0xb15   :  { %5608 = vrot.lane.b32.xlu1 %v18427_v10, %s17236_s27 }
 0xb77   :  { %v18443_v57 = vpop.permute.xlu1 %5520 }
 0xb78   :  { %5684 = vrot.lane.b32.xlu0 %v18443_v57, %s17236_s27 }
 0xb79   :  { %v18447_v55 = vpop.permute.xlu0 %5522 }
 0xb7a   :  { %5760 = vrot.lane.b32.xlu1 %v18447_v55, %s17236_s27 }
 0xb7b   :  { %v18451_v0 = vpop.permute.xlu1 %5524 }
 0xb7c   :  { %5836 = vrot.lane.b32.xlu0 %v18451_v0, %s17236_s27 }
 0xb7d   :  { %v18455_v61 = vpop.permute.xlu0 %5528 }
 0xb7f   :  { %v18457_v4 = vpop.permute.xlu1 %5526 }
 0xb80   :  { %5912 = vrot.lane.b32.xlu1 %v18457_v4, %s17236_s27  ;;  %5988 = vrot.lane.b32.xlu0 %v18455_v61, %s17236_s27 }
 0xb81   :  { %v5533_v34 = vpop.permute.xlu0 %5532 }
 0xb82   :  { %15997 = vmatpush3.xpose.msk.msra.mxu1 %vm389_vm2, %v5533_v34 }
 0xb83   :  { %v18464_v27 = vpop.permute.xlu1 %5530  ;;  %16001 = vmatprep.subr.mxu1 %v17233_v25 }
 0xb84   :  { %6064 = vrot.lane.b32.xlu1 %v18464_v27, %s17236_s27 }
 0xb85   :  { %15999 = vmatmul.mubr.msk.f32.vlgmr.msra.gmra.mrb[64].mxu1 %vm389_vm2, %v18421_v47 }
 0xb86   :  { %16003 = vmatprep.mubr.msk.f32.mxu1 %vm17235_vm1, %v17233_v25 }
 0xb87   :  { %v5609_v26 = vpop.permute.xlu1 %5608 }
 0xb88   :  { %16002 = vmatpush3.xpose.msk.msra.mxu1 %vm389_vm2, %v5609_v26 }
 0xb89   :  { %16006 = vmatprep.subr.mxu1 %v17233_v25 }
 0xb8b   :  { %16004 = vmatmul.mubr.msk.f32.vlgmr.msra.gmra.mrb[66].mxu1 %vm389_vm2, %v18427_v10 }
 0xb8c   :  { %16008 = vmatprep.mubr.msk.f32.mxu1 %vm17235_vm1, %v17233_v25 }
 0xbea   :  { %v5685_v23 = vpop.permute.xlu0 %5684 }
 0xbeb   :  { %16007 = vmatpush3.xpose.msk.msra.mxu1 %vm389_vm2, %v5685_v23 }
 0xbec   :  { %v5761_v63 = vpop.permute.xlu1 %5760  ;;  %16016 = vmatprep.subr.mxu1 %v17233_v25 }
 0xbed   :  { %16012 = vmatpush3.xpose.msk.msra.mxu0 %vm389_vm2, %v5761_v63 }
 0xbee   :  { %16009 = vmatmul.mubr.msk.f32.vlgmr.msra.gmra.mrb[68].mxu1 %vm389_vm2, %v18443_v57  ;;  %v5837_v60 = vpop.permute.xlu0 %5836  ;;  %16021 = vmatprep.subr.mxu0 %v17233_v25 }
 0xbef   :  { %16017 = vmatpush3.xpose.msk.msra.mxu1 %vm389_vm2, %v5837_v60  ;;  %16018 = vmatprep.mubr.msk.f32.mxu1 %vm17235_vm1, %v17233_v25 }
 0xbf0   :  { %16014 = vmatmul.mubr.msk.f32.vlgmr.msra.gmra.mrb[58].mxu0 %vm389_vm2, %v18447_v55  ;;  %16026 = vmatprep.subr.mxu1 %v17233_v25 }
 0xbf1   :  { %16023 = vmatprep.mubr.msk.f32.mxu0 %vm17235_vm1, %v17233_v25 }
 0xbf2   :  { %v5913_v1 = vpop.permute.xlu1 %5912  ;;  %16019 = vmatmul.mubr.msk.f32.vlgmr.msra.gmra.mrb[70].mxu1 %vm389_vm2, %v18451_v0  ;;  %v5989_v2 = vpop.permute.xlu0 %5988 }
 0xbf3   :  { %16022 = vmatpush3.xpose.msk.msra.mxu0 %vm389_vm2, %v5913_v1  ;;  %16027 = vmatpush3.xpose.msk.msra.mxu1 %vm389_vm2, %v5989_v2 }
 0xbf4   :  { %16028 = vmatprep.mubr.msk.f32.mxu1 %vm17235_vm1, %v17233_v25  ;;  %16031 = vmatprep.subr.mxu0 %v17233_v25 }
 0xbf5   :  { %16036 = vmatprep.subr.mxu1 %v17233_v25 }
 0xbf6   :  { %16024 = vmatmul.mubr.msk.f32.vlgmr.msra.gmra.mrb[60].mxu0 %vm389_vm2, %v18457_v4  ;;  %v6065_v14 = vpop.permute.xlu1 %6064  ;;  %16029 = vmatmul.mubr.msk.f32.vlgmr.msra.gmra.mrb[72].mxu1 %vm389_vm2, %v18455_v61 }
 0xbf7   :  { %16032 = vmatpush3.xpose.msk.msra.mxu0 %vm389_vm2, %v6065_v14  ;;  %16033 = vmatprep.mubr.msk.f32.mxu0 %vm17235_vm1, %v17233_v25 }
 0xbf8   :  { %16041 = vmatprep.subr.mxu0 %v17233_v25  ;;  %16038 = vmatprep.mubr.msk.f32.mxu1 %vm17235_vm1, %v17233_v25 }
 0xbfa   :  { %16034 = vmatmul.mubr.msk.f32.vlgmr.msra.gmra.mrb[62].mxu0 %vm389_vm2, %v18464_v27 }
 0xbfb   :  { %16043 = vmatprep.mubr.msk.f32.mxu0 %vm17235_vm1, %v17233_v25 }
 0xc58   :  { %v5604_v52 = vpop.f32.mrb[64].mxu1 }
 0xc59   :  { %v6140_v53 = vmul.f32 0.35355338, %v5604_v52  ;;  %v16000_v17 = vpop.f32.mrb[65].mxu1 }
 0xc5b   :  { %v6160_v48 = vadd.f32 %v14952_v16, %v6140_v53 }
 0xc5d   :  { %v6169_v21 = vsel %vm6168_vm7, %v6160_v48, -inf }
 0xc5e   :  { %6170 = vmax.xlane.f32.xlu0 %v6169_v21  ;;  %v5680_v32 = vpop.f32.mrb[66].mxu1 }
 0xc5f   :  { %v6141_v18 = vmul.f32 0.35355338, %v5680_v32  ;;  %v16005_v31 = vpop.f32.mrb[67].mxu1 }
 0xc61   :  { %v6161_v20 = vadd.f32 %v14953_v3, %v6141_v18 }
 0xc63   :  { %v6172_v51 = vsel %vm6168_vm7, %v6161_v20, -inf }
 0xc64   :  { %6173 = vmax.xlane.f32.xlu1 %v6172_v51 }
 0xcc1   :  { %v5756_v30 = vpop.f32.mrb[68].mxu1 }
 0xcc2   :  { %v6142_v43 = vmul.f32 0.35355338, %v5756_v30  ;;  %v16010_v8 = vpop.f32.mrb[69].mxu1 }
 0xcc3   :  { %v5832_v36 = vpop.f32.mrb[58].mxu0 }
 0xcc4   :  { %v6162_v40 = vadd.f32 %v14952_v16, %v6142_v43  ;;  %v6143_v42 = vmul.f32 0.35355338, %v5832_v36  ;;  %v16015_v6 = vpop.f32.mrb[59].mxu0 }
 0xcc5   :  { %v5908_v44 = vpop.f32.mrb[70].mxu1 }
 0xcc6   :  { %v6163_v28 = vadd.f32 %v14953_v3, %v6143_v42  ;;  %v6144_v35 = vmul.f32 0.35355338, %v5908_v44  ;;  %v16020_v54 = vpop.f32.mrb[71].mxu1  ;;  %v6175_v5 = vsel %vm6168_vm7, %v6162_v40, -inf }
 0xcc7   :  { %6176 = vmax.xlane.f32.xlu0 %v6175_v5 }
 0xcc8   :  { %v6164_v62 = vadd.f32 %v14952_v16, %v6144_v35  ;;  %v6178_v29 = vsel %vm6168_vm7, %v6163_v28, -inf }
 0xcc9   :  { %v5984_v37 = vpop.f32.mrb[60].mxu0  ;;  %v6060_v33 = vpop.f32.mrb[72].mxu1 }
 0xcca   :  { %v6145_v41 = vmul.f32 0.35355338, %v5984_v37  ;;  %v6146_v50 = vmul.f32 0.35355338, %v6060_v33  ;;  %v16025_v12 = vpop.f32.mrb[61].mxu0  ;;  %v16030_v39 = vpop.f32.mrb[73].mxu1 }
 0xccb   :  { %6179 = vmax.xlane.f32.xlu0 %v6178_v29  ;;  %v6181_v38 = vsel %vm6168_vm7, %v6164_v62, -inf }
 0xccc   :  { %v6165_v7 = vadd.f32 %v14953_v3, %v6145_v41  ;;  %v6166_v56 = vadd.f32 %v14952_v16, %v6146_v50  ;;  %6182 = vmax.xlane.f32.xlu1 %v6181_v38 }
 0xccd   :  { %v6136_v11 = vpop.f32.mrb[62].mxu0 }
 0xcce   :  { %v6147_v59 = vmul.f32 0.35355338, %v6136_v11  ;;  %v16035_v45 = vpop.f32.mrb[63].mxu0  ;;  %v6184_v24 = vsel %vm6168_vm7, %v6165_v7, -inf  ;;  %v6187_v9 = vsel %vm6168_vm7, %v6166_v56, -inf }
 0xccf   :  { %6185 = vmax.xlane.f32.xlu0 %v6184_v24 }
 0xcd0   :  { %v6167_v22 = vadd.f32 %v14953_v3, %v6147_v59  ;;  %6188 = vmax.xlane.f32.xlu1 %v6187_v9 }
 0xcd2   :  { %v6190_v46 = vsel %vm6168_vm7, %v6167_v22, -inf }
 0xcd3   :  { %6191 = vmax.xlane.f32.xlu0 %v6190_v46 }
 0xce1   :  { %6257 = vrot.lane.b32.xlu1 %v18421_v47, %s17237_s30 }
 0xce5   :  { %6413 = vrot.lane.b32.xlu1 %v18443_v57, %s17237_s30 }
 0xce9   :  { %6490 = vrot.lane.b32.xlu1 %v18447_v55, %s17237_s30  ;;  %6336 = vrot.lane.b32.xlu0 %v18427_v10, %s17237_s30 }
 0xceb   :  { %v6171_v26 = vpop.xlane.xlu0 %6170 }
 0xcec   :  { %v6193_v47 = vsub.f32 %v6160_v48, %v6171_v26 }
 0xced   :  { %6644 = vrot.lane.b32.xlu1 %v18457_v4, %s17237_s30  ;;  %6567 = vrot.lane.b32.xlu0 %v18451_v0, %s17237_s30 }
 0xcee   :  { %v6201_v63 = vmul.f32 1.442695, %v6193_v47 }
 0xcf1   :  { %v6174_v58 = vpop.xlane.xlu1 %6173 }
 0xcf2   :  { %v6194_v34 = vsub.f32 %v6161_v20, %v6174_v58 }
 0xcf4   :  { %v6203_v23 = vmul.f32 1.442695, %v6194_v34 }
 0xcf6   :  { %16907 = vpow2.f32 %v6203_v23 }
 0xcf7   :  { %16909 = vpow2.f32 %v6201_v63 }
 0xd00   :  { %v18535_v57 = vpop.eup %16907 }
 0xd01   :  { %v6220_v55 = vsel %vm6168_vm7, %v18535_v57, 0.0  ;;  %v18539_v10 = vpop.eup %16909 }
 0xd02   :  { %v6217_v4 = vsel %vm6168_vm7, %v18539_v10, 0.0 }
 0xd0c   :  { %6221 = vadd.xlane.f32.xlu0 %v6220_v55 }
 0xd11   :  { %6218 = vadd.xlane.f32.xlu1 %v6217_v4 }
 0xd54   :  { %v6177_v0 = vpop.xlane.xlu0 %6176 }
 0xd55   :  { %v6195_v60 = vsub.f32 %v6162_v40, %v6177_v0  ;;  %v14911_v0 = vld [vmem:[%s20088_s7 + $0x40] sm:$0xff] }
 0xd57   :  { %v6205_v1 = vmul.f32 1.442695, %v6195_v60 }
 0xd58   :  { %v6180_v2 = vpop.xlane.xlu0 %6179 }
 0xd59   :  { %16911 = vpow2.f32 %v6205_v1  ;;  %v6196_v14 = vsub.f32 %v6163_v28, %v6180_v2  ;;  %v6183_v16 = vpop.xlane.xlu1 %6182 }
 0xd5a   :  { %v6197_v52 = vsub.f32 %v6164_v62, %v6183_v16 }
 0xd5b   :  { %v6207_v53 = vmul.f32 1.442695, %v6196_v14  ;;  %v14912_v14 = vld [vmem:[%s20088_s7 + $0x48] sm:$0xff] }
 0xd5c   :  { %v6209_v17 = vmul.f32 1.442695, %v6197_v52  ;;  %v6186_v48 = vpop.xlane.xlu0 %6185 }
 0xd5d   :  { %16913 = vpow2.f32 %v6207_v53  ;;  %v6198_v21 = vsub.f32 %v6165_v7, %v6186_v48  ;;  %v6189_v3 = vpop.xlane.xlu1 %6188 }
 0xd5e   :  { %16915 = vpow2.f32 %v6209_v17  ;;  %v6199_v32 = vsub.f32 %v6166_v56, %v6189_v3 }
 0xd5f   :  { %v6211_v18 = vmul.f32 1.442695, %v6198_v21  ;;  %v14913_v21 = vld [vmem:[%s20088_s7 + $0x50] sm:$0xff] }
 0xd60   :  { %v6213_v31 = vmul.f32 1.442695, %v6199_v32  ;;  %v6192_v20 = vpop.xlane.xlu0 %6191 }
 0xd61   :  { %16917 = vpow2.f32 %v6211_v18  ;;  %v6200_v51 = vsub.f32 %v6167_v22, %v6192_v20  ;;  %v6258_v30 = vpop.permute.xlu1 %6257 }
 0xd62   :  { %16919 = vpow2.f32 %v6213_v31  ;;  %16037 = vmatpush3.msk.msra.mxu1 %vm6263_vm8, %v6258_v30  ;;  %v14914_v30 = vld [vmem:[%s20088_s7 + $0x58] sm:$0xff] }
 0xd63   :  { %v16912_v43 = vpop.eup %16911  ;;  %v6215_v8 = vmul.f32 1.442695, %v6200_v51  ;;  %16046 = vmatprep.subr.mxu1 %v17233_v25 }
 0xd64   :  { %v6337_v36 = vpop.permute.xlu0 %6336  ;;  %v6223_v40 = vsel %vm6168_vm7, %v16912_v43, 0.0 }
 0xd65   :  { %16921 = vpow2.f32 %v6215_v8  ;;  %16042 = vmatpush3.msk.msra.mxu0 %vm6263_vm8, %v6337_v36  ;;  %6224 = vadd.xlane.f32.xlu1 %v6223_v40  ;;  %v6414_v29 = vpop.permute.xlu1 %6413 }
 0xd66   :  { %16051 = vmatprep.subr.mxu0 %v17233_v25 }
 0xd67   :  { %v16914_v42 = vpop.eup %16913 }
 0xd68   :  { %v16916_v6 = vpop.eup %16915  ;;  %v6226_v44 = vsel %vm6168_vm7, %v16914_v42, 0.0  ;;  %v6568_v50 = vpop.permute.xlu0 %6567 }
 0xd69   :  { %6227 = vadd.xlane.f32.xlu0 %v6226_v44  ;;  %v6229_v28 = vsel %vm6168_vm7, %v16916_v6, 0.0  ;;  %v6491_v41 = vpop.permute.xlu1 %6490 }
 0xd6a   :  { %6230 = vadd.xlane.f32.xlu1 %v6229_v28 }
 0xd6b   :  { %v16918_v35 = vpop.eup %16917 }
 0xd6c   :  { %v18550_v54 = vpop.eup %16919  ;;  %v6232_v5 = vsel %vm6168_vm7, %v16918_v35, 0.0 }
 0xd6d   :  { %6233 = vadd.xlane.f32.xlu0 %v6232_v5  ;;  %v6235_v62 = vsel %vm6168_vm7, %v18550_v54, 0.0  ;;  %v6645_v39 = vpop.permute.xlu1 %6644 }
 0xd6e   :  { %6236 = vadd.xlane.f32.xlu1 %v6235_v62 }
 0xd6f   :  { %v18555_v37 = vpop.eup %16921 }
 0xd70   :  { %v6238_v33 = vsel %vm6168_vm7, %v18555_v37, 0.0 }
 0xd71   :  { %6239 = vadd.xlane.f32.xlu0 %v6238_v33 }
 0xd7f   :  { %6798 = vrot.lane.b32.xlu1 %v18464_v27, %s17237_s30 }
 0xd87   :  { %6721 = vrot.lane.b32.xlu0 %v18455_v61, %s17237_s30 }
 0xd99   :  { %v6222_v12 = vpop.xlane.xlu0 %6221 }
 0xd9a   :  { %16923 = vrcp.f32 %v6222_v12  ;;  %v14974_v12 = vld [vmem:[%s20089_s8 + $0x2] ss:$0 sm:$0xff] }
 0xd9e   :  { %v6219_v38 = vpop.xlane.xlu1 %6218 }
 0xd9f   :  { %16925 = vrcp.f32 %v6219_v38 }
 0xda4   :  { %v16924_v7 = vpop.eup %16923 }
 0xda5   :  { %v6244_v56 = vmul.f32 %v16924_v7, %v18535_v57 }
 0xda7   :  { %16044 = vmatmul.mubr.msk.f32.vlgmr.msra.gmra.mrb[64].mxu0 %vm6259_vm9, %v6244_v56 }
 0xda8   :  { %16052 = vmatpush3.msk.msra.mxu0 %vm6263_vm8, %v6491_v41  ;;  %16053 = vmatprep.mubr.msk.f32.mxu0 %vm17235_vm1, %v17233_v25 }
 0xda9   :  { %v16926_v61 = vpop.eup %16925  ;;  %16061 = vmatprep.subr.mxu0 %v17233_v25 }
 0xdaa   :  { %v6242_v27 = vmul.f32 %v16926_v61, %v18539_v10 }
 0xdac   :  { %16039 = vmatmul.mubr.msk.f32.vlgmr.msra.gmra.mrb[74].mxu1 %vm6259_vm9, %v6242_v27 }
 0xdad   :  { %16047 = vmatpush3.msk.msra.mxu1 %vm6263_vm8, %v6414_v29  ;;  %16048 = vmatprep.mubr.msk.f32.mxu1 %vm17235_vm1, %v17233_v25 }
 0xdae   :  { %16056 = vmatprep.subr.mxu1 %v17233_v25 }
 0xdf2   :  { %v6225_v11 = vpop.xlane.xlu1 %6224 }
 0xdf3   :  { %16927 = vrcp.f32 %v6225_v11 }
 0xdf6   :  { %v6228_v59 = vpop.xlane.xlu0 %6227 }
 0xdf7   :  { %16929 = vrcp.f32 %v6228_v59  ;;  %v6231_v45 = vpop.xlane.xlu1 %6230 }
 0xdf8   :  { %16931 = vrcp.f32 %v6231_v45 }
 0xdfa   :  { %v6234_v24 = vpop.xlane.xlu0 %6233 }
 0xdfb   :  { %16933 = vrcp.f32 %v6234_v24  ;;  %v6237_v9 = vpop.xlane.xlu1 %6236 }
 0xdfc   :  { %16935 = vrcp.f32 %v6237_v9 }
 0xdfd   :  { %v16928_v22 = vpop.eup %16927 }
 0xdfe   :  { %v6240_v46 = vpop.xlane.xlu0 %6239  ;;  %v6246_v58 = vmul.f32 %v16928_v22, %v16912_v43  ;;  %v14918_v22 = vld [vmem:[%s20092_s11 + $0x40] sm:$0xff] }
 0xdff   :  { %16937 = vrcp.f32 %v6240_v46  ;;  %v6799_v60 = vpop.permute.xlu1 %6798  ;;  %v14919_v46 = vld [vmem:[%s20092_s11 + $0x48] sm:$0xff] }
 0xe00   :  { %16049 = vmatmul.mubr.msk.f32.vlgmr.msra.gmra.mrb[76].mxu1 %vm6259_vm9, %v6246_v58  ;;  %v16649_v58 = vpack.c.bf16 %v14919_v46, %v14918_v22  ;;  %v14981_v46 = vld [vmem:[%s20096_s15 + $0x2] ss:$0 sm:$0xff] }
 0xe01   :  { %v16930_v34 = vpop.eup %16929  ;;  %16057 = vmatpush3.msk.msra.mxu1 %vm6263_vm8, %v6568_v50  ;;  %16058 = vmatprep.mubr.msk.f32.mxu1 %vm17235_vm1, %v17233_v25 }
 0xe02   :  { %v16932_v26 = vpop.eup %16931  ;;  %16066 = vmatprep.subr.mxu1 %v17233_v25  ;;  %v6248_v23 = vmul.f32 %v16930_v34, %v16914_v42  ;;  %v6722_v47 = vpop.permute.xlu0 %6721  ;;  %v14921_v34 = vld [vmem:[%s20092_s11 + $0x58] sm:$0xff] }
 0xe03   :  { %v6250_v63 = vmul.f32 %v16932_v26, %v16916_v6 }
 0xe04   :  { %16054 = vmatmul.mubr.msk.f32.vlgmr.msra.gmra.mrb[66].mxu0 %vm6259_vm9, %v6248_v23 }
 0xe05   :  { %v16934_v57 = vpop.eup %16933  ;;  %16059 = vmatmul.mubr.msk.f32.vlgmr.msra.gmra.mrb[78].mxu1 %vm6259_vm9, %v6250_v63  ;;  %16062 = vmatpush3.msk.msra.mxu0 %vm6263_vm8, %v6645_v39 }
 0xe06   :  { %v16936_v55 = vpop.eup %16935  ;;  %16067 = vmatpush3.msk.msra.mxu1 %vm6263_vm8, %v6722_v47  ;;  %16063 = vmatprep.mubr.msk.f32.mxu0 %vm17235_vm1, %v17233_v25  ;;  %v6252_v10 = vmul.f32 %v16934_v57, %v16918_v35 }
 0xe07   :  { %16068 = vmatprep.mubr.msk.f32.mxu1 %vm17235_vm1, %v17233_v25  ;;  %16071 = vmatprep.subr.mxu0 %v17233_v25  ;;  %v6254_v4 = vmul.f32 %v16936_v55, %v18550_v54  ;;  %v14975_v55 = vld [vmem:[%s20090_s9 + $0x2] ss:$0 sm:$0xff] }
 0xe08   :  { %16064 = vmatmul.mubr.msk.f32.vlgmr.msra.gmra.mrb[68].mxu0 %vm6259_vm9, %v6252_v10  ;;  %16076 = vmatprep.subr.mxu1 %v17233_v25 }
 0xe09   :  { %v16938_v1 = vpop.eup %16937  ;;  %16069 = vmatmul.mubr.msk.f32.vlgmr.msra.gmra.mrb[80].mxu1 %vm6259_vm9, %v6254_v4  ;;  %16072 = vmatpush3.msk.msra.mxu0 %vm6263_vm8, %v6799_v60  ;;  %v14976_v4 = vld [vmem:[%s20091_s10 + $0x2] ss:$0 sm:$0xff] }
 0xe0a   :  { %16073 = vmatprep.mubr.msk.f32.mxu0 %vm17235_vm1, %v17233_v25  ;;  %v6256_v2 = vmul.f32 %v16938_v1, %v18555_v37  ;;  %16077 = vmatpush3.msra.mxu1 %v14911_v0  ;;  %v14923_v1 = vld [vmem:[%s20094_s13 + $0x80] sm:$0xff] }
 0xe0b   :  { %16078 = vmatprep.mubr.msk.f32.mxu1 %vm17235_vm1, %v17233_v25  ;;  %16081 = vmatprep.subr.mxu0 %v17233_v25 }
 0xe0c   :  { %16074 = vmatmul.mubr.msk.f32.vlgmr.msra.gmra.mrb[70].mxu0 %vm6259_vm9, %v6256_v2  ;;  %16086 = vmatprep.subr.mxu1 %v17233_v25  ;;  %v14924_v2 = vld [vmem:[%s20094_s13 + $0x88] sm:$0xff] }
 0xe0d   :  { %16083 = vmatprep.mubr.msk.f32.mxu0 %vm17235_vm1, %v17233_v25  ;;  %16082 = vmatpush3.msra.mxu0 %v14912_v14  ;;  %v16655_v14 = vpack.c.bf16 %v14924_v2, %v14923_v1 }
 0xe0e   :  { %16091 = vmatprep.subr.mxu0 %v17233_v25 }
 0xe7a   :  { %v6409_v16 = vpop.f32.mrb[64].mxu0 }
 0xe7b   :  { %v16045_v52 = vpop.f32.mrb[65].mxu0 }
 0xe7c   :  { %v14926_v52 = vld [vmem:[%s20094_s13 + $0x98] sm:$0xff] }
 0xe7f   :  { %v6332_v53 = vpop.f32.mrb[74].mxu1 }
 0xe80   :  { %v6877_v17 = vcombine.low %v6332_v53, %v6409_v16  ;;  %v16040_v48 = vpop.f32.mrb[75].mxu1  ;;  %v14925_v16 = vld [vmem:[%s20094_s13 + $0x90] sm:$0xff] }
 0xe81   :  { %v16658_v53 = vpack.c.bf16 %v14926_v52, %v14925_v16  ;;  %v14928_v48 = vld [vmem:[%s20094_s13 + $0xa8] sm:$0xff] }
 0xe82   :  { %16079 = vmatmul.mubr.msk.f32.vlgmr.msra.gmra.mrb[82].mxu1 %vm389_vm2, %v6877_v17  ;;  %v14927_v17 = vld [vmem:[%s20094_s13 + $0xa0] sm:$0xff] }
 0xe83   :  { %16087 = vmatpush3.msra.mxu1 %v14913_v21  ;;  %16088 = vmatprep.mubr.msk.f32.mxu1 %vm17235_vm1, %v17233_v25  ;;  %v16661_v21 = vpack.c.bf16 %v14928_v48, %v14927_v17 }
 0xe84   :  { %16648 = vmatprep.subr.bf16.mxu1 %v17239_v19 }
 0xed3   :  { %v6486_v3 = vpop.f32.mrb[76].mxu1 }
 0xed4   :  { %v16050_v32 = vpop.f32.mrb[77].mxu1 }
 0xed5   :  { %v14930_v32 = vld [vmem:[%s20094_s13 + $0xb8] sm:$0xff] }
 0xed7   :  { %v6563_v18 = vpop.f32.mrb[66].mxu0 }
 0xed8   :  { %v6952_v31 = vcombine.low %v6486_v3, %v6563_v18  ;;  %v6640_v20 = vpop.f32.mrb[78].mxu1  ;;  %v16055_v51 = vpop.f32.mrb[67].mxu0  ;;  %v14929_v3 = vld [vmem:[%s20094_s13 + $0xb0] sm:$0xff] }
 0xed9   :  { %v16060_v43 = vpop.f32.mrb[79].mxu1  ;;  %v16664_v18 = vpack.c.bf16 %v14930_v32, %v14929_v3  ;;  %v15011_v32 = vld [vmem:[%s20087_s6 + $0x1] ss:$0 sm:$0xff] }
 0xeda   :  { %16084 = vmatmul.mubr.msk.f32.vlgmr.msra.gmra.mrb[72].mxu0 %vm389_vm2, %v6952_v31  ;;  %v14977_v31 = vld [vmem:[%s20093_s12 + $0x2] ss:$0 sm:$0xff] }
 0xedb   :  { %v6717_v8 = vpop.f32.mrb[68].mxu0  ;;  %16092 = vmatpush3.msra.mxu0 %v14914_v30  ;;  %16093 = vmatprep.mubr.msk.f32.mxu0 %vm17235_vm1, %v17233_v25 }
 0xedc   :  { %v7027_v36 = vcombine.low %v6640_v20, %v6717_v8  ;;  %v6794_v40 = vpop.f32.mrb[80].mxu1  ;;  %v16065_v42 = vpop.f32.mrb[69].mxu0  ;;  %16654 = vmatprep.subr.bf16.mxu0 %v17239_v19 }
 0xedd   :  { %v16070_v6 = vpop.f32.mrb[81].mxu1 }
 0xede   :  { %16089 = vmatmul.mubr.msk.f32.vlgmr.msra.gmra.mrb[84].mxu1 %vm389_vm2, %v7027_v36 }
 0xedf   :  { %v6871_v44 = vpop.f32.mrb[70].mxu0  ;;  %16104 = vmatprep.mubr.msk.f32.mxu1 %vm17235_vm1, %v17233_v25  ;;  %16650 = vmatpush3.bf16.msra.mxu1 %v16649_v58 }
 0xee0   :  { %v7102_v28 = vcombine.low %v6794_v40, %v6871_v44  ;;  %v16075_v35 = vpop.f32.mrb[71].mxu0  ;;  %16651 = vmatprep.subr.bf16.mxu1 %v17239_v19 }
 0xee2   :  { %16094 = vmatmul.mubr.msk.f32.vlgmr.msra.gmra.mrb[74].mxu0 %vm389_vm2, %v7102_v28 }
 0xee3   :  { %16123 = vmatprep.mubr.msk.f32.mxu0 %vm17235_vm1, %v17233_v25  ;;  %16656 = vmatpush3.bf16.msra.mxu0 %v16655_v14 }
 0xee4   :  { %16657 = vmatprep.subr.bf16.mxu0 %v17239_v19 }
 0xee7   :  { %16659 = vmatpush3.bf16.msra.mxu0 %v16658_v53 }
 0xee8   :  { %16660 = vmatprep.subr.bf16.mxu0 %v17239_v19 }
 0xeeb   :  { %16662 = vmatpush3.bf16.msra.mxu0 %v16661_v21 }
 0xeec   :  { %16663 = vmatprep.subr.bf16.mxu0 %v17239_v19 }
 0xeef   :  { %16665 = vmatpush3.bf16.msra.mxu0 %v16664_v18 }
 0xef0   :  { %16143 = vmatprep.subr.mxu0 %v17233_v25 }
 0xf55   :  { %v6946_v54 = vpop.f32.mrb[82].mxu1 }
 0xf56   :  { %v16080_v5 = vpop.f32.mrb[83].mxu1 }
 0xfad   :  { %v7021_v62 = vpop.f32.mrb[72].mxu0 }
 0xfae   :  { %v7175_v37 = vadd.f32 %v7021_v62, %v6946_v54  ;;  %v16085_v33 = vpop.f32.mrb[73].mxu0  ;;  %v14979_v54 = vld [vmem:[%s20095_s14 + $0x2] ss:$0 sm:$0xff] }
 0xfb1   :  { %v7096_v29 = vpop.f32.mrb[84].mxu1 }
 0xfb2   :  { %v7176_v41 = vadd.f32 %v7175_v37, %v7096_v29  ;;  %v16090_v50 = vpop.f32.mrb[85].mxu1 }
 0xfb5   :  { %v7171_v39 = vpop.f32.mrb[74].mxu0 }
 0xfb6   :  { %v7177_v38 = vadd.f32 %v7176_v41, %v7171_v39  ;;  %v16095_v7 = vpop.f32.mrb[75].mxu0 }
 0xfb7   :  { %v14983_v7 = vld [vmem:[%s20086_s5 + $0x20] sm:$0xff] }
 0xfb8   :  { %v7184_v56 = vadd.f32 %v14974_v12, %v7177_v38 }
 0xfba   :  { %v7186_v61 = vadd.f32 %v7184_v56, %v18412_v49  ;;  %v14920_v49 = vld [vmem:[%s20092_s11 + $0x50] sm:$0xff]  ;;  %v14984_v56 = vld [vmem:[%s20086_s5 + $0x28] sm:$0xff] }
 0xfbb   :  { %v16652_v26 = vpack.c.bf16 %v14921_v34, %v14920_v49  ;;  %v14982_v49 = vld [vmem:[%s20097_s16 + $0x2] ss:$0 sm:$0xff] }
 0xfbc   :  { %v7187_v27 = vsel %vm231_vm0, %v7186_v61, 0.0 }
 0xfbd   :  { %7188 = vadd.xlane.f32.xlu0 %v7187_v27  ;;  %16653 = vmatpush3.bf16.msra.mxu1 %v16652_v26  ;;  %v14985_v27 = vld [vmem:[%s20086_s5 + $0x30] sm:$0xff] }
0x104a   :  { %v7189_v11 = vpop.xlane.xlu0 %7188 }
0x104b   :  { %v7190_v59 = vmul.f32 0.03125, %v7189_v11  ;;  %v14986_v11 = vld [vmem:[%s20086_s5 + $0x38] sm:$0xff] }
0x104d   :  { %v7191_v45 = vsub.f32 %v7186_v61, %v7190_v59  ;;  %v16666_v61 = vpack.c.bf16 %v14984_v56, %v14983_v7  ;;  %v16670_v59 = vpack.c.bf16 %v14986_v11, %v14985_v27 }
0x104f   :  { %v7192_v24 = vmul.f32 %v7191_v45, %v7191_v45  ;;  %16667 = vmatprep.subr.bf16.mxu1 %v16666_v61 }
0x1051   :  { %v7193_v9 = vsel %vm231_vm0, %v7192_v24, 0.0 }
0x1052   :  { %7194 = vadd.xlane.f32.xlu1 %v7193_v9 }
0x10df   :  { %v7195_v23 = vpop.xlane.xlu1 %7194 }
0x10e0   :  { %v7196_v47 = vmul.f32 0.03125, %v7195_v23 }
0x10e2   :  { %v7197_v63 = vadd.f32 1e-12, %v7196_v47 }
0x10e4   :  { %16939 = vrsqrt.f32 %v7197_v63 }
0x10ee   :  { %v16940_v57 = vpop.eup %16939 }
0x10ef   :  { %v7199_v10 = vmul.f32 %v16940_v57, %v7191_v45 }
0x10f1   :  { %v7206_v0 = vmul.f32 %v14975_v55, %v7199_v10 }
0x10f3   :  { %v7213_v60 = vadd.f32 %v14976_v4, %v7206_v0 }
0x10f5   :  { %16105 = vmatmul.mubr.msk.f32.vlgmr.msra.gmra.mrb[86].mxu1 %vm231_vm0, %v7213_v60 }
0x10f6   :  { %16669 = vmatpush3.bf16.msra.mxu1 %v16666_v61 }
0x10f7   :  { %16671 = vmatprep.subr.bf16.mxu1 %v16670_v59 }
0x10fa   :  { %16673 = vmatpush3.bf16.msra.mxu1 %v16670_v59 }
0x10fb   :  { %16153 = vmatprep.subr.mxu1 %v17233_v25 }
0x11c8   :  { %v7289_v20 = vpop.f32.mrb[86].mxu1 }
0x11c9   :  { %v7290_v51 = vadd.f32 %v14977_v31, %v7289_v20  ;;  %v16106_v30 = vpop.f32.mrb[87].mxu1 }
0x11cb   :  { %v7293_v43 = vmul.f32 %v7290_v51, %v7290_v51 }
0x11cd   :  { %v7294_v8 = vmul.f32 %v7293_v43, %v7290_v51 }
0x11cf   :  { %v7295_v36 = vmul.f32 0.044715, %v7294_v8 }
0x11d1   :  { %v7296_v40 = vadd.f32 %v7295_v36, %v7290_v51 }
0x11d3   :  { %v7297_v42 = vmul.f32 0.7978846, %v7296_v40 }
0x11d5   :  { %16941 = vtanh.f32 %v7297_v42 }
0x11df   :  { %v16942_v6 = vpop.eup %16941 }
0x11e0   :  { %v7299_v44 = vadd.f32 1.0, %v16942_v6 }
0x11e2   :  { %v7300_v28 = vmul.f32 0.5, %v7299_v44 }
0x11e4   :  { %v7301_v35 = vmul.f32 %v7300_v28, %v7290_v51 }
0x11e6   :  { %16124 = vmatmul.mubr.msk.f32.vlgmr.msra.gmra.mrb[76].mxu0 %vm5148_vm3, %v7301_v35 }
0x11e7   :  { %16145 = vmatprep.mubr.msk.f32.mxu0 %vm17235_vm1, %v17233_v25 }
0x12b9   :  { %v7377_v5 = vpop.f32.mrb[76].mxu0 }
0x12ba   :  { %v7378_v62 = vadd.f32 %v14979_v54, %v7377_v5  ;;  %v16125_v37 = vpop.f32.mrb[77].mxu0 }
0x12bc   :  { %v7381_v33 = vadd.f32 %v7378_v62, %v7213_v60 }
0x12be   :  { %v7382_v29 = vsel %vm231_vm0, %v7381_v33, 0.0 }
0x12bf   :  { %7383 = vadd.xlane.f32.xlu0 %v7382_v29 }
0x134c   :  { %v7384_v41 = vpop.xlane.xlu0 %7383 }
0x134d   :  { %v7385_v50 = vmul.f32 0.03125, %v7384_v41 }
0x134f   :  { %v7386_v12 = vsub.f32 %v7381_v33, %v7385_v50 }
0x1351   :  { %v7387_v39 = vmul.f32 %v7386_v12, %v7386_v12 }
0x1353   :  { %v7388_v38 = vsel %vm231_vm0, %v7387_v39, 0.0 }
0x1354   :  { %7389 = vadd.xlane.f32.xlu0 %v7388_v38 }
0x13e1   :  { %v7390_v45 = vpop.xlane.xlu0 %7389 }
0x13e2   :  { %v7391_v24 = vmul.f32 0.03125, %v7390_v45 }
0x13e4   :  { %v7392_v9 = vadd.f32 1e-12, %v7391_v24 }
0x13e6   :  { %16943 = vrsqrt.f32 %v7392_v9 }
0x13f0   :  { %v16944_v22 = vpop.eup %16943 }
0x13f1   :  { %v7394_v58 = vmul.f32 %v16944_v22, %v7386_v12 }
0x13f3   :  { %v7401_v34 = vmul.f32 %v14981_v46, %v7394_v58 }
0x13f5   :  { %v18715_v26 = vadd.f32 %v14982_v49, %v7401_v34 }
0x13f7   :  { %v18719_v23 = vcombine.high %v18715_v26, %v18715_v26  ;;  %v7418_v47 = vrot.slane %v18715_v26, %v17715_v13 }
0x13f9   :  { %v7419_v63 = vcombine.high %v7418_v47, %v7418_v47  ;;  %v7426_v57 = vrot.slane %v7418_v47, %v17715_v13  ;;  %v7442_v55 = vrot.slane %v18719_v23, %v17715_v13 }
0x13fb   :  { %v7433_v10 = vrot.slane %v7419_v63, %v17715_v13  ;;  %v7434_v4 = vcombine.high %v7426_v57, %v7426_v57  ;;  %v7443_v0 = vcombine.high %v7442_v55, %v7442_v55  ;;  %v7450_v60 = vrot.slane %v7442_v55, %v17715_v13 }
0x13fd   :  { %v7435_v1 = vcombine.high %v7433_v10, %v7433_v10  ;;  %v7457_v2 = vrot.slane %v7443_v0, %v17715_v13  ;;  %v7458_v14 = vcombine.high %v7450_v60, %v7450_v60  ;;  %7467 = vst.msk [vmem:[#allocation8] sm:$0x1] %vm7466_vm10, %v7433_v10  ;;  %7468 = vst.msk [vmem:[#allocation8 + $0x8] sm:$0x1] %vm7466_vm10, %v7434_v4 }
0x13ff   :  { %v7459_v16 = vcombine.high %v7457_v2, %v7457_v2  ;;  %7471 = vst.msk [vmem:[#allocation8 + $0x20] sm:$0x1] %vm7466_vm10, %v7458_v14  ;;  %7469 = vst.msk [vmem:[#allocation8 + $0x10] sm:$0x1] %vm7466_vm10, %v7435_v1 }
0x1400   :  { %7470 = vst.msk [vmem:[#allocation8 + $0x18] sm:$0x1] %vm7466_vm10, %v7457_v2 }
0x1401   :  { %7472 = vst.msk [vmem:[#allocation8 + $0x28] sm:$0x1] %vm7466_vm10, %v7459_v16 }
0x1404   :  { %v7473_v52 = vld [vmem:[#allocation8] sm:$0xff]  ;;  %v7474_v53 = vld [vmem:[#allocation8 + $0x8] sm:$0xff] }
0x1405   :  { %16134 = vmatprep.mubr.msk.f32.mxu1 %vm231_vm0, %v7473_v52 }
0x1406   :  { %16135 = vmatmul.mubr.msk.f32.vlgmr.msra.gmra.mrb[88].mxu1 %vm231_vm0, %v7474_v53  ;;  %v7475_v17 = vld [vmem:[#allocation8 + $0x10] sm:$0xff]  ;;  %v7477_v21 = vld [vmem:[#allocation8 + $0x20] sm:$0xff] }
0x1407   :  { %16137 = vmatprep.mubr.msk.f32.mxu1 %vm231_vm0, %v7475_v17  ;;  %v7476_v48 = vld [vmem:[#allocation8 + $0x18] sm:$0xff] }
0x1408   :  { %v7478_v3 = vld [vmem:[#allocation8 + $0x28] sm:$0xff] }
0x140a   :  { %16138 = vmatmul.mubr.msk.f32.gmra.mrb[90].mxu1 %vm231_vm0, %v7476_v48 }
0x140b   :  { %16140 = vmatprep.mubr.msk.f32.mxu1 %vm231_vm0, %v7477_v21 }
0x140e   :  { %16141 = vmatmul.mubr.msk.f32.gmra.mrb[92].mxu1 %vm231_vm0, %v7478_v3  ;;  %v14782_v3 = vld.sshfl [vmem:[%s20110_s1] sm:$0x13 pattern:$0x75316420] }
0x140f   :  { %16155 = vmatprep.mubr.msk.f32.mxu1 %vm17235_vm1, %v17233_v25 }
0x14d9   :  { %v16136_v18 = vpop.f32.mrb[88].mxu1 }
0x14da   :  { %v18746_v31 = vadd.f32 %v16136_v18, %v15011_v32  ;;  %v7609_v20 = vpop.f32.mrb[89].mxu1  ;;  %v149_v18 = vcombine.high %v14782_v3, %v14782_v3 }
0x14db   :  { %v18748_v51 = vadd.f32 %v15011_v32, %v7609_v20 }
0x14dc   :  { %7646 = vrot.lane.b32.xlu0 %v18746_v31, %s17231_s2 }
0x14dd   :  { %7644 = vrot.lane.b32.xlu1 %v18748_v51, %s17231_s2  ;;  %v16139_v30 = vpop.f32.mrb[90].mxu1 }
0x14de   :  { %v7619_v43 = vpop.f32.mrb[91].mxu1  ;;  %v18758_v42 = vadd.f32 %v16139_v30, %v15011_v32 }
0x14df   :  { %v18754_v8 = vadd.f32 %v15011_v32, %v7619_v43  ;;  %v163_v43 = vrot.slane %v149_v18, %v17715_v13 }
0x14e1   :  { %v16142_v36 = vpop.f32.mrb[92].mxu1  ;;  %7648 = vrot.lane.b32.xlu1 %v18754_v8, %s17231_s2 }
0x14e2   :  { %v7629_v40 = vpop.f32.mrb[93].mxu1  ;;  %v18766_v44 = vadd.f32 %v16142_v36, %v15011_v32 }
0x14e3   :  { %v18760_v6 = vadd.f32 %v15011_v32, %v7629_v40  ;;  %v156_v32 = vrot.slane %v14782_v3, %v17715_v13 }
0x14e5   :  { %7652 = vrot.lane.b32.xlu0 %v18760_v6, %s17231_s2  ;;  %7650 = vrot.lane.b32.xlu1 %v18758_v42, %s17231_s2  ;;  %v19072_v20 = vrot.slane %v156_v32, %v17718_v15 }
0x14e9   :  { %7656 = vrot.lane.b32.xlu0 %v18748_v51, %s17232_s25  ;;  %7654 = vrot.lane.b32.xlu1 %v18766_v44, %s17231_s2 }
0x14ed   :  { %7660 = vrot.lane.b32.xlu0 %v18754_v8, %s17232_s25  ;;  %7658 = vrot.lane.b32.xlu1 %v18746_v31, %s17232_s25 }
0x14f1   :  { %7664 = vrot.lane.b32.xlu0 %v18760_v6, %s17232_s25  ;;  %7662 = vrot.lane.b32.xlu1 %v18758_v42, %s17232_s25 }
0x14f5   :  { %7668 = vrot.lane.b32.xlu0 %v18748_v51, %s17234_s26  ;;  %7666 = vrot.lane.b32.xlu1 %v18766_v44, %s17232_s25 }
0x14f9   :  { %7672 = vrot.lane.b32.xlu0 %v18754_v8, %s17234_s26  ;;  %7670 = vrot.lane.b32.xlu1 %v18746_v31, %s17234_s26 }
0x14fd   :  { %7676 = vrot.lane.b32.xlu0 %v18760_v6, %s17234_s26  ;;  %7674 = vrot.lane.b32.xlu1 %v18758_v42, %s17234_s26 }
0x1501   :  { %7680 = vrot.lane.b32.xlu0 %v18748_v51, %s17236_s27  ;;  %7678 = vrot.lane.b32.xlu1 %v18766_v44, %s17234_s26 }
0x1505   :  { %7832 = vrot.lane.b32.xlu0 %v18754_v8, %s17236_s27  ;;  %7756 = vrot.lane.b32.xlu1 %v18746_v31, %s17236_s27 }
0x1509   :  { %7984 = vrot.lane.b32.xlu0 %v18760_v6, %s17236_s27  ;;  %7908 = vrot.lane.b32.xlu1 %v18758_v42, %s17236_s27 }
0x150d   :  { %8060 = vrot.lane.b32.xlu1 %v18766_v44, %s17236_s27 }
0x154e   :  { %v18806_v28 = vpop.permute.xlu0 %7646 }
0x154f   :  { %v18808_v35 = vpop.permute.xlu1 %7644  ;;  %8212 = vrot.lane.b32.xlu1 %v18806_v28, %s17236_s27 }
0x1550   :  { %8136 = vrot.lane.b32.xlu0 %v18808_v35, %s17236_s27 }
0x1553   :  { %v18814_v54 = vpop.permute.xlu1 %7648 }
0x1554   :  { %8288 = vrot.lane.b32.xlu0 %v18814_v54, %s17236_s27 }
0x1557   :  { %v18818_v5 = vpop.permute.xlu0 %7652  ;;  %v18820_v62 = vpop.permute.xlu1 %7650 }
0x1558   :  { %8440 = vrot.lane.b32.xlu0 %v18818_v5, %s17236_s27  ;;  %8364 = vrot.lane.b32.xlu1 %v18820_v62, %s17236_s27 }
0x155b   :  { %v18826_v37 = vpop.permute.xlu0 %7656  ;;  %v18828_v33 = vpop.permute.xlu1 %7654 }
0x155c   :  { %8592 = vrot.lane.b32.xlu0 %v18826_v37, %s17236_s27  ;;  %8516 = vrot.lane.b32.xlu1 %v18828_v33, %s17236_s27 }
0x155f   :  { %v18834_v29 = vpop.permute.xlu0 %7660  ;;  %v18836_v41 = vpop.permute.xlu1 %7658 }
0x1560   :  { %8744 = vrot.lane.b32.xlu0 %v18834_v29, %s17236_s27  ;;  %8668 = vrot.lane.b32.xlu1 %v18836_v41, %s17236_s27 }
0x1563   :  { %v18842_v50 = vpop.permute.xlu0 %7664  ;;  %v18844_v12 = vpop.permute.xlu1 %7662 }
0x1564   :  { %8896 = vrot.lane.b32.xlu0 %v18842_v50, %s17236_s27  ;;  %8820 = vrot.lane.b32.xlu1 %v18844_v12, %s17236_s27 }
0x1567   :  { %v18850_v39 = vpop.permute.xlu0 %7668  ;;  %v18852_v38 = vpop.permute.xlu1 %7666 }
0x1568   :  { %9048 = vrot.lane.b32.xlu0 %v18850_v39, %s17236_s27  ;;  %8972 = vrot.lane.b32.xlu1 %v18852_v38, %s17236_s27 }
0x156b   :  { %v18858_v7 = vpop.permute.xlu0 %7672  ;;  %v18860_v56 = vpop.permute.xlu1 %7670 }
0x156c   :  { %9200 = vrot.lane.b32.xlu0 %v18858_v7, %s17236_s27  ;;  %9124 = vrot.lane.b32.xlu1 %v18860_v56, %s17236_s27 }
0x156f   :  { %v18866_v61 = vpop.permute.xlu0 %7676  ;;  %v18868_v27 = vpop.permute.xlu1 %7674 }
0x1570   :  { %9352 = vrot.lane.b32.xlu0 %v18866_v61, %s17236_s27  ;;  %9276 = vrot.lane.b32.xlu1 %v18868_v27, %s17236_s27 }
0x1573   :  { %v7681_v11 = vpop.permute.xlu0 %7680  ;;  %v18874_v59 = vpop.permute.xlu1 %7678 }
0x1574   :  { %16144 = vmatpush3.xpose.msk.msra.mxu0 %vm389_vm2, %v7681_v11  ;;  %9922 = vrot.lane.b32.xlu0 %v18746_v31, %s17237_s30 }
0x1575   :  { %9428 = vrot.lane.b32.xlu1 %v18874_v59, %s17236_s27  ;;  %16148 = vmatprep.subr.mxu0 %v17233_v25 }
0x1577   :  { %16146 = vmatmul.mubr.msk.f32.vlgmr.msra.gmra.mrb[78].mxu0 %vm389_vm2, %v18748_v51  ;;  %v7833_v45 = vpop.permute.xlu0 %7832  ;;  %v7757_v24 = vpop.permute.xlu1 %7756 }
0x1578   :  { %16154 = vmatpush3.xpose.msk.msra.mxu1 %vm389_vm2, %v7833_v45  ;;  %10074 = vrot.lane.b32.xlu0 %v18758_v42, %s17237_s30 }
0x1579   :  { %9846 = vrot.lane.b32.xlu1 %v18748_v51, %s17237_s30  ;;  %16149 = vmatpush3.xpose.msk.msra.mxu0 %vm389_vm2, %v7757_v24  ;;  %v164_v51 = vcombine.high %v156_v32, %v156_v32 }
0x157a   :  { %16150 = vmatprep.mubr.msk.f32.mxu0 %vm17235_vm1, %v17233_v25  ;;  %16163 = vmatprep.subr.mxu1 %v17233_v25 }
0x157b   :  { %16156 = vmatmul.mubr.msk.f32.vlgmr.msra.gmra.mrb[94].mxu1 %vm389_vm2, %v18754_v8  ;;  %v7985_v9 = vpop.permute.xlu0 %7984  ;;  %16158 = vmatprep.subr.mxu0 %v17233_v25  ;;  %v7909_v22 = vpop.permute.xlu1 %7908 }
0x157c   :  { %16151 = vmatmul.mubr.msk.f32.vlgmr.msra.gmra.mrb[80].mxu0 %vm389_vm2, %v18746_v31  ;;  %16164 = vmatpush3.xpose.msk.msra.mxu1 %vm389_vm2, %v7985_v9  ;;  %v14783_v31 = vld.sshfl [vmem:[%s20110_s1 + $0x4] sm:$0x13 pattern:$0x75316420] }
0x157d   :  { %10226 = vrot.lane.b32.xlu0 %v18766_v44, %s17237_s30  ;;  %9998 = vrot.lane.b32.xlu1 %v18754_v8, %s17237_s30  ;;  %v172_v8 = vcombine.high %v14783_v31, %v14783_v31 }
0x157e   :  { %16159 = vmatpush3.xpose.msk.msra.mxu0 %vm389_vm2, %v7909_v22  ;;  %16160 = vmatprep.mubr.msk.f32.mxu0 %vm17235_vm1, %v17233_v25 }
0x157f   :  { %16165 = vmatprep.mubr.msk.f32.mxu1 %vm17235_vm1, %v17233_v25  ;;  %16168 = vmatprep.subr.mxu0 %v17233_v25  ;;  %v8061_v46 = vpop.permute.xlu1 %8060 }
0x1580   :  { %16166 = vmatmul.mubr.msk.f32.vlgmr.msra.gmra.mrb[96].mxu1 %vm389_vm2, %v18760_v6  ;;  %16173 = vmatprep.subr.mxu1 %v17233_v25 }
0x1581   :  { %16161 = vmatmul.mubr.msk.f32.vlgmr.msra.gmra.mrb[82].mxu0 %vm389_vm2, %v18758_v42  ;;  %10378 = vrot.lane.b32.xlu0 %v18806_v28, %s17237_s30 }
0x1582   :  { %10150 = vrot.lane.b32.xlu1 %v18760_v6, %s17237_s30  ;;  %16169 = vmatpush3.xpose.msk.msra.mxu0 %vm389_vm2, %v8061_v46  ;;  %v19079_v6 = vrot.slane %v164_v51, %v17718_v15 }
0x1583   :  { %16170 = vmatprep.mubr.msk.f32.mxu0 %vm17235_vm1, %v17233_v25  ;;  %16178 = vmatprep.subr.mxu0 %v17233_v25 }
0x1584   :  { %16175 = vmatprep.mubr.msk.f32.mxu1 %vm17235_vm1, %v17233_v25 }
0x1585   :  { %16171 = vmatmul.mubr.msk.f32.vlgmr.msra.gmra.mrb[84].mxu0 %vm389_vm2, %v18766_v44  ;;  %10530 = vrot.lane.b32.xlu0 %v18820_v62, %s17237_s30  ;;  %v19082_v44 = vrot.slane %v163_v43, %v17718_v15 }
0x1586   :  { %10302 = vrot.lane.b32.xlu1 %v18808_v35, %s17237_s30  ;;  %16180 = vmatprep.mubr.msk.f32.mxu0 %vm17235_vm1, %v17233_v25 }
0x1589   :  { %10682 = vrot.lane.b32.xlu0 %v18828_v33, %s17237_s30 }
0x158a   :  { %10454 = vrot.lane.b32.xlu1 %v18814_v54, %s17237_s30 }
0x158d   :  { %10910 = vrot.lane.b32.xlu0 %v18834_v29, %s17237_s30 }
0x158e   :  { %10758 = vrot.lane.b32.xlu1 %v18826_v37, %s17237_s30 }
0x1591   :  { %11214 = vrot.lane.b32.xlu0 %v18850_v39, %s17237_s30 }
0x1592   :  { %10834 = vrot.lane.b32.xlu1 %v18836_v41, %s17237_s30 }
0x1595   :  { %11062 = vrot.lane.b32.xlu0 %v18842_v50, %s17237_s30 }
0x1596   :  { %10986 = vrot.lane.b32.xlu1 %v18844_v12, %s17237_s30 }
0x159a   :  { %11138 = vrot.lane.b32.xlu1 %v18852_v38, %s17237_s30 }
0x159e   :  { %11290 = vrot.lane.b32.xlu1 %v18860_v56, %s17237_s30 }
0x15a2   :  { %10606 = vrot.lane.b32.xlu1 %v18818_v5, %s17237_s30 }
0x15c1   :  { %v8213_v58 = vpop.permute.xlu1 %8212 }
0x15c2   :  { %v8137_v49 = vpop.permute.xlu0 %8136  ;;  %16179 = vmatpush3.xpose.msk.msra.mxu0 %vm389_vm2, %v8213_v58 }
0x15c3   :  { %16174 = vmatpush3.xpose.msk.msra.mxu1 %vm389_vm2, %v8137_v49  ;;  %16188 = vmatprep.subr.mxu0 %v17233_v25 }
0x15c4   :  { %16183 = vmatprep.subr.mxu1 %v17233_v25 }
0x15c5   :  { %16181 = vmatmul.mubr.msk.f32.vlgmr.msra.gmra.mrb[86].mxu0 %vm389_vm2, %v18806_v28 }
0x15c6   :  { %16176 = vmatmul.mubr.msk.f32.vlgmr.msra.gmra.mrb[98].mxu1 %vm389_vm2, %v18808_v35  ;;  %v8289_v34 = vpop.permute.xlu0 %8288  ;;  %16190 = vmatprep.mubr.msk.f32.mxu0 %vm17235_vm1, %v17233_v25  ;;  %v186_v35 = vrot.slane %v172_v8, %v17715_v13 }
0x15c7   :  { %16184 = vmatpush3.xpose.msk.msra.mxu1 %vm389_vm2, %v8289_v34  ;;  %16185 = vmatprep.mubr.msk.f32.mxu1 %vm17235_vm1, %v17233_v25 }
0x15c8   :  { %16193 = vmatprep.subr.mxu1 %v17233_v25 }
0x15ca   :  { %16186 = vmatmul.mubr.msk.f32.vlgmr.msra.gmra.mrb[100].mxu1 %vm389_vm2, %v18814_v54  ;;  %v8441_v47 = vpop.permute.xlu0 %8440  ;;  %v8365_v63 = vpop.permute.xlu1 %8364 }
0x15cb   :  { %16189 = vmatpush3.xpose.msk.msra.mxu0 %vm389_vm2, %v8365_v63  ;;  %16194 = vmatpush3.xpose.msk.msra.mxu1 %vm389_vm2, %v8441_v47 }
0x15cc   :  { %16195 = vmatprep.mubr.msk.f32.mxu1 %vm17235_vm1, %v17233_v25  ;;  %16203 = vmatprep.subr.mxu1 %v17233_v25 }
0x15cd   :  { %16198 = vmatprep.subr.mxu0 %v17233_v25 }
0x15ce   :  { %16196 = vmatmul.mubr.msk.f32.vlgmr.msra.gmra.mrb[102].mxu1 %vm389_vm2, %v18818_v5  ;;  %v8593_v57 = vpop.permute.xlu0 %8592  ;;  %16191 = vmatmul.mubr.msk.f32.vlgmr.msra.gmra.mrb[88].mxu0 %vm389_vm2, %v18820_v62  ;;  %v8517_v55 = vpop.permute.xlu1 %8516 }
0x15cf   :  { %16199 = vmatpush3.xpose.msk.msra.mxu0 %vm389_vm2, %v8517_v55  ;;  %16204 = vmatpush3.xpose.msk.msra.mxu1 %vm389_vm2, %v8593_v57 }
0x15d0   :  { %16200 = vmatprep.mubr.msk.f32.mxu0 %vm17235_vm1, %v17233_v25  ;;  %16205 = vmatprep.mubr.msk.f32.mxu1 %vm17235_vm1, %v17233_v25 }
0x15d1   :  { %16213 = vmatprep.subr.mxu1 %v17233_v25  ;;  %16208 = vmatprep.subr.mxu0 %v17233_v25 }
0x15d2   :  { %16206 = vmatmul.mubr.msk.f32.vlgmr.msra.gmra.mrb[104].mxu1 %vm389_vm2, %v18826_v37  ;;  %v8745_v10 = vpop.permute.xlu0 %8744  ;;  %16201 = vmatmul.mubr.msk.f32.vlgmr.msra.gmra.mrb[90].mxu0 %vm389_vm2, %v18828_v33  ;;  %v8669_v4 = vpop.permute.xlu1 %8668  ;;  %v179_v33 = vrot.slane %v14783_v31, %v17715_v13 }
0x15d3   :  { %16209 = vmatpush3.xpose.msk.msra.mxu0 %vm389_vm2, %v8669_v4  ;;  %16214 = vmatpush3.xpose.msk.msra.mxu1 %vm389_vm2, %v8745_v10 }
0x15d4   :  { %16210 = vmatprep.mubr.msk.f32.mxu0 %vm17235_vm1, %v17233_v25  ;;  %16215 = vmatprep.mubr.msk.f32.mxu1 %vm17235_vm1, %v17233_v25  ;;  %v187_v45 = vcombine.high %v179_v33, %v179_v33 }
0x15d5   :  { %16223 = vmatprep.subr.mxu1 %v17233_v25  ;;  %16218 = vmatprep.subr.mxu0 %v17233_v25 }
0x15d6   :  { %16216 = vmatmul.mubr.msk.f32.vlgmr.msra.gmra.mrb[106].mxu1 %vm389_vm2, %v18834_v29  ;;  %v8897_v0 = vpop.permute.xlu0 %8896  ;;  %16211 = vmatmul.mubr.msk.f32.vlgmr.msra.gmra.mrb[92].mxu0 %vm389_vm2, %v18836_v41  ;;  %v8821_v60 = vpop.permute.xlu1 %8820  ;;  %v19111_v63 = vrot.slane %v187_v45, %v17718_v15 }
0x15d7   :  { %16219 = vmatpush3.xpose.msk.msra.mxu0 %vm389_vm2, %v8821_v60  ;;  %16224 = vmatpush3.xpose.msk.msra.mxu1 %vm389_vm2, %v8897_v0 }
0x15d8   :  { %16220 = vmatprep.mubr.msk.f32.mxu0 %vm17235_vm1, %v17233_v25  ;;  %16225 = vmatprep.mubr.msk.f32.mxu1 %vm17235_vm1, %v17233_v25 }
0x15d9   :  { %16233 = vmatprep.subr.mxu1 %v17233_v25  ;;  %16228 = vmatprep.subr.mxu0 %v17233_v25 }
0x15da   :  { %16226 = vmatmul.mubr.msk.f32.vlgmr.msra.gmra.mrb[108].mxu1 %vm389_vm2, %v18842_v50  ;;  %v9049_v1 = vpop.permute.xlu0 %9048  ;;  %16221 = vmatmul.mubr.msk.f32.vlgmr.msra.gmra.mrb[94].mxu0 %vm389_vm2, %v18844_v12  ;;  %v8973_v2 = vpop.permute.xlu1 %8972 }
0x15db   :  { %16229 = vmatpush3.xpose.msk.msra.mxu0 %vm389_vm2, %v8973_v2  ;;  %16234 = vmatpush3.xpose.msk.msra.mxu1 %vm389_vm2, %v9049_v1 }
0x15dc   :  { %16230 = vmatprep.mubr.msk.f32.mxu0 %vm17235_vm1, %v17233_v25  ;;  %16235 = vmatprep.mubr.msk.f32.mxu1 %vm17235_vm1, %v17233_v25 }
0x15dd   :  { %16243 = vmatprep.subr.mxu1 %v17233_v25  ;;  %16238 = vmatprep.subr.mxu0 %v17233_v25 }
0x15de   :  { %16236 = vmatmul.mubr.msk.f32.vlgmr.msra.gmra.mrb[110].mxu1 %vm389_vm2, %v18850_v39  ;;  %v9201_v14 = vpop.permute.xlu0 %9200  ;;  %16231 = vmatmul.mubr.msk.f32.vlgmr.msra.gmra.mrb[96].mxu0 %vm389_vm2, %v18852_v38  ;;  %v9125_v16 = vpop.permute.xlu1 %9124  ;;  %v19095_v39 = vrot.slane %v186_v35, %v17718_v15  ;;  %v19098_v38 = vrot.slane %v179_v33, %v17718_v15 }
0x15df   :  { %16239 = vmatpush3.xpose.msk.msra.mxu0 %vm389_vm2, %v9125_v16  ;;  %16244 = vmatpush3.xpose.msk.msra.mxu1 %vm389_vm2, %v9201_v14 }
0x15e0   :  { %16240 = vmatprep.mubr.msk.f32.mxu0 %vm17235_vm1, %v17233_v25  ;;  %16245 = vmatprep.mubr.msk.f32.mxu1 %vm17235_vm1, %v17233_v25 }
0x15e1   :  { %16253 = vmatprep.subr.mxu1 %v17233_v25  ;;  %16248 = vmatprep.subr.mxu0 %v17233_v25 }
0x15e2   :  { %16246 = vmatmul.mubr.msk.f32.vlgmr.msra.gmra.mrb[112].mxu1 %vm389_vm2, %v18858_v7  ;;  %v9353_v52 = vpop.permute.xlu0 %9352  ;;  %16241 = vmatmul.mubr.msk.f32.vlgmr.msra.gmra.mrb[98].mxu0 %vm389_vm2, %v18860_v56  ;;  %v9277_v53 = vpop.permute.xlu1 %9276 }
0x15e3   :  { %16249 = vmatpush3.xpose.msk.msra.mxu0 %vm389_vm2, %v9277_v53  ;;  %16254 = vmatpush3.xpose.msk.msra.mxu1 %vm389_vm2, %v9353_v52 }
0x15e4   :  { %16250 = vmatprep.mubr.msk.f32.mxu0 %vm17235_vm1, %v17233_v25  ;;  %16255 = vmatprep.mubr.msk.f32.mxu1 %vm17235_vm1, %v17233_v25 }
0x15e5   :  { %16258 = vmatprep.subr.mxu0 %v17233_v25  ;;  %16263 = vmatprep.subr.mxu1 %v17233_v25 }
0x15e6   :  { %16256 = vmatmul.mubr.msk.f32.vlgmr.msra.gmra.mrb[114].mxu1 %vm389_vm2, %v18866_v61  ;;  %16251 = vmatmul.mubr.msk.f32.vlgmr.msra.gmra.mrb[100].mxu0 %vm389_vm2, %v18868_v27  ;;  %v9923_v48 = vpop.permute.xlu0 %9922 }
0x15e7   :  { %v9429_v17 = vpop.permute.xlu1 %9428  ;;  %16260 = vmatprep.mubr.msk.f32.mxu0 %vm17235_vm1, %v17233_v25  ;;  %16265 = vmatprep.mubr.msk.f32.mxu1 %vm17235_vm1, %v17233_v25 }
0x15e8   :  { %16259 = vmatpush3.xpose.msk.msra.mxu0 %vm389_vm2, %v9429_v17 }
0x15e9   :  { %16268 = vmatprep.subr.mxu0 %v17233_v25 }
0x15eb   :  { %16261 = vmatmul.mubr.msk.f32.vlgmr.msra.gmra.mrb[102].mxu0 %vm389_vm2, %v18874_v59  ;;  %v9847_v21 = vpop.permute.xlu1 %9846 }
0x15ec   :  { %16264 = vmatpush3.msra.mxu1 %v9847_v21  ;;  %16269 = vmatpush3.msra.mxu0 %v9923_v48 }
0x15ed   :  { %16273 = vmatprep.subr.mxu1 %v17233_v25  ;;  %16270 = vmatprep.mubr.msk.f32.mxu0 %vm17235_vm1, %v17233_v25 }
0x15ee   :  { %16278 = vmatprep.subr.mxu0 %v17233_v25 }
0x15ef   :  { %v19132_v51 = vpop.permute.xlu1 %9998 }
0x164a   :  { %v7752_v30 = vpop.f32.mrb[78].mxu0 }
0x164b   :  { %v9504_v36 = vmul.f32 0.35355338, %v7752_v30  ;;  %v16147_v40 = vpop.f32.mrb[79].mxu0 }
0x164d   :  { %v19076_v42 = vadd.f32 %v19072_v20, %v9504_v36 }
0x164e   :  { %v7904_v28 = vpop.f32.mrb[94].mxu1 }
0x164f   :  { %v7828_v54 = vpop.f32.mrb[80].mxu0  ;;  %v9506_v5 = vmul.f32 0.35355338, %v7904_v28  ;;  %v16157_v62 = vpop.f32.mrb[95].mxu1  ;;  %v9582_v37 = vsel %vm389_vm2, %v19076_v42, -inf }
0x1650   :  { %v9505_v29 = vmul.f32 0.35355338, %v7828_v54  ;;  %v16152_v41 = vpop.f32.mrb[81].mxu0  ;;  %9583 = vmax.xlane.f32.xlu0 %v9582_v37 }
0x1651   :  { %v19089_v50 = vadd.f32 %v19079_v6, %v9506_v5 }
0x1652   :  { %v19092_v12 = vadd.f32 %v19082_v44, %v9505_v29 }
0x1653   :  { %v8056_v56 = vpop.f32.mrb[96].mxu1  ;;  %v9588_v11 = vsel %vm389_vm2, %v19089_v50, -inf }
0x1654   :  { %v7980_v24 = vpop.f32.mrb[82].mxu0  ;;  %v9508_v9 = vmul.f32 0.35355338, %v8056_v56  ;;  %v16167_v22 = vpop.f32.mrb[97].mxu1  ;;  %9589 = vmax.xlane.f32.xlu0 %v9588_v11  ;;  %v9585_v46 = vsel %vm389_vm2, %v19092_v12, -inf }
0x1655   :  { %v9507_v58 = vmul.f32 0.35355338, %v7980_v24  ;;  %v16162_v49 = vpop.f32.mrb[83].mxu0  ;;  %9586 = vmax.xlane.f32.xlu1 %v9585_v46 }
0x1656   :  { %v19105_v34 = vadd.f32 %v19095_v39, %v9508_v9  ;;  %v19149_v9 = vpop.permute.xlu1 %10150 }
0x1657   :  { %v19108_v47 = vadd.f32 %v19098_v38, %v9507_v58 }
0x1658   :  { %v8132_v57 = vpop.f32.mrb[84].mxu0  ;;  %v9594_v55 = vsel %vm389_vm2, %v19105_v34, -inf }
0x1659   :  { %v9509_v10 = vmul.f32 0.35355338, %v8132_v57  ;;  %v16172_v4 = vpop.f32.mrb[85].mxu0  ;;  %9595 = vmax.xlane.f32.xlu1 %v9594_v55  ;;  %v9591_v0 = vsel %vm389_vm2, %v19108_v47, -inf }
0x165a   :  { %9592 = vmax.xlane.f32.xlu0 %v9591_v0 }
0x165b   :  { %v19118_v60 = vadd.f32 %v19111_v63, %v9509_v10 }
0x165d   :  { %v9597_v1 = vsel %vm389_vm2, %v19118_v60, -inf }
0x165e   :  { %9598 = vmax.xlane.f32.xlu0 %v9597_v1 }
0x1698   :  { %v8284_v15 = vpop.f32.mrb[86].mxu0 }
0x1699   :  { %v9511_v2 = vmul.f32 0.35355338, %v8284_v15  ;;  %v8208_v14 = vpop.f32.mrb[98].mxu1  ;;  %v16182_v16 = vpop.f32.mrb[87].mxu0 }
0x169a   :  { %v9510_v52 = vmul.f32 0.35355338, %v8208_v14  ;;  %v16177_v53 = vpop.f32.mrb[99].mxu1  ;;  %v19161_v15 = vpop.permute.xlu0 %10074 }
0x169b   :  { %v19123_v17 = vadd.f32 %v19082_v44, %v9511_v2 }
0x169c   :  { %v19126_v48 = vadd.f32 %v19072_v20, %v9510_v52 }
0x169d   :  { %v8360_v21 = vpop.f32.mrb[100].mxu1  ;;  %v9603_v3 = vsel %vm389_vm2, %v19123_v17, -inf }
0x169e   :  { %v9512_v32 = vmul.f32 0.35355338, %v8360_v21  ;;  %v16187_v18 = vpop.f32.mrb[101].mxu1  ;;  %9604 = vmax.xlane.f32.xlu0 %v9603_v3  ;;  %v9600_v31 = vsel %vm389_vm2, %v19126_v48, -inf }
0x169f   :  { %9601 = vmax.xlane.f32.xlu1 %v9600_v31 }
0x16a0   :  { %v19135_v30 = vadd.f32 %v19079_v6, %v9512_v32 }
0x16a1   :  { %v8436_v43 = vpop.f32.mrb[88].mxu0  ;;  %v8512_v8 = vpop.f32.mrb[102].mxu1 }
0x16a2   :  { %v9513_v36 = vmul.f32 0.35355338, %v8436_v43  ;;  %v9514_v40 = vmul.f32 0.35355338, %v8512_v8  ;;  %v16192_v28 = vpop.f32.mrb[89].mxu0  ;;  %v16197_v35 = vpop.f32.mrb[103].mxu1 }
0x16a3   :  { %v9606_v54 = vsel %vm389_vm2, %v19135_v30, -inf  ;;  %v19173_v43 = vpop.permute.xlu1 %10302 }
0x16a4   :  { %v19140_v5 = vadd.f32 %v19098_v38, %v9513_v36  ;;  %v19143_v62 = vadd.f32 %v19095_v39, %v9514_v40  ;;  %9607 = vmax.xlane.f32.xlu1 %v9606_v54 }
0x16a5   :  { %v8588_v37 = vpop.f32.mrb[90].mxu0  ;;  %v8664_v33 = vpop.f32.mrb[104].mxu1 }
0x16a6   :  { %v9515_v29 = vmul.f32 0.35355338, %v8588_v37  ;;  %v9516_v41 = vmul.f32 0.35355338, %v8664_v33  ;;  %v16202_v56 = vpop.f32.mrb[91].mxu0  ;;  %v16207_v11 = vpop.f32.mrb[105].mxu1 }
0x16a7   :  { %v9612_v45 = vsel %vm389_vm2, %v19143_v62, -inf  ;;  %v9609_v24 = vsel %vm389_vm2, %v19140_v5, -inf  ;;  %v19185_v56 = vpop.permute.xlu0 %10226 }
0x16a8   :  { %v19152_v22 = vadd.f32 %v19111_v63, %v9515_v29  ;;  %v19155_v46 = vadd.f32 %v19072_v20, %v9516_v41  ;;  %9613 = vmax.xlane.f32.xlu1 %v9612_v45  ;;  %9610 = vmax.xlane.f32.xlu0 %v9609_v24 }
0x16a9   :  { %v8740_v58 = vpop.f32.mrb[92].mxu0  ;;  %v8816_v49 = vpop.f32.mrb[106].mxu1 }
0x16aa   :  { %v9517_v57 = vmul.f32 0.35355338, %v8740_v58  ;;  %v9518_v55 = vmul.f32 0.35355338, %v8816_v49  ;;  %v16212_v10 = vpop.f32.mrb[93].mxu0  ;;  %v16217_v4 = vpop.f32.mrb[107].mxu1 }
0x16ab   :  { %v9618_v0 = vsel %vm389_vm2, %v19155_v46, -inf  ;;  %v9615_v1 = vsel %vm389_vm2, %v19152_v22, -inf }
0x16ac   :  { %v19164_v2 = vadd.f32 %v19082_v44, %v9517_v57  ;;  %v19167_v14 = vadd.f32 %v19079_v6, %v9518_v55  ;;  %9619 = vmax.xlane.f32.xlu1 %v9618_v0  ;;  %9616 = vmax.xlane.f32.xlu0 %v9615_v1  ;;  %v19197_v1 = vpop.permute.xlu1 %10454 }
0x16ad   :  { %v8892_v16 = vpop.f32.mrb[94].mxu0  ;;  %v8968_v52 = vpop.f32.mrb[108].mxu1 }
0x16ae   :  { %v9519_v53 = vmul.f32 0.35355338, %v8892_v16  ;;  %v9520_v21 = vmul.f32 0.35355338, %v8968_v52  ;;  %v16222_v3 = vpop.f32.mrb[95].mxu0  ;;  %v16227_v32 = vpop.f32.mrb[109].mxu1 }
0x16af   :  { %v9624_v18 = vsel %vm389_vm2, %v19167_v14, -inf  ;;  %v9621_v31 = vsel %vm389_vm2, %v19164_v2, -inf }
0x16b0   :  { %v19176_v8 = vadd.f32 %v19098_v38, %v9519_v53  ;;  %v19179_v36 = vadd.f32 %v19095_v39, %v9520_v21  ;;  %9625 = vmax.xlane.f32.xlu1 %v9624_v18  ;;  %9622 = vmax.xlane.f32.xlu0 %v9621_v31  ;;  %v19205_v31 = vpop.permute.xlu0 %10378 }
0x16b1   :  { %v9044_v40 = vpop.f32.mrb[96].mxu0  ;;  %v9120_v28 = vpop.f32.mrb[110].mxu1 }
0x16b2   :  { %v9521_v35 = vmul.f32 0.35355338, %v9044_v40  ;;  %v9522_v54 = vmul.f32 0.35355338, %v9120_v28  ;;  %v16232_v37 = vpop.f32.mrb[97].mxu0  ;;  %v16237_v33 = vpop.f32.mrb[111].mxu1 }
0x16b3   :  { %v9630_v29 = vsel %vm389_vm2, %v19179_v36, -inf  ;;  %v9627_v41 = vsel %vm389_vm2, %v19176_v8, -inf }
0x16b4   :  { %v19188_v11 = vadd.f32 %v19111_v63, %v9521_v35  ;;  %v19191_v45 = vadd.f32 %v19072_v20, %v9522_v54  ;;  %9631 = vmax.xlane.f32.xlu1 %v9630_v29  ;;  %9628 = vmax.xlane.f32.xlu0 %v9627_v41  ;;  %v19221_v41 = vpop.permute.xlu1 %10758 }
0x16b5   :  { %v9196_v24 = vpop.f32.mrb[98].mxu0  ;;  %v9272_v58 = vpop.f32.mrb[112].mxu1 }
0x16b6   :  { %v9523_v49 = vmul.f32 0.35355338, %v9196_v24  ;;  %v9524_v57 = vmul.f32 0.35355338, %v9272_v58  ;;  %v16242_v55 = vpop.f32.mrb[99].mxu0  ;;  %v16247_v10 = vpop.f32.mrb[113].mxu1 }
0x16b7   :  { %v9636_v4 = vsel %vm389_vm2, %v19191_v45, -inf  ;;  %v9633_v0 = vsel %vm389_vm2, %v19188_v11, -inf }
0x16b8   :  { %v19200_v16 = vadd.f32 %v19082_v44, %v9523_v49  ;;  %v19203_v20 = vadd.f32 %v19079_v6, %v9524_v57  ;;  %9637 = vmax.xlane.f32.xlu1 %v9636_v4  ;;  %9634 = vmax.xlane.f32.xlu0 %v9633_v0  ;;  %v19230_v58 = vpop.permute.xlu1 %10834 }
0x16b9   :  { %v9348_v52 = vpop.f32.mrb[100].mxu0  ;;  %v9424_v53 = vpop.f32.mrb[114].mxu1 }
0x16ba   :  { %v9525_v21 = vmul.f32 0.35355338, %v9348_v52  ;;  %v9526_v3 = vmul.f32 0.35355338, %v9424_v53  ;;  %v16252_v32 = vpop.f32.mrb[101].mxu0  ;;  %v16257_v18 = vpop.f32.mrb[115].mxu1 }
0x16bb   :  { %v9642_v40 = vsel %vm389_vm2, %v19203_v20, -inf  ;;  %v9639_v44 = vsel %vm389_vm2, %v19200_v16, -inf }
0x16bc   :  { %v19212_v28 = vadd.f32 %v19098_v38, %v9525_v21  ;;  %v19215_v6 = vadd.f32 %v19095_v39, %v9526_v3  ;;  %9643 = vmax.xlane.f32.xlu1 %v9642_v40  ;;  %9640 = vmax.xlane.f32.xlu0 %v9639_v44  ;;  %v19223_v38 = vpop.permute.xlu0 %10530  ;;  %v19234_v57 = vpop.permute.xlu1 %10986 }
0x16be   :  { %v9500_v35 = vpop.f32.mrb[102].mxu0  ;;  %v9648_v54 = vsel %vm389_vm2, %v19215_v6, -inf  ;;  %v9645_v37 = vsel %vm389_vm2, %v19212_v28, -inf }
0x16bf   :  { %v9527_v33 = vmul.f32 0.35355338, %v9500_v35  ;;  %v16262_v29 = vpop.f32.mrb[103].mxu0 }
0x16c0   :  { %9649 = vmax.xlane.f32.xlu1 %v9648_v54  ;;  %9646 = vmax.xlane.f32.xlu0 %v9645_v37  ;;  %v19232_v49 = vpop.permute.xlu0 %10682  ;;  %v19240_v10 = vpop.permute.xlu1 %11138 }
0x16c1   :  { %v19226_v39 = vadd.f32 %v19111_v63, %v9527_v33 }
0x16c3   :  { %v9651_v24 = vsel %vm389_vm2, %v19226_v39, -inf }
0x16c4   :  { %9652 = vmax.xlane.f32.xlu0 %v9651_v24  ;;  %v19236_v55 = vpop.permute.xlu0 %10910  ;;  %v19244_v63 = vpop.permute.xlu1 %11290 }
0x16c8   :  { %v19242_v4 = vpop.permute.xlu0 %11214  ;;  %v19250_v53 = vpop.permute.xlu1 %10606 }
0x16cc   :  { %v19246_v0 = vpop.permute.xlu0 %11062 }
0x16d1   :  { %11442 = vrot.lane.b32.xlu1 %v18868_v27, %s17237_s30 }
0x16da   :  { %11366 = vrot.lane.b32.xlu0 %v18858_v7, %s17237_s30 }
0x16dd   :  { %v9584_v52 = vpop.xlane.xlu0 %9583 }
0x16de   :  { %v9654_v21 = vsub.f32 %v19076_v42, %v9584_v52 }
0x16e0   :  { %v9678_v18 = vmul.f32 1.442695, %v9654_v21 }
0x16e1   :  { %v9590_v3 = vpop.xlane.xlu0 %9589 }
0x16e2   :  { %v9656_v32 = vsub.f32 %v19089_v50, %v9590_v3  ;;  %v9587_v27 = vpop.xlane.xlu1 %9586  ;;  %16945 = vpow2.f32 %v9678_v18 }
0x16e3   :  { %v9655_v40 = vsub.f32 %v19092_v12, %v9587_v27 }
0x16e4   :  { %v9682_v44 = vmul.f32 1.442695, %v9656_v32 }
0x16e5   :  { %v9680_v54 = vmul.f32 1.442695, %v9655_v40 }
0x16e6   :  { %v9596_v35 = vpop.xlane.xlu1 %9595  ;;  %16947 = vpow2.f32 %v9682_v44 }
0x16e7   :  { %v9593_v37 = vpop.xlane.xlu0 %9592  ;;  %v9658_v33 = vsub.f32 %v19105_v34, %v9596_v35  ;;  %16949 = vpow2.f32 %v9680_v54 }
0x16e8   :  { %v9657_v7 = vsub.f32 %v19108_v47, %v9593_v37 }
0x16e9   :  { %v9686_v29 = vmul.f32 1.442695, %v9658_v33 }
0x16ea   :  { %v9684_v42 = vmul.f32 1.442695, %v9657_v7 }
0x16eb   :  { %v9599_v24 = vpop.xlane.xlu0 %9598  ;;  %16951 = vpow2.f32 %v9686_v29 }
0x16ec   :  { %v9659_v50 = vsub.f32 %v19118_v60, %v9599_v24  ;;  %16953 = vpow2.f32 %v9684_v42  ;;  %v19258_v12 = vpop.eup %16945 }
0x16ed   :  { %v9726_v34 = vsel %vm389_vm2, %v19258_v12, 0.0 }
0x16ee   :  { %v9688_v52 = vmul.f32 1.442695, %v9659_v50 }
0x16f0   :  { %16955 = vpow2.f32 %v9688_v52  ;;  %v19260_v21 = vpop.eup %16947 }
0x16f1   :  { %v19264_v3 = vpop.eup %16949  ;;  %v9732_v32 = vsel %vm389_vm2, %v19260_v21, 0.0 }
0x16f2   :  { %v9729_v60 = vsel %vm389_vm2, %v19264_v3, 0.0 }
0x16f5   :  { %9727 = vadd.xlane.f32.xlu1 %v9726_v34  ;;  %v19266_v47 = vpop.eup %16951 }
0x16f6   :  { %v19272_v27 = vpop.eup %16953  ;;  %v9738_v40 = vsel %vm389_vm2, %v19266_v47, 0.0 }
0x16f7   :  { %v9735_v18 = vsel %vm389_vm2, %v19272_v27, 0.0 }
0x16f9   :  { %9733 = vadd.xlane.f32.xlu1 %v9732_v32  ;;  %9730 = vadd.xlane.f32.xlu0 %v9729_v60 }
0x16fa   :  { %v19278_v44 = vpop.eup %16955 }
0x16fb   :  { %v9741_v35 = vsel %vm389_vm2, %v19278_v44, 0.0 }
0x16fd   :  { %9736 = vadd.xlane.f32.xlu0 %v9735_v18  ;;  %9739 = vadd.xlane.f32.xlu1 %v9738_v40 }
0x1701   :  { %9742 = vadd.xlane.f32.xlu0 %v9741_v35 }
0x172b   :  { %v9605_v54 = vpop.xlane.xlu0 %9604 }
0x172c   :  { %v9661_v37 = vsub.f32 %v19123_v17, %v9605_v54  ;;  %v9602_v33 = vpop.xlane.xlu1 %9601 }
0x172d   :  { %v9660_v7 = vsub.f32 %v19126_v48, %v9602_v33 }
0x172e   :  { %v9692_v29 = vmul.f32 1.442695, %v9661_v37 }
0x172f   :  { %v9690_v42 = vmul.f32 1.442695, %v9660_v7 }
0x1730   :  { %16957 = vpow2.f32 %v9692_v29 }
0x1731   :  { %16959 = vpow2.f32 %v9690_v42  ;;  %v9608_v24 = vpop.xlane.xlu1 %9607 }
0x1732   :  { %v9662_v50 = vsub.f32 %v19135_v30, %v9608_v24 }
0x1734   :  { %v9694_v52 = vmul.f32 1.442695, %v9662_v50 }
0x1735   :  { %v9611_v34 = vpop.xlane.xlu0 %9610  ;;  %v9614_v32 = vpop.xlane.xlu1 %9613 }
0x1736   :  { %16961 = vpow2.f32 %v9694_v52  ;;  %v9663_v60 = vsub.f32 %v19140_v5, %v9611_v34  ;;  %v9664_v18 = vsub.f32 %v19143_v62, %v9614_v32 }
0x1738   :  { %v9696_v40 = vmul.f32 1.442695, %v9663_v60  ;;  %v9698_v17 = vmul.f32 1.442695, %v9664_v18 }
0x1739   :  { %v9617_v35 = vpop.xlane.xlu0 %9616  ;;  %v9620_v54 = vpop.xlane.xlu1 %9619 }
0x173a   :  { %v19287_v48 = vpop.eup %16957  ;;  %16963 = vpow2.f32 %v9696_v40  ;;  %v9665_v37 = vsub.f32 %v19152_v22, %v9617_v35  ;;  %v9666_v33 = vsub.f32 %v19155_v46, %v9620_v54 }
0x173b   :  { %v19291_v30 = vpop.eup %16959  ;;  %16965 = vpow2.f32 %v9698_v17  ;;  %v9747_v7 = vsel %vm389_vm2, %v19287_v48, 0.0 }
0x173c   :  { %v9700_v5 = vmul.f32 1.442695, %v9665_v37  ;;  %v9702_v29 = vmul.f32 1.442695, %v9666_v33  ;;  %9748 = vadd.xlane.f32.xlu0 %v9747_v7  ;;  %v9744_v62 = vsel %vm389_vm2, %v19291_v30, 0.0 }
0x173d   :  { %v9623_v42 = vpop.xlane.xlu0 %9622  ;;  %v9626_v24 = vpop.xlane.xlu1 %9625  ;;  %9745 = vadd.xlane.f32.xlu1 %v9744_v62 }
0x173e   :  { %16967 = vpow2.f32 %v9700_v5  ;;  %v9667_v22 = vsub.f32 %v19164_v2, %v9623_v42  ;;  %v9668_v46 = vsub.f32 %v19167_v14, %v9626_v24 }
0x173f   :  { %16969 = vpow2.f32 %v9702_v29 }
0x1740   :  { %v19299_v50 = vpop.eup %16961  ;;  %v9704_v52 = vmul.f32 1.442695, %v9667_v22  ;;  %v9706_v34 = vmul.f32 1.442695, %v9668_v46 }
0x1741   :  { %v9629_v32 = vpop.xlane.xlu0 %9628  ;;  %v9632_v60 = vpop.xlane.xlu1 %9631  ;;  %v9750_v18 = vsel %vm389_vm2, %v19299_v50, 0.0 }
0x1742   :  { %16971 = vpow2.f32 %v9704_v52  ;;  %v9669_v40 = vsub.f32 %v19176_v8, %v9629_v32  ;;  %v9670_v17 = vsub.f32 %v19179_v36, %v9632_v60  ;;  %9751 = vadd.xlane.f32.xlu1 %v9750_v18 }
0x1743   :  { %16973 = vpow2.f32 %v9706_v34 }
0x1744   :  { %v19305_v2 = vpop.eup %16963  ;;  %v9708_v14 = vmul.f32 1.442695, %v9669_v40  ;;  %v9710_v35 = vmul.f32 1.442695, %v9670_v17 }
0x1745   :  { %v19307_v54 = vpop.eup %16965  ;;  %v9635_v37 = vpop.xlane.xlu0 %9634  ;;  %v9753_v7 = vsel %vm389_vm2, %v19305_v2, 0.0 }
0x1746   :  { %v9638_v33 = vpop.xlane.xlu1 %9637  ;;  %16975 = vpow2.f32 %v9708_v14  ;;  %v9671_v5 = vsub.f32 %v19188_v11, %v9635_v37  ;;  %9754 = vadd.xlane.f32.xlu0 %v9753_v7  ;;  %v9756_v36 = vsel %vm389_vm2, %v19307_v54, 0.0 }
0x1747   :  { %v9672_v8 = vsub.f32 %v19191_v45, %v9638_v33  ;;  %16977 = vpow2.f32 %v9710_v35  ;;  %9757 = vadd.xlane.f32.xlu1 %v9756_v36 }
0x1748   :  { %v19315_v29 = vpop.eup %16967  ;;  %v9712_v62 = vmul.f32 1.442695, %v9671_v5 }
0x1749   :  { %v9714_v42 = vmul.f32 1.442695, %v9672_v8  ;;  %v19317_v24 = vpop.eup %16969  ;;  %v9641_v22 = vpop.xlane.xlu0 %9640  ;;  %v9759_v52 = vsel %vm389_vm2, %v19315_v29, 0.0 }
0x174a   :  { %v9644_v46 = vpop.xlane.xlu1 %9643  ;;  %16979 = vpow2.f32 %v9712_v62  ;;  %v9673_v11 = vsub.f32 %v19200_v16, %v9641_v22  ;;  %9760 = vadd.xlane.f32.xlu0 %v9759_v52  ;;  %v9762_v34 = vsel %vm389_vm2, %v19317_v24, 0.0 }
0x174b   :  { %v9674_v45 = vsub.f32 %v19203_v20, %v9644_v46  ;;  %16981 = vpow2.f32 %v9714_v42  ;;  %9763 = vadd.xlane.f32.xlu1 %v9762_v34 }
0x174c   :  { %v19325_v32 = vpop.eup %16971  ;;  %v9716_v60 = vmul.f32 1.442695, %v9673_v11 }
0x174d   :  { %v9718_v18 = vmul.f32 1.442695, %v9674_v45  ;;  %v19327_v40 = vpop.eup %16973  ;;  %v9647_v17 = vpop.xlane.xlu0 %9646  ;;  %v9765_v35 = vsel %vm389_vm2, %v19325_v32, 0.0 }
0x174e   :  { %v9650_v14 = vpop.xlane.xlu1 %9649  ;;  %16983 = vpow2.f32 %v9716_v60  ;;  %v9675_v16 = vsub.f32 %v19212_v28, %v9647_v17  ;;  %9766 = vadd.xlane.f32.xlu0 %v9765_v35  ;;  %v9768_v37 = vsel %vm389_vm2, %v19327_v40, 0.0 }
0x174f   :  { %v9676_v20 = vsub.f32 %v19215_v6, %v9650_v14  ;;  %16985 = vpow2.f32 %v9718_v18  ;;  %9769 = vadd.xlane.f32.xlu1 %v9768_v37 }
0x1750   :  { %v19335_v33 = vpop.eup %16975  ;;  %v9720_v7 = vmul.f32 1.442695, %v9675_v16 }
0x1751   :  { %v9722_v5 = vmul.f32 1.442695, %v9676_v20  ;;  %v19337_v8 = vpop.eup %16977  ;;  %v9653_v36 = vpop.xlane.xlu0 %9652  ;;  %v9771_v62 = vsel %vm389_vm2, %v19335_v33, 0.0 }
0x1752   :  { %16987 = vpow2.f32 %v9720_v7  ;;  %v9677_v28 = vsub.f32 %v19226_v39, %v9653_v36  ;;  %9772 = vadd.xlane.f32.xlu0 %v9771_v62  ;;  %v9774_v6 = vsel %vm389_vm2, %v19337_v8, 0.0  ;;  %v19376_v37 = vpop.permute.xlu1 %11442 }
0x1753   :  { %16989 = vpow2.f32 %v9722_v5  ;;  %9775 = vadd.xlane.f32.xlu1 %v9774_v6 }
0x1754   :  { %v19344_v42 = vpop.eup %16979  ;;  %v9724_v22 = vmul.f32 1.442695, %v9677_v28 }
0x1755   :  { %v19346_v46 = vpop.eup %16981  ;;  %v9777_v52 = vsel %vm389_vm2, %v19344_v42, 0.0  ;;  %v19378_v7 = vpop.permute.xlu0 %11366 }
0x1756   :  { %16991 = vpow2.f32 %v9724_v22  ;;  %9778 = vadd.xlane.f32.xlu0 %v9777_v52  ;;  %v9780_v11 = vsel %vm389_vm2, %v19346_v46, 0.0 }
0x1757   :  { %9781 = vadd.xlane.f32.xlu1 %v9780_v11 }
0x1758   :  { %v19352_v39 = vpop.eup %16983 }
0x1759   :  { %v19354_v45 = vpop.eup %16985  ;;  %v9783_v34 = vsel %vm389_vm2, %v19352_v39, 0.0 }
0x175a   :  { %9784 = vadd.xlane.f32.xlu0 %v9783_v34  ;;  %v9786_v60 = vsel %vm389_vm2, %v19354_v45, 0.0 }
0x175b   :  { %9787 = vadd.xlane.f32.xlu1 %v9786_v60 }
0x175c   :  { %v19360_v18 = vpop.eup %16987 }
0x175d   :  { %v19362_v17 = vpop.eup %16989  ;;  %v9789_v14 = vsel %vm389_vm2, %v19360_v18, 0.0 }
0x175e   :  { %9790 = vadd.xlane.f32.xlu0 %v9789_v14  ;;  %v9792_v35 = vsel %vm389_vm2, %v19362_v17, 0.0 }
0x175f   :  { %9793 = vadd.xlane.f32.xlu1 %v9792_v35 }
0x1760   :  { %v19368_v16 = vpop.eup %16991 }
0x1761   :  { %v9795_v20 = vsel %vm389_vm2, %v19368_v16, 0.0 }
0x1762   :  { %9796 = vadd.xlane.f32.xlu0 %v9795_v20 }
0x1770   :  { %11594 = vrot.lane.b32.xlu1 %v18874_v59, %s17237_s30 }
0x1778   :  { %11518 = vrot.lane.b32.xlu0 %v18866_v61, %s17237_s30 }
0x1782   :  { %v9728_v5 = vpop.xlane.xlu1 %9727 }
0x1783   :  { %16993 = vrcp.f32 %v9728_v5 }
0x1786   :  { %v9731_v36 = vpop.xlane.xlu0 %9730  ;;  %v9734_v62 = vpop.xlane.xlu1 %9733 }
0x1787   :  { %16995 = vrcp.f32 %v9731_v36 }
0x1788   :  { %16997 = vrcp.f32 %v9734_v62 }
0x178a   :  { %v9737_v28 = vpop.xlane.xlu0 %9736  ;;  %v9740_v6 = vpop.xlane.xlu1 %9739 }
0x178b   :  { %16999 = vrcp.f32 %v9737_v28 }
0x178c   :  { %17001 = vrcp.f32 %v9740_v6 }
0x178d   :  { %v16994_v22 = vpop.eup %16993 }
0x178e   :  { %v9799_v59 = vmul.f32 %v16994_v22, %v19258_v12  ;;  %v9743_v52 = vpop.xlane.xlu0 %9742 }
0x178f   :  { %17003 = vrcp.f32 %v9743_v52 }
0x1790   :  { %16266 = vmatmul.mubr.msk.f32.vlgmr.msra.gmra.mrb[116].mxu1 %vm389_vm2, %v9799_v59 }
0x1791   :  { %v16996_v61 = vpop.eup %16995  ;;  %16274 = vmatpush3.msra.mxu1 %v19132_v51  ;;  %16275 = vmatprep.mubr.msk.f32.mxu1 %vm17235_vm1, %v17233_v25 }
0x1792   :  { %v16998_v11 = vpop.eup %16997  ;;  %v9801_v34 = vmul.f32 %v16996_v61, %v19264_v3  ;;  %16283 = vmatprep.subr.mxu1 %v17233_v25 }
0x1793   :  { %v9803_v60 = vmul.f32 %v16998_v11, %v19260_v21 }
0x1794   :  { %16271 = vmatmul.mubr.msk.f32.vlgmr.msra.gmra.mrb[104].mxu0 %vm389_vm2, %v9801_v34 }
0x1795   :  { %v17000_v12 = vpop.eup %16999  ;;  %16276 = vmatmul.mubr.msk.f32.vlgmr.msra.gmra.mrb[118].mxu1 %vm389_vm2, %v9803_v60  ;;  %16279 = vmatpush3.msra.mxu0 %v19161_v15 }
0x1796   :  { %v17002_v14 = vpop.eup %17001  ;;  %v9805_v51 = vmul.f32 %v17000_v12, %v19272_v27  ;;  %16284 = vmatpush3.msra.mxu1 %v19149_v9  ;;  %16280 = vmatprep.mubr.msk.f32.mxu0 %vm17235_vm1, %v17233_v25 }
0x1797   :  { %v9807_v3 = vmul.f32 %v17002_v14, %v19266_v47  ;;  %16285 = vmatprep.mubr.msk.f32.mxu1 %vm17235_vm1, %v17233_v25  ;;  %16288 = vmatprep.subr.mxu0 %v17233_v25 }
0x1798   :  { %16293 = vmatprep.subr.mxu1 %v17233_v25  ;;  %16281 = vmatmul.mubr.msk.f32.vlgmr.msra.gmra.mrb[106].mxu0 %vm389_vm2, %v9805_v51 }
0x1799   :  { %v17004_v15 = vpop.eup %17003  ;;  %16286 = vmatmul.mubr.msk.f32.vlgmr.msra.gmra.mrb[120].mxu1 %vm389_vm2, %v9807_v3  ;;  %16289 = vmatpush3.msra.mxu0 %v19185_v56 }
0x179a   :  { %v9809_v9 = vmul.f32 %v17004_v15, %v19278_v44  ;;  %16294 = vmatpush3.msra.mxu1 %v19173_v43  ;;  %16290 = vmatprep.mubr.msk.f32.mxu0 %vm17235_vm1, %v17233_v25 }
0x179b   :  { %16298 = vmatprep.subr.mxu0 %v17233_v25  ;;  %16295 = vmatprep.mubr.msk.f32.mxu1 %vm17235_vm1, %v17233_v25 }
0x179c   :  { %16291 = vmatmul.mubr.msk.f32.vlgmr.msra.gmra.mrb[108].mxu0 %vm389_vm2, %v9809_v9  ;;  %16303 = vmatprep.subr.mxu1 %v17233_v25 }
0x179d   :  { %16299 = vmatpush3.msra.mxu0 %v19205_v31  ;;  %16300 = vmatprep.mubr.msk.f32.mxu0 %vm17235_vm1, %v17233_v25 }
0x179e   :  { %16308 = vmatprep.subr.mxu0 %v17233_v25 }
0x17c9   :  { %v9749_v43 = vpop.xlane.xlu0 %9748 }
0x17ca   :  { %17005 = vrcp.f32 %v9749_v43  ;;  %v9746_v56 = vpop.xlane.xlu1 %9745 }
0x17cb   :  { %17007 = vrcp.f32 %v9746_v56 }
0x17cf   :  { %v9752_v21 = vpop.xlane.xlu1 %9751 }
0x17d0   :  { %17009 = vrcp.f32 %v9752_v21 }
0x17d3   :  { %v9755_v47 = vpop.xlane.xlu0 %9754 }
0x17d4   :  { %v17006_v27 = vpop.eup %17005  ;;  %17011 = vrcp.f32 %v9755_v47  ;;  %v9758_v44 = vpop.xlane.xlu1 %9757 }
0x17d5   :  { %v17008_v35 = vpop.eup %17007  ;;  %v9813_v20 = vmul.f32 %v17006_v27, %v19287_v48  ;;  %17013 = vrcp.f32 %v9758_v44 }
0x17d6   :  { %v9811_v31 = vmul.f32 %v17008_v35, %v19291_v30 }
0x17d7   :  { %v9761_v5 = vpop.xlane.xlu0 %9760  ;;  %16301 = vmatmul.mubr.msk.f32.vlgmr.msra.gmra.mrb[110].mxu0 %vm389_vm2, %v9813_v20 }
0x17d8   :  { %17015 = vrcp.f32 %v9761_v5  ;;  %v9764_v36 = vpop.xlane.xlu1 %9763  ;;  %16309 = vmatpush3.msra.mxu0 %v19223_v38  ;;  %16296 = vmatmul.mubr.msk.f32.vlgmr.msra.gmra.mrb[122].mxu1 %vm389_vm2, %v9811_v31 }
0x17d9   :  { %17017 = vrcp.f32 %v9764_v36  ;;  %16304 = vmatpush3.msra.mxu1 %v19197_v1  ;;  %16305 = vmatprep.mubr.msk.f32.mxu1 %vm17235_vm1, %v17233_v25 }
0x17da   :  { %v17010_v62 = vpop.eup %17009  ;;  %16313 = vmatprep.subr.mxu1 %v17233_v25  ;;  %16310 = vmatprep.mubr.msk.f32.mxu0 %vm17235_vm1, %v17233_v25 }
0x17db   :  { %v9815_v48 = vmul.f32 %v17010_v62, %v19299_v50  ;;  %v9767_v30 = vpop.xlane.xlu0 %9766  ;;  %16318 = vmatprep.subr.mxu0 %v17233_v25 }
0x17dc   :  { %17019 = vrcp.f32 %v9767_v30  ;;  %v9770_v38 = vpop.xlane.xlu1 %9769 }
0x17dd   :  { %17021 = vrcp.f32 %v9770_v38  ;;  %16306 = vmatmul.mubr.msk.f32.vlgmr.msra.gmra.mrb[124].mxu1 %vm389_vm2, %v9815_v48 }
0x17de   :  { %v17012_v1 = vpop.eup %17011  ;;  %16314 = vmatpush3.msra.mxu1 %v19250_v53  ;;  %16315 = vmatprep.mubr.msk.f32.mxu1 %vm17235_vm1, %v17233_v25 }
0x17df   :  { %v17014_v28 = vpop.eup %17013  ;;  %v9817_v6 = vmul.f32 %v17012_v1, %v19305_v2  ;;  %v9773_v22 = vpop.xlane.xlu0 %9772  ;;  %16323 = vmatprep.subr.mxu1 %v17233_v25 }
0x17e0   :  { %v9819_v50 = vmul.f32 %v17014_v28, %v19307_v54  ;;  %17023 = vrcp.f32 %v9773_v22  ;;  %v9776_v59 = vpop.xlane.xlu1 %9775  ;;  %v14991_v28 = vld [vmem:[%s20088_s7 + $0x38] sm:$0xff] }
0x17e1   :  { %17025 = vrcp.f32 %v9776_v59  ;;  %16311 = vmatmul.mubr.msk.f32.vlgmr.msra.gmra.mrb[112].mxu0 %vm389_vm2, %v9817_v6 }
0x17e2   :  { %v17016_v52 = vpop.eup %17015  ;;  %16316 = vmatmul.mubr.msk.f32.vlgmr.msra.gmra.mrb[126].mxu1 %vm389_vm2, %v9819_v50  ;;  %16319 = vmatpush3.msra.mxu0 %v19232_v49 }
0x17e3   :  { %v17018_v53 = vpop.eup %17017  ;;  %v9821_v61 = vmul.f32 %v17016_v52, %v19315_v29  ;;  %16324 = vmatpush3.msra.mxu1 %v19221_v41  ;;  %v9779_v2 = vpop.xlane.xlu0 %9778  ;;  %16320 = vmatprep.mubr.msk.f32.mxu0 %vm17235_vm1, %v17233_v25 }
0x17e4   :  { %v9823_v54 = vmul.f32 %v17018_v53, %v19317_v24  ;;  %17027 = vrcp.f32 %v9779_v2  ;;  %v9782_v11 = vpop.xlane.xlu1 %9781  ;;  %16325 = vmatprep.mubr.msk.f32.mxu1 %vm17235_vm1, %v17233_v25  ;;  %16328 = vmatprep.subr.mxu0 %v17233_v25 }
0x17e5   :  { %17029 = vrcp.f32 %v9782_v11  ;;  %16333 = vmatprep.subr.mxu1 %v17233_v25  ;;  %16321 = vmatmul.mubr.msk.f32.vlgmr.msra.gmra.mrb[114].mxu0 %vm389_vm2, %v9821_v61 }
0x17e6   :  { %v17020_v49 = vpop.eup %17019  ;;  %16326 = vmatmul.mubr.msk.f32.vlgmr.msra.gmra.mrb[128].mxu1 %vm389_vm2, %v9823_v54  ;;  %16329 = vmatpush3.msra.mxu0 %v19230_v58 }
0x17e7   :  { %v17022_v41 = vpop.eup %17021  ;;  %v9825_v29 = vmul.f32 %v17020_v49, %v19325_v32  ;;  %16334 = vmatpush3.msra.mxu1 %v19236_v55  ;;  %v9785_v24 = vpop.xlane.xlu0 %9784  ;;  %16330 = vmatprep.mubr.msk.f32.mxu0 %vm17235_vm1, %v17233_v25 }
0x17e8   :  { %v9827_v34 = vmul.f32 %v17022_v41, %v19327_v40  ;;  %17031 = vrcp.f32 %v9785_v24  ;;  %v9788_v60 = vpop.xlane.xlu1 %9787  ;;  %16335 = vmatprep.mubr.msk.f32.mxu1 %vm17235_vm1, %v17233_v25  ;;  %16338 = vmatprep.subr.mxu0 %v17233_v25 }
0x17e9   :  { %17033 = vrcp.f32 %v9788_v60  ;;  %16343 = vmatprep.subr.mxu1 %v17233_v25  ;;  %16331 = vmatmul.mubr.msk.f32.vlgmr.msra.gmra.mrb[116].mxu0 %vm389_vm2, %v9825_v29 }
0x17ea   :  { %v17024_v58 = vpop.eup %17023  ;;  %16336 = vmatmul.mubr.msk.f32.vlgmr.msra.gmra.mrb[130].mxu1 %vm389_vm2, %v9827_v34  ;;  %16339 = vmatpush3.msra.mxu0 %v19234_v57 }
0x17eb   :  { %v17026_v55 = vpop.eup %17025  ;;  %v9829_v32 = vmul.f32 %v17024_v58, %v19335_v33  ;;  %16344 = vmatpush3.msra.mxu1 %v19246_v0  ;;  %v9791_v40 = vpop.xlane.xlu0 %9790  ;;  %16340 = vmatprep.mubr.msk.f32.mxu0 %vm17235_vm1, %v17233_v25 }
0x17ec   :  { %v9831_v12 = vmul.f32 %v17026_v55, %v19337_v8  ;;  %17035 = vrcp.f32 %v9791_v40  ;;  %v9794_v14 = vpop.xlane.xlu1 %9793  ;;  %16345 = vmatprep.mubr.msk.f32.mxu1 %vm17235_vm1, %v17233_v25  ;;  %16348 = vmatprep.subr.mxu0 %v17233_v25 }
0x17ed   :  { %17037 = vrcp.f32 %v9794_v14  ;;  %16353 = vmatprep.subr.mxu1 %v17233_v25  ;;  %16341 = vmatmul.mubr.msk.f32.vlgmr.msra.gmra.mrb[118].mxu0 %vm389_vm2, %v9829_v32 }
0x17ee   :  { %v17028_v57 = vpop.eup %17027  ;;  %16346 = vmatmul.mubr.msk.f32.vlgmr.msra.gmra.mrb[132].mxu1 %vm389_vm2, %v9831_v12  ;;  %16349 = vmatpush3.msra.mxu0 %v19240_v10 }
0x17ef   :  { %v17030_v0 = vpop.eup %17029  ;;  %v9833_v33 = vmul.f32 %v17028_v57, %v19344_v42  ;;  %16354 = vmatpush3.msra.mxu1 %v19242_v4  ;;  %v9797_v8 = vpop.xlane.xlu0 %9796  ;;  %16350 = vmatprep.mubr.msk.f32.mxu0 %vm17235_vm1, %v17233_v25 }
0x17f0   :  { %v9835_v51 = vmul.f32 %v17030_v0, %v19346_v46  ;;  %17039 = vrcp.f32 %v9797_v8  ;;  %16355 = vmatprep.mubr.msk.f32.mxu1 %vm17235_vm1, %v17233_v25  ;;  %16358 = vmatprep.subr.mxu0 %v17233_v25  ;;  %v11595_v9 = vpop.permute.xlu1 %11594 }
0x17f1   :  { %16363 = vmatprep.subr.mxu1 %v17233_v25  ;;  %16351 = vmatmul.mubr.msk.f32.vlgmr.msra.gmra.mrb[120].mxu0 %vm389_vm2, %v9833_v33 }
0x17f2   :  { %v17032_v10 = vpop.eup %17031  ;;  %16356 = vmatmul.mubr.msk.f32.vlgmr.msra.gmra.mrb[134].mxu1 %vm389_vm2, %v9835_v51  ;;  %16359 = vmatpush3.msra.mxu0 %v19244_v63 }
0x17f3   :  { %v17034_v4 = vpop.eup %17033  ;;  %v9837_v42 = vmul.f32 %v17032_v10, %v19352_v39  ;;  %16364 = vmatpush3.msra.mxu1 %v19378_v7  ;;  %16360 = vmatprep.mubr.msk.f32.mxu0 %vm17235_vm1, %v17233_v25  ;;  %v11519_v3 = vpop.permute.xlu0 %11518  ;;  %v14988_v39 = vld [vmem:[%s20088_s7 + $0x20] sm:$0xff] }
0x17f4   :  { %v9839_v46 = vmul.f32 %v17034_v4, %v19354_v45  ;;  %16365 = vmatprep.mubr.msk.f32.mxu1 %vm17235_vm1, %v17233_v25  ;;  %16368 = vmatprep.subr.mxu0 %v17233_v25 }
0x17f5   :  { %16373 = vmatprep.subr.mxu1 %v17233_v25  ;;  %16361 = vmatmul.mubr.msk.f32.vlgmr.msra.gmra.mrb[122].mxu0 %vm389_vm2, %v9837_v42 }
0x17f6   :  { %v17036_v63 = vpop.eup %17035  ;;  %16366 = vmatmul.mubr.msk.f32.vlgmr.msra.gmra.mrb[136].mxu1 %vm389_vm2, %v9839_v46  ;;  %16369 = vmatpush3.msra.mxu0 %v19376_v37 }
0x17f7   :  { %v17038_v45 = vpop.eup %17037  ;;  %v9841_v7 = vmul.f32 %v17036_v63, %v19360_v18  ;;  %16374 = vmatpush3.msra.mxu1 %v11519_v3  ;;  %16370 = vmatprep.mubr.msk.f32.mxu0 %vm17235_vm1, %v17233_v25  ;;  %v15114_v63 = vld [vmem:[%s20089_s8 + $0x1] ss:$0 sm:$0xff] }
0x17f8   :  { %v9843_v15 = vmul.f32 %v17038_v45, %v19362_v17  ;;  %16375 = vmatprep.mubr.msk.f32.mxu1 %vm17235_vm1, %v17233_v25  ;;  %16378 = vmatprep.subr.mxu0 %v17233_v25  ;;  %v14989_v17 = vld [vmem:[%s20088_s7 + $0x28] sm:$0xff] }
0x17f9   :  { %16371 = vmatmul.mubr.msk.f32.vlgmr.msra.gmra.mrb[124].mxu0 %vm389_vm2, %v9841_v7  ;;  %16383 = vmatprep.subr.mxu1 %v14988_v39 }
0x17fa   :  { %v17040_v37 = vpop.eup %17039  ;;  %16376 = vmatmul.mubr.msk.f32.vlgmr.msra.gmra.mrb[138].mxu1 %vm389_vm2, %v9843_v15  ;;  %16379 = vmatpush3.msra.mxu0 %v11595_v9  ;;  %v17121_v9 = vld [vmem:[#allocation8 + $0x8] sm:$0xff] }
0x17fb   :  { %v9845_v18 = vmul.f32 %v17040_v37, %v19368_v16  ;;  %16380 = vmatprep.mubr.msk.f32.mxu0 %vm17235_vm1, %v17233_v25  ;;  %16384 = vmatpush3.msra.mxu1 %v14988_v39  ;;  %v14990_v16 = vld [vmem:[%s20088_s7 + $0x30] sm:$0xff] }
0x17fc   :  { %16394 = vmatprep.subr.mxu1 %v14989_v17 }
0x17fd   :  { %16381 = vmatmul.mubr.msk.f32.vlgmr.msra.gmra.mrb[126].mxu0 %vm389_vm2, %v9845_v18  ;;  %v17122_v18 = vld [vmem:[#allocation8] sm:$0xff] }
0x1863   :  { %v9918_v43 = vpop.f32.mrb[116].mxu1 }
0x1864   :  { %v16267_v56 = vpop.f32.mrb[117].mxu1  ;;  %16385 = vmatprep.mubr.msk.f32.mxu1 %vm389_vm2, %v9918_v43 }
0x1867   :  { %v9994_v21 = vpop.f32.mrb[104].mxu0 }
0x1868   :  { %v10070_v47 = vpop.f32.mrb[118].mxu1  ;;  %v16272_v27 = vpop.f32.mrb[105].mxu0  ;;  %16386 = vmatmul.mubr.msk.f32.vlgmr.msra.gmra.mrb[140].mxu1 %vm389_vm2, %v9994_v21 }
0x1869   :  { %v16277_v44 = vpop.f32.mrb[119].mxu1  ;;  %16388 = vmatprep.mubr.msk.f32.mxu1 %vm389_vm2, %v10070_v47  ;;  %16395 = vmatpush3.msra.mxu1 %v14989_v17 }
0x186a   :  { %16405 = vmatprep.subr.mxu1 %v14990_v16  ;;  %v17123_v44 = vld [vmem:[#allocation8 + $0x10] sm:$0xff] }
0x186b   :  { %v10146_v35 = vpop.f32.mrb[106].mxu0 }
0x186c   :  { %v10222_v20 = vpop.f32.mrb[120].mxu1  ;;  %v16282_v31 = vpop.f32.mrb[107].mxu0  ;;  %16389 = vmatmul.mubr.msk.f32.gmra.mrb[142].mxu1 %vm389_vm2, %v10146_v35 }
0x186d   :  { %v16287_v5 = vpop.f32.mrb[121].mxu1  ;;  %16391 = vmatprep.mubr.msk.f32.mxu1 %vm389_vm2, %v10222_v20 }
0x186e   :  { %v17124_v5 = vld [vmem:[#allocation8 + $0x18] sm:$0xff] }
0x186f   :  { %v10298_v36 = vpop.f32.mrb[108].mxu0 }
0x1870   :  { %v16292_v62 = vpop.f32.mrb[109].mxu0  ;;  %16392 = vmatmul.mubr.msk.f32.gmra.mrb[144].mxu1 %vm389_vm2, %v10298_v36 }
0x18aa   :  { %v10450_v48 = vpop.f32.mrb[110].mxu0 }
0x18ab   :  { %v10374_v30 = vpop.f32.mrb[122].mxu1  ;;  %v16302_v38 = vpop.f32.mrb[111].mxu0 }
0x18ac   :  { %v16297_v1 = vpop.f32.mrb[123].mxu1  ;;  %16396 = vmatprep.mubr.msk.f32.mxu1 %vm389_vm2, %v10374_v30  ;;  %v17125_v38 = vld [vmem:[#allocation8 + $0x20] sm:$0xff] }
0x18ad   :  { %16397 = vmatmul.mubr.msk.f32.vlgmr.msra.gmra.mrb[140].mxu1 %vm389_vm2, %v10450_v48 }
0x18ae   :  { %16406 = vmatpush3.msra.mxu1 %v14990_v16 }
0x18af   :  { %16416 = vmatprep.subr.mxu1 %v14991_v28 }
0x18b0   :  { %v10526_v6 = vpop.f32.mrb[124].mxu1 }
0x18b1   :  { %v16307_v22 = vpop.f32.mrb[125].mxu1  ;;  %16399 = vmatprep.mubr.msk.f32.mxu1 %vm389_vm2, %v10526_v6 }
0x18b4   :  { %v10602_v50 = vpop.f32.mrb[112].mxu0 }
0x18b5   :  { %v10678_v59 = vpop.f32.mrb[126].mxu1  ;;  %v16312_v52 = vpop.f32.mrb[113].mxu0  ;;  %16400 = vmatmul.mubr.msk.f32.gmra.mrb[142].mxu1 %vm389_vm2, %v10602_v50 }
0x18b6   :  { %v16317_v53 = vpop.f32.mrb[127].mxu1  ;;  %16402 = vmatprep.mubr.msk.f32.mxu1 %vm389_vm2, %v10678_v59 }
0x18b8   :  { %v10754_v61 = vpop.f32.mrb[114].mxu0 }
0x18b9   :  { %v10830_v2 = vpop.f32.mrb[128].mxu1  ;;  %v16322_v54 = vpop.f32.mrb[115].mxu0  ;;  %16403 = vmatmul.mubr.msk.f32.gmra.mrb[144].mxu1 %vm389_vm2, %v10754_v61 }
0x18ba   :  { %v16327_v11 = vpop.f32.mrb[129].mxu1  ;;  %16407 = vmatprep.mubr.msk.f32.mxu1 %vm389_vm2, %v10830_v2 }
0x18bc   :  { %v10906_v49 = vpop.f32.mrb[116].mxu0 }
0x18bd   :  { %v10982_v41 = vpop.f32.mrb[130].mxu1  ;;  %v16332_v29 = vpop.f32.mrb[117].mxu0  ;;  %16408 = vmatmul.mubr.msk.f32.vlgmr.msra.gmra.mrb[140].mxu1 %vm389_vm2, %v10906_v49 }
0x18be   :  { %v16337_v24 = vpop.f32.mrb[131].mxu1  ;;  %16410 = vmatprep.mubr.msk.f32.mxu1 %vm389_vm2, %v10982_v41  ;;  %16417 = vmatpush3.msra.mxu1 %v14991_v28  ;;  %v17126_v28 = vld [vmem:[#allocation8 + $0x28] sm:$0xff] }
0x18bf   :  { %16495 = vmatprep.subr.mxu1 %v17233_v25 }
0x18c0   :  { %v11058_v34 = vpop.f32.mrb[118].mxu0 }
0x18c1   :  { %v11134_v60 = vpop.f32.mrb[132].mxu1  ;;  %v16342_v58 = vpop.f32.mrb[119].mxu0  ;;  %16411 = vmatmul.mubr.msk.f32.gmra.mrb[142].mxu1 %vm389_vm2, %v11058_v34 }
0x18c2   :  { %v16347_v55 = vpop.f32.mrb[133].mxu1  ;;  %16413 = vmatprep.mubr.msk.f32.mxu1 %vm389_vm2, %v11134_v60 }
0x18c4   :  { %v11210_v32 = vpop.f32.mrb[120].mxu0 }
0x18c5   :  { %v11286_v40 = vpop.f32.mrb[134].mxu1  ;;  %v16352_v12 = vpop.f32.mrb[121].mxu0  ;;  %16414 = vmatmul.mubr.msk.f32.gmra.mrb[144].mxu1 %vm389_vm2, %v11210_v32 }
0x18c6   :  { %v16357_v14 = vpop.f32.mrb[135].mxu1  ;;  %16418 = vmatprep.mubr.msk.f32.mxu1 %vm389_vm2, %v11286_v40 }
0x18c8   :  { %v11362_v57 = vpop.f32.mrb[122].mxu0 }
0x18c9   :  { %v11438_v0 = vpop.f32.mrb[136].mxu1  ;;  %v16362_v33 = vpop.f32.mrb[123].mxu0  ;;  %16419 = vmatmul.mubr.msk.f32.vlgmr.msra.gmra.mrb[140].mxu1 %vm389_vm2, %v11362_v57 }
0x18ca   :  { %v16367_v8 = vpop.f32.mrb[137].mxu1  ;;  %16421 = vmatprep.mubr.msk.f32.mxu1 %vm389_vm2, %v11438_v0 }
0x18cc   :  { %v11514_v51 = vpop.f32.mrb[124].mxu0 }
0x18cd   :  { %v11590_v10 = vpop.f32.mrb[138].mxu1  ;;  %v16372_v4 = vpop.f32.mrb[125].mxu0  ;;  %16422 = vmatmul.mubr.msk.f32.gmra.mrb[142].mxu1 %vm389_vm2, %v11514_v51 }
0x18ce   :  { %v16377_v42 = vpop.f32.mrb[139].mxu1  ;;  %16424 = vmatprep.mubr.msk.f32.mxu1 %vm389_vm2, %v11590_v10 }
0x18d0   :  { %v11666_v46 = vpop.f32.mrb[126].mxu0 }
0x18d1   :  { %v16382_v3 = vpop.f32.mrb[127].mxu0  ;;  %16425 = vmatmul.mubr.msk.f32.gmra.mrb[144].mxu1 %vm389_vm2, %v11666_v46 }
0x18d2   :  { %16497 = vmatprep.mubr.msk.f32.mxu1 %vm17235_vm1, %v17233_v25 }
0x199c   :  { %v16420_v39 = vpop.f32.mrb[140].mxu1 }
0x199d   :  { %v12147_v45 = vadd.f32 %v16420_v39, %v15114_v63  ;;  %v12093_v7 = vpop.f32.mrb[141].mxu1 }
0x199e   :  { %v12146_v15 = vadd.f32 %v15114_v63, %v12093_v7  ;;  %v14996_v7 = vld [vmem:[%s20092_s11 + $0x28] sm:$0xff] }
0x199f   :  { %v12153_v37 = vadd.f32 %v17121_v9, %v12147_v45  ;;  %v14995_v45 = vld [vmem:[%s20092_s11 + $0x20] sm:$0xff]  ;;  %v14997_v9 = vld [vmem:[%s20092_s11 + $0x30] sm:$0xff] }
0x19a0   :  { %v12152_v17 = vadd.f32 %v17122_v18, %v12146_v15  ;;  %v16423_v43 = vpop.f32.mrb[142].mxu1  ;;  %v16674_v15 = vpack.c.bf16 %v14996_v7, %v14995_v45  ;;  %v15006_v45 = vld [vmem:[%s20094_s13 + $0x70] sm:$0xff]  ;;  %v15007_v7 = vld [vmem:[%s20094_s13 + $0x78] sm:$0xff] }
0x19a1   :  { %v12103_v56 = vpop.f32.mrb[143].mxu1  ;;  %v12161_v21 = vsel %vm231_vm0, %v12153_v37, 0.0  ;;  %v12149_v16 = vadd.f32 %v16423_v43, %v15114_v63 }
0x19a2   :  { %v12148_v47 = vadd.f32 %v15114_v63, %v12103_v56  ;;  %12162 = vadd.xlane.f32.xlu1 %v12161_v21  ;;  %v12158_v27 = vsel %vm231_vm0, %v12152_v17, 0.0  ;;  %16675 = vmatprep.subr.bf16.mxu0 %v16674_v15 }
0x19a3   :  { %12159 = vadd.xlane.f32.xlu0 %v12158_v27  ;;  %v12155_v36 = vadd.f32 %v17124_v5, %v12149_v16  ;;  %16677 = vmatpush3.bf16.msra.mxu0 %v16674_v15  ;;  %v16694_v15 = vpack.c.bf16 %v15007_v7, %v15006_v45 }
0x19a4   :  { %v12154_v35 = vadd.f32 %v17123_v44, %v12148_v47  ;;  %v16426_v20 = vpop.f32.mrb[144].mxu1 }
0x19a5   :  { %v12113_v31 = vpop.f32.mrb[145].mxu1  ;;  %v12151_v62 = vadd.f32 %v16426_v20, %v15114_v63  ;;  %v12167_v22 = vsel %vm231_vm0, %v12155_v36, 0.0 }
0x19a6   :  { %v12150_v48 = vadd.f32 %v15114_v63, %v12113_v31  ;;  %v12164_v30 = vsel %vm231_vm0, %v12154_v35, 0.0 }
0x19a7   :  { %12165 = vadd.xlane.f32.xlu0 %v12164_v30  ;;  %v12157_v6 = vadd.f32 %v17126_v28, %v12151_v62  ;;  %v15115_v28 = vld [vmem:[%s20090_s9 + $0x1] ss:$0 sm:$0xff] }
0x19a8   :  { %v12156_v1 = vadd.f32 %v17125_v38, %v12150_v48 }
0x19a9   :  { %v12173_v59 = vsel %vm231_vm0, %v12157_v6, 0.0 }
0x19aa   :  { %v12170_v50 = vsel %vm231_vm0, %v12156_v1, 0.0 }
0x19ab   :  { %12168 = vadd.xlane.f32.xlu0 %v12167_v22  ;;  %12171 = vadd.xlane.f32.xlu1 %v12170_v50 }
0x19af   :  { %12174 = vadd.xlane.f32.xlu0 %v12173_v59 }
0x1a2f   :  { %v12163_v52 = vpop.xlane.xlu1 %12162 }
0x1a30   :  { %v12177_v53 = vmul.f32 0.03125, %v12163_v52  ;;  %v12160_v61 = vpop.xlane.xlu0 %12159  ;;  %v15116_v52 = vld [vmem:[%s20091_s10 + $0x1] ss:$0 sm:$0xff] }
0x1a31   :  { %v12176_v2 = vmul.f32 0.03125, %v12160_v61 }
0x1a32   :  { %v19560_v54 = vsub.f32 %v12153_v37, %v12177_v53  ;;  %v14998_v37 = vld [vmem:[%s20092_s11 + $0x38] sm:$0xff] }
0x1a33   :  { %v19562_v11 = vsub.f32 %v12152_v17, %v12176_v2  ;;  %v16678_v18 = vpack.c.bf16 %v14998_v37, %v14997_v9  ;;  %v15117_v9 = vld [vmem:[%s20093_s12 + $0x1] ss:$0 sm:$0xff] }
0x1a34   :  { %v12166_v49 = vpop.xlane.xlu0 %12165  ;;  %v12189_v41 = vmul.f32 %v19560_v54, %v19560_v54 }
0x1a35   :  { %v12178_v29 = vmul.f32 0.03125, %v12166_v49  ;;  %v12188_v24 = vmul.f32 %v19562_v11, %v19562_v11  ;;  %16679 = vmatprep.subr.bf16.mxu0 %v16678_v18 }
0x1a36   :  { %v12197_v34 = vsel %vm231_vm0, %v12189_v41, 0.0  ;;  %16681 = vmatpush3.bf16.msra.mxu0 %v16678_v18 }
0x1a37   :  { %v19569_v60 = vsub.f32 %v12154_v35, %v12178_v29  ;;  %12198 = vadd.xlane.f32.xlu0 %v12197_v34  ;;  %v12194_v58 = vsel %vm231_vm0, %v12188_v24, 0.0 }
0x1a38   :  { %v12169_v55 = vpop.xlane.xlu0 %12168  ;;  %12195 = vadd.xlane.f32.xlu1 %v12194_v58  ;;  %v12172_v32 = vpop.xlane.xlu1 %12171 }
0x1a39   :  { %v12179_v40 = vmul.f32 0.03125, %v12169_v55  ;;  %v12180_v12 = vmul.f32 0.03125, %v12172_v32  ;;  %v12190_v14 = vmul.f32 %v19569_v60, %v19569_v60 }
0x1a3b   :  { %v19574_v57 = vsub.f32 %v12155_v36, %v12179_v40  ;;  %v19576_v0 = vsub.f32 %v12156_v1, %v12180_v12  ;;  %v12200_v33 = vsel %vm231_vm0, %v12190_v14, 0.0 }
0x1a3c   :  { %v12175_v8 = vpop.xlane.xlu0 %12174  ;;  %12201 = vadd.xlane.f32.xlu1 %v12200_v33 }
0x1a3d   :  { %v12181_v51 = vmul.f32 0.03125, %v12175_v8  ;;  %v12191_v10 = vmul.f32 %v19574_v57, %v19574_v57  ;;  %v12192_v4 = vmul.f32 %v19576_v0, %v19576_v0 }
0x1a3f   :  { %v19583_v42 = vsub.f32 %v12157_v6, %v12181_v51  ;;  %v12203_v46 = vsel %vm231_vm0, %v12191_v10, 0.0  ;;  %v12206_v3 = vsel %vm231_vm0, %v12192_v4, 0.0  ;;  %v15001_v51 = vld [vmem:[%s20094_s13 + $0x48] sm:$0xff]  ;;  %v15002_v4 = vld [vmem:[%s20094_s13 + $0x50] sm:$0xff] }
0x1a40   :  { %12204 = vadd.xlane.f32.xlu0 %v12203_v46  ;;  %12207 = vadd.xlane.f32.xlu1 %v12206_v3  ;;  %v15004_v3 = vld [vmem:[%s20094_s13 + $0x60] sm:$0xff] }
0x1a41   :  { %v12193_v63 = vmul.f32 %v19583_v42, %v19583_v42 }
0x1a43   :  { %v12209_v39 = vsel %vm231_vm0, %v12193_v63, 0.0  ;;  %v15005_v63 = vld [vmem:[%s20094_s13 + $0x68] sm:$0xff] }
0x1a44   :  { %12210 = vadd.xlane.f32.xlu0 %v12209_v39  ;;  %v16690_v39 = vpack.c.bf16 %v15005_v63, %v15004_v3 }
0x1ac4   :  { %v12199_v17 = vpop.xlane.xlu0 %12198 }
0x1ac5   :  { %v12213_v43 = vmul.f32 0.03125, %v12199_v17  ;;  %v12196_v56 = vpop.xlane.xlu1 %12195 }
0x1ac6   :  { %v12212_v21 = vmul.f32 0.03125, %v12196_v56 }
0x1ac7   :  { %v12219_v16 = vadd.f32 1e-12, %v12213_v43 }
0x1ac8   :  { %v12218_v47 = vadd.f32 1e-12, %v12212_v21 }
0x1ac9   :  { %17041 = vrsqrt.f32 %v12219_v16  ;;  %v12202_v27 = vpop.xlane.xlu1 %12201 }
0x1aca   :  { %17043 = vrsqrt.f32 %v12218_v47  ;;  %v12214_v44 = vmul.f32 0.03125, %v12202_v27 }
0x1acc   :  { %v12220_v35 = vadd.f32 1e-12, %v12214_v44 }
0x1acd   :  { %v12205_v20 = vpop.xlane.xlu0 %12204  ;;  %v12208_v31 = vpop.xlane.xlu1 %12207 }
0x1ace   :  { %17045 = vrsqrt.f32 %v12220_v35  ;;  %v12215_v5 = vmul.f32 0.03125, %v12205_v20  ;;  %v12216_v36 = vmul.f32 0.03125, %v12208_v31 }
0x1ad0   :  { %v12221_v62 = vadd.f32 1e-12, %v12215_v5  ;;  %v12222_v48 = vadd.f32 1e-12, %v12216_v36 }
0x1ad1   :  { %v12211_v30 = vpop.xlane.xlu0 %12210 }
0x1ad2   :  { %17047 = vrsqrt.f32 %v12221_v62  ;;  %v12217_v38 = vmul.f32 0.03125, %v12211_v30 }
0x1ad3   :  { %v17042_v1 = vpop.eup %17041  ;;  %17049 = vrsqrt.f32 %v12222_v48 }
0x1ad4   :  { %v17044_v6 = vpop.eup %17043  ;;  %v12231_v22 = vmul.f32 %v17042_v1, %v19560_v54  ;;  %v12223_v50 = vadd.f32 1e-12, %v12217_v38 }
0x1ad5   :  { %v12230_v59 = vmul.f32 %v17044_v6, %v19562_v11 }
0x1ad6   :  { %17051 = vrsqrt.f32 %v12223_v50  ;;  %v12243_v53 = vmul.f32 %v15115_v28, %v12231_v22 }
0x1ad7   :  { %v12242_v61 = vmul.f32 %v15115_v28, %v12230_v59 }
0x1ad8   :  { %v17046_v2 = vpop.eup %17045  ;;  %v19613_v29 = vadd.f32 %v15116_v52, %v12243_v53 }
0x1ad9   :  { %v19610_v49 = vadd.f32 %v15116_v52, %v12242_v61  ;;  %v12232_v41 = vmul.f32 %v17046_v2, %v19569_v60 }
0x1adb   :  { %16435 = vmatprep.mubr.msk.f32.mxu0 %vm231_vm0, %v19610_v49  ;;  %v12244_v54 = vmul.f32 %v15115_v28, %v12232_v41 }
0x1adc   :  { %v17048_v24 = vpop.eup %17047  ;;  %16436 = vmatmul.mubr.msk.f32.vlgmr.msra.gmra.mrb[128].mxu0 %vm231_vm0, %v19613_v29 }
0x1add   :  { %v17050_v11 = vpop.eup %17049  ;;  %v19619_v34 = vadd.f32 %v15116_v52, %v12244_v54  ;;  %v12233_v58 = vmul.f32 %v17048_v24, %v19574_v57 }
0x1ade   :  { %v12234_v55 = vmul.f32 %v17050_v11, %v19576_v0  ;;  %v15000_v0 = vld [vmem:[%s20094_s13 + $0x40] sm:$0xff] }
0x1adf   :  { %16438 = vmatprep.mubr.msk.f32.mxu0 %vm231_vm0, %v19619_v34  ;;  %v12245_v60 = vmul.f32 %v15115_v28, %v12233_v58  ;;  %v16682_v10 = vpack.c.bf16 %v15001_v51, %v15000_v0 }
0x1ae0   :  { %v17052_v32 = vpop.eup %17051  ;;  %v12246_v40 = vmul.f32 %v15115_v28, %v12234_v55 }
0x1ae1   :  { %v19625_v12 = vadd.f32 %v15116_v52, %v12245_v60  ;;  %v12235_v14 = vmul.f32 %v17052_v32, %v19583_v42  ;;  %16683 = vmatprep.subr.bf16.mxu0 %v16682_v10  ;;  %v15003_v42 = vld [vmem:[%s20094_s13 + $0x58] sm:$0xff] }
0x1ae2   :  { %v19628_v33 = vadd.f32 %v15116_v52, %v12246_v40  ;;  %16685 = vmatpush3.bf16.msra.mxu0 %v16682_v10  ;;  %v16686_v46 = vpack.c.bf16 %v15003_v42, %v15002_v4 }
0x1ae3   :  { %16439 = vmatmul.mubr.msk.f32.gmra.mrb[130].mxu0 %vm231_vm0, %v19625_v12  ;;  %v12247_v8 = vmul.f32 %v15115_v28, %v12235_v14 }
0x1ae4   :  { %16441 = vmatprep.mubr.msk.f32.mxu0 %vm231_vm0, %v19628_v33  ;;  %16687 = vmatprep.subr.bf16.mxu0 %v16686_v46 }
0x1ae5   :  { %v19634_v57 = vadd.f32 %v15116_v52, %v12247_v8 }
0x1ae6   :  { %16689 = vmatpush3.bf16.msra.mxu0 %v16686_v46 }
0x1ae7   :  { %16442 = vmatmul.mubr.msk.f32.gmra.mrb[132].mxu0 %vm231_vm0, %v19634_v57  ;;  %16691 = vmatprep.subr.bf16.mxu0 %v16690_v39 }
0x1aea   :  { %16693 = vmatpush3.bf16.msra.mxu0 %v16690_v39 }
0x1aeb   :  { %16695 = vmatprep.subr.bf16.mxu0 %v16694_v15 }
0x1aee   :  { %16697 = vmatpush3.bf16.msra.mxu0 %v16694_v15 }
0x1aef   :  { %16698 = vmatprep.subr.bf16.mxu0 %v17239_v19 }
0x1baf   :  { %v16437_v37 = vpop.f32.mrb[128].mxu0 }
0x1bb0   :  { %v12356_v18 = vadd.f32 %v16437_v37, %v15117_v9  ;;  %v12350_v17 = vpop.f32.mrb[129].mxu0 }
0x1bb1   :  { %v12351_v43 = vadd.f32 %v15117_v9, %v12350_v17 }
0x1bb2   :  { %v12380_v56 = vmul.f32 %v12356_v18, %v12356_v18 }
0x1bb3   :  { %v12379_v21 = vmul.f32 %v12351_v43, %v12351_v43 }
0x1bb4   :  { %v12386_v16 = vmul.f32 %v12380_v56, %v12356_v18 }
0x1bb5   :  { %v12385_v47 = vmul.f32 %v12379_v21, %v12351_v43 }
0x1bb6   :  { %v12392_v27 = vmul.f32 0.044715, %v12386_v16  ;;  %v16440_v44 = vpop.f32.mrb[130].mxu0 }
0x1bb7   :  { %v12391_v35 = vmul.f32 0.044715, %v12385_v47  ;;  %v12366_v20 = vadd.f32 %v16440_v44, %v15117_v9  ;;  %v12360_v31 = vpop.f32.mrb[131].mxu0 }
0x1bb8   :  { %v12398_v5 = vadd.f32 %v12392_v27, %v12356_v18  ;;  %v12361_v36 = vadd.f32 %v15117_v9, %v12360_v31 }
0x1bb9   :  { %v12397_v62 = vadd.f32 %v12391_v35, %v12351_v43  ;;  %v12382_v48 = vmul.f32 %v12366_v20, %v12366_v20 }
0x1bba   :  { %v12404_v30 = vmul.f32 0.7978846, %v12398_v5  ;;  %v12381_v38 = vmul.f32 %v12361_v36, %v12361_v36  ;;  %v16443_v1 = vpop.f32.mrb[132].mxu0 }
0x1bbb   :  { %v12403_v28 = vmul.f32 0.7978846, %v12397_v62  ;;  %v12388_v6 = vmul.f32 %v12382_v48, %v12366_v20  ;;  %v12376_v22 = vadd.f32 %v16443_v1, %v15117_v9  ;;  %v12370_v50 = vpop.f32.mrb[133].mxu0 }
0x1bbc   :  { %17053 = vtanh.f32 %v12404_v30  ;;  %v12387_v59 = vmul.f32 %v12381_v38, %v12361_v36  ;;  %v12371_v52 = vadd.f32 %v15117_v9, %v12370_v50 }
0x1bbd   :  { %17055 = vtanh.f32 %v12403_v28  ;;  %v12394_v53 = vmul.f32 0.044715, %v12388_v6  ;;  %v12384_v61 = vmul.f32 %v12376_v22, %v12376_v22 }
0x1bbe   :  { %v12393_v2 = vmul.f32 0.044715, %v12387_v59  ;;  %v12383_v41 = vmul.f32 %v12371_v52, %v12371_v52 }
0x1bbf   :  { %v12400_v54 = vadd.f32 %v12394_v53, %v12366_v20  ;;  %v12390_v24 = vmul.f32 %v12384_v61, %v12376_v22 }
0x1bc0   :  { %v12399_v11 = vadd.f32 %v12393_v2, %v12361_v36  ;;  %v12389_v58 = vmul.f32 %v12383_v41, %v12371_v52 }
0x1bc1   :  { %v12406_v55 = vmul.f32 0.7978846, %v12400_v54  ;;  %v12396_v60 = vmul.f32 0.044715, %v12390_v24 }
0x1bc2   :  { %v12405_v32 = vmul.f32 0.7978846, %v12399_v11  ;;  %v12395_v40 = vmul.f32 0.044715, %v12389_v58 }
0x1bc3   :  { %17057 = vtanh.f32 %v12406_v55  ;;  %v12402_v14 = vadd.f32 %v12396_v60, %v12376_v22 }
0x1bc4   :  { %17059 = vtanh.f32 %v12405_v32  ;;  %v12401_v8 = vadd.f32 %v12395_v40, %v12371_v52 }
0x1bc5   :  { %v12408_v0 = vmul.f32 0.7978846, %v12402_v14 }
0x1bc6   :  { %v17054_v51 = vpop.eup %17053  ;;  %v12407_v10 = vmul.f32 0.7978846, %v12401_v8 }
0x1bc7   :  { %v17056_v4 = vpop.eup %17055  ;;  %v12416_v42 = vadd.f32 1.0, %v17054_v51  ;;  %17061 = vtanh.f32 %v12408_v0 }
0x1bc8   :  { %17063 = vtanh.f32 %v12407_v10  ;;  %v12415_v46 = vadd.f32 1.0, %v17056_v4 }
0x1bc9   :  { %v12422_v3 = vmul.f32 0.5, %v12416_v42 }
0x1bca   :  { %v12421_v63 = vmul.f32 0.5, %v12415_v46 }
0x1bcb   :  { %v12428_v7 = vmul.f32 %v12422_v3, %v12356_v18 }
0x1bcc   :  { %v12427_v39 = vmul.f32 %v12421_v63, %v12351_v43 }
0x1bcd   :  { %v17058_v45 = vpop.eup %17057 }
0x1bce   :  { %v17060_v15 = vpop.eup %17059  ;;  %16460 = vmatprep.mubr.msk.f32.mxu0 %vm5148_vm3, %v12427_v39  ;;  %v12418_v9 = vadd.f32 1.0, %v17058_v45 }
0x1bcf   :  { %16461 = vmatmul.mubr.msk.f32.vlgmr.msra.gmra.mrb[134].mxu0 %vm5148_vm3, %v12428_v7  ;;  %v12417_v37 = vadd.f32 1.0, %v17060_v15 }
0x1bd0   :  { %v12424_v17 = vmul.f32 0.5, %v12418_v9 }
0x1bd1   :  { %v17062_v56 = vpop.eup %17061  ;;  %v12423_v21 = vmul.f32 0.5, %v12417_v37 }
0x1bd2   :  { %v17064_v16 = vpop.eup %17063  ;;  %v12420_v47 = vadd.f32 1.0, %v17062_v56  ;;  %v12430_v35 = vmul.f32 %v12424_v17, %v12366_v20 }
0x1bd3   :  { %v12429_v27 = vmul.f32 %v12423_v21, %v12361_v36  ;;  %v12419_v44 = vadd.f32 1.0, %v17064_v16  ;;  %v15124_v36 = vld [vmem:[%s20095_s14 + $0x1] ss:$0 sm:$0xff] }
0x1bd4   :  { %v12426_v31 = vmul.f32 0.5, %v12420_v47 }
0x1bd5   :  { %16463 = vmatprep.mubr.msk.f32.mxu0 %vm5148_vm3, %v12429_v27  ;;  %v12425_v43 = vmul.f32 0.5, %v12419_v44 }
0x1bd6   :  { %16464 = vmatmul.mubr.msk.f32.gmra.mrb[136].mxu0 %vm5148_vm3, %v12430_v35  ;;  %v12432_v5 = vmul.f32 %v12426_v31, %v12376_v22  ;;  %v15133_v31 = vld [vmem:[%s20086_s5 + $0x60] sm:$0xff] }
0x1bd7   :  { %v12431_v18 = vmul.f32 %v12425_v43, %v12371_v52  ;;  %v15134_v43 = vld [vmem:[%s20086_s5 + $0x68] sm:$0xff] }
0x1bd9   :  { %16466 = vmatprep.mubr.msk.f32.mxu0 %vm5148_vm3, %v12431_v18  ;;  %v16699_v18 = vpack.c.bf16 %v15134_v43, %v15133_v31 }
0x1bda   :  { %16467 = vmatmul.mubr.msk.f32.gmra.mrb[138].mxu0 %vm5148_vm3, %v12432_v5  ;;  %v15135_v5 = vld [vmem:[%s20086_s5 + $0x70] sm:$0xff] }
0x1bdb   :  { %16477 = vmatprep.mubr.msk.f32.mxu0 %vm17235_vm1, %v17233_v25  ;;  %16700 = vmatpush3.bf16.msra.mxu0 %v16699_v18  ;;  %v15161_v18 = vld [vmem:[%s20087_s6 + $0x3] ss:$0 sm:$0xff] }
0x1bdc   :  { %16701 = vmatprep.subr.bf16.mxu0 %v17239_v19 }
0x1ca2   :  { %v16462_v20 = vpop.f32.mrb[134].mxu0 }
0x1ca3   :  { %v12529_v62 = vadd.f32 %v16462_v20, %v15124_v36  ;;  %v12523_v48 = vpop.f32.mrb[135].mxu0 }
0x1ca4   :  { %v12524_v6 = vadd.f32 %v15124_v36, %v12523_v48 }
0x1ca5   :  { %v12553_v30 = vadd.f32 %v12529_v62, %v19613_v29 }
0x1ca6   :  { %v12552_v61 = vadd.f32 %v12524_v6, %v19610_v49 }
0x1ca7   :  { %v12561_v38 = vsel %vm231_vm0, %v12553_v30, 0.0 }
0x1ca8   :  { %12562 = vadd.xlane.f32.xlu1 %v12561_v38  ;;  %v12558_v58 = vsel %vm231_vm0, %v12552_v61, 0.0 }
0x1ca9   :  { %v16465_v1 = vpop.f32.mrb[136].mxu0 }
0x1caa   :  { %v12533_v28 = vpop.f32.mrb[137].mxu0  ;;  %v12539_v29 = vadd.f32 %v16465_v1, %v15124_v36 }
0x1cab   :  { %v12534_v22 = vadd.f32 %v15124_v36, %v12533_v28 }
0x1cad   :  { %v12554_v50 = vadd.f32 %v12534_v22, %v19619_v34  ;;  %v16468_v59 = vpop.f32.mrb[138].mxu0  ;;  %v12555_v34 = vadd.f32 %v12539_v29, %v19625_v12 }
0x1cae   :  { %v12549_v52 = vadd.f32 %v16468_v59, %v15124_v36  ;;  %v12543_v53 = vpop.f32.mrb[139].mxu0 }
0x1caf   :  { %v12544_v2 = vadd.f32 %v15124_v36, %v12543_v53  ;;  %v12564_v41 = vsel %vm231_vm0, %v12554_v50, 0.0  ;;  %v12567_v49 = vsel %vm231_vm0, %v12555_v34, 0.0  ;;  %v15136_v36 = vld [vmem:[%s20086_s5 + $0x78] sm:$0xff] }
0x1cb0   :  { %v12557_v54 = vadd.f32 %v12549_v52, %v19634_v57  ;;  %12565 = vadd.xlane.f32.xlu1 %v12564_v41  ;;  %v16702_v20 = vpack.c.bf16 %v15136_v36, %v15135_v5 }
0x1cb1   :  { %v12556_v24 = vadd.f32 %v12544_v2, %v19628_v33 }
0x1cb2   :  { %v12573_v11 = vsel %vm231_vm0, %v12557_v54, 0.0  ;;  %16703 = vmatpush3.bf16.msra.mxu0 %v16702_v20 }
0x1cb3   :  { %12574 = vadd.xlane.f32.xlu0 %v12573_v11  ;;  %v12570_v55 = vsel %vm231_vm0, %v12556_v24, 0.0  ;;  %16480 = vmatprep.subr.mxu0 %v17233_v25 }
0x1cb4   :  { %12559 = vadd.xlane.f32.xlu1 %v12558_v58 }
0x1cb7   :  { %12571 = vadd.xlane.f32.xlu0 %v12570_v55 }
0x1cbb   :  { %12568 = vadd.xlane.f32.xlu0 %v12567_v49 }
0x1d35   :  { %v12563_v60 = vpop.xlane.xlu1 %12562 }
0x1d36   :  { %v12577_v57 = vmul.f32 0.03125, %v12563_v60 }
0x1d38   :  { %v12583_v32 = vsub.f32 %v12553_v30, %v12577_v57 }
0x1d3a   :  { %v12589_v40 = vmul.f32 %v12583_v32, %v12583_v32 }
0x1d3c   :  { %v12597_v33 = vsel %vm231_vm0, %v12589_v40, 0.0 }
0x1d3d   :  { %v12566_v14 = vpop.xlane.xlu1 %12565  ;;  %12598 = vadd.xlane.f32.xlu1 %v12597_v33 }
0x1d3e   :  { %v12578_v8 = vmul.f32 0.03125, %v12566_v14 }
0x1d40   :  { %v19690_v0 = vsub.f32 %v12554_v50, %v12578_v8  ;;  %v12575_v51 = vpop.xlane.xlu0 %12574 }
0x1d41   :  { %v12581_v10 = vmul.f32 0.03125, %v12575_v51  ;;  %v12560_v12 = vpop.xlane.xlu1 %12559 }
0x1d42   :  { %v12576_v4 = vmul.f32 0.03125, %v12560_v12  ;;  %v12590_v42 = vmul.f32 %v19690_v0, %v19690_v0 }
0x1d43   :  { %v19694_v46 = vsub.f32 %v12557_v54, %v12581_v10 }
0x1d44   :  { %v19696_v3 = vsub.f32 %v12552_v61, %v12576_v4  ;;  %v12572_v63 = vpop.xlane.xlu0 %12571  ;;  %v12600_v39 = vsel %vm231_vm0, %v12590_v42, 0.0  ;;  %v15131_v61 = vld [vmem:[%s20096_s15 + $0x1] ss:$0 sm:$0xff] }
0x1d45   :  { %v12580_v45 = vmul.f32 0.03125, %v12572_v63  ;;  %12601 = vadd.xlane.f32.xlu1 %v12600_v39  ;;  %v12593_v7 = vmul.f32 %v19694_v46, %v19694_v46 }
0x1d46   :  { %v12588_v15 = vmul.f32 %v19696_v3, %v19696_v3 }
0x1d47   :  { %v19703_v9 = vsub.f32 %v12556_v24, %v12580_v45  ;;  %v12609_v37 = vsel %vm231_vm0, %v12593_v7, 0.0  ;;  %v15132_v24 = vld [vmem:[%s20097_s16 + $0x1] ss:$0 sm:$0xff] }
0x1d48   :  { %12610 = vadd.xlane.f32.xlu0 %v12609_v37  ;;  %v12569_v17 = vpop.xlane.xlu0 %12568  ;;  %v12594_v56 = vsel %vm231_vm0, %v12588_v15, 0.0 }
0x1d49   :  { %v12579_v21 = vmul.f32 0.03125, %v12569_v17  ;;  %12595 = vadd.xlane.f32.xlu1 %v12594_v56  ;;  %v12592_v16 = vmul.f32 %v19703_v9, %v19703_v9 }
0x1d4b   :  { %v19709_v47 = vsub.f32 %v12555_v34, %v12579_v21  ;;  %v12606_v27 = vsel %vm231_vm0, %v12592_v16, 0.0 }
0x1d4c   :  { %12607 = vadd.xlane.f32.xlu0 %v12606_v27 }
0x1d4d   :  { %v12591_v44 = vmul.f32 %v19709_v47, %v19709_v47 }
0x1d4f   :  { %v12603_v35 = vsel %vm231_vm0, %v12591_v44, 0.0 }
0x1d50   :  { %12604 = vadd.xlane.f32.xlu0 %v12603_v35 }
0x1dca   :  { %v12599_v62 = vpop.xlane.xlu1 %12598 }
0x1dcb   :  { %v12613_v48 = vmul.f32 0.03125, %v12599_v62 }
0x1dcd   :  { %v12619_v30 = vadd.f32 1e-12, %v12613_v48 }
0x1dcf   :  { %17065 = vrsqrt.f32 %v12619_v30 }
0x1dd2   :  { %v12602_v38 = vpop.xlane.xlu1 %12601 }
0x1dd3   :  { %v12614_v1 = vmul.f32 0.03125, %v12602_v38 }
0x1dd5   :  { %v12620_v28 = vadd.f32 1e-12, %v12614_v1  ;;  %v12611_v6 = vpop.xlane.xlu0 %12610 }
0x1dd6   :  { %v12617_v22 = vmul.f32 0.03125, %v12611_v6  ;;  %v12596_v50 = vpop.xlane.xlu1 %12595 }
0x1dd7   :  { %17067 = vrsqrt.f32 %v12620_v28  ;;  %v12612_v59 = vmul.f32 0.03125, %v12596_v50 }
0x1dd8   :  { %v12623_v52 = vadd.f32 1e-12, %v12617_v22 }
0x1dd9   :  { %v17066_v53 = vpop.eup %17065  ;;  %v12618_v2 = vadd.f32 1e-12, %v12612_v59  ;;  %v12608_v41 = vpop.xlane.xlu0 %12607 }
0x1dda   :  { %v12631_v54 = vmul.f32 %v17066_v53, %v12583_v32  ;;  %17069 = vrsqrt.f32 %v12623_v52  ;;  %v12616_v29 = vmul.f32 0.03125, %v12608_v41 }
0x1ddb   :  { %17071 = vrsqrt.f32 %v12618_v2 }
0x1ddc   :  { %v12643_v11 = vmul.f32 %v15131_v61, %v12631_v54  ;;  %v12622_v58 = vadd.f32 1e-12, %v12616_v29  ;;  %v17127_v29 = vld [vmem:[#allocation5] ss:$0 sm:$0xff] }
0x1ddd   :  { %v12605_v34 = vpop.xlane.xlu0 %12604 }
0x1dde   :  { %v12655_v55 = vadd.f32 %v15132_v24, %v12643_v11  ;;  %17073 = vrsqrt.f32 %v12622_v58  ;;  %v12615_v49 = vmul.f32 0.03125, %v12605_v34 }
0x1de0   :  { %12661 = vst.msk [vmem:[#allocation8 + $0x8] sm:$0xff] %vm231_vm0, %v12655_v55  ;;  %v12621_v60 = vadd.f32 1e-12, %v12615_v49  ;;  %v12672_v15 = vrot.slane %v12655_v55, 7  ;;  %v17128_v49 = vld [vmem:[#allocation5 + $0x1] ss:$0 sm:$0xff] }
0x1de1   :  { %v17068_v57 = vpop.eup %17067 }
0x1de2   :  { %v12632_v40 = vmul.f32 %v17068_v57, %v19690_v0  ;;  %17075 = vrsqrt.f32 %v12621_v60 }
0x1de4   :  { %v17070_v32 = vpop.eup %17069  ;;  %v12644_v33 = vmul.f32 %v15131_v61, %v12632_v40 }
0x1de5   :  { %v17072_v14 = vpop.eup %17071  ;;  %v12635_v8 = vmul.f32 %v17070_v32, %v19694_v46 }
0x1de6   :  { %v12656_v51 = vadd.f32 %v15132_v24, %v12644_v33  ;;  %v12630_v10 = vmul.f32 %v17072_v14, %v19696_v3 }
0x1de7   :  { %v12647_v12 = vmul.f32 %v15131_v61, %v12635_v8 }
0x1de8   :  { %v17074_v4 = vpop.eup %17073  ;;  %12662 = vst.msk [vmem:[#allocation8 + $0x10] sm:$0xff] %vm231_vm0, %v12656_v51  ;;  %v12642_v42 = vmul.f32 %v15131_v61, %v12630_v10  ;;  %v12674_v56 = vrot.slane %v12656_v51, 6 }
0x1de9   :  { %v12659_v63 = vadd.f32 %v15132_v24, %v12647_v12  ;;  %v12634_v39 = vmul.f32 %v17074_v4, %v19703_v9 }
0x1dea   :  { %v12654_v45 = vadd.f32 %v15132_v24, %v12642_v42 }
0x1deb   :  { %12665 = vst.msk [vmem:[#allocation8 + $0x28] sm:$0xff] %vm231_vm0, %v12659_v63  ;;  %v12646_v0 = vmul.f32 %v15131_v61, %v12634_v39  ;;  %v12678_v9 = vrot.slane %v12659_v63, 6 }
0x1dec   :  { %v17076_v7 = vpop.eup %17075  ;;  %12660 = vst.msk [vmem:[#allocation8] sm:$0xff] %vm231_vm0, %v12654_v45  ;;  %v12673_v3 = vsel %vm5383_vm4, %v12672_v15, %v12654_v45 }
0x1ded   :  { %v12658_v46 = vadd.f32 %v15132_v24, %v12646_v0  ;;  %v12633_v37 = vmul.f32 %v17076_v7, %v19709_v47  ;;  %v12675_v27 = vsel %vm5386_vm5, %v12674_v56, %v12673_v3 }
0x1dee   :  { %v12682_v47 = vsel %vm5394_vm6, %v18715_v26, %v12675_v27 }
0x1def   :  { %12664 = vst.msk [vmem:[#allocation8 + $0x20] sm:$0xff] %vm231_vm0, %v12658_v46  ;;  %v12645_v17 = vmul.f32 %v15131_v61, %v12633_v37  ;;  %v12676_v21 = vrot.slane %v12658_v46, 7 }
0x1df1   :  { %v12657_v16 = vadd.f32 %v15132_v24, %v12645_v17 }
0x1df3   :  { %v12677_v44 = vsel %vm5383_vm4, %v12676_v21, %v12657_v16  ;;  %12663 = vst.msk [vmem:[#allocation8 + $0x18] sm:$0xff] %vm231_vm0, %v12657_v16 }
0x1df4   :  { %v12679_v35 = vsel %vm5386_vm5, %v12678_v9, %v12677_v44 }
0x1df5   :  { %v12683_v31 = vsel %vm5394_vm6, %v18719_v23, %v12679_v35 }
0x1df6   :  { %v19754_v43 = vcombine.low %v12682_v47, %v12683_v31 }
0x1df8   :  { %16478 = vmatmul.mubr.msk.f32.vlgmr.msra.gmra.mrb[140].mxu0 %vm231_vm0, %v19754_v43 }
0x1df9   :  { %16482 = vmatprep.mubr.msk.f32.mxu0 %vm17235_vm1, %v17233_v25 }
0x1ecb   :  { %v12801_v5 = vpop.f32.mrb[140].mxu0 }
0x1ecc   :  { %v19763_v36 = vadd.f32 %v15161_v18, %v12801_v5  ;;  %v16479_v20 = vpop.f32.mrb[141].mxu0 }
0x1ece   :  { %12807 = vrot.lane.b32.xlu1 %v19763_v36, %s17231_s2  ;;  %v19769_v26 = vcombine.high %v19763_v36, %v19763_v36 }
0x1ed0   :  { %12809 = vrot.lane.b32.xlu0 %v19769_v26, %s17231_s2 }
0x1ed2   :  { %12811 = vrot.lane.b32.xlu1 %v19763_v36, %s17232_s25 }
0x1ed4   :  { %12815 = vrot.lane.b32.xlu0 %v19763_v36, %s17234_s26 }
0x1ed6   :  { %12813 = vrot.lane.b32.xlu1 %v19769_v26, %s17232_s25 }
0x1ed8   :  { %12819 = vrot.lane.b32.xlu0 %v19763_v36, %s17236_s27 }
0x1eda   :  { %12817 = vrot.lane.b32.xlu1 %v19769_v26, %s17234_s26 }
0x1ede   :  { %12895 = vrot.lane.b32.xlu1 %v19769_v26, %s17236_s27 }
0x1f40   :  { %v19785_v23 = vpop.permute.xlu1 %12807 }
0x1f41   :  { %12971 = vrot.lane.b32.xlu0 %v19785_v23, %s17236_s27 }
0x1f42   :  { %v19789_v62 = vpop.permute.xlu0 %12809 }
0x1f43   :  { %13047 = vrot.lane.b32.xlu1 %v19789_v62, %s17236_s27 }
0x1f44   :  { %v19793_v48 = vpop.permute.xlu1 %12811 }
0x1f45   :  { %13123 = vrot.lane.b32.xlu0 %v19793_v48, %s17236_s27 }
0x1f46   :  { %v19797_v30 = vpop.permute.xlu0 %12815 }
0x1f48   :  { %v19799_v38 = vpop.permute.xlu1 %12813 }
0x1f49   :  { %13199 = vrot.lane.b32.xlu1 %v19799_v38, %s17236_s27  ;;  %13275 = vrot.lane.b32.xlu0 %v19797_v30, %s17236_s27 }
0x1f4a   :  { %v12820_v1 = vpop.permute.xlu0 %12819 }
0x1f4b   :  { %16481 = vmatpush3.xpose.msk.msra.mxu0 %vm389_vm2, %v12820_v1 }
0x1f4c   :  { %v19806_v28 = vpop.permute.xlu1 %12817  ;;  %16485 = vmatprep.subr.mxu0 %v17233_v25 }
0x1f4d   :  { %13351 = vrot.lane.b32.xlu1 %v19806_v28, %s17236_s27 }
0x1f4e   :  { %16483 = vmatmul.mubr.msk.f32.vlgmr.msra.gmra.mrb[142].mxu0 %vm389_vm2, %v19763_v36 }
0x1f4f   :  { %16487 = vmatprep.mubr.msk.f32.mxu0 %vm17235_vm1, %v17233_v25 }
0x1f50   :  { %v12896_v6 = vpop.permute.xlu1 %12895 }
0x1f51   :  { %16486 = vmatpush3.xpose.msk.msra.mxu0 %vm389_vm2, %v12896_v6 }
0x1f52   :  { %16490 = vmatprep.subr.mxu0 %v17233_v25 }
0x1f54   :  { %16488 = vmatmul.mubr.msk.f32.vlgmr.msra.gmra.mrb[144].mxu0 %vm389_vm2, %v19769_v26 }
0x1f55   :  { %16492 = vmatprep.mubr.msk.f32.mxu0 %vm17235_vm1, %v17233_v25 }
0x1fb3   :  { %v12972_v22 = vpop.permute.xlu0 %12971 }
0x1fb4   :  { %16491 = vmatpush3.xpose.msk.msra.mxu0 %vm389_vm2, %v12972_v22 }
0x1fb5   :  { %v13048_v50 = vpop.permute.xlu1 %13047  ;;  %16500 = vmatprep.subr.mxu0 %v17233_v25 }
0x1fb6   :  { %16496 = vmatpush3.xpose.msk.msra.mxu1 %vm389_vm2, %v13048_v50 }
0x1fb7   :  { %16493 = vmatmul.mubr.msk.f32.vlgmr.msra.gmra.mrb[146].mxu0 %vm389_vm2, %v19785_v23  ;;  %v13124_v59 = vpop.permute.xlu0 %13123  ;;  %16505 = vmatprep.subr.mxu1 %v17233_v25 }
0x1fb8   :  { %16501 = vmatpush3.xpose.msk.msra.mxu0 %vm389_vm2, %v13124_v59  ;;  %16502 = vmatprep.mubr.msk.f32.mxu0 %vm17235_vm1, %v17233_v25 }
0x1fb9   :  { %16498 = vmatmul.mubr.msk.f32.vlgmr.msra.gmra.mrb[146].mxu1 %vm389_vm2, %v19789_v62  ;;  %16510 = vmatprep.subr.mxu0 %v17233_v25 }
0x1fba   :  { %16507 = vmatprep.mubr.msk.f32.mxu1 %vm17235_vm1, %v17233_v25 }
0x1fbb   :  { %v13200_v52 = vpop.permute.xlu1 %13199  ;;  %16503 = vmatmul.mubr.msk.f32.vlgmr.msra.gmra.mrb[148].mxu0 %vm389_vm2, %v19793_v48  ;;  %v13276_v53 = vpop.permute.xlu0 %13275 }
0x1fbc   :  { %16506 = vmatpush3.xpose.msk.msra.mxu1 %vm389_vm2, %v13200_v52  ;;  %16511 = vmatpush3.xpose.msk.msra.mxu0 %vm389_vm2, %v13276_v53 }
0x1fbd   :  { %16512 = vmatprep.mubr.msk.f32.mxu0 %vm17235_vm1, %v17233_v25  ;;  %16515 = vmatprep.subr.mxu1 %v17233_v25 }
0x1fbe   :  { %16520 = vmatprep.subr.mxu0 %v17233_v25 }
0x1fbf   :  { %16508 = vmatmul.mubr.msk.f32.vlgmr.msra.gmra.mrb[148].mxu1 %vm389_vm2, %v19799_v38  ;;  %v13352_v61 = vpop.permute.xlu1 %13351  ;;  %16513 = vmatmul.mubr.msk.f32.vlgmr.msra.gmra.mrb[150].mxu0 %vm389_vm2, %v19797_v30 }
0x1fc0   :  { %16516 = vmatpush3.xpose.msk.msra.mxu1 %vm389_vm2, %v13352_v61  ;;  %16517 = vmatprep.mubr.msk.f32.mxu1 %vm17235_vm1, %v17233_v25 }
0x1fc1   :  { %16525 = vmatprep.subr.mxu1 %v17233_v25  ;;  %16522 = vmatprep.mubr.msk.f32.mxu0 %vm17235_vm1, %v17233_v25 }
0x1fc3   :  { %16518 = vmatmul.mubr.msk.f32.vlgmr.msra.gmra.mrb[150].mxu1 %vm389_vm2, %v19806_v28 }
0x1fc4   :  { %16527 = vmatprep.mubr.msk.f32.mxu1 %vm17235_vm1, %v17233_v25 }
0x2021   :  { %v12891_v2 = vpop.f32.mrb[142].mxu0 }
0x2022   :  { %v13427_v41 = vmul.f32 0.35355338, %v12891_v2  ;;  %v16484_v54 = vpop.f32.mrb[143].mxu0 }
0x2024   :  { %v13435_v24 = vadd.f32 %v17127_v29, %v13427_v41 }
0x2026   :  { %v13443_v11 = vsel %vm6168_vm7, %v13435_v24, -inf }
0x2027   :  { %13444 = vmax.xlane.f32.xlu0 %v13443_v11  ;;  %v12967_v58 = vpop.f32.mrb[144].mxu0 }
0x2028   :  { %v13428_v34 = vmul.f32 0.35355338, %v12967_v58  ;;  %v16489_v55 = vpop.f32.mrb[145].mxu0 }
0x202a   :  { %v13436_v60 = vadd.f32 %v17128_v49, %v13428_v34 }
0x202c   :  { %v13446_v57 = vsel %vm6168_vm7, %v13436_v60, -inf }
0x202d   :  { %13447 = vmax.xlane.f32.xlu1 %v13446_v57 }
0x208a   :  { %v13043_v40 = vpop.f32.mrb[146].mxu0 }
0x208b   :  { %v13429_v32 = vmul.f32 0.35355338, %v13043_v40  ;;  %v16494_v33 = vpop.f32.mrb[147].mxu0 }
0x208c   :  { %v13119_v14 = vpop.f32.mrb[146].mxu1 }
0x208d   :  { %v13437_v8 = vadd.f32 %v17127_v29, %v13429_v32  ;;  %v13430_v51 = vmul.f32 0.35355338, %v13119_v14  ;;  %v16499_v10 = vpop.f32.mrb[147].mxu1 }
0x208e   :  { %v13195_v12 = vpop.f32.mrb[148].mxu0 }
0x208f   :  { %v13438_v4 = vadd.f32 %v17128_v49, %v13430_v51  ;;  %v13431_v42 = vmul.f32 0.35355338, %v13195_v12  ;;  %v16504_v63 = vpop.f32.mrb[149].mxu0  ;;  %v13449_v39 = vsel %vm6168_vm7, %v13437_v8, -inf }
0x2090   :  { %13450 = vmax.xlane.f32.xlu0 %v13449_v39 }
0x2091   :  { %v13439_v45 = vadd.f32 %v17127_v29, %v13431_v42  ;;  %v13452_v15 = vsel %vm6168_vm7, %v13438_v4, -inf }
0x2092   :  { %v13271_v0 = vpop.f32.mrb[148].mxu1  ;;  %v13347_v7 = vpop.f32.mrb[150].mxu0 }
0x2093   :  { %v13432_v46 = vmul.f32 0.35355338, %v13271_v0  ;;  %v13433_v37 = vmul.f32 0.35355338, %v13347_v7  ;;  %v16509_v3 = vpop.f32.mrb[149].mxu1  ;;  %v16514_v17 = vpop.f32.mrb[151].mxu0 }
0x2094   :  { %13453 = vmax.xlane.f32.xlu0 %v13452_v15  ;;  %v13455_v56 = vsel %vm6168_vm7, %v13439_v45, -inf }
0x2095   :  { %v13440_v21 = vadd.f32 %v17128_v49, %v13432_v46  ;;  %v13441_v16 = vadd.f32 %v17127_v29, %v13433_v37  ;;  %13456 = vmax.xlane.f32.xlu1 %v13455_v56 }
0x2096   :  { %v13423_v9 = vpop.f32.mrb[150].mxu1 }
0x2097   :  { %v13434_v27 = vmul.f32 0.35355338, %v13423_v9  ;;  %v16519_v44 = vpop.f32.mrb[151].mxu1  ;;  %v13458_v35 = vsel %vm6168_vm7, %v13440_v21, -inf  ;;  %v13461_v47 = vsel %vm6168_vm7, %v13441_v16, -inf }
0x2098   :  { %13459 = vmax.xlane.f32.xlu0 %v13458_v35 }
0x2099   :  { %v13442_v31 = vadd.f32 %v17128_v49, %v13434_v27  ;;  %13462 = vmax.xlane.f32.xlu1 %v13461_v47 }
0x209b   :  { %v13464_v18 = vsel %vm6168_vm7, %v13442_v31, -inf }
0x209c   :  { %13465 = vmax.xlane.f32.xlu0 %v13464_v18 }
0x20aa   :  { %13531 = vrot.lane.b32.xlu1 %v19763_v36, %s17237_s30 }
0x20ae   :  { %13685 = vrot.lane.b32.xlu1 %v19785_v23, %s17237_s30 }
0x20b2   :  { %13762 = vrot.lane.b32.xlu1 %v19789_v62, %s17237_s30  ;;  %13608 = vrot.lane.b32.xlu0 %v19769_v26, %s17237_s30 }
0x20b4   :  { %v13445_v1 = vpop.xlane.xlu0 %13444 }
0x20b5   :  { %v13467_v36 = vsub.f32 %v13435_v24, %v13445_v1 }
0x20b6   :  { %13916 = vrot.lane.b32.xlu1 %v19799_v38, %s17237_s30  ;;  %13839 = vrot.lane.b32.xlu0 %v19793_v48, %s17237_s30 }
0x20b7   :  { %v13475_v22 = vmul.f32 1.442695, %v13467_v36 }
0x20ba   :  { %v13448_v5 = vpop.xlane.xlu1 %13447 }
0x20bb   :  { %v13468_v20 = vsub.f32 %v13436_v60, %v13448_v5 }
0x20bd   :  { %v13477_v6 = vmul.f32 1.442695, %v13468_v20 }
0x20bf   :  { %17077 = vpow2.f32 %v13477_v6 }
0x20c0   :  { %17079 = vpow2.f32 %v13475_v22 }
0x20c9   :  { %v19877_v23 = vpop.eup %17077 }
0x20ca   :  { %v13494_v62 = vsel %vm6168_vm7, %v19877_v23, 0.0  ;;  %v19881_v26 = vpop.eup %17079 }
0x20cb   :  { %v13491_v38 = vsel %vm6168_vm7, %v19881_v26, 0.0 }
0x20d5   :  { %13495 = vadd.xlane.f32.xlu0 %v13494_v62 }
0x20da   :  { %13492 = vadd.xlane.f32.xlu1 %v13491_v38  ;;  %v15138_v38 = vld [vmem:[%s20088_s7 + $0x60] sm:$0xff] }
0x211d   :  { %v13451_v48 = vpop.xlane.xlu0 %13450 }
0x211e   :  { %v13469_v50 = vsub.f32 %v13437_v8, %v13451_v48 }
0x2120   :  { %v13479_v59 = vmul.f32 1.442695, %v13469_v50 }
0x2121   :  { %v13454_v52 = vpop.xlane.xlu0 %13453 }
0x2122   :  { %17081 = vpow2.f32 %v13479_v59  ;;  %v13470_v53 = vsub.f32 %v13438_v4, %v13454_v52  ;;  %v13457_v61 = vpop.xlane.xlu1 %13456  ;;  %v15139_v52 = vld [vmem:[%s20088_s7 + $0x68] sm:$0xff] }
0x2123   :  { %v13471_v2 = vsub.f32 %v13439_v45, %v13457_v61 }
0x2124   :  { %v13481_v41 = vmul.f32 1.442695, %v13470_v53 }
0x2125   :  { %v13483_v54 = vmul.f32 1.442695, %v13471_v2  ;;  %v13460_v29 = vpop.xlane.xlu0 %13459 }
0x2126   :  { %17083 = vpow2.f32 %v13481_v41  ;;  %v13472_v24 = vsub.f32 %v13440_v21, %v13460_v29  ;;  %v13463_v11 = vpop.xlane.xlu1 %13462  ;;  %v15140_v29 = vld [vmem:[%s20088_s7 + $0x70] sm:$0xff] }
0x2127   :  { %17085 = vpow2.f32 %v13483_v54  ;;  %v13473_v58 = vsub.f32 %v13441_v16, %v13463_v11 }
0x2128   :  { %v13485_v34 = vmul.f32 1.442695, %v13472_v24 }
0x2129   :  { %v13487_v55 = vmul.f32 1.442695, %v13473_v58  ;;  %v13466_v49 = vpop.xlane.xlu0 %13465 }
0x212a   :  { %17087 = vpow2.f32 %v13485_v34  ;;  %v13474_v60 = vsub.f32 %v13442_v31, %v13466_v49  ;;  %v13532_v57 = vpop.permute.xlu1 %13531 }
0x212b   :  { %17089 = vpow2.f32 %v13487_v55  ;;  %16521 = vmatpush3.msk.msra.mxu0 %vm6263_vm8, %v13532_v57 }
0x212c   :  { %v17082_v40 = vpop.eup %17081  ;;  %v13489_v32 = vmul.f32 1.442695, %v13474_v60  ;;  %16530 = vmatprep.subr.mxu0 %v17233_v25  ;;  %v15141_v60 = vld [vmem:[%s20088_s7 + $0x78] sm:$0xff] }
0x212d   :  { %v13609_v33 = vpop.permute.xlu0 %13608  ;;  %v13497_v14 = vsel %vm6168_vm7, %v17082_v40, 0.0 }
0x212e   :  { %17091 = vpow2.f32 %v13489_v32  ;;  %16526 = vmatpush3.msk.msra.mxu1 %vm6263_vm8, %v13609_v33  ;;  %13498 = vadd.xlane.f32.xlu1 %v13497_v14  ;;  %v13686_v7 = vpop.permute.xlu1 %13685 }
0x212f   :  { %16535 = vmatprep.subr.mxu1 %v17233_v25 }
0x2130   :  { %v17084_v8 = vpop.eup %17083 }
0x2131   :  { %v17086_v51 = vpop.eup %17085  ;;  %v13500_v10 = vsel %vm6168_vm7, %v17084_v8, 0.0  ;;  %v13840_v46 = vpop.permute.xlu0 %13839 }
0x2132   :  { %13501 = vadd.xlane.f32.xlu0 %v13500_v10  ;;  %v13503_v12 = vsel %vm6168_vm7, %v17086_v51, 0.0  ;;  %v13763_v15 = vpop.permute.xlu1 %13762 }
0x2133   :  { %13504 = vadd.xlane.f32.xlu1 %v13503_v12 }
0x2134   :  { %v17088_v4 = vpop.eup %17087 }
0x2135   :  { %v17090_v42 = vpop.eup %17089  ;;  %v13506_v63 = vsel %vm6168_vm7, %v17088_v4, 0.0 }
0x2136   :  { %13507 = vadd.xlane.f32.xlu0 %v13506_v63  ;;  %v13509_v39 = vsel %vm6168_vm7, %v17090_v42, 0.0  ;;  %v13917_v3 = vpop.permute.xlu1 %13916 }
0x2137   :  { %13510 = vadd.xlane.f32.xlu1 %v13509_v39 }
0x2138   :  { %v19894_v45 = vpop.eup %17091 }
0x2139   :  { %v13512_v0 = vsel %vm6168_vm7, %v19894_v45, 0.0 }
0x213a   :  { %13513 = vadd.xlane.f32.xlu0 %v13512_v0 }
0x2148   :  { %14070 = vrot.lane.b32.xlu1 %v19806_v28, %s17237_s30 }
0x2150   :  { %13993 = vrot.lane.b32.xlu0 %v19797_v30, %s17237_s30 }
0x2162   :  { %v13496_v37 = vpop.xlane.xlu0 %13495 }
0x2163   :  { %17093 = vrcp.f32 %v13496_v37 }
0x2167   :  { %v13493_v17 = vpop.xlane.xlu1 %13492 }
0x2168   :  { %17095 = vrcp.f32 %v13493_v17 }
0x216d   :  { %v17094_v56 = vpop.eup %17093 }
0x216e   :  { %v13518_v21 = vmul.f32 %v17094_v56, %v19877_v23 }
0x2170   :  { %16528 = vmatmul.mubr.msk.f32.vlgmr.msra.gmra.mrb[152].mxu1 %vm6259_vm9, %v13518_v21 }
0x2171   :  { %16536 = vmatpush3.msk.msra.mxu1 %vm6263_vm8, %v13763_v15  ;;  %16537 = vmatprep.mubr.msk.f32.mxu1 %vm17235_vm1, %v17233_v25 }
0x2172   :  { %v17096_v28 = vpop.eup %17095  ;;  %16545 = vmatprep.subr.mxu1 %v17233_v25 }
0x2173   :  { %v13516_v30 = vmul.f32 %v17096_v28, %v19881_v26 }
0x2175   :  { %16523 = vmatmul.mubr.msk.f32.vlgmr.msra.gmra.mrb[152].mxu0 %vm6259_vm9, %v13516_v30 }
0x2176   :  { %16531 = vmatpush3.msk.msra.mxu0 %vm6263_vm8, %v13686_v7  ;;  %16532 = vmatprep.mubr.msk.f32.mxu0 %vm17235_vm1, %v17233_v25 }
0x2177   :  { %16540 = vmatprep.subr.mxu0 %v17233_v25 }
0x21bb   :  { %v13499_v16 = vpop.xlane.xlu1 %13498 }
0x21bc   :  { %17097 = vrcp.f32 %v13499_v16 }
0x21bf   :  { %v13502_v9 = vpop.xlane.xlu0 %13501 }
0x21c0   :  { %17099 = vrcp.f32 %v13502_v9  ;;  %v13505_v27 = vpop.xlane.xlu1 %13504 }
0x21c1   :  { %17101 = vrcp.f32 %v13505_v27 }
0x21c3   :  { %v13508_v44 = vpop.xlane.xlu0 %13507 }
0x21c4   :  { %17103 = vrcp.f32 %v13508_v44  ;;  %v13511_v35 = vpop.xlane.xlu1 %13510  ;;  %v15145_v44 = vld [vmem:[%s20092_s11 + $0x60] sm:$0xff] }
0x21c5   :  { %17105 = vrcp.f32 %v13511_v35  ;;  %v15146_v35 = vld [vmem:[%s20092_s11 + $0x68] sm:$0xff] }
0x21c6   :  { %v17098_v47 = vpop.eup %17097 }
0x21c7   :  { %v13520_v31 = vmul.f32 %v17098_v47, %v17082_v40  ;;  %v13514_v18 = vpop.xlane.xlu0 %13513  ;;  %v16705_v47 = vpack.c.bf16 %v15146_v35, %v15145_v44 }
0x21c8   :  { %17107 = vrcp.f32 %v13514_v18  ;;  %v14071_v48 = vpop.permute.xlu1 %14070 }
0x21c9   :  { %16533 = vmatmul.mubr.msk.f32.vlgmr.msra.gmra.mrb[154].mxu0 %vm6259_vm9, %v13520_v31  ;;  %v15148_v31 = vld [vmem:[%s20092_s11 + $0x78] sm:$0xff] }
0x21ca   :  { %v17100_v5 = vpop.eup %17099  ;;  %16541 = vmatpush3.msk.msra.mxu0 %vm6263_vm8, %v13840_v46  ;;  %16542 = vmatprep.mubr.msk.f32.mxu0 %vm17235_vm1, %v17233_v25  ;;  %v15199_v46 = vld [vmem:[%s20089_s8 + $0x3] ss:$0 sm:$0xff] }
0x21cb   :  { %v17102_v20 = vpop.eup %17101  ;;  %v13522_v1 = vmul.f32 %v17100_v5, %v17084_v8  ;;  %16550 = vmatprep.subr.mxu0 %v17233_v25  ;;  %v13994_v36 = vpop.permute.xlu0 %13993 }
0x21cc   :  { %v13524_v6 = vmul.f32 %v17102_v20, %v17086_v51 }
0x21cd   :  { %16538 = vmatmul.mubr.msk.f32.vlgmr.msra.gmra.mrb[154].mxu1 %vm6259_vm9, %v13522_v1 }
0x21ce   :  { %v17104_v22 = vpop.eup %17103  ;;  %16543 = vmatmul.mubr.msk.f32.vlgmr.msra.gmra.mrb[156].mxu0 %vm6259_vm9, %v13524_v6  ;;  %16546 = vmatpush3.msk.msra.mxu1 %vm6263_vm8, %v13917_v3 }
0x21cf   :  { %v17106_v23 = vpop.eup %17105  ;;  %v13526_v62 = vmul.f32 %v17104_v22, %v17088_v4  ;;  %16551 = vmatpush3.msk.msra.mxu0 %vm6263_vm8, %v13994_v36  ;;  %16547 = vmatprep.mubr.msk.f32.mxu1 %vm17235_vm1, %v17233_v25  ;;  %v15200_v36 = vld [vmem:[%s20090_s9 + $0x3] ss:$0 sm:$0xff] }
0x21d0   :  { %v13528_v26 = vmul.f32 %v17106_v23, %v17090_v42  ;;  %16552 = vmatprep.mubr.msk.f32.mxu0 %vm17235_vm1, %v17233_v25  ;;  %16555 = vmatprep.subr.mxu1 %v17233_v25  ;;  %v15201_v23 = vld [vmem:[%s20091_s10 + $0x3] ss:$0 sm:$0xff] }
0x21d1   :  { %16548 = vmatmul.mubr.msk.f32.vlgmr.msra.gmra.mrb[156].mxu1 %vm6259_vm9, %v13526_v62  ;;  %16560 = vmatprep.subr.mxu0 %v17233_v25 }
0x21d2   :  { %v17108_v50 = vpop.eup %17107  ;;  %16553 = vmatmul.mubr.msk.f32.vlgmr.msra.gmra.mrb[158].mxu0 %vm6259_vm9, %v13528_v26  ;;  %16556 = vmatpush3.msk.msra.mxu1 %vm6263_vm8, %v14071_v48  ;;  %v15151_v48 = vld [vmem:[%s20094_s13 + $0xc8] sm:$0xff] }
0x21d3   :  { %v13530_v59 = vmul.f32 %v17108_v50, %v19894_v45  ;;  %16557 = vmatprep.mubr.msk.f32.mxu1 %vm17235_vm1, %v17233_v25  ;;  %16561 = vmatpush3.msra.mxu0 %v15138_v38  ;;  %v15150_v38 = vld [vmem:[%s20094_s13 + $0xc0] sm:$0xff] }
0x21d4   :  { %16562 = vmatprep.mubr.msk.f32.mxu0 %vm17235_vm1, %v17233_v25  ;;  %16565 = vmatprep.subr.mxu1 %v17233_v25  ;;  %v16711_v50 = vpack.c.bf16 %v15151_v48, %v15150_v38 }
0x21d5   :  { %16558 = vmatmul.mubr.msk.f32.vlgmr.msra.gmra.mrb[158].mxu1 %vm6259_vm9, %v13530_v59  ;;  %16570 = vmatprep.subr.mxu0 %v17233_v25  ;;  %v15152_v59 = vld [vmem:[%s20094_s13 + $0xd0] sm:$0xff] }
0x21d6   :  { %16567 = vmatprep.mubr.msk.f32.mxu1 %vm17235_vm1, %v17233_v25  ;;  %16566 = vmatpush3.msra.mxu1 %v15139_v52  ;;  %v15153_v52 = vld [vmem:[%s20094_s13 + $0xd8] sm:$0xff] }
0x21d7   :  { %16575 = vmatprep.subr.mxu1 %v17233_v25 }
0x2243   :  { %v13681_v53 = vpop.f32.mrb[152].mxu1 }
0x2244   :  { %v16529_v61 = vpop.f32.mrb[153].mxu1 }
0x2245   :  { %v15154_v61 = vld [vmem:[%s20094_s13 + $0xe0] sm:$0xff] }
0x2248   :  { %v13604_v2 = vpop.f32.mrb[152].mxu0 }
0x2249   :  { %v14149_v41 = vcombine.low %v13604_v2, %v13681_v53  ;;  %v16524_v54 = vpop.f32.mrb[153].mxu0  ;;  %v16714_v53 = vpack.c.bf16 %v15153_v52, %v15152_v59  ;;  %v15155_v2 = vld [vmem:[%s20094_s13 + $0xe8] sm:$0xff] }
0x224a   :  { %v15156_v54 = vld [vmem:[%s20094_s13 + $0xf0] sm:$0xff] }
0x224b   :  { %16563 = vmatmul.mubr.msk.f32.vlgmr.msra.gmra.mrb[160].mxu0 %vm389_vm2, %v14149_v41  ;;  %v16717_v41 = vpack.c.bf16 %v15155_v2, %v15154_v61 }
0x224c   :  { %16571 = vmatpush3.msra.mxu0 %v15140_v29  ;;  %16572 = vmatprep.mubr.msk.f32.mxu0 %vm17235_vm1, %v17233_v25  ;;  %v15157_v29 = vld [vmem:[%s20094_s13 + $0xf8] sm:$0xff] }
0x224d   :  { %16704 = vmatprep.subr.bf16.mxu0 %v17239_v19 }
0x229c   :  { %v13758_v24 = vpop.f32.mrb[154].mxu0 }
0x229d   :  { %v16534_v11 = vpop.f32.mrb[155].mxu0 }
0x229e   :  { %v15202_v11 = vld [vmem:[%s20093_s12 + $0x3] ss:$0 sm:$0xff] }
0x22a0   :  { %v13835_v58 = vpop.f32.mrb[154].mxu1 }
0x22a1   :  { %v14224_v34 = vcombine.low %v13758_v24, %v13835_v58  ;;  %v13912_v55 = vpop.f32.mrb[156].mxu0  ;;  %v16539_v49 = vpop.f32.mrb[155].mxu1  ;;  %v16720_v24 = vpack.c.bf16 %v15157_v29, %v15156_v54 }
0x22a2   :  { %v16544_v57 = vpop.f32.mrb[157].mxu0 }
0x22a3   :  { %16568 = vmatmul.mubr.msk.f32.vlgmr.msra.gmra.mrb[160].mxu1 %vm389_vm2, %v14224_v34 }
0x22a4   :  { %v13989_v40 = vpop.f32.mrb[156].mxu1  ;;  %16576 = vmatpush3.msra.mxu1 %v15141_v60  ;;  %16577 = vmatprep.mubr.msk.f32.mxu1 %vm17235_vm1, %v17233_v25 }
0x22a5   :  { %v14299_v32 = vcombine.low %v13912_v55, %v13989_v40  ;;  %v14066_v33 = vpop.f32.mrb[158].mxu0  ;;  %v16549_v14 = vpop.f32.mrb[157].mxu1  ;;  %16710 = vmatprep.subr.bf16.mxu1 %v17239_v19 }
0x22a6   :  { %v16554_v8 = vpop.f32.mrb[159].mxu0 }
0x22a7   :  { %16573 = vmatmul.mubr.msk.f32.vlgmr.msra.gmra.mrb[162].mxu0 %vm389_vm2, %v14299_v32 }
0x22a8   :  { %v14143_v51 = vpop.f32.mrb[158].mxu1  ;;  %16588 = vmatprep.mubr.msk.f32.mxu0 %vm17235_vm1, %v17233_v25  ;;  %16706 = vmatpush3.bf16.msra.mxu0 %v16705_v47 }
0x22a9   :  { %v14374_v10 = vcombine.low %v14066_v33, %v14143_v51  ;;  %v16559_v12 = vpop.f32.mrb[159].mxu1  ;;  %16707 = vmatprep.subr.bf16.mxu0 %v17239_v19  ;;  %v15204_v51 = vld [vmem:[%s20095_s14 + $0x3] ss:$0 sm:$0xff] }
0x22ab   :  { %16578 = vmatmul.mubr.msk.f32.vlgmr.msra.gmra.mrb[162].mxu1 %vm389_vm2, %v14374_v10 }
0x22ac   :  { %16607 = vmatprep.mubr.msk.f32.mxu1 %vm17235_vm1, %v17233_v25  ;;  %16712 = vmatpush3.bf16.msra.mxu1 %v16711_v50 }
0x22ad   :  { %16713 = vmatprep.subr.bf16.mxu1 %v17239_v19 }
0x22b0   :  { %16715 = vmatpush3.bf16.msra.mxu1 %v16714_v53 }
0x22b1   :  { %16716 = vmatprep.subr.bf16.mxu1 %v17239_v19 }
0x22b4   :  { %16718 = vmatpush3.bf16.msra.mxu1 %v16717_v41 }
0x22b5   :  { %16719 = vmatprep.subr.bf16.mxu1 %v17239_v19 }
0x22b8   :  { %16721 = vmatpush3.bf16.msra.mxu1 %v16720_v24 }
0x231e   :  { %v14218_v4 = vpop.f32.mrb[160].mxu0 }
0x231f   :  { %v16564_v42 = vpop.f32.mrb[161].mxu0 }
0x2376   :  { %v14293_v63 = vpop.f32.mrb[160].mxu1 }
0x2377   :  { %v14447_v39 = vadd.f32 %v14293_v63, %v14218_v4  ;;  %v16569_v45 = vpop.f32.mrb[161].mxu1 }
0x237a   :  { %v14368_v0 = vpop.f32.mrb[162].mxu0 }
0x237b   :  { %v14448_v7 = vadd.f32 %v14447_v39, %v14368_v0  ;;  %v16574_v15 = vpop.f32.mrb[163].mxu0 }
0x237e   :  { %v14443_v37 = vpop.f32.mrb[162].mxu1 }
0x237f   :  { %v14449_v3 = vadd.f32 %v14448_v7, %v14443_v37  ;;  %v16579_v17 = vpop.f32.mrb[163].mxu1 }
0x2381   :  { %v14456_v56 = vadd.f32 %v15199_v46, %v14449_v3 }
0x2383   :  { %v14458_v21 = vadd.f32 %v14456_v56, %v19754_v43  ;;  %v15147_v43 = vld [vmem:[%s20092_s11 + $0x70] sm:$0xff]  ;;  %v15206_v56 = vld [vmem:[%s20096_s15 + $0x3] ss:$0 sm:$0xff]  ;;  %s17240_s11 = smov [#allocation7]  }
0x2384   :  { %v16708_v18 = vpack.c.bf16 %v15148_v31, %v15147_v43  ;;  %s14751_s27 = sshll.u32 %s17240_s11, 4  ;;  %s14752_s27 = int_to_ptr.vmem [resolvable:$true] %s14751_s27 }
0x2385   :  { %v14459_v25 = vsel %vm231_vm0, %v14458_v21, 0.0  ;;  %s17173_s15 = scalar_lea.vmem %s14752_s27, 32  ;;  %p17178_p3 = scmp.lt.s32.totalorder %s14752_s27, %s14752_s27 }
0x2386   :  { %14460 = vadd.xlane.f32.xlu0 %v14459_v25  ;;  %16709 = vmatpush3.bf16.msra.mxu0 %v16708_v18  ;;  %v15207_v25 = vld [vmem:[%s20097_s16 + $0x3] ss:$0 sm:$0xff]  ;;  %p17174_p2 = scmp.ne.s32.totalorder %s14752_s27, %s17173_s15  ;;  %p17179_p4 = scmp.lt.s32.totalorder %s17173_s15, %s17173_s15 }
0x2388   :  { %p17180_p5 = por %p17179_p4, %p17178_p3 }
0x238a   :  { %p17181_p6 = pnand %p17180_p5, %p17174_p2 }
0x2413   :  { %v14461_v28 = vpop.xlane.xlu0 %14460 }
0x2414   :  { %v14462_v30 = vmul.f32 0.03125, %v14461_v28 }
0x2416   :  { %v14463_v16 = vsub.f32 %v14458_v21, %v14462_v30 }
0x2418   :  { %v14464_v9 = vmul.f32 %v14463_v16, %v14463_v16 }
0x241a   :  { %v14465_v27 = vsel %vm231_vm0, %v14464_v9, 0.0 }
0x241b   :  { %14466 = vadd.xlane.f32.xlu1 %v14465_v27 }
0x24a8   :  { %v14467_v5 = vpop.xlane.xlu1 %14466 }
0x24a9   :  { %v14468_v20 = vmul.f32 0.03125, %v14467_v5 }
0x24ab   :  { %v14469_v1 = vadd.f32 1e-12, %v14468_v20 }
0x24ad   :  { %17109 = vrsqrt.f32 %v14469_v1 }
0x24b7   :  { %v17110_v6 = vpop.eup %17109 }
0x24b8   :  { %v14471_v22 = vmul.f32 %v17110_v6, %v14463_v16 }
0x24ba   :  { %v14478_v62 = vmul.f32 %v15200_v36, %v14471_v22 }
0x24bc   :  { %v14485_v26 = vadd.f32 %v15201_v23, %v14478_v62 }
0x24be   :  { %16589 = vmatmul.mubr.msk.f32.vlgmr.msra.gmra.mrb[164].mxu0 %vm231_vm0, %v14485_v26 }
0x2591   :  { %v14561_v58 = vpop.f32.mrb[164].mxu0 }
0x2592   :  { %v14562_v34 = vadd.f32 %v15202_v11, %v14561_v58  ;;  %v16590_v55 = vpop.f32.mrb[165].mxu0 }
0x2594   :  { %v14565_v49 = vmul.f32 %v14562_v34, %v14562_v34 }
0x2596   :  { %v14566_v60 = vmul.f32 %v14565_v49, %v14562_v34 }
0x2598   :  { %v14567_v19 = vmul.f32 0.044715, %v14566_v60 }
0x259a   :  { %v14568_v57 = vadd.f32 %v14567_v19, %v14562_v34 }
0x259c   :  { %v14569_v40 = vmul.f32 0.7978846, %v14568_v57 }
0x259e   :  { %17111 = vtanh.f32 %v14569_v40 }
0x25a8   :  { %v17112_v32 = vpop.eup %17111 }
0x25a9   :  { %v14571_v33 = vadd.f32 1.0, %v17112_v32 }
0x25ab   :  { %v14572_v14 = vmul.f32 0.5, %v14571_v33 }
0x25ad   :  { %v14573_v8 = vmul.f32 %v14572_v14, %v14562_v34 }
0x25af   :  { %16608 = vmatmul.mubr.msk.f32.vlgmr.msra.gmra.mrb[164].mxu1 %vm5148_vm3, %v14573_v8 }
0x2682   :  { %v14649_v10 = vpop.f32.mrb[164].mxu1 }
0x2683   :  { %v14650_v12 = vadd.f32 %v15204_v51, %v14649_v10  ;;  %v16609_v4 = vpop.f32.mrb[165].mxu1 }
0x2685   :  { %v14653_v42 = vadd.f32 %v14650_v12, %v14485_v26 }
0x2687   :  { %v14654_v63 = vsel %vm231_vm0, %v14653_v42, 0.0 }
0x2688   :  { %14655 = vadd.xlane.f32.xlu0 %v14654_v63 }
0x2715   :  { %v14656_v39 = vpop.xlane.xlu0 %14655 }
0x2716   :  { %v14657_v45 = vmul.f32 0.03125, %v14656_v39 }
0x2718   :  { %v14658_v0 = vsub.f32 %v14653_v42, %v14657_v45 }
0x271a   :  { %v14659_v7 = vmul.f32 %v14658_v0, %v14658_v0 }
0x271c   :  { %v14660_v15 = vsel %vm231_vm0, %v14659_v7, 0.0 }
0x271d   :  { %14661 = vadd.xlane.f32.xlu0 %v14660_v15 }
0x27aa   :  { %v14662_v46 = vpop.xlane.xlu0 %14661 }
0x27ab   :  { %v14663_v37 = vmul.f32 0.03125, %v14662_v46 }
0x27ad   :  { %v14664_v3 = vadd.f32 1e-12, %v14663_v37 }
0x27af   :  { %17113 = vrsqrt.f32 %v14664_v3 }
0x27b9   :  { %v17114_v17 = vpop.eup %17113 }
0x27ba   :  { %v14666_v21 = vmul.f32 %v17114_v17, %v14658_v0 }
0x27bc   :  { %v14673_v28 = vmul.f32 %v15206_v56, %v14666_v21 }
0x27be   :  { %v14680_v30 = vadd.f32 %v15207_v25, %v14673_v28 }
0x27c0   :  { %v14682_v16 = vcombine.high %v14680_v30, %v14680_v30  ;;  %v14690_v9 = vrot.slane %v14680_v30, %v17715_v13  ;;  %14744 = vst.msk [vmem:[#allocation7] sm:$0x1] %vm7466_vm10, %v14680_v30 }
0x27c2   :  { %v14691_v27 = vcombine.high %v14690_v9, %v14690_v9  ;;  %v14698_v44 = vrot.slane %v14690_v9, %v17715_v13  ;;  %v14714_v35 = vrot.slane %v14682_v16, %v17715_v13  ;;  %14745 = vst.msk [vmem:[#allocation7 + $0x1] sm:$0x1] %vm7466_vm10, %v14682_v16 }
0x27c3   :  { %17184 = shalt.err (!%p17181_p6)
}
0x27c4   :  { %s17185_s3 = scalar_lea.hbm %s20098_s17, 32 }
0x27c5   :  { %p17186_p7 = scmp.ne.s32.totalorder %s20098_s17, %s17185_s3  ;;  %p17189_p8 = scmp.lt.u32.totalorder %s17185_s3, %s20098_s17 }
0x27c7   :  { %p17191_p9 = pnand %p17189_p8, %p17186_p7 }
0x27c9   :  { %17194 = shalt.err (!%p17191_p9)
}
0x27ca   :  { %14757 = dma.vmem_to_hbm [thread:$0]  %s14752_s27, 32, %s20098_s17, [#allocation4], %s17229_s28, %s17229_s28, %s17230_s0   ;;  %v14705_v47 = vrot.slane %v14691_v27, %v17715_v13  ;;  %v14706_v43 = vcombine.high %v14698_v44, %v14698_v44  ;;  %v14715_v31 = vcombine.high %v14714_v35, %v14714_v35  ;;  %v14722_v18 = vrot.slane %v14714_v35, %v17715_v13 }
0x27cb   :  { %s17241_s5 = smov [#allocation8]  }
0x27cc   :  { %s14763_s8 = sshll.u32 %s17241_s5, 4  ;;  %v14707_v5 = vcombine.high %v14705_v47, %v14705_v47  ;;  %v14729_v20 = vrot.slane %v14715_v31, %v17715_v13  ;;  %v14730_v1 = vcombine.high %v14722_v18, %v14722_v18  ;;  %14738 = vst.msk [vmem:[#allocation8] sm:$0x1] %vm7466_vm10, %v14705_v47  ;;  %14739 = vst.msk [vmem:[#allocation8 + $0x8] sm:$0x1] %vm7466_vm10, %v14706_v43  ;;  %s14764_s8 = int_to_ptr.vmem [resolvable:$true] %s14763_s8 }
0x27cd   :  { %s17195_s17 = scalar_lea.vmem %s14764_s8, 768  ;;  %p17200_p11 = scmp.lt.s32.totalorder %s14764_s8, %s14764_s8 }
0x27ce   :  { %v14731_v6 = vcombine.high %v14729_v20, %v14729_v20  ;;  %14740 = vst.msk [vmem:[#allocation8 + $0x10] sm:$0x1] %vm7466_vm10, %v14707_v5  ;;  %14741 = vst.msk [vmem:[#allocation8 + $0x18] sm:$0x1] %vm7466_vm10, %v14729_v20  ;;  %p17196_p10 = scmp.ne.s32.totalorder %s14764_s8, %s17195_s17  ;;  %p17201_p12 = scmp.lt.s32.totalorder %s17195_s17, %s17195_s17 }
0x27cf   :  { %14742 = vst.msk [vmem:[#allocation8 + $0x20] sm:$0x1] %vm7466_vm10, %v14730_v1 }
0x27d0   :  { %14743 = vst.msk [vmem:[#allocation8 + $0x28] sm:$0x1] %vm7466_vm10, %v14731_v6  ;;  %p17202_p13 = por %p17201_p12, %p17200_p11 }
0x27d2   :  { %p17203_p0 = pnand %p17202_p13, %p17196_p10 }
0x27d4   :  { %17206 = shalt.err (!%p17203_p0)
}
0x27d5   :  { %s20111_s19 = sld [smem:[#allocation17_spill]] }
0x27db   :  { %s17207_s1 = scalar_lea.hbm %s20111_s19, 768 }
0x27dc   :  { %p17208_p1 = scmp.ne.s32.totalorder %s20111_s19, %s17207_s1  ;;  %p17211_p2 = scmp.lt.u32.totalorder %s17207_s1, %s20111_s19 }
0x27de   :  { %p17213_p3 = pnand %p17211_p2, %p17208_p1 }
0x27e0   :  { %17216 = shalt.err (!%p17213_p3)
}
0x27e1   :  { %14769 = dma.vmem_to_hbm [thread:$0]  %s14764_s8, 768, %s20111_s19, [#allocation9], %s17226_s23, %s17226_s23, %s17227_s24  }
0x27e2   :  { %17221 = dma.done.wait [#allocation4], 32  }
0x27e3   :  { %17222 = vsyncadd [#allocation4], 4294967264 }
0x27e4   :  { %17223 = dma.done.wait [#allocation9], 768  }
0x27e5   :  { %17224 = vsyncadd [#allocation9], 4294966528 }
0x27e6   :  { %14776 = vsyncpa [#allocation3], 1 }
0x27e7   :  { %14777 = vsyncpa [#allocation6], 1 }
0x27e8   :  { %14778 = vsyncpa [#allocation4], 1 }
0x27e9   :  { %14779 = vsyncpa [#allocation9], 1 }

</bundles_post_ra>
